<compile_context>
chip_gen: v6e
topology: v6e:2x2x1
jax: 0.10.0
libtpu: 0.0.40
codegen_flags: <defaults>
</compile_context>

<pallas_src>
import numpy as np
import jax
import jax.numpy as jnp
from jax.experimental import pallas as pl
from jax.experimental.pallas import tpu as pltpu

CODE_DIM = 512        # codeword size (input is (B, 1, 512))
GRID_N   = 46         # meshgrid resolution -> m = 46 * 46 = 2116
M        = GRID_N * GRID_N
TP       = 1088       # points per tile (multiple of 8); 2 tiles cover M
H1       = 256
H2       = 64
OUT_C    = 3


# ---------------------------------------------------------------------------
# Pallas kernel: both folding MLPs fused, tiled over (batch, point-tile).
# ---------------------------------------------------------------------------
def decoder_kernel(cwb1_ref, cwb4_ref, g_ref, w1b_ref,
                   w2_ref, b2_ref, w34_ref,
                   w5_ref, b5_ref, w6_ref, b6_ref,
                   out_ref):
    g = g_ref[...]                                     # (TP, 2) folding grid

    # Layer-1 grid contribution: two VPU broadcast-FMAs instead of a K=2 matmul.
    gterm = (g[:, 0:1] * w1b_ref[0:1, :]
             + g[:, 1:2] * w1b_ref[1:2, :])            # (TP, 256)

    # ---- mlp1 (codeword term + bias precomputed per batch -> cwb1)
    h1 = jnp.maximum(cwb1_ref[0] + gterm, 0.0)                         # (TP, 256)
    h1b = jnp.maximum(
        jnp.dot(h1, w2_ref[...], preferred_element_type=jnp.float32)
        + b2_ref[...], 0.0)                                            # (TP, 64)

    # ---- mlp2 (f1 fused via w34 = W3 @ W4b; its bias folded into cwb4)
    h2 = jnp.maximum(
        cwb4_ref[0]
        + jnp.dot(h1b, w34_ref[...], preferred_element_type=jnp.float32),
        0.0)                                                           # (TP, 256)
    h2b = jnp.maximum(
        jnp.dot(h2, w5_ref[...], preferred_element_type=jnp.float32)
        + b5_ref[...], 0.0)                                            # (TP, 64)
    out = (jnp.dot(h2b, w6_ref[...], preferred_element_type=jnp.float32)
           + b6_ref[...])                                              # (TP, 3)
    out_ref[...] = out[None]                                           # (1, TP, 3)


def _full_spec(shape):
    # whole-array block (no tiling), same block for every grid step
    return pl.BlockSpec(shape, lambda b, i: tuple(0 for _ in shape))


def decoder_forward(x, params):
    """x: (B, 1, CODE_DIM) float32 -> (B, M, 3) float32 (matches PyTorch output)."""
    (w1a, w1b, b1, w2, b2, w3, b3,
     w4a, w4b, b4, w5, b5, w6, b6) = params

    B = x.shape[0]
    cw = x[:, 0, :]                                         # (B, 512)
    hp = jax.lax.Precision.HIGHEST

    # Per-batch codeword contributions (tiny XLA matmuls): removes codeword
    # replication and the 512-contraction matmuls from the kernel entirely.
    cwb1 = (jnp.dot(cw, w1a, precision=hp) + b1).reshape(B, 1, H1)
    cwb4 = (jnp.dot(cw, w4a, precision=hp) + b4
            + jnp.dot(b3, w4b, precision=hp)).reshape(B, 1, H1)
    # Fuse mlp1's 3-channel output straight into mlp2's first layer.
    w34 = jnp.dot(w3, w4b, precision=hp)                    # (64, 256)

    # build_grid: itertools.product(linspace, linspace) == meshgrid(indexing='ij')
    xs = jnp.linspace(-0.3, 0.3, GRID_N)
    gx, gy = jnp.meshgrid(xs, xs, indexing="ij")
    grid_pts = jnp.stack([gx, gy], axis=-1).reshape(M, 2).astype(jnp.float32)

    n_tiles = pl.cdiv(M, TP)
    M_pad = n_tiles * TP
    grid_pts = jnp.pad(grid_pts, ((0, M_pad - M), (0, 0)))  # (M_pad, 2)

    out = pl.pallas_call(
        decoder_kernel,
        out_shape=jax.ShapeDtypeStruct((B, M_pad, OUT_C), jnp.float32),
        grid_spec=pltpu.PrefetchScalarGridSpec(
            num_scalar_prefetch=0,
            grid=(B, n_tiles),
            in_specs=[
                pl.BlockSpec((1, 1, H1), lambda b, i: (b, 0, 0)),   # cwb1 (per batch)
                pl.BlockSpec((1, 1, H1), lambda b, i: (b, 0, 0)),   # cwb4 (per batch)
                pl.BlockSpec((TP, 2),    lambda b, i: (i, 0)),      # grid tile
                _full_spec(w1b.shape),
                _full_spec(w2.shape),  _full_spec(b2.shape),
                _full_spec(w34.shape),
                _full_spec(w5.shape),  _full_spec(b5.shape),
                _full_spec(w6.shape),  _full_spec(b6.shape),
            ],
            out_specs=pl.BlockSpec((1, TP, OUT_C), lambda b, i: (b, i, 0)),
        ),
        compiler_params=pltpu.CompilerParams(
            dimension_semantics=("parallel", "parallel"),
        ),
    )(cwb1, cwb4, grid_pts, w1b, w2, b2, w34, w5, b5, w6, b6)

    return out[:, :M, :]


# ---------------------------------------------------------------------------
# Deterministic parameter construction (PyTorch-style uniform fan-in init).
# Weights are stored as (C_in, C_out) == Conv1d weight[..., 0].T
# ---------------------------------------------------------------------------
def make_params(key):
    def lin(k, fan_in, fan_out):
        kw, kb = jax.random.split(k)
        bound = 1.0 / np.sqrt(fan_in)
        w = jax.random.uniform(kw, (fan_in, fan_out), jnp.float32, -bound, bound)
        b = jax.random.uniform(kb, (1, fan_out), jnp.float32, -bound, bound)
        return w, b

    ks = jax.random.split(key, 6)
    w1, b1 = lin(ks[0], CODE_DIM + 2, 256)   # mlp1 conv1: 514 -> 256
    w2, b2 = lin(ks[1], 256, 64)             # mlp1 conv2
    w3, b3 = lin(ks[2], 64, 3)               # mlp1 conv3
    w4, b4 = lin(ks[3], CODE_DIM + 3, 256)   # mlp2 conv1: 515 -> 256
    w5, b5 = lin(ks[4], 256, 64)             # mlp2 conv2
    w6, b6 = lin(ks[5], 64, 3)               # mlp2 conv3

    # split first-layer weights into codeword part / concatenated-feature part
    w1a, w1b = w1[:CODE_DIM], w1[CODE_DIM:]          # (512,256), (2,256)
    w4a, w4b = w4[:CODE_DIM], w4[CODE_DIM:]          # (512,256), (3,256)
    return (w1a, w1b, b1, w2, b2, w3, b3,
            w4a, w4b, b4, w5, b5, w6, b6)


# ---------------------------------------------------------------------------
# Pure-JAX reference (mirrors the PyTorch forward exactly).
# ---------------------------------------------------------------------------
def reference_forward(x, params):
    (w1a, w1b, b1, w2, b2, w3, b3,
     w4a, w4b, b4, w5, b5, w6, b6) = params
    B = x.shape[0]
    cw = x[:, 0, :]                                         # (B, 512)
    xs = jnp.linspace(-0.3, 0.3, GRID_N)
    gx, gy = jnp.meshgrid(xs, xs, indexing="ij")
    grid = jnp.stack([gx, gy], axis=-1).reshape(M, 2).astype(jnp.float32)

    cw_rep = jnp.broadcast_to(cw[:, None, :], (B, M, CODE_DIM))
    g_rep = jnp.broadcast_to(grid[None], (B, M, 2))
    hp = jax.lax.Precision.HIGHEST

    c1 = jnp.concatenate([cw_rep, g_rep], axis=-1)          # (B, M, 514)
    w1 = jnp.concatenate([w1a, w1b], axis=0)
    h = jax.nn.relu(jnp.einsum("bmc,co->bmo", c1, w1, precision=hp) + b1)
    h = jax.nn.relu(jnp.einsum("bmc,co->bmo", h, w2, precision=hp) + b2)
    f1 = jnp.einsum("bmc,co->bmo", h, w3, precision=hp) + b3

    c2 = jnp.concatenate([cw_rep, f1], axis=-1)             # (B, M, 515)
    w4 = jnp.concatenate([w4a, w4b], axis=0)
    h2 = jax.nn.relu(jnp.einsum("bmc,co->bmo", c2, w4, precision=hp) + b4)
    h2 = jax.nn.relu(jnp.einsum("bmc,co->bmo", h2, w5, precision=hp) + b5)
    return jnp.einsum("bmc,co->bmo", h2, w6, precision=hp) + b6


if __name__ == "__main__":
    key = jax.random.PRNGKey(0)
    k_x, k_p = jax.random.split(key)

    B = 2
    x = jax.random.normal(k_x, (B, 1, CODE_DIM), dtype=jnp.float32)  # (B, 1, 512)
    params = make_params(k_p)

    out = jax.block_until_ready(decoder_forward(x, params))
    ref = jax.block_until_ready(reference_forward(x, params))

    assert out.shape == (B, M, 3), out.shape
    assert bool(jnp.allclose(out, ref, atol=2e-3, rtol=2e-3)), \
        f"max abs diff {float(jnp.max(jnp.abs(out - ref)))}"

    print("KERNEL_OK")
</pallas_src>

<mosaic_0001>
module attributes {stable_mosaic.version = 11 : i64} {
  func.func @decoder_kernel(%arg0: i32, %arg1: i32, %arg2: memref<1x1x256xf32, #tpu.memory_space<vmem>>, %arg3: memref<1x1x256xf32, #tpu.memory_space<vmem>>, %arg4: memref<1088x2xf32, #tpu.memory_space<vmem>>, %arg5: memref<2x256xf32, #tpu.memory_space<vmem>>, %arg6: memref<256x64xf32, #tpu.memory_space<vmem>>, %arg7: memref<1x64xf32, #tpu.memory_space<vmem>>, %arg8: memref<64x256xf32, #tpu.memory_space<vmem>>, %arg9: memref<256x64xf32, #tpu.memory_space<vmem>>, %arg10: memref<1x64xf32, #tpu.memory_space<vmem>>, %arg11: memref<64x3xf32, #tpu.memory_space<vmem>>, %arg12: memref<1x3xf32, #tpu.memory_space<vmem>>, %arg13: memref<1x1088x3xf32, #tpu.memory_space<vmem>>) attributes {dimension_semantics = [#tpu.dimension_semantics<parallel>, #tpu.dimension_semantics<parallel>], iteration_bounds = array<i64: 2, 2>, scalar_prefetch = 0 : i64, scratch_operands = 0 : i64, tpu.core_type = #tpu.core_type<tc>, window_params = [{transform_indices = @transform_0, window_bounds = array<i64: 1, 1, 256>}, {transform_indices = @transform_1, window_bounds = array<i64: 1, 1, 256>}, {transform_indices = @transform_2, window_bounds = array<i64: 1088, 2>}, {pipeline_mode = #tpu.pipeline_mode<synchronous>, transform_indices = @transform_3, window_bounds = array<i64: 2, 256>}, {pipeline_mode = #tpu.pipeline_mode<synchronous>, transform_indices = @transform_4, window_bounds = array<i64: 256, 64>}, {pipeline_mode = #tpu.pipeline_mode<synchronous>, transform_indices = @transform_5, window_bounds = array<i64: 1, 64>}, {pipeline_mode = #tpu.pipeline_mode<synchronous>, transform_indices = @transform_6, window_bounds = array<i64: 64, 256>}, {pipeline_mode = #tpu.pipeline_mode<synchronous>, transform_indices = @transform_7, window_bounds = array<i64: 256, 64>}, {pipeline_mode = #tpu.pipeline_mode<synchronous>, transform_indices = @transform_8, window_bounds = array<i64: 1, 64>}, {pipeline_mode = #tpu.pipeline_mode<synchronous>, transform_indices = @transform_9, window_bounds = array<i64: 64, 3>}, {pipeline_mode = #tpu.pipeline_mode<synchronous>, transform_indices = @transform_10, window_bounds = array<i64: 1, 3>}, {transform_indices = @transform_11, window_bounds = array<i64: 1, 1088, 3>}]} {
    %c0 = arith.constant 0 : index
    %c0_0 = arith.constant 0 : index
    %0 = vector.load %arg4[%c0, %c0_0] : memref<1088x2xf32, #tpu.memory_space<vmem>>, vector<1088x2xf32>
    %1 = vector.extract_strided_slice %0 {offsets = [0, 0], sizes = [1088, 1], strides = [1, 1]} : vector<1088x2xf32> to vector<1088x1xf32>
    %c0_1 = arith.constant 0 : index
    %c0_2 = arith.constant 0 : index
    %2 = vector.load %arg5[%c0_1, %c0_2] : memref<2x256xf32, #tpu.memory_space<vmem>>, vector<1x256xf32>
    %3 = vector.broadcast %1 : vector<1088x1xf32> to vector<1088x256xf32>
    %4 = vector.broadcast %2 : vector<1x256xf32> to vector<1088x256xf32>
    %5 = arith.mulf %3, %4 : vector<1088x256xf32>
    %6 = vector.extract_strided_slice %0 {offsets = [0, 1], sizes = [1088, 1], strides = [1, 1]} : vector<1088x2xf32> to vector<1088x1xf32>
    %c1 = arith.constant 1 : index
    %c0_3 = arith.constant 0 : index
    %7 = vector.load %arg5[%c1, %c0_3] : memref<2x256xf32, #tpu.memory_space<vmem>>, vector<1x256xf32>
    %8 = vector.broadcast %6 : vector<1088x1xf32> to vector<1088x256xf32>
    %9 = vector.broadcast %7 : vector<1x256xf32> to vector<1088x256xf32>
    %10 = arith.mulf %8, %9 : vector<1088x256xf32>
    %11 = arith.addf %5, %10 : vector<1088x256xf32>
    %c0_4 = arith.constant 0 : index
    %c0_5 = arith.constant 0 : index
    %c0_6 = arith.constant 0 : index
    %12 = vector.load %arg2[%c0_4, %c0_5, %c0_6] : memref<1x1x256xf32, #tpu.memory_space<vmem>>, vector<1x1x256xf32>
    %13 = vector.shape_cast %12 : vector<1x1x256xf32> to vector<1x256xf32>
    %14 = vector.broadcast %13 : vector<1x256xf32> to vector<1088x256xf32>
    %15 = arith.addf %14, %11 : vector<1088x256xf32>
    %cst = arith.constant 0.000000e+00 : f32
    %16 = vector.broadcast %cst : f32 to vector<1088x256xf32>
    %17 = arith.maximumf %15, %16 : vector<1088x256xf32>
    %c0_7 = arith.constant 0 : index
    %c0_8 = arith.constant 0 : index
    %18 = vector.load %arg6[%c0_7, %c0_8] : memref<256x64xf32, #tpu.memory_space<vmem>>, vector<256x64xf32>
    %cst_9 = arith.constant dense<0.000000e+00> : vector<1088x64xf32>
    %19 = tpu.matmul %17, %18, %cst_9 {dimension_numbers = #tpu.dot_dimension_numbers<[1], [0], [0], [1], [0, 0, 1, 1], [], []>} : vector<1088x256xf32>, vector<256x64xf32>, vector<1088x64xf32> -> vector<1088x64xf32>
    %c0_10 = arith.constant 0 : index
    %c0_11 = arith.constant 0 : index
    %20 = vector.load %arg7[%c0_10, %c0_11] : memref<1x64xf32, #tpu.memory_space<vmem>>, vector<1x64xf32>
    %21 = vector.broadcast %20 : vector<1x64xf32> to vector<1088x64xf32>
    %22 = arith.addf %19, %21 : vector<1088x64xf32>
    %cst_12 = arith.constant 0.000000e+00 : f32
    %23 = vector.broadcast %cst_12 : f32 to vector<1088x64xf32>
    %24 = arith.maximumf %22, %23 : vector<1088x64xf32>
    %c0_13 = arith.constant 0 : index
    %c0_14 = arith.constant 0 : index
    %c0_15 = arith.constant 0 : index
    %25 = vector.load %arg3[%c0_13, %c0_14, %c0_15] : memref<1x1x256xf32, #tpu.memory_space<vmem>>, vector<1x1x256xf32>
    %26 = vector.shape_cast %25 : vector<1x1x256xf32> to vector<1x256xf32>
    %c0_16 = arith.constant 0 : index
    %c0_17 = arith.constant 0 : index
    %27 = vector.load %arg8[%c0_16, %c0_17] : memref<64x256xf32, #tpu.memory_space<vmem>>, vector<64x256xf32>
    %cst_18 = arith.constant dense<0.000000e+00> : vector<1088x256xf32>
    %28 = tpu.matmul %24, %27, %cst_18 {dimension_numbers = #tpu.dot_dimension_numbers<[1], [0], [0], [1], [0, 0, 1, 1], [], []>} : vector<1088x64xf32>, vector<64x256xf32>, vector<1088x256xf32> -> vector<1088x256xf32>
    %29 = vector.broadcast %26 : vector<1x256xf32> to vector<1088x256xf32>
    %30 = arith.addf %29, %28 : vector<1088x256xf32>
    %cst_19 = arith.constant 0.000000e+00 : f32
    %31 = vector.broadcast %cst_19 : f32 to vector<1088x256xf32>
    %32 = arith.maximumf %30, %31 : vector<1088x256xf32>
    %c0_20 = arith.constant 0 : index
    %c0_21 = arith.constant 0 : index
    %33 = vector.load %arg9[%c0_20, %c0_21] : memref<256x64xf32, #tpu.memory_space<vmem>>, vector<256x64xf32>
    %cst_22 = arith.constant dense<0.000000e+00> : vector<1088x64xf32>
    %34 = tpu.matmul %32, %33, %cst_22 {dimension_numbers = #tpu.dot_dimension_numbers<[1], [0], [0], [1], [0, 0, 1, 1], [], []>} : vector<1088x256xf32>, vector<256x64xf32>, vector<1088x64xf32> -> vector<1088x64xf32>
    %c0_23 = arith.constant 0 : index
    %c0_24 = arith.constant 0 : index
    %35 = vector.load %arg10[%c0_23, %c0_24] : memref<1x64xf32, #tpu.memory_space<vmem>>, vector<1x64xf32>
    %36 = vector.broadcast %35 : vector<1x64xf32> to vector<1088x64xf32>
    %37 = arith.addf %34, %36 : vector<1088x64xf32>
    %cst_25 = arith.constant 0.000000e+00 : f32
    %38 = vector.broadcast %cst_25 : f32 to vector<1088x64xf32>
    %39 = arith.maximumf %37, %38 : vector<1088x64xf32>
    %c0_26 = arith.constant 0 : index
    %c0_27 = arith.constant 0 : index
    %40 = vector.load %arg11[%c0_26, %c0_27] : memref<64x3xf32, #tpu.memory_space<vmem>>, vector<64x3xf32>
    %cst_28 = arith.constant dense<0.000000e+00> : vector<1088x3xf32>
    %41 = tpu.matmul %39, %40, %cst_28 {dimension_numbers = #tpu.dot_dimension_numbers<[1], [0], [0], [1], [0, 0, 1, 1], [], []>} : vector<1088x64xf32>, vector<64x3xf32>, vector<1088x3xf32> -> vector<1088x3xf32>
    %c0_29 = arith.constant 0 : index
    %c0_30 = arith.constant 0 : index
    %42 = vector.load %arg12[%c0_29, %c0_30] : memref<1x3xf32, #tpu.memory_space<vmem>>, vector<1x3xf32>
    %43 = vector.broadcast %42 : vector<1x3xf32> to vector<1088x3xf32>
    %44 = arith.addf %41, %43 : vector<1088x3xf32>
    %45 = vector.shape_cast %44 : vector<1088x3xf32> to vector<1x1088x3xf32>
    %c0_31 = arith.constant 0 : index
    %c0_32 = arith.constant 0 : index
    %c0_33 = arith.constant 0 : index
    %46 = vector.load %arg13[%c0_31, %c0_32, %c0_33] : memref<1x1088x3xf32, #tpu.memory_space<vmem>>, vector<1x1088x3xf32>
    tpu.vector_store %arg13[%c0_31, %c0_32, %c0_33], %45 {strides = array<i32>} : memref<1x1088x3xf32, #tpu.memory_space<vmem>>, vector<1x1088x3xf32>,
    return
  }
  func.func @transform_0(%arg0: i32, %arg1: i32) -> (i32, i32, i32) {
    %c0_i32 = arith.constant 0 : i32
    %c0_i32_0 = arith.constant 0 : i32
    %c0_i32_1 = arith.constant 0 : i32
    return %arg0, %c0_i32, %c0_i32_0 : i32, i32, i32
  }
  func.func @transform_1(%arg0: i32, %arg1: i32) -> (i32, i32, i32) {
    %c0_i32 = arith.constant 0 : i32
    %c0_i32_0 = arith.constant 0 : i32
    %c0_i32_1 = arith.constant 0 : i32
    return %arg0, %c0_i32, %c0_i32_0 : i32, i32, i32
  }
  func.func @transform_2(%arg0: i32, %arg1: i32) -> (i32, i32) {
    %c0_i32 = arith.constant 0 : i32
    %c0_i32_0 = arith.constant 0 : i32
    return %arg1, %c0_i32 : i32, i32
  }
  func.func @transform_3(%arg0: i32, %arg1: i32) -> (i32, i32) {
    %c0_i32 = arith.constant 0 : i32
    %c0_i32_0 = arith.constant 0 : i32
    %c0_i32_1 = arith.constant 0 : i32
    return %c0_i32, %c0_i32_0 : i32, i32
  }
  func.func @transform_4(%arg0: i32, %arg1: i32) -> (i32, i32) {
    %c0_i32 = arith.constant 0 : i32
    %c0_i32_0 = arith.constant 0 : i32
    %c0_i32_1 = arith.constant 0 : i32
    return %c0_i32, %c0_i32_0 : i32, i32
  }
  func.func @transform_5(%arg0: i32, %arg1: i32) -> (i32, i32) {
    %c0_i32 = arith.constant 0 : i32
    %c0_i32_0 = arith.constant 0 : i32
    %c0_i32_1 = arith.constant 0 : i32
    return %c0_i32, %c0_i32_0 : i32, i32
  }
  func.func @transform_6(%arg0: i32, %arg1: i32) -> (i32, i32) {
    %c0_i32 = arith.constant 0 : i32
    %c0_i32_0 = arith.constant 0 : i32
    %c0_i32_1 = arith.constant 0 : i32
    return %c0_i32, %c0_i32_0 : i32, i32
  }
  func.func @transform_7(%arg0: i32, %arg1: i32) -> (i32, i32) {
    %c0_i32 = arith.constant 0 : i32
    %c0_i32_0 = arith.constant 0 : i32
    %c0_i32_1 = arith.constant 0 : i32
    return %c0_i32, %c0_i32_0 : i32, i32
  }
  func.func @transform_8(%arg0: i32, %arg1: i32) -> (i32, i32) {
    %c0_i32 = arith.constant 0 : i32
    %c0_i32_0 = arith.constant 0 : i32
    %c0_i32_1 = arith.constant 0 : i32
    return %c0_i32, %c0_i32_0 : i32, i32
  }
  func.func @transform_9(%arg0: i32, %arg1: i32) -> (i32, i32) {
    %c0_i32 = arith.constant 0 : i32
    %c0_i32_0 = arith.constant 0 : i32
    %c0_i32_1 = arith.constant 0 : i32
    return %c0_i32, %c0_i32_0 : i32, i32
  }
  func.func @transform_10(%arg0: i32, %arg1: i32) -> (i32, i32) {
    %c0_i32 = arith.constant 0 : i32
    %c0_i32_0 = arith.constant 0 : i32
    %c0_i32_1 = arith.constant 0 : i32
    return %c0_i32, %c0_i32_0 : i32, i32
  }
  func.func @transform_11(%arg0: i32, %arg1: i32) -> (i32, i32, i32) {
    %c0_i32 = arith.constant 0 : i32
    %c0_i32_0 = arith.constant 0 : i32
    return %arg0, %arg1, %c0_i32 : i32, i32, i32
  }
}

</mosaic_0001>

<bundles_post_ra>
// kernel: tpu_custom_call.1
= control target key start
LH: loop header
LB: loop body
LE: loop exit
PB: predicated region body
PF: predicated region fallthrough
CT: control target
= control target key end

     0   :  { %s13277_s0 = inlined_call_operand.hbm [shape: f32[2,1,256], index: 0, kind: input, shape index: {}]   ;;  %s13278_s1 = inlined_call_operand.hbm [shape: f32[2,1,256], index: 1, kind: input, shape index: {}]   ;;  %s13279_s2 = inlined_call_operand.vmem [shape: f32[2176,2], index: 2, kind: input, shape index: {}]   ;;  %s13280_s3 = inlined_call_operand.hbm [shape: f32[2,256], index: 3, kind: input, shape index: {}]   ;;  %s13281_s4 = inlined_call_operand.vmem [shape: f32[256,64], index: 4, kind: input, shape index: {}]   ;;  %s13282_s5 = inlined_call_operand.hbm [shape: f32[1,64], index: 5, kind: input, shape index: {}]   ;;  %s13283_s6 = inlined_call_operand.hbm [shape: f32[64,256], index: 6, kind: input, shape index: {}]   ;;  %s13284_s7 = inlined_call_operand.vmem [shape: f32[256,64], index: 7, kind: input, shape index: {}]   ;;  %s13285_s8 = inlined_call_operand.hbm [shape: f32[1,64], index: 8, kind: input, shape index: {}]   ;;  %s13286_s9 = inlined_call_operand.vmem [shape: f32[64,3], index: 9, kind: input, shape index: {}]   ;;  %s13287_s10 = inlined_call_operand.hbm [shape: f32[1,3], index: 10, kind: input, shape index: {}]   ;;  %s13288_s11 = inlined_call_operand.vmem [shape: f32[2,2176,3], index: 11, kind: output, shape index: {}]  }
   0x1   :  { %13297 = sst [smem:[#allocation148_spill]] %s13277_s0 }
   0x2   :  { %13298 = sst [smem:[#allocation149_spill]] %s13280_s3 }
   0x3   :  { %13299 = sst [smem:[#allocation150_spill]] %s13282_s5 }
   0x4   :  { %13300 = sst [smem:[#allocation151_spill]] %s13283_s6 }
   0x5   :  { %13301 = sst [smem:[#allocation152_spill]] %s13285_s8 }
   0x6   :  { %13302 = sst [smem:[#allocation153_spill]] %s13287_s10 }
   0x7   :  { %13303 = sst [smem:[#allocation154_spill]] %s13288_s11 }
   0x8   :  { %16 = vsyncpa [#allocation3], 0 }
   0x9   :  { %18 = vsyncpa [#allocation3 + $0x1], 0 }
   0xa   :  { %19 = vsyncpa [#allocation5], 0 }
   0xb   :  { %21 = vsyncpa [#allocation5 + $0x1], 0 }
   0xc   :  { %22 = vsyncpa [#allocation8], 0 }
   0xd   :  { %23 = vsyncpa [#allocation11], 0  ;;  %s9664_s17 = smov 0   ;;  %s9666_s18 = smov 0  }
   0xe   :  { %s9668_s19 = smov 0   ;;  %s9670_s20 = smov 0  }
   0xf   :  { %s9672_s21 = smov 0   ;;  %s9674_s22 = smov 0  }
  0x10   :  { %s9676_s23 = smov 0   ;;  %s9678_s24 = smov 0  }
  0x11 LB: > { %13304 = sst [smem:[#allocation18_spill]] %s9578_s21  ;;  %s13289_s25 = sadd.s32 4294967295, %s9590_s24   ;;  %s9590_s24 = sphi %s9678_s24, %s29_s24   ;;  %s9586_s23 = sphi %s9676_s23, %s13606_s23   ;;  %s9582_s22 = sphi %s9674_s22, %s13605_s22   ;;  %s9578_s21 = sphi %s9672_s21, %s13604_s21   ;;  %s9574_s20 = sphi %s9670_s20, %s13603_s20   ;;  %s9570_s19 = sphi %s9668_s19, %s13602_s19   ;;  %s9566_s18 = sphi %s9666_s18, %s13601_s18   ;;  %s9562_s17 = sphi %s9664_s17, %s13600_s17  }
  0x12   : > { %p8495_p0 = scmp.ge.s32.totalorder %s9590_s24, 1  ;;  %p9708_p1 = scmp.eq.s32.totalorder %s13289_s25, 0 }
  0x13   : > { %p320_p2 = scmp.lt.s32.totalorder %s9590_s24, 5  ;;  %s9592_s28 = smov [#allocation6]  }
  0x14   : > { %s13305_s26 = scalar_select %p9708_p1, 1, 0 }
  0x15   : > { %p9713_p3 = pnand %p8495_p0, %p320_p2  ;;  %s333_s29 = sshll.u32 %s9592_s28, 4  ;;  %s334_s29 = int_to_ptr.vmem [resolvable:$true] %s333_s29 }
  0x16   : > { %s9593_s30 = smov [#allocation7]   ;;  %s9594_s14 = smov [#allocation10]  }
  0x17   : > { %s13306_s27 = scalar_select %p9713_p3, 1, 0 }
  0x18   : > { %p9202_p4 = pneg %p9713_p3  ;;  %s347_s12 = sshll.u32 %s9593_s30, 4  ;;  %s348_s12 = int_to_ptr.vmem [resolvable:$true] %s347_s12 }
  0x19   : > { %s374_s15 = sshll.u32 %s9594_s14, 4  ;;  %s9333_s28 = scalar_lea.vmem %s334_s29, 64  ;;  %s9725_s15 = int_to_ptr.vmem [resolvable:$true] %s374_s15 }
  0x1a   : > { %p9721_p5 = pnand %p9202_p4, %p9708_p1  ;;  %p9334_p7 = scmp.ne.s32.totalorder %s334_s29, %s9333_s28 }
  0x1b   : > { %p9341_p10 = scmp.lt.s32.totalorder %s334_s29, %s334_s29  ;;  %p9342_p11 = scmp.lt.s32.totalorder %s9333_s28, %s9333_s28 }
  0x1c   : > { %p9729_p6 = pneg %p9721_p5 }
  0x1d   : > { %p9343_p12 = por %p9342_p11, %p9341_p10 }
  0x1e   : > { %p9336_p8 = pnand %p9334_p7, %p9729_p6 }
  0x20   : > { %p9337_p9 = pneg %p9336_p8 }
  0x22   : > { %p9344_p13 = pnand %p9343_p12, %p9337_p9 }
  0x24   : > { %9347 = shalt.err (!%p9344_p13)
}
  0x25   : > { %s13309_s3 = sld [smem:[#allocation149_spill]]  ;;  %s9359_s25 = scalar_lea.vmem %s348_s12, 16 }
  0x26   : > { %p9360_p0 = scmp.ne.s32.totalorder %s348_s12, %s9359_s25  ;;  %s9366_s11 = scalar_lea.vmem %s348_s12, 32 }
  0x27   : > { %p9367_p7 = scmp.lt.s32.totalorder %s348_s12, %s348_s12  ;;  %p9368_p8 = scmp.lt.s32.totalorder %s9366_s11, %s9359_s25 }
  0x28   : > { %p9362_p2 = pnand %p9360_p0, %p9729_p6 }
  0x29   : > { %p9369_p3 = por %p9368_p8, %p9367_p7 }
  0x2a   : > { %p9363_p4 = pneg %p9362_p2 }
  0x2b   : > { %9205 = dma.hbm_to_vmem [thread:$0]  (!%p9721_p5), %s13309_s3, 64, %s334_s29, [#allocation5]  }
  0x2c   : > { %p9370_p1 = pnand %p9369_p3, %p9363_p4 }
  0x2e   : > { %9373 = shalt.err (!%p9370_p1)
}
  0x2f   : > { %s13310_s5 = sld [smem:[#allocation150_spill]]  ;;  %s9385_s29 = scalar_lea.vmem %s9725_s15, 16 }
  0x30   : > { %p9386_p9 = scmp.ne.s32.totalorder %s9725_s15, %s9385_s29  ;;  %s9392_s11 = scalar_lea.vmem %s9725_s15, 32 }
  0x31   : > { %p9393_p3 = scmp.lt.s32.totalorder %s9725_s15, %s9725_s15  ;;  %p9394_p1 = scmp.lt.s32.totalorder %s9392_s11, %s9385_s29 }
  0x32   : > { %p9388_p10 = pnand %p9386_p9, %p9729_p6 }
  0x33   : > { %p9395_p12 = por %p9394_p1, %p9393_p3 }
  0x34   : > { %p9389_p11 = pneg %p9388_p10 }
  0x35   : > { %9208 = dma.hbm_to_vmem [thread:$0]  (!%p9721_p5), %s13310_s5, 16, %s348_s12, [#allocation8]  }
  0x36   : > { %p9396_p13 = pnand %p9395_p12, %p9389_p11 }
  0x38   : > { %9399 = shalt.err (!%p9396_p13)
}
  0x39   : > { %s13311_s8 = sld [smem:[#allocation152_spill]]  ;;  %s9595_s12 = smov [#allocation9]  }
  0x3a   : > { %s357_s30 = sshll.u32 %s9595_s12, 4  ;;  %s358_s30 = int_to_ptr.vmem [resolvable:$true] %s357_s30 }
  0x3b   : > { %s9411_s14 = scalar_lea.vmem %s358_s30, 2048  ;;  %p9419_p7 = scmp.lt.s32.totalorder %s358_s30, %s358_s30 }
  0x3c   : > { %p9412_p0 = scmp.ne.s32.totalorder %s358_s30, %s9411_s14  ;;  %p9420_p8 = scmp.lt.s32.totalorder %s9411_s14, %s9411_s14 }
  0x3e   : > { %p9414_p2 = pnand %p9412_p0, %p9729_p6  ;;  %p9421_p9 = por %p9420_p8, %p9419_p7 }
  0x3f   : > { %9214 = dma.hbm_to_vmem [thread:$0]  (!%p9721_p5), %s13311_s8, 16, %s9725_s15, [#allocation11]  }
  0x40   : > { %p9415_p4 = pneg %p9414_p2 }
  0x42   : > { %p9422_p10 = pnand %p9421_p9, %p9415_p4 }
  0x44   : > { %9425 = shalt.err (!%p9422_p10)
}
  0x45   : > { %s9596_s28 = smov 256   ;;  %s9597_s29 = smov 16  }
  0x46   : > { %s13312_s6 = sld [smem:[#allocation151_spill]]  ;;  %s9598_s21 = smov [#allocation12]  }
  0x47   : > { %s388_s25 = sshll.u32 %s9598_s21, 4  ;;  %s389_s25 = int_to_ptr.vmem [resolvable:$true] %s388_s25 }
  0x48   : > { %s9437_s12 = scalar_lea.vmem %s389_s25, 16  ;;  %s9444_s14 = scalar_lea.vmem %s389_s25, 32 }
  0x49   : > { %p9438_p11 = scmp.ne.s32.totalorder %s389_s25, %s9437_s12  ;;  %p9445_p12 = scmp.lt.s32.totalorder %s389_s25, %s389_s25 }
  0x4a   : > { %p9446_p13 = scmp.lt.s32.totalorder %s9444_s14, %s9437_s12 }
  0x4b   : > { %p9440_p3 = pnand %p9438_p11, %p9729_p6 }
  0x4c   : > { %9211 = dma.hbm_to_vmem [thread:$0]  (!%p9721_p5), %s13312_s6, 2048, %s358_s30, [#allocation8], %s9596_s28, %s9596_s28, %s9597_s29  }
  0x4d   : > { %p9441_p1 = pneg %p9440_p3  ;;  %p9447_p0 = por %p9446_p13, %p9445_p12 }
  0x4f   : > { %p9448_p2 = pnand %p9447_p0, %p9441_p1 }
  0x51   : > { %9451 = shalt.err (!%p9448_p2)
}
  0x52   : > { %s13313_s10 = sld [smem:[#allocation153_spill]]  ;;  %s38_s16 = sadd.s32 1, %s9582_s22 }
  0x53   : > { %p39_p6 = scmp.ge.s32.totalorder %s38_s16, 2  ;;  %s41_s13 = sadd.s32 1, %s9586_s23 }
  0x54   : > { %s48_s30 = sadd.s32 1, %s9570_s19  ;;  %p55_p4 = scmp.ne.s32.totalorder %s9570_s19, %s9566_s18 }
  0x55   : > { %s13608_s16 = smov (%p39_p6, %s38_s16), 0  ;;  %s13610_s13 = smov (!%p39_p6, %s41_s13), %s9586_s23 }
  0x56   : > { %p56_p7 = scmp.eq.s32.totalorder %s9590_s24, 0  ;;  %p61_p8 = scmp.ne.s32.totalorder %s9566_s18, %s9562_s17 }
  0x57   : > { %p43_p9 = scmp.ge.s32.totalorder %s13610_s13, 2  ;;  %p9230_p10 = scmp.lt.s32.totalorder %s9590_s24, 4 }
  0x58   : > { %9217 = dma.hbm_to_vmem [thread:$0]  (!%p9721_p5), %s13313_s10, 16, %s389_s25, [#allocation11]  }
  0x59   : > { %p57_p11 = por %p56_p7, %p55_p4  ;;  %p13314_p3 = scmp.ne.s32.totalorder %s13305_s26, 0 }
  0x5a   : > { %s13612_s13 = smov (%p43_p9, %s13610_s13), 0  ;;  %s399_s5 = sand.u32 1, %s9570_s19  }
  0x5b   : > { %p9788_p1 = por %p13314_p3, %p61_p8  ;;  %13316 = sst [smem:[#allocation19_spill]] %s13612_s13 }
  0x5c   : > { %s8795_s28 = sshll.u32 %s9586_s23, 5  ;;  %s45_s29 = ssub.s32 %s9586_s23, %s13612_s13 }
  0x5d   : > { %p46_p5 = scmp.eq.s32.totalorder %s45_s29, 0  ;;  %s8502_s11 = sshll.u32 %s399_s5, 1 }
  0x5e   : > { %s13317_s0 = sld [smem:[#allocation148_spill]]  ;;  %s403_s12 = scalar_lea.vmem [#allocation2], %s8502_s11 }
  0x5f   : > { %s9802_s25 = scalar_select %p46_p5, %s9570_s19, %s48_s30  }
  0x60   : > { %s411_s14 = sshll.u32 %s403_s12, 4  ;;  %p9806_p12 = pnand %p9230_p10, %p57_p11  ;;  %s412_s14 = int_to_ptr.vmem [resolvable:$true] %s411_s14 }
  0x61   : > { %s9813_s29 = scalar_lea.hbm %s13278_s1, %s8795_s28  ;;  %s400_s13 = scalar_lea.sflag [#allocation3], %s399_s5 }
  0x62   : > { %p9454_p13 = pneg %p9806_p12  ;;  %s9465_s30 = scalar_lea.vmem %s412_s14, 32 }
  0x63   : > { %p9466_p0 = scmp.ne.s32.totalorder %s412_s14, %s9465_s30  ;;  %s9599_s15 = smov [#allocation2]  }
  0x64   : > { %s409_s17 = scalar_lea.hbm %s13317_s0, %s8795_s28  ;;  %s9470_s21 = sshll.u32 %s9599_s15, 4  ;;  %s9471_s21 = int_to_ptr.vmem [resolvable:$false] %s9470_s21 }
  0x65   : > { %p9468_p2 = pnand %p9466_p0, %p9454_p13  ;;  %s9472_s12 = scalar_lea.vmem %s9471_s21, 64 }
  0x66   : > { %p9473_p4 = scmp.lt.s32.totalorder %s412_s14, %s9471_s21  ;;  %p9474_p7 = scmp.lt.s32.totalorder %s9472_s12, %s9465_s30 }
  0x67   : > { %p9469_p6 = pneg %p9468_p2 }
  0x68   : > { %p9475_p8 = por %p9474_p7, %p9473_p4 }
  0x6a   : > { %p9476_p9 = pnand %p9475_p8, %p9469_p6 }
  0x6c   : > { %9479 = shalt.err (!%p9476_p9)
}
  0x6d   : > { %9221 = dma.hbm_to_vmem [thread:$0]  (!%p9806_p12), %s409_s17, 32, %s412_s14, %s400_s13  }
  0x6e   : > { %s418_s8 = sand.u32 1, %s9590_s24   ;;  %s422_s10 = scalar_lea.vmem [#allocation4], %s8502_s11 }
  0x6f   : > { %s430_s5 = sshll.u32 %s422_s10, 4  ;;  %s419_s28 = scalar_lea.sflag [#allocation5], %s418_s8  ;;  %s431_s5 = int_to_ptr.vmem [resolvable:$true] %s430_s5 }
  0x70   : > { %s9493_s0 = scalar_lea.vmem %s431_s5, 32  ;;  %s9600_s30 = smov [#allocation4]  }
  0x71   : > { %p9494_p10 = scmp.ne.s32.totalorder %s431_s5, %s9493_s0  ;;  %s9498_s15 = sshll.u32 %s9600_s30, 4  ;;  %s9499_s15 = int_to_ptr.vmem [resolvable:$false] %s9498_s15 }
  0x72   : > { %s9500_s21 = scalar_lea.vmem %s9499_s15, 64  ;;  %p9501_p5 = scmp.lt.s32.totalorder %s431_s5, %s9499_s15 }
  0x73   : > { %p9496_p11 = pnand %p9494_p10, %p9454_p13  ;;  %p9502_p0 = scmp.lt.s32.totalorder %s9500_s21, %s9493_s0 }
  0x75   : > { %p9497_p3 = pneg %p9496_p11  ;;  %p9503_p2 = por %p9502_p0, %p9501_p5 }
  0x77   : > { %p9504_p6 = pnand %p9503_p2, %p9497_p3 }
  0x79   : > { %9507 = shalt.err (!%p9504_p6)
}
  0x7a   : > { %9224 = dma.hbm_to_vmem [thread:$0]  (!%p9806_p12), %s9813_s29, 32, %s431_s5, %s419_s28  }
  0x7b   : > { %p13319_p4 = scmp.ne.s32.totalorder %s13306_s27, 0 }
  0x7d   : > { %448 = sbr.rel (%p13319_p4) target bundleno = 1970 (0x7b2), region = 64 }
  0x82   : > { %s450_s13 = sand.u32 1, %s9566_s18  }
  0x83   : > { %s9832_s11 = sshll.u32 %s450_s13, 1  ;;  %s451_s17 = scalar_lea.sflag [#allocation3], %s450_s13 }
  0x84   : > { %s454_s14 = scalar_lea.vmem [#allocation2], %s9832_s11 }
  0x85   : > { %9541 = dma.done.wait (%p9788_p1), %s451_s17, 32  }
  0x86   : > { %9543 = vsyncadd (%p9788_p1), %s451_s17, 4294967264  ;;  %s13320_s0 = sadd.s32 4294967295, %s9590_s24   ;;  %s463_s29 = scalar_lea.vmem [#allocation4], %s9832_s11 }
  0x87   : > { %s459_s6 = sand.u32 1, %s13320_s0  }
  0x88   : > { %s460_s27 = scalar_lea.sflag [#allocation5], %s459_s6 }
  0x89   : > { %9545 = dma.done.wait (%p9788_p1), %s460_s27, 32  }
  0x8a   : > { %9547 = vsyncadd (%p9788_p1), %s460_s27, 4294967264  ;;  %p13321_p12 = scmp.ne.s32.totalorder %s13305_s26, 0 }
  0x8c   : > { %9549 = dma.done.wait (%p13321_p12), [#allocation5], 64  }
  0x8d   : > { %9551 = vsyncadd (%p13321_p12), [#allocation5], 4294967232 }
  0x8e   : > { %9553 = dma.done.wait (%p13321_p12), [#allocation8], 2064  }
  0x8f   : > { %9555 = vsyncadd (%p13321_p12), [#allocation8], 4294965232 }
  0x90   : > { %9557 = dma.done.wait (%p13321_p12), [#allocation11], 32  }
  0x91   : > { %9559 = vsyncadd (%p13321_p12), [#allocation11], 4294967264  ;;  %s536_s3 = smul.u32 136, %s9574_s20  ;;  %v9601_v0 = vmov 0   ;;  %v13295_v1 = vmov 0.0   ;;  %v3324_v2 = vld [vmem:[%s13281_s4 + $0x78] sm:$0xff] }
  0x92   : > { %9312 = vset.pattern.permute.xlu1 %v9601_v0  ;;  %9310 = vset.pattern.permute.xlu0 %v9601_v0  ;;  %v3323_v5 = vld [vmem:[%s13281_s4 + $0x70] sm:$0xff]  ;;  %v3322_v6 = vld [vmem:[%s13281_s4 + $0x68] sm:$0xff]  ;;  %v9603_v7 = vmov 1   ;;  %v3321_v8 = vld [vmem:[%s13281_s4 + $0x60] sm:$0xff]  ;;  %vm4246_vm0 = vcmask 523264   ;;  %s13560_s6 = sld [smem:[#allocation154_spill]] }
  0x93   : > { %p537_p1 = scmp.lt.s32.totalorder %s536_s3, 271  ;;  %3348 = vmatprep.subr.mxu0 %v13295_v1  ;;  %4887 = vmatprep.mubr.f32.mxu1 %v13295_v1  ;;  %v3320_v10 = vld [vmem:[%s13281_s4 + $0x58] sm:$0xff]  ;;  %v3319_v12 = vld [vmem:[%s13281_s4 + $0x50] sm:$0xff]  ;;  %v3318_v13 = vld [vmem:[%s13281_s4 + $0x48] sm:$0xff]  ;;  %vm8179_vm1 = vcmask 23552  }
  0x94   : > { %3349 = vmatpush1.msra.mxu0 %v3324_v2  ;;  %v3317_v15 = vld [vmem:[%s13281_s4 + $0x40] sm:$0xff]  ;;  %v3316_v16 = vld [vmem:[%s13281_s4 + $0x38] sm:$0xff]  ;;  %v3315_v18 = vld [vmem:[%s13281_s4 + $0x30] sm:$0xff] }
  0x95   : > { %s13614_s3 = smov (!%p537_p1, %s536_s3), 271  ;;  %3350 = vmatprep.subr.mxu0 %v13295_v1  ;;  %v3314_v19 = vld [vmem:[%s13281_s4 + $0x28] sm:$0xff]  ;;  %v9919_v21 = vld [vmem:[#allocation9 + $0x70] sm:$0xff]  ;;  %v3311_v26 = vld [vmem:[%s13281_s4 + $0x10] sm:$0xff] }
  0x96   : > { %s8516_s12 = sshll.u32 %s13614_s3, 3  ;;  %3351 = vmatpush1.msra.mxu0 %v3323_v5  ;;  %v9917_v20 = vld [vmem:[#allocation9 + $0x78] sm:$0xff]  ;;  %v3312_v24 = vld [vmem:[%s13281_s4 + $0x18] sm:$0xff]  ;;  %v3339_v32 = vld [vmem:[%s13281_s4 + $0xf0] sm:$0xff]  ;;  %v1370_v5 = vlaneseq }
  0x97   : > { %s9867_s26 = scalar_lea.vmem %s13279_s2, %s8516_s12  ;;  %3352 = vmatprep.subr.mxu0 %v13295_v1  ;;  %v3313_v23 = vld [vmem:[%s13281_s4 + $0x20] sm:$0xff]  ;;  %9161 = vmatprep.subr.mxu1 %v9917_v20  ;;  %v3310_v27 = vld [vmem:[%s13281_s4 + $0x8] sm:$0xff]  ;;  %v3340_v30 = vld [vmem:[%s13281_s4 + $0xf8] sm:$0xff] }
  0x98   : > { %v553_v3 = vld [vmem:[%s9867_s26 + $0x8] sm:$0xff]  ;;  %v552_v4 = vld [vmem:[%s9867_s26] sm:$0xff]  ;;  %v554_v9 = vld [vmem:[%s9867_s26 + $0x10] sm:$0xff]  ;;  %3353 = vmatpush1.msra.mxu0 %v3322_v6  ;;  %9169 = vmatpush1.msra.mxu1 %v9919_v21 }
  0x99   : > { %696 = vperm.xlu1 %9312, %v553_v3   ;;  %691 = vperm.xlu0 %9310, %v552_v4   ;;  %v555_v11 = vld [vmem:[%s9867_s26 + $0x18] sm:$0xff]  ;;  %v556_v14 = vld [vmem:[%s9867_s26 + $0x20] sm:$0xff]  ;;  %v557_v17 = vld [vmem:[%s9867_s26 + $0x28] sm:$0xff] }
  0x9a   : > { %3354 = vmatprep.subr.mxu0 %v13295_v1  ;;  %v558_v22 = vld [vmem:[%s9867_s26 + $0x30] sm:$0xff]  ;;  %v559_v25 = vld [vmem:[%s9867_s26 + $0x38] sm:$0xff]  ;;  %v560_v28 = vld [vmem:[%s9867_s26 + $0x40] sm:$0xff] }
  0x9b   : > { %3355 = vmatpush1.msra.mxu0 %v3321_v8  ;;  %v3309_v29 = vld [vmem:[%s13281_s4] sm:$0xff]  ;;  %v561_v31 = vld [vmem:[%s9867_s26 + $0x48] sm:$0xff]  ;;  %v562_v34 = vld [vmem:[%s9867_s26 + $0x50] sm:$0xff] }
  0x9c   : > { %3356 = vmatprep.subr.mxu0 %v13295_v1  ;;  %v3338_v33 = vld [vmem:[%s13281_s4 + $0xe8] sm:$0xff]  ;;  %v3337_v35 = vld [vmem:[%s13281_s4 + $0xe0] sm:$0xff]  ;;  %v3336_v36 = vld [vmem:[%s13281_s4 + $0xd8] sm:$0xff] }
  0x9d   : > { %9313 = vset.pattern.permute.xlu1 %v9603_v7  ;;  %9311 = vset.pattern.permute.xlu0 %v9603_v7  ;;  %v563_v37 = vld [vmem:[%s9867_s26 + $0x58] sm:$0xff]  ;;  %v3335_v38 = vld [vmem:[%s13281_s4 + $0xd0] sm:$0xff]  ;;  %v3334_v39 = vld [vmem:[%s13281_s4 + $0xc8] sm:$0xff]  ;;  %v1371_v7 = vshrl.u32 %v1370_v5, 7 }
  0x9e   : > { %1659 = vperm.xlu1 %9313, %v553_v3   ;;  %1655 = vperm.xlu0 %9311, %v552_v4   ;;  %v564_v40 = vld [vmem:[%s9867_s26 + $0x60] sm:$0xff]  ;;  %v3332_v42 = vld [vmem:[%s13281_s4 + $0xb8] sm:$0xff]  ;;  %v565_v43 = vld [vmem:[%s9867_s26 + $0x68] sm:$0xff] }
  0x9f   : > { %3357 = vmatpush1.msra.mxu0 %v3320_v10  ;;  %v3333_v41 = vld [vmem:[%s13281_s4 + $0xc0] sm:$0xff]  ;;  %v3331_v44 = vld [vmem:[%s13281_s4 + $0xb0] sm:$0xff]  ;;  %v3330_v45 = vld [vmem:[%s13281_s4 + $0xa8] sm:$0xff]  ;;  %v10042_v10 = vsub.s32 1, %v1371_v7 }
  0xa0   : > { %3358 = vmatprep.subr.mxu0 %v13295_v1  ;;  %v566_v46 = vld [vmem:[%s9867_s26 + $0x70] sm:$0xff]  ;;  %v3329_v47 = vld [vmem:[%s13281_s4 + $0xa0] sm:$0xff]  ;;  %v3328_v48 = vld [vmem:[%s13281_s4 + $0x98] sm:$0xff] }
  0xa1   : > { %3359 = vmatpush1.msra.mxu0 %v3319_v12  ;;  %v567_v49 = vld [vmem:[%s9867_s26 + $0x78] sm:$0xff]  ;;  %v3327_v50 = vld [vmem:[%s13281_s4 + $0x90] sm:$0xff]  ;;  %v3326_v51 = vld [vmem:[%s13281_s4 + $0x88] sm:$0xff] }
  0xa2   : > { %9314 = vset.pattern.permute.xlu1 %v9601_v0  ;;  %1663 = vperm.xlu0 %9311, %v554_v9   ;;  %v568_v52 = vld [vmem:[%s9867_s26 + $0x80] sm:$0xff]  ;;  %v569_v54 = vld [vmem:[%s9867_s26 + $0x88] sm:$0xff]  ;;  %v570_v55 = vld [vmem:[%s9867_s26 + $0x90] sm:$0xff] }
  0xa3   : > { %701 = vperm.xlu1 %9314, %v554_v9   ;;  %3360 = vmatprep.subr.mxu0 %v13295_v1  ;;  %v3325_v53 = vld [vmem:[%s13281_s4 + $0x80] sm:$0xff]  ;;  %v571_v56 = vld [vmem:[%s9867_s26 + $0x98] sm:$0xff]  ;;  %v10026_v59 = vld [vmem:[#allocation9 + $0x60] sm:$0xff]  ;;  %v10040_v9 = vsub.s32 0, %v1371_v7 }
  0xa4   : > { %3361 = vmatpush1.msra.mxu0 %v3318_v13  ;;  %v572_v57 = vld [vmem:[%s9867_s26 + $0xa0] sm:$0xff]  ;;  %v10024_v58 = vld [vmem:[#allocation9 + $0x68] sm:$0xff]  ;;  %v573_v60 = vld [vmem:[%s9867_s26 + $0xa8] sm:$0xff] }
  0xa5   : > { %3362 = vmatprep.subr.mxu0 %v13295_v1  ;;  %9162 = vmatprep.subr.mxu1 %v10024_v58  ;;  %v574_v61 = vld [vmem:[%s9867_s26 + $0xb0] sm:$0xff]  ;;  %v575_v62 = vld [vmem:[%s9867_s26 + $0xb8] sm:$0xff]  ;;  %v576_v63 = vld [vmem:[%s9867_s26 + $0xc0] sm:$0xff] }
  0xa6   : > { %1667 = vperm.xlu0 %9311, %v555_v11   ;;  %3363 = vmatpush1.msra.mxu0 %v3317_v15  ;;  %v577_v0 = vld [vmem:[%s9867_s26 + $0xc8] sm:$0xff]  ;;  %v578_v2 = vld [vmem:[%s9867_s26 + $0xd0] sm:$0xff]  ;;  %v579_v3 = vld [vmem:[%s9867_s26 + $0xd8] sm:$0xff] }
  0xa7   : > { %706 = vperm.xlu1 %9314, %v555_v11   ;;  %3364 = vmatprep.subr.mxu0 %v13295_v1  ;;  %v580_v4 = vld [vmem:[%s9867_s26 + $0xe0] sm:$0xff]  ;;  %v581_v6 = vld [vmem:[%s9867_s26 + $0xe8] sm:$0xff]  ;;  %v582_v8 = vld [vmem:[%s9867_s26 + $0xf0] sm:$0xff] }
  0xa8   : > { %3365 = vmatpush1.msra.mxu0 %v3316_v16  ;;  %9170 = vmatpush1.msra.mxu1 %v10026_v59  ;;  %v688_v11 = vld [vmem:[#allocation6] ss:$2 sm:$0x3]  ;;  %v583_v12 = vld [vmem:[%s9867_s26 + $0xf8] sm:$0xff] }
  0xa9   : > { %3366 = vmatprep.subr.mxu0 %v13295_v1  ;;  %v1653_v13 = vld [vmem:[#allocation6 + $0x1] ss:$2 sm:$0x3]  ;;  %v10046_v16 = vrot.slane %v688_v11, %v10040_v9 }
  0xaa   : > { %1671 = vperm.xlu0 %9311, %v556_v14   ;;  %3367 = vmatpush1.msra.mxu0 %v3315_v18  ;;  %v2753_v18 = vld [vmem:[%s454_s14] sm:$0x3]  ;;  %s13547_s14 = sld [smem:[#allocation18_spill]] }
  0xab   : > { %711 = vperm.xlu1 %9314, %v556_v14   ;;  %3368 = vmatprep.subr.mxu0 %v13295_v1 }
  0xac   : > { %3369 = vmatpush1.msra.mxu0 %v3314_v19  ;;  %v10054_v19 = vrot.slane %v1653_v13, %v10040_v9 }
  0xad   : > { %3370 = vmatprep.subr.mxu0 %v13295_v1 }
  0xae   : > { %1675 = vperm.xlu0 %9311, %v557_v17   ;;  %3371 = vmatpush1.msra.mxu0 %v3313_v23  ;;  %v10061_v23 = vrot.slane %v2753_v18, %v10040_v9 }
  0xaf   : > { %716 = vperm.xlu1 %9314, %v557_v17   ;;  %3372 = vmatprep.subr.mxu0 %v13295_v1  ;;  %v10049_v17 = vrot.slane %v688_v11, %v10042_v10 }
  0xb0   : > { %3373 = vmatpush1.msra.mxu0 %v3312_v24  ;;  %p543_p13 = scmp.lt.s32.totalorder %s13547_s14, 1 }
  0xb1   : > { %3374 = vmatprep.subr.mxu0 %v13295_v1 }
  0xb2   : > { %1679 = vperm.xlu0 %9311, %v558_v22   ;;  %3375 = vmatpush1.msra.mxu0 %v3311_v26  ;;  %s13616_s14 = smov (!%p543_p13, %s13547_s14), 1 }
  0xb3   : > { %721 = vperm.xlu1 %9314, %v558_v22   ;;  %3376 = vmatprep.subr.mxu0 %v13295_v1  ;;  %v584_v22 = vld [vmem:[%s9867_s26 + $0x100] sm:$0xff]  ;;  %s9177_s0 = smul.u32 272, %s13616_s14 }
  0xb4   : > { %3377 = vmatpush1.msra.mxu0 %v3310_v27 }
  0xb5   : > { %3378 = vmatprep.subr.mxu0 %v13295_v1  ;;  %s548_s11 = sadd.s32 %s9177_s0, %s13614_s3 }
  0xb6   : > { %1683 = vperm.xlu0 %9311, %v559_v25   ;;  %3379 = vmatpush1.msra.mxu0 %v3309_v29  ;;  %v10067_v29 = vrot.slane %v2753_v18, %v10042_v10 }
  0xb7   : > { %726 = vperm.xlu1 %9314, %v559_v25   ;;  %3380 = vmatprep.subr.mxu0 %v13295_v1 }
  0xb8   : > { %3381 = vmatpush2.msra.mxu0 %v3340_v30 }
  0xb9   : > { %3382 = vmatprep.subr.mxu0 %v13295_v1 }
  0xba   : > { %1687 = vperm.xlu0 %9311, %v560_v28   ;;  %3383 = vmatpush2.msra.mxu0 %v3339_v32 }
  0xbb   : > { %731 = vperm.xlu1 %9314, %v560_v28   ;;  %3384 = vmatprep.subr.mxu0 %v13295_v1 }
  0xbc   : > { %3385 = vmatpush2.msra.mxu0 %v3338_v33 }
  0xbd   : > { %3386 = vmatprep.subr.mxu0 %v13295_v1 }
  0xbe   : > { %1691 = vperm.xlu0 %9311, %v561_v31   ;;  %3387 = vmatpush2.msra.mxu0 %v3337_v35  ;;  %v585_v35 = vld [vmem:[%s9867_s26 + $0x108] sm:$0xff] }
  0xbf   : > { %736 = vperm.xlu1 %9314, %v561_v31   ;;  %3388 = vmatprep.subr.mxu0 %v13295_v1 }
  0xc0   : > { %3389 = vmatpush2.msra.mxu0 %v3336_v36 }
  0xc1   : > { %3390 = vmatprep.subr.mxu0 %v13295_v1 }
  0xc2   : > { %1695 = vperm.xlu0 %9311, %v562_v34   ;;  %3391 = vmatpush2.msra.mxu0 %v3335_v38 }
  0xc3   : > { %741 = vperm.xlu1 %9314, %v562_v34   ;;  %3392 = vmatprep.subr.mxu0 %v13295_v1 }
  0xc4   : > { %3393 = vmatpush2.msra.mxu0 %v3334_v39 }
  0xc5   : > { %3394 = vmatprep.subr.mxu0 %v13295_v1 }
  0xc6   : > { %1699 = vperm.xlu0 %9311, %v563_v37   ;;  %3395 = vmatpush2.msra.mxu0 %v3333_v41 }
  0xc7   : > { %746 = vperm.xlu1 %9314, %v563_v37   ;;  %3396 = vmatprep.subr.mxu0 %v13295_v1 }
  0xc8   : > { %3397 = vmatpush2.msra.mxu0 %v3332_v42 }
  0xc9   : > { %3398 = vmatprep.subr.mxu0 %v13295_v1 }
  0xca   : > { %1703 = vperm.xlu0 %9311, %v564_v40   ;;  %3399 = vmatpush2.msra.mxu0 %v3331_v44 }
  0xcb   : > { %751 = vperm.xlu1 %9314, %v564_v40   ;;  %3400 = vmatprep.subr.mxu0 %v13295_v1 }
  0xcc   : > { %3401 = vmatpush2.msra.mxu0 %v3330_v45 }
  0xcd   : > { %3402 = vmatprep.subr.mxu0 %v13295_v1 }
  0xce   : > { %1707 = vperm.xlu0 %9311, %v565_v43   ;;  %3403 = vmatpush2.msra.mxu0 %v3329_v47 }
  0xcf   : > { %756 = vperm.xlu1 %9314, %v565_v43   ;;  %3404 = vmatprep.subr.mxu0 %v13295_v1 }
  0xd0   : > { %3405 = vmatpush2.msra.mxu0 %v3328_v48  ;;  %v586_v48 = vld [vmem:[%s9867_s26 + $0x110] sm:$0xff] }
  0xd1   : > { %3406 = vmatprep.subr.mxu0 %v13295_v1 }
  0xd2   : > { %1711 = vperm.xlu0 %9311, %v566_v46   ;;  %3407 = vmatpush2.msra.mxu0 %v3327_v50 }
  0xd3   : > { %761 = vperm.xlu1 %9314, %v566_v46   ;;  %3408 = vmatprep.subr.mxu0 %v13295_v1 }
  0xd4   : > { %3409 = vmatpush2.msra.mxu0 %v3326_v51 }
  0xd5   : > { %3410 = vmatprep.subr.mxu0 %v13295_v1 }
  0xd6   : > { %1715 = vperm.xlu0 %9311, %v567_v49   ;;  %3411 = vmatpush2.msra.mxu0 %v3325_v53 }
  0xd7   : > { %766 = vperm.xlu1 %9314, %v567_v49   ;;  %4671 = vmatprep.subr.mxu0 %v9917_v20  ;;  %v10057_v20 = vrot.slane %v1653_v13, %v10042_v10 }
  0xda   : > { %1719 = vperm.xlu0 %9311, %v568_v52  }
  0xdb   : > { %771 = vperm.xlu1 %9314, %v568_v52  }
  0xde   : > { %1723 = vperm.xlu0 %9311, %v569_v54  }
  0xdf   : > { %776 = vperm.xlu1 %9314, %v569_v54  }
  0xe2   : > { %1727 = vperm.xlu0 %9311, %v570_v55  }
  0xe3   : > { %781 = vperm.xlu1 %9314, %v570_v55  }
  0xe6   : > { %1731 = vperm.xlu0 %9311, %v571_v56  }
  0xe7   : > { %786 = vperm.xlu1 %9314, %v571_v56  }
  0xea   : > { %1735 = vperm.xlu0 %9311, %v572_v57  }
  0xeb   : > { %791 = vperm.xlu1 %9314, %v572_v57  }
  0xee   : > { %1739 = vperm.xlu0 %9311, %v573_v60  }
  0xef   : > { %796 = vperm.xlu1 %9314, %v573_v60  }
  0xf2   : > { %1743 = vperm.xlu0 %9311, %v574_v61  }
  0xf3   : > { %801 = vperm.xlu1 %9314, %v574_v61  }
  0xf6   : > { %1747 = vperm.xlu0 %9311, %v575_v62  }
  0xf7   : > { %806 = vperm.xlu1 %9314, %v575_v62  }
  0xfa   : > { %1751 = vperm.xlu0 %9311, %v576_v63  }
  0xfb   : > { %811 = vperm.xlu1 %9314, %v576_v63  }
  0xfe   : > { %1755 = vperm.xlu0 %9311, %v577_v0  }
  0xff   : > { %816 = vperm.xlu1 %9314, %v577_v0   ;;  %v587_v0 = vld [vmem:[%s9867_s26 + $0x118] sm:$0xff] }
 0x102   : > { %1759 = vperm.xlu0 %9311, %v578_v2  }
 0x103   : > { %821 = vperm.xlu1 %9314, %v578_v2  }
 0x106   : > { %1763 = vperm.xlu0 %9311, %v579_v3  }
 0x107   : > { %826 = vperm.xlu1 %9314, %v579_v3  }
 0x10a   : > { %1767 = vperm.xlu0 %9311, %v580_v4  }
 0x10b   : > { %831 = vperm.xlu1 %9314, %v580_v4  }
 0x10e   : > { %1771 = vperm.xlu0 %9311, %v581_v6  }
 0x10f   : > { %836 = vperm.xlu1 %9314, %v581_v6  }
 0x112   : > { %1775 = vperm.xlu0 %9311, %v582_v8  }
 0x113   : > { %841 = vperm.xlu1 %9314, %v582_v8  }
 0x114   : > { %v692_v14 = vpop.permute.xlu0 %691  ;;  %v697_v15 = vpop.permute.xlu1 %696 }
 0x115   : > { %v1380_v24 = vmul.f32 %v10046_v16, %v692_v14  ;;  %v1381_v25 = vmul.f32 %v10049_v17, %v692_v14  ;;  %v1383_v26 = vmul.f32 %v10049_v17, %v697_v15  ;;  %v1382_v34 = vmul.f32 %v10046_v16, %v697_v15  ;;  %v588_v15 = vld [vmem:[%s9867_s26 + $0x120] sm:$0xff] }
 0x116   : > { %1779 = vperm.xlu0 %9311, %v583_v12  }
 0x117   : > { %846 = vperm.xlu1 %9314, %v583_v12  }
 0x119   : > { %v1660_v27 = vpop.permute.xlu1 %1659  ;;  %v1656_v28 = vpop.permute.xlu0 %1655 }
 0x11a   : > { %v2211_v30 = vmul.f32 %v10054_v19, %v1660_v27  ;;  %v2212_v31 = vmul.f32 %v10057_v20, %v1660_v27  ;;  %v2209_v32 = vmul.f32 %v10054_v19, %v1656_v28  ;;  %v2210_v33 = vmul.f32 %v10057_v20, %v1656_v28  ;;  %1783 = vperm.xlu0 %9311, %v584_v22  }
 0x11b   : > { %851 = vperm.xlu1 %9314, %v584_v22  }
 0x11c   : > { %v2484_v36 = vadd.f32 %v2212_v31, %v1383_v26  ;;  %v2481_v37 = vadd.f32 %v2209_v32, %v1380_v24  ;;  %v2482_v38 = vadd.f32 %v2210_v33, %v1381_v25  ;;  %v2483_v39 = vadd.f32 %v2211_v30, %v1382_v34  ;;  %v589_v33 = vld [vmem:[%s9867_s26 + $0x128] sm:$0xff] }
 0x11d   : > { %v1664_v40 = vpop.permute.xlu0 %1663 }
 0x11e   : > { %v2213_v41 = vmul.f32 %v10054_v19, %v1664_v40  ;;  %v2214_v42 = vmul.f32 %v10057_v20, %v1664_v40  ;;  %v702_v43 = vpop.permute.xlu1 %701  ;;  %1787 = vperm.xlu0 %9311, %v585_v35   ;;  %v2766_v44 = vadd.f32 %v10067_v29, %v2482_v38  ;;  %v2765_v45 = vadd.f32 %v10061_v23, %v2481_v37 }
 0x11f   : > { %v1384_v46 = vmul.f32 %v10046_v16, %v702_v43  ;;  %v1385_v47 = vmul.f32 %v10049_v17, %v702_v43  ;;  %856 = vperm.xlu1 %9314, %v585_v35   ;;  %v2768_v49 = vadd.f32 %v10067_v29, %v2484_v36  ;;  %v2767_v55 = vadd.f32 %v10061_v23, %v2483_v39 }
 0x120   : > { %v3038_v50 = vmax.f32 %v2766_v44, 0.0  ;;  %v3037_v51 = vmax.f32 %v2765_v45, 0.0 }
 0x121   : > { %v2485_v52 = vadd.f32 %v2213_v41, %v1384_v46  ;;  %v2486_v53 = vadd.f32 %v2214_v42, %v1385_v47  ;;  %v1668_v54 = vpop.permute.xlu0 %1667  ;;  %v3040_v61 = vmax.f32 %v2768_v49, 0.0  ;;  %v3039_v7 = vmax.f32 %v2767_v55, 0.0  ;;  %v4241_v41 = vld [vmem:[#allocation9 + $0x58] sm:$0xff]  ;;  %v590_v47 = vld [vmem:[%s9867_s26 + $0x130] sm:$0xff]  ;;  %v4240_v49 = vld [vmem:[#allocation9 + $0x50] sm:$0xff] }
 0x122   : > { %v2215_v56 = vmul.f32 %v10054_v19, %v1668_v54  ;;  %v2216_v57 = vmul.f32 %v10057_v20, %v1668_v54  ;;  %v707_v60 = vpop.permute.xlu1 %706  ;;  %1791 = vperm.xlu0 %9311, %v586_v48   ;;  %3412 = vmatprep.mubr.f32.mxu0 %v3038_v50 }
 0x123   : > { %v1386_v62 = vmul.f32 %v10046_v16, %v707_v60  ;;  %v1387_v63 = vmul.f32 %v10049_v17, %v707_v60  ;;  %861 = vperm.xlu1 %9314, %v586_v48   ;;  %3413 = vmatmul.mubr.f32.vlgmr.msra.gmra.mxu0 %v3037_v51  ;;  %v2770_v2 = vadd.f32 %v10067_v29, %v2486_v53 }
 0x124   : > { %4672 = vmatpush1.msra.mxu0 %v9919_v21  ;;  %3417 = vmatprep.mubr.f32.mxu0 %v3040_v61  ;;  %v2769_v3 = vadd.f32 %v10061_v23, %v2485_v52 }
 0x125   : > { %v2487_v4 = vadd.f32 %v2215_v56, %v1386_v62  ;;  %v2488_v5 = vadd.f32 %v2216_v57, %v1387_v63  ;;  %v1672_v6 = vpop.permute.xlu0 %1671  ;;  %v3042_v8 = vmax.f32 %v2770_v2, 0.0  ;;  %4673 = vmatprep.subr.mxu0 %v10024_v58  ;;  %9163 = vmatprep.subr.mxu1 %v4241_v41  ;;  %v591_v63 = vld [vmem:[%s9867_s26 + $0x138] sm:$0xff] }
 0x126   : > { %v2217_v11 = vmul.f32 %v10054_v19, %v1672_v6  ;;  %v2218_v12 = vmul.f32 %v10057_v20, %v1672_v6  ;;  %v712_v13 = vpop.permute.xlu1 %711  ;;  %1795 = vperm.xlu0 %9311, %v587_v0   ;;  %4674 = vmatpush1.msra.mxu0 %v10026_v59  ;;  %v3041_v58 = vmax.f32 %v2769_v3, 0.0 }
 0x127   : > { %v1388_v21 = vmul.f32 %v10046_v16, %v712_v13  ;;  %v1389_v14 = vmul.f32 %v10049_v17, %v712_v13  ;;  %866 = vperm.xlu1 %9314, %v587_v0   ;;  %3418 = vmatmul.mubr.f32.gmra.mxu0 %v3039_v7  ;;  %v2772_v18 = vadd.f32 %v10067_v29, %v2488_v5 }
 0x128   : > { %3422 = vmatprep.mubr.f32.mxu0 %v3042_v8  ;;  %v2771_v27 = vadd.f32 %v10061_v23, %v2487_v4  ;;  %4675 = vmatprep.subr.mxu0 %v4241_v41 }
 0x129   : > { %v2489_v22 = vadd.f32 %v2217_v11, %v1388_v21  ;;  %v2490_v24 = vadd.f32 %v2218_v12, %v1389_v14  ;;  %v1676_v25 = vpop.permute.xlu0 %1675  ;;  %v3044_v26 = vmax.f32 %v2772_v18, 0.0  ;;  %4676 = vmatpush1.msra.mxu0 %v4240_v49  ;;  %9171 = vmatpush1.msra.mxu1 %v4240_v49  ;;  %v592_v14 = vld [vmem:[%s9867_s26 + $0x140] sm:$0xff] }
 0x12a   : > { %v2219_v59 = vmul.f32 %v10054_v19, %v1676_v25  ;;  %v2220_v28 = vmul.f32 %v10057_v20, %v1676_v25  ;;  %v717_v30 = vpop.permute.xlu1 %716  ;;  %1799 = vperm.xlu0 %9311, %v588_v15   ;;  %v3043_v39 = vmax.f32 %v2771_v27, 0.0 }
 0x12b   : > { %v1390_v31 = vmul.f32 %v10046_v16, %v717_v30  ;;  %v1391_v32 = vmul.f32 %v10049_v17, %v717_v30  ;;  %871 = vperm.xlu1 %9314, %v588_v15   ;;  %3423 = vmatmul.mubr.f32.gmra.mxu0 %v3041_v58  ;;  %v2774_v34 = vadd.f32 %v10067_v29, %v2490_v24 }
 0x12c   : > { %3427 = vmatprep.mubr.f32.mxu0 %v3044_v26  ;;  %v2773_v35 = vadd.f32 %v10061_v23, %v2489_v22 }
 0x12d   : > { %v2491_v36 = vadd.f32 %v2219_v59, %v1390_v31  ;;  %v2492_v37 = vadd.f32 %v2220_v28, %v1391_v32  ;;  %v1680_v38 = vpop.permute.xlu0 %1679  ;;  %v3046_v40 = vmax.f32 %v2774_v34, 0.0  ;;  %v593_v32 = vld [vmem:[%s9867_s26 + $0x148] sm:$0xff] }
 0x12e   : > { %v2221_v42 = vmul.f32 %v10054_v19, %v1680_v38  ;;  %v2222_v43 = vmul.f32 %v10057_v20, %v1680_v38  ;;  %v722_v44 = vpop.permute.xlu1 %721  ;;  %1803 = vperm.xlu0 %9311, %v589_v33   ;;  %v3045_v50 = vmax.f32 %v2773_v35, 0.0 }
 0x12f   : > { %v1392_v45 = vmul.f32 %v10046_v16, %v722_v44  ;;  %v1393_v46 = vmul.f32 %v10049_v17, %v722_v44  ;;  %876 = vperm.xlu1 %9314, %v589_v33   ;;  %3428 = vmatmul.mubr.f32.gmra.mxu0 %v3043_v39  ;;  %v2776_v48 = vadd.f32 %v10067_v29, %v2492_v37 }
 0x130   : > { %3432 = vmatprep.mubr.f32.mxu0 %v3046_v40  ;;  %v2775_v55 = vadd.f32 %v10061_v23, %v2491_v36 }
 0x131   : > { %v2493_v51 = vadd.f32 %v2221_v42, %v1392_v45  ;;  %v2494_v52 = vadd.f32 %v2222_v43, %v1393_v46  ;;  %v1684_v53 = vpop.permute.xlu0 %1683  ;;  %v3048_v54 = vmax.f32 %v2776_v48, 0.0  ;;  %v594_v45 = vld [vmem:[%s9867_s26 + $0x150] sm:$0xff] }
 0x132   : > { %v2223_v56 = vmul.f32 %v10054_v19, %v1684_v53  ;;  %v2224_v57 = vmul.f32 %v10057_v20, %v1684_v53  ;;  %v727_v60 = vpop.permute.xlu1 %726  ;;  %1807 = vperm.xlu0 %9311, %v590_v47   ;;  %v3047_v6 = vmax.f32 %v2775_v55, 0.0 }
 0x133   : > { %v1394_v61 = vmul.f32 %v10046_v16, %v727_v60  ;;  %v1395_v62 = vmul.f32 %v10049_v17, %v727_v60  ;;  %881 = vperm.xlu1 %9314, %v590_v47   ;;  %3433 = vmatmul.mubr.f32.gmra.mxu0 %v3045_v50  ;;  %v2778_v0 = vadd.f32 %v10067_v29, %v2494_v52  ;;  %v595_v60 = vld [vmem:[%s9867_s26 + $0x158] sm:$0xff] }
 0x134   : > { %3437 = vmatprep.mubr.f32.mxu0 %v3048_v54  ;;  %v2777_v2 = vadd.f32 %v10061_v23, %v2493_v51 }
 0x135   : > { %v2495_v3 = vadd.f32 %v2223_v56, %v1394_v61  ;;  %v2496_v4 = vadd.f32 %v2224_v57, %v1395_v62  ;;  %v1688_v5 = vpop.permute.xlu0 %1687  ;;  %v3050_v7 = vmax.f32 %v2778_v0, 0.0 }
 0x136   : > { %v2225_v8 = vmul.f32 %v10054_v19, %v1688_v5  ;;  %v2226_v11 = vmul.f32 %v10057_v20, %v1688_v5  ;;  %v732_v12 = vpop.permute.xlu1 %731  ;;  %1811 = vperm.xlu0 %9311, %v591_v63   ;;  %v3049_v18 = vmax.f32 %v2777_v2, 0.0 }
 0x137   : > { %v1396_v13 = vmul.f32 %v10046_v16, %v732_v12  ;;  %v1397_v21 = vmul.f32 %v10049_v17, %v732_v12  ;;  %886 = vperm.xlu1 %9314, %v591_v63   ;;  %3438 = vmatmul.mubr.f32.gmra.mxu0 %v3047_v6  ;;  %v2780_v15 = vadd.f32 %v10067_v29, %v2496_v4  ;;  %v596_v12 = vld [vmem:[%s9867_s26 + $0x160] sm:$0xff] }
 0x138   : > { %3442 = vmatprep.mubr.f32.mxu0 %v3050_v7  ;;  %v2779_v26 = vadd.f32 %v10061_v23, %v2495_v3 }
 0x139   : > { %v2497_v58 = vadd.f32 %v2225_v8, %v1396_v13  ;;  %v2498_v22 = vadd.f32 %v2226_v11, %v1397_v21  ;;  %v1692_v24 = vpop.permute.xlu0 %1691  ;;  %v3052_v25 = vmax.f32 %v2780_v15, 0.0 }
 0x13a   : > { %v2227_v27 = vmul.f32 %v10054_v19, %v1692_v24  ;;  %v2228_v59 = vmul.f32 %v10057_v20, %v1692_v24  ;;  %v737_v28 = vpop.permute.xlu1 %736  ;;  %1815 = vperm.xlu0 %9311, %v592_v14   ;;  %v3051_v38 = vmax.f32 %v2779_v26, 0.0 }
 0x13b   : > { %v1398_v30 = vmul.f32 %v10046_v16, %v737_v28  ;;  %v1399_v31 = vmul.f32 %v10049_v17, %v737_v28  ;;  %891 = vperm.xlu1 %9314, %v592_v14   ;;  %3443 = vmatmul.mubr.f32.gmra.mxu0 %v3049_v18  ;;  %v2782_v33 = vadd.f32 %v10067_v29, %v2498_v22  ;;  %v597_v28 = vld [vmem:[%s9867_s26 + $0x168] sm:$0xff] }
 0x13c   : > { %3447 = vmatprep.mubr.f32.mxu0 %v3052_v25  ;;  %v2781_v34 = vadd.f32 %v10061_v23, %v2497_v58 }
 0x13d   : > { %v2499_v35 = vadd.f32 %v2227_v27, %v1398_v30  ;;  %v2500_v36 = vadd.f32 %v2228_v59, %v1399_v31  ;;  %v1696_v37 = vpop.permute.xlu0 %1695  ;;  %v3054_v39 = vmax.f32 %v2782_v33, 0.0 }
 0x13e   : > { %v2229_v40 = vmul.f32 %v10054_v19, %v1696_v37  ;;  %v2230_v41 = vmul.f32 %v10057_v20, %v1696_v37  ;;  %v742_v42 = vpop.permute.xlu1 %741  ;;  %1819 = vperm.xlu0 %9311, %v593_v32   ;;  %v3053_v47 = vmax.f32 %v2781_v34, 0.0 }
 0x13f   : > { %v1400_v43 = vmul.f32 %v10046_v16, %v742_v42  ;;  %v1401_v44 = vmul.f32 %v10049_v17, %v742_v42  ;;  %896 = vperm.xlu1 %9314, %v593_v32   ;;  %3448 = vmatmul.mubr.f32.gmra.mxu0 %v3051_v38  ;;  %v2784_v46 = vadd.f32 %v10067_v29, %v2500_v36  ;;  %v598_v42 = vld [vmem:[%s9867_s26 + $0x170] sm:$0xff] }
 0x140   : > { %3452 = vmatprep.mubr.f32.mxu0 %v3054_v39  ;;  %v2783_v52 = vadd.f32 %v10061_v23, %v2499_v35 }
 0x141   : > { %v2501_v48 = vadd.f32 %v2229_v40, %v1400_v43  ;;  %v2502_v49 = vadd.f32 %v2230_v41, %v1401_v44  ;;  %v1700_v50 = vpop.permute.xlu0 %1699  ;;  %v3056_v51 = vmax.f32 %v2784_v46, 0.0 }
 0x142   : > { %v2231_v53 = vmul.f32 %v10054_v19, %v1700_v50  ;;  %v2232_v54 = vmul.f32 %v10057_v20, %v1700_v50  ;;  %v747_v55 = vpop.permute.xlu1 %746  ;;  %1823 = vperm.xlu0 %9311, %v594_v45   ;;  %v3055_v3 = vmax.f32 %v2783_v52, 0.0 }
 0x143   : > { %v1402_v56 = vmul.f32 %v10046_v16, %v747_v55  ;;  %v1403_v57 = vmul.f32 %v10049_v17, %v747_v55  ;;  %901 = vperm.xlu1 %9314, %v594_v45   ;;  %3453 = vmatmul.mubr.f32.gmra.mxu0 %v3053_v47  ;;  %v2786_v61 = vadd.f32 %v10067_v29, %v2502_v49  ;;  %v599_v55 = vld [vmem:[%s9867_s26 + $0x178] sm:$0xff] }
 0x144   : > { %3457 = vmatprep.mubr.f32.mxu0 %v3056_v51  ;;  %v2785_v62 = vadd.f32 %v10061_v23, %v2501_v48 }
 0x145   : > { %v2503_v63 = vadd.f32 %v2231_v53, %v1402_v56  ;;  %v2504_v0 = vadd.f32 %v2232_v54, %v1403_v57  ;;  %v1704_v2 = vpop.permute.xlu0 %1703  ;;  %v3058_v4 = vmax.f32 %v2786_v61, 0.0 }
 0x146   : > { %v2233_v5 = vmul.f32 %v10054_v19, %v1704_v2  ;;  %v2234_v6 = vmul.f32 %v10057_v20, %v1704_v2  ;;  %v752_v7 = vpop.permute.xlu1 %751  ;;  %1827 = vperm.xlu0 %9311, %v595_v60   ;;  %v3057_v21 = vmax.f32 %v2785_v62, 0.0 }
 0x147   : > { %v1404_v8 = vmul.f32 %v10046_v16, %v752_v7  ;;  %v1405_v11 = vmul.f32 %v10049_v17, %v752_v7  ;;  %906 = vperm.xlu1 %9314, %v595_v60   ;;  %3458 = vmatmul.mubr.f32.gmra.mxu0 %v3055_v3  ;;  %v2788_v13 = vadd.f32 %v10067_v29, %v2504_v0  ;;  %v600_v7 = vld [vmem:[%s9867_s26 + $0x180] sm:$0xff] }
 0x148   : > { %3462 = vmatprep.mubr.f32.mxu0 %v3058_v4  ;;  %v2787_v22 = vadd.f32 %v10061_v23, %v2503_v63 }
 0x149   : > { %v2505_v14 = vadd.f32 %v2233_v5, %v1404_v8  ;;  %v2506_v15 = vadd.f32 %v2234_v6, %v1405_v11  ;;  %v1708_v18 = vpop.permute.xlu0 %1707  ;;  %v3060_v58 = vmax.f32 %v2788_v13, 0.0 }
 0x14a   : > { %v2235_v24 = vmul.f32 %v10054_v19, %v1708_v18  ;;  %v2236_v25 = vmul.f32 %v10057_v20, %v1708_v18  ;;  %v757_v26 = vpop.permute.xlu1 %756  ;;  %1831 = vperm.xlu0 %9311, %v596_v12   ;;  %v3059_v35 = vmax.f32 %v2787_v22, 0.0 }
 0x14b   : > { %v1406_v27 = vmul.f32 %v10046_v16, %v757_v26  ;;  %v1407_v59 = vmul.f32 %v10049_v17, %v757_v26  ;;  %911 = vperm.xlu1 %9314, %v596_v12   ;;  %3463 = vmatmul.mubr.f32.gmra.mxu0 %v3057_v21  ;;  %v2790_v30 = vadd.f32 %v10067_v29, %v2506_v15  ;;  %v601_v26 = vld [vmem:[%s9867_s26 + $0x188] sm:$0xff] }
 0x14c   : > { %3467 = vmatprep.mubr.f32.mxu0 %v3060_v58  ;;  %v2789_v31 = vadd.f32 %v10061_v23, %v2505_v14 }
 0x14d   : > { %v2507_v32 = vadd.f32 %v2235_v24, %v1406_v27  ;;  %v2508_v33 = vadd.f32 %v2236_v25, %v1407_v59  ;;  %v1712_v34 = vpop.permute.xlu0 %1711  ;;  %v3062_v36 = vmax.f32 %v2790_v30, 0.0 }
 0x14e   : > { %v2237_v37 = vmul.f32 %v10054_v19, %v1712_v34  ;;  %v2238_v38 = vmul.f32 %v10057_v20, %v1712_v34  ;;  %v762_v39 = vpop.permute.xlu1 %761  ;;  %1835 = vperm.xlu0 %9311, %v597_v28   ;;  %v3061_v44 = vmax.f32 %v2789_v31, 0.0 }
 0x14f   : > { %v1408_v40 = vmul.f32 %v10046_v16, %v762_v39  ;;  %v1409_v41 = vmul.f32 %v10049_v17, %v762_v39  ;;  %916 = vperm.xlu1 %9314, %v597_v28   ;;  %3468 = vmatmul.mubr.f32.gmra.mxu0 %v3059_v35  ;;  %v2792_v43 = vadd.f32 %v10067_v29, %v2508_v33  ;;  %v602_v39 = vld [vmem:[%s9867_s26 + $0x190] sm:$0xff] }
 0x150   : > { %3472 = vmatprep.mubr.f32.mxu0 %v3062_v36  ;;  %v2791_v49 = vadd.f32 %v10061_v23, %v2507_v32 }
 0x151   : > { %v2509_v45 = vadd.f32 %v2237_v37, %v1408_v40  ;;  %v2510_v46 = vadd.f32 %v2238_v38, %v1409_v41  ;;  %v1716_v47 = vpop.permute.xlu0 %1715  ;;  %v3064_v48 = vmax.f32 %v2792_v43, 0.0 }
 0x152   : > { %v2239_v50 = vmul.f32 %v10054_v19, %v1716_v47  ;;  %v2240_v51 = vmul.f32 %v10057_v20, %v1716_v47  ;;  %v767_v52 = vpop.permute.xlu1 %766  ;;  %1839 = vperm.xlu0 %9311, %v598_v42   ;;  %v3063_v63 = vmax.f32 %v2791_v49, 0.0 }
 0x153   : > { %v1410_v53 = vmul.f32 %v10046_v16, %v767_v52  ;;  %v1411_v54 = vmul.f32 %v10049_v17, %v767_v52  ;;  %921 = vperm.xlu1 %9314, %v598_v42   ;;  %3473 = vmatmul.mubr.f32.gmra.mxu0 %v3061_v44  ;;  %v2794_v56 = vadd.f32 %v10067_v29, %v2510_v46  ;;  %v603_v52 = vld [vmem:[%s9867_s26 + $0x198] sm:$0xff] }
 0x154   : > { %3477 = vmatprep.mubr.f32.mxu0 %v3064_v48  ;;  %v2793_v57 = vadd.f32 %v10061_v23, %v2509_v45 }
 0x155   : > { %v2511_v60 = vadd.f32 %v2239_v50, %v1410_v53  ;;  %v2512_v61 = vadd.f32 %v2240_v51, %v1411_v54  ;;  %v1720_v62 = vpop.permute.xlu0 %1719  ;;  %v3066_v0 = vmax.f32 %v2794_v56, 0.0 }
 0x156   : > { %v2241_v2 = vmul.f32 %v10054_v19, %v1720_v62  ;;  %v2242_v3 = vmul.f32 %v10057_v20, %v1720_v62  ;;  %v772_v4 = vpop.permute.xlu1 %771  ;;  %1843 = vperm.xlu0 %9311, %v599_v55   ;;  %v3065_v11 = vmax.f32 %v2793_v57, 0.0 }
 0x157   : > { %v1412_v5 = vmul.f32 %v10046_v16, %v772_v4  ;;  %v1413_v6 = vmul.f32 %v10049_v17, %v772_v4  ;;  %926 = vperm.xlu1 %9314, %v599_v55   ;;  %3478 = vmatmul.mubr.f32.gmra.mxu0 %v3063_v63  ;;  %v2796_v8 = vadd.f32 %v10067_v29, %v2512_v61  ;;  %v604_v4 = vld [vmem:[%s9867_s26 + $0x1a0] sm:$0xff] }
 0x158   : > { %3482 = vmatprep.mubr.f32.mxu0 %v3066_v0  ;;  %v2795_v15 = vadd.f32 %v10061_v23, %v2511_v60 }
 0x159   : > { %v2513_v12 = vadd.f32 %v2241_v2, %v1412_v5  ;;  %v2514_v13 = vadd.f32 %v2242_v3, %v1413_v6  ;;  %v1724_v21 = vpop.permute.xlu0 %1723  ;;  %v3068_v14 = vmax.f32 %v2796_v8, 0.0 }
 0x15a   : > { %v2243_v18 = vmul.f32 %v10054_v19, %v1724_v21  ;;  %v2244_v58 = vmul.f32 %v10057_v20, %v1724_v21  ;;  %v777_v22 = vpop.permute.xlu1 %776  ;;  %1847 = vperm.xlu0 %9311, %v600_v7   ;;  %v3067_v32 = vmax.f32 %v2795_v15, 0.0 }
 0x15b   : > { %v1414_v24 = vmul.f32 %v10046_v16, %v777_v22  ;;  %v1415_v25 = vmul.f32 %v10049_v17, %v777_v22  ;;  %931 = vperm.xlu1 %9314, %v600_v7   ;;  %3483 = vmatmul.mubr.f32.gmra.mxu0 %v3065_v11  ;;  %v2798_v27 = vadd.f32 %v10067_v29, %v2514_v13  ;;  %v605_v22 = vld [vmem:[%s9867_s26 + $0x1a8] sm:$0xff] }
 0x15c   : > { %3487 = vmatprep.mubr.f32.mxu0 %v3068_v14  ;;  %v2797_v59 = vadd.f32 %v10061_v23, %v2513_v12 }
 0x15d   : > { %v2515_v28 = vadd.f32 %v2243_v18, %v1414_v24  ;;  %v2516_v30 = vadd.f32 %v2244_v58, %v1415_v25  ;;  %v1728_v31 = vpop.permute.xlu0 %1727  ;;  %v3070_v33 = vmax.f32 %v2798_v27, 0.0 }
 0x15e   : > { %v2245_v34 = vmul.f32 %v10054_v19, %v1728_v31  ;;  %v2246_v35 = vmul.f32 %v10057_v20, %v1728_v31  ;;  %v782_v36 = vpop.permute.xlu1 %781  ;;  %1851 = vperm.xlu0 %9311, %v601_v26   ;;  %v3069_v41 = vmax.f32 %v2797_v59, 0.0 }
 0x15f   : > { %v1416_v37 = vmul.f32 %v10046_v16, %v782_v36  ;;  %v1417_v38 = vmul.f32 %v10049_v17, %v782_v36  ;;  %936 = vperm.xlu1 %9314, %v601_v26   ;;  %3488 = vmatmul.mubr.f32.gmra.mxu0 %v3067_v32  ;;  %v2800_v40 = vadd.f32 %v10067_v29, %v2516_v30  ;;  %v606_v36 = vld [vmem:[%s9867_s26 + $0x1b0] sm:$0xff] }
 0x160   : > { %3492 = vmatprep.mubr.f32.mxu0 %v3070_v33  ;;  %v2799_v46 = vadd.f32 %v10061_v23, %v2515_v28 }
 0x161   : > { %v2517_v42 = vadd.f32 %v2245_v34, %v1416_v37  ;;  %v2518_v43 = vadd.f32 %v2246_v35, %v1417_v38  ;;  %v1732_v44 = vpop.permute.xlu0 %1731  ;;  %v3072_v45 = vmax.f32 %v2800_v40, 0.0 }
 0x162   : > { %v2247_v47 = vmul.f32 %v10054_v19, %v1732_v44  ;;  %v2248_v48 = vmul.f32 %v10057_v20, %v1732_v44  ;;  %v787_v49 = vpop.permute.xlu1 %786  ;;  %1855 = vperm.xlu0 %9311, %v602_v39   ;;  %v3071_v60 = vmax.f32 %v2799_v46, 0.0  ;;  %v4239_v44 = vld [vmem:[#allocation9 + $0x48] sm:$0xff] }
 0x163   : > { %v1418_v50 = vmul.f32 %v10046_v16, %v787_v49  ;;  %v1419_v51 = vmul.f32 %v10049_v17, %v787_v49  ;;  %941 = vperm.xlu1 %9314, %v602_v39   ;;  %3493 = vmatmul.mubr.f32.gmra.mxu0 %v3069_v41  ;;  %v2802_v53 = vadd.f32 %v10067_v29, %v2518_v43 }
 0x164   : > { %3497 = vmatprep.mubr.f32.mxu0 %v3072_v45  ;;  %v2801_v54 = vadd.f32 %v10061_v23, %v2517_v42  ;;  %4677 = vmatprep.subr.mxu0 %v4239_v44 }
 0x165   : > { %v2519_v55 = vadd.f32 %v2247_v47, %v1418_v50  ;;  %v2520_v56 = vadd.f32 %v2248_v48, %v1419_v51  ;;  %v1736_v57 = vpop.permute.xlu0 %1735  ;;  %v3074_v61 = vmax.f32 %v2802_v53, 0.0  ;;  %v607_v50 = vld [vmem:[%s9867_s26 + $0x1b8] sm:$0xff]  ;;  %9164 = vmatprep.subr.mxu1 %v4239_v44 }
 0x166   : > { %v2249_v62 = vmul.f32 %v10054_v19, %v1736_v57  ;;  %v2250_v63 = vmul.f32 %v10057_v20, %v1736_v57  ;;  %v792_v0 = vpop.permute.xlu1 %791  ;;  %1859 = vperm.xlu0 %9311, %v603_v52   ;;  %v3073_v6 = vmax.f32 %v2801_v54, 0.0 }
 0x167   : > { %v1420_v2 = vmul.f32 %v10046_v16, %v792_v0  ;;  %v1421_v3 = vmul.f32 %v10049_v17, %v792_v0  ;;  %946 = vperm.xlu1 %9314, %v603_v52   ;;  %3498 = vmatmul.mubr.f32.gmra.mxu0 %v3071_v60  ;;  %v2804_v5 = vadd.f32 %v10067_v29, %v2520_v56  ;;  %v4238_v52 = vld [vmem:[#allocation9 + $0x40] sm:$0xff] }
 0x168   : > { %3502 = vmatprep.mubr.f32.mxu0 %v3074_v61  ;;  %v2803_v13 = vadd.f32 %v10061_v23, %v2519_v55  ;;  %4678 = vmatpush1.msra.mxu0 %v4238_v52 }
 0x169   : > { %v2521_v7 = vadd.f32 %v2249_v62, %v1420_v2  ;;  %v2522_v8 = vadd.f32 %v2250_v63, %v1421_v3  ;;  %v1740_v11 = vpop.permute.xlu0 %1739  ;;  %v3076_v12 = vmax.f32 %v2804_v5, 0.0  ;;  %9172 = vmatpush1.msra.mxu1 %v4238_v52  ;;  %v608_v3 = vld [vmem:[%s9867_s26 + $0x1c0] sm:$0xff] }
 0x16a   : > { %v2251_v21 = vmul.f32 %v10054_v19, %v1740_v11  ;;  %v2252_v14 = vmul.f32 %v10057_v20, %v1740_v11  ;;  %v797_v15 = vpop.permute.xlu1 %796  ;;  %1863 = vperm.xlu0 %9311, %v604_v4   ;;  %v3075_v28 = vmax.f32 %v2803_v13, 0.0 }
 0x16b   : > { %v1422_v18 = vmul.f32 %v10046_v16, %v797_v15  ;;  %v1423_v58 = vmul.f32 %v10049_v17, %v797_v15  ;;  %951 = vperm.xlu1 %9314, %v604_v4   ;;  %3503 = vmatmul.mubr.f32.gmra.mxu0 %v3073_v6  ;;  %v2806_v24 = vadd.f32 %v10067_v29, %v2522_v8 }
 0x16c   : > { %3507 = vmatprep.mubr.f32.mxu0 %v3076_v12  ;;  %v2805_v25 = vadd.f32 %v10061_v23, %v2521_v7 }
 0x16d   : > { %v2523_v26 = vadd.f32 %v2251_v21, %v1422_v18  ;;  %v2524_v27 = vadd.f32 %v2252_v14, %v1423_v58  ;;  %v1744_v59 = vpop.permute.xlu0 %1743  ;;  %v3078_v30 = vmax.f32 %v2806_v24, 0.0  ;;  %v609_v58 = vld [vmem:[%s9867_s26 + $0x1c8] sm:$0xff] }
 0x16e   : > { %v2253_v31 = vmul.f32 %v10054_v19, %v1744_v59  ;;  %v2254_v32 = vmul.f32 %v10057_v20, %v1744_v59  ;;  %v802_v33 = vpop.permute.xlu1 %801  ;;  %1867 = vperm.xlu0 %9311, %v605_v22   ;;  %v3077_v38 = vmax.f32 %v2805_v25, 0.0 }
 0x16f   : > { %v1424_v34 = vmul.f32 %v10046_v16, %v802_v33  ;;  %v1425_v35 = vmul.f32 %v10049_v17, %v802_v33  ;;  %956 = vperm.xlu1 %9314, %v605_v22   ;;  %3508 = vmatmul.mubr.f32.gmra.mxu0 %v3075_v28  ;;  %v2808_v37 = vadd.f32 %v10067_v29, %v2524_v27 }
 0x170   : > { %3512 = vmatprep.mubr.f32.mxu0 %v3078_v30  ;;  %v2807_v43 = vadd.f32 %v10061_v23, %v2523_v26 }
 0x171   : > { %v2525_v39 = vadd.f32 %v2253_v31, %v1424_v34  ;;  %v2526_v40 = vadd.f32 %v2254_v32, %v1425_v35  ;;  %v1748_v41 = vpop.permute.xlu0 %1747  ;;  %v3080_v42 = vmax.f32 %v2808_v37, 0.0  ;;  %v610_v35 = vld [vmem:[%s9867_s26 + $0x1d0] sm:$0xff] }
 0x172   : > { %v2255_v45 = vmul.f32 %v10054_v19, %v1748_v41  ;;  %v2256_v46 = vmul.f32 %v10057_v20, %v1748_v41  ;;  %v807_v47 = vpop.permute.xlu1 %806  ;;  %1871 = vperm.xlu0 %9311, %v606_v36   ;;  %v3079_v57 = vmax.f32 %v2807_v43, 0.0 }
 0x173   : > { %v1426_v48 = vmul.f32 %v10046_v16, %v807_v47  ;;  %v1427_v49 = vmul.f32 %v10049_v17, %v807_v47  ;;  %961 = vperm.xlu1 %9314, %v606_v36   ;;  %3513 = vmatmul.mubr.f32.gmra.mxu0 %v3077_v38  ;;  %v2810_v51 = vadd.f32 %v10067_v29, %v2526_v40 }
 0x174   : > { %3517 = vmatprep.mubr.f32.mxu0 %v3080_v42  ;;  %v2809_v53 = vadd.f32 %v10061_v23, %v2525_v39 }
 0x175   : > { %v2527_v54 = vadd.f32 %v2255_v45, %v1426_v48  ;;  %v2528_v55 = vadd.f32 %v2256_v46, %v1427_v49  ;;  %v1752_v56 = vpop.permute.xlu0 %1751  ;;  %v3082_v60 = vmax.f32 %v2810_v51, 0.0  ;;  %v611_v48 = vld [vmem:[%s9867_s26 + $0x1d8] sm:$0xff] }
 0x176   : > { %v2257_v61 = vmul.f32 %v10054_v19, %v1752_v56  ;;  %v2258_v62 = vmul.f32 %v10057_v20, %v1752_v56  ;;  %v812_v63 = vpop.permute.xlu1 %811  ;;  %1875 = vperm.xlu0 %9311, %v607_v50   ;;  %v3081_v5 = vmax.f32 %v2809_v53, 0.0 }
 0x177   : > { %v1428_v0 = vmul.f32 %v10046_v16, %v812_v63  ;;  %v1429_v2 = vmul.f32 %v10049_v17, %v812_v63  ;;  %966 = vperm.xlu1 %9314, %v607_v50   ;;  %3518 = vmatmul.mubr.f32.gmra.mxu0 %v3079_v57  ;;  %v2812_v4 = vadd.f32 %v10067_v29, %v2528_v55  ;;  %v612_v63 = vld [vmem:[%s9867_s26 + $0x1e0] sm:$0xff] }
 0x178   : > { %3522 = vmatprep.mubr.f32.mxu0 %v3082_v60  ;;  %v2811_v12 = vadd.f32 %v10061_v23, %v2527_v54 }
 0x179   : > { %v2529_v6 = vadd.f32 %v2257_v61, %v1428_v0  ;;  %v2530_v7 = vadd.f32 %v2258_v62, %v1429_v2  ;;  %v1756_v8 = vpop.permute.xlu0 %1755  ;;  %v3084_v11 = vmax.f32 %v2812_v4, 0.0 }
 0x17a   : > { %v2259_v13 = vmul.f32 %v10054_v19, %v1756_v8  ;;  %v2260_v21 = vmul.f32 %v10057_v20, %v1756_v8  ;;  %v817_v14 = vpop.permute.xlu1 %816  ;;  %1879 = vperm.xlu0 %9311, %v608_v3   ;;  %v3083_v59 = vmax.f32 %v2811_v12, 0.0 }
 0x17b   : > { %v1430_v15 = vmul.f32 %v10046_v16, %v817_v14  ;;  %v1431_v18 = vmul.f32 %v10049_v17, %v817_v14  ;;  %971 = vperm.xlu1 %9314, %v608_v3   ;;  %3523 = vmatmul.mubr.f32.gmra.mxu0 %v3081_v5  ;;  %v2814_v22 = vadd.f32 %v10067_v29, %v2530_v7  ;;  %v613_v14 = vld [vmem:[%s9867_s26 + $0x1e8] sm:$0xff] }
 0x17c   : > { %3527 = vmatprep.mubr.f32.mxu0 %v3084_v11  ;;  %v2813_v24 = vadd.f32 %v10061_v23, %v2529_v6 }
 0x17d   : > { %v2531_v25 = vadd.f32 %v2259_v13, %v1430_v15  ;;  %v2532_v26 = vadd.f32 %v2260_v21, %v1431_v18  ;;  %v1760_v27 = vpop.permute.xlu0 %1759  ;;  %v3086_v28 = vmax.f32 %v2814_v22, 0.0 }
 0x17e   : > { %v2261_v30 = vmul.f32 %v10054_v19, %v1760_v27  ;;  %v2262_v31 = vmul.f32 %v10057_v20, %v1760_v27  ;;  %v822_v32 = vpop.permute.xlu1 %821  ;;  %1883 = vperm.xlu0 %9311, %v609_v58   ;;  %v3085_v37 = vmax.f32 %v2813_v24, 0.0 }
 0x17f   : > { %v1432_v33 = vmul.f32 %v10046_v16, %v822_v32  ;;  %v1433_v34 = vmul.f32 %v10049_v17, %v822_v32  ;;  %976 = vperm.xlu1 %9314, %v609_v58   ;;  %3528 = vmatmul.mubr.f32.gmra.mxu0 %v3083_v59  ;;  %v2816_v36 = vadd.f32 %v10067_v29, %v2532_v26  ;;  %v614_v32 = vld [vmem:[%s9867_s26 + $0x1f0] sm:$0xff] }
 0x180   : > { %3532 = vmatprep.mubr.f32.mxu0 %v3086_v28  ;;  %v2815_v42 = vadd.f32 %v10061_v23, %v2531_v25 }
 0x181   : > { %v2533_v38 = vadd.f32 %v2261_v30, %v1432_v33  ;;  %v2534_v39 = vadd.f32 %v2262_v31, %v1433_v34  ;;  %v1764_v40 = vpop.permute.xlu0 %1763  ;;  %v3088_v41 = vmax.f32 %v2816_v36, 0.0 }
 0x182   : > { %v2263_v43 = vmul.f32 %v10054_v19, %v1764_v40  ;;  %v2264_v44 = vmul.f32 %v10057_v20, %v1764_v40  ;;  %v827_v45 = vpop.permute.xlu1 %826  ;;  %1887 = vperm.xlu0 %9311, %v610_v35   ;;  %v3087_v54 = vmax.f32 %v2815_v42, 0.0 }
 0x183   : > { %v1434_v46 = vmul.f32 %v10046_v16, %v827_v45  ;;  %v1435_v47 = vmul.f32 %v10049_v17, %v827_v45  ;;  %981 = vperm.xlu1 %9314, %v610_v35   ;;  %3533 = vmatmul.mubr.f32.gmra.mxu0 %v3085_v37  ;;  %v2818_v49 = vadd.f32 %v10067_v29, %v2534_v39  ;;  %v615_v45 = vld [vmem:[%s9867_s26 + $0x1f8] sm:$0xff] }
 0x184   : > { %3537 = vmatprep.mubr.f32.mxu0 %v3088_v41  ;;  %v2817_v50 = vadd.f32 %v10061_v23, %v2533_v38 }
 0x185   : > { %v2535_v51 = vadd.f32 %v2263_v43, %v1434_v46  ;;  %v2536_v52 = vadd.f32 %v2264_v44, %v1435_v47  ;;  %v1768_v53 = vpop.permute.xlu0 %1767  ;;  %v3090_v55 = vmax.f32 %v2818_v49, 0.0 }
 0x186   : > { %v2265_v56 = vmul.f32 %v10054_v19, %v1768_v53  ;;  %v2266_v57 = vmul.f32 %v10057_v20, %v1768_v53  ;;  %v832_v60 = vpop.permute.xlu1 %831  ;;  %1891 = vperm.xlu0 %9311, %v611_v48   ;;  %v3089_v2 = vmax.f32 %v2817_v50, 0.0 }
 0x187   : > { %v1436_v61 = vmul.f32 %v10046_v16, %v832_v60  ;;  %v1437_v62 = vmul.f32 %v10049_v17, %v832_v60  ;;  %986 = vperm.xlu1 %9314, %v611_v48   ;;  %3538 = vmatmul.mubr.f32.gmra.mxu0 %v3087_v54  ;;  %v2820_v0 = vadd.f32 %v10067_v29, %v2536_v52  ;;  %v616_v60 = vld [vmem:[%s9867_s26 + $0x200] sm:$0xff] }
 0x188   : > { %3542 = vmatprep.mubr.f32.mxu0 %v3090_v55  ;;  %v2819_v7 = vadd.f32 %v10061_v23, %v2535_v51 }
 0x189   : > { %v2537_v3 = vadd.f32 %v2265_v56, %v1436_v61  ;;  %v2538_v4 = vadd.f32 %v2266_v57, %v1437_v62  ;;  %v1772_v5 = vpop.permute.xlu0 %1771  ;;  %v3092_v6 = vmax.f32 %v2820_v0, 0.0 }
 0x18a   : > { %v2267_v8 = vmul.f32 %v10054_v19, %v1772_v5  ;;  %v2268_v11 = vmul.f32 %v10057_v20, %v1772_v5  ;;  %v837_v12 = vpop.permute.xlu1 %836  ;;  %1895 = vperm.xlu0 %9311, %v612_v63   ;;  %v3091_v25 = vmax.f32 %v2819_v7, 0.0 }
 0x18b   : > { %v1438_v13 = vmul.f32 %v10046_v16, %v837_v12  ;;  %v1439_v21 = vmul.f32 %v10049_v17, %v837_v12  ;;  %991 = vperm.xlu1 %9314, %v612_v63   ;;  %3543 = vmatmul.mubr.f32.gmra.mxu0 %v3089_v2  ;;  %v2822_v15 = vadd.f32 %v10067_v29, %v2538_v4  ;;  %v617_v12 = vld [vmem:[%s9867_s26 + $0x208] sm:$0xff] }
 0x18c   : > { %3547 = vmatprep.mubr.f32.mxu0 %v3092_v6  ;;  %v2821_v18 = vadd.f32 %v10061_v23, %v2537_v3 }
 0x18d   : > { %v2539_v58 = vadd.f32 %v2267_v8, %v1438_v13  ;;  %v2540_v22 = vadd.f32 %v2268_v11, %v1439_v21  ;;  %v1776_v24 = vpop.permute.xlu0 %1775  ;;  %v3094_v26 = vmax.f32 %v2822_v15, 0.0 }
 0x18e   : > { %v2269_v27 = vmul.f32 %v10054_v19, %v1776_v24  ;;  %v2270_v59 = vmul.f32 %v10057_v20, %v1776_v24  ;;  %v842_v28 = vpop.permute.xlu1 %841  ;;  %1899 = vperm.xlu0 %9311, %v613_v14   ;;  %v3093_v34 = vmax.f32 %v2821_v18, 0.0 }
 0x18f   : > { %v1440_v30 = vmul.f32 %v10046_v16, %v842_v28  ;;  %v1441_v31 = vmul.f32 %v10049_v17, %v842_v28  ;;  %996 = vperm.xlu1 %9314, %v613_v14   ;;  %3548 = vmatmul.mubr.f32.gmra.mxu0 %v3091_v25  ;;  %v2824_v33 = vadd.f32 %v10067_v29, %v2540_v22  ;;  %v618_v28 = vld [vmem:[%s9867_s26 + $0x210] sm:$0xff] }
 0x190   : > { %3552 = vmatprep.mubr.f32.mxu0 %v3094_v26  ;;  %v2823_v39 = vadd.f32 %v10061_v23, %v2539_v58 }
 0x191   : > { %v2541_v35 = vadd.f32 %v2269_v27, %v1440_v30  ;;  %v2542_v36 = vadd.f32 %v2270_v59, %v1441_v31  ;;  %v1780_v37 = vpop.permute.xlu0 %1779  ;;  %v3096_v38 = vmax.f32 %v2824_v33, 0.0 }
 0x192   : > { %v2271_v40 = vmul.f32 %v10054_v19, %v1780_v37  ;;  %v2272_v41 = vmul.f32 %v10057_v20, %v1780_v37  ;;  %v847_v42 = vpop.permute.xlu1 %846  ;;  %1903 = vperm.xlu0 %9311, %v614_v32   ;;  %v3095_v51 = vmax.f32 %v2823_v39, 0.0 }
 0x193   : > { %v1442_v43 = vmul.f32 %v10046_v16, %v847_v42  ;;  %v1443_v44 = vmul.f32 %v10049_v17, %v847_v42  ;;  %1001 = vperm.xlu1 %9314, %v614_v32   ;;  %3553 = vmatmul.mubr.f32.gmra.mxu0 %v3093_v34  ;;  %v2826_v46 = vadd.f32 %v10067_v29, %v2542_v36  ;;  %v619_v42 = vld [vmem:[%s9867_s26 + $0x218] sm:$0xff] }
 0x194   : > { %3557 = vmatprep.mubr.f32.mxu0 %v3096_v38  ;;  %v2825_v47 = vadd.f32 %v10061_v23, %v2541_v35 }
 0x195   : > { %v2543_v48 = vadd.f32 %v2271_v40, %v1442_v43  ;;  %v2544_v49 = vadd.f32 %v2272_v41, %v1443_v44  ;;  %v1784_v50 = vpop.permute.xlu0 %1783  ;;  %v3098_v52 = vmax.f32 %v2826_v46, 0.0 }
 0x196   : > { %v2273_v53 = vmul.f32 %v10054_v19, %v1784_v50  ;;  %v2274_v54 = vmul.f32 %v10057_v20, %v1784_v50  ;;  %v852_v55 = vpop.permute.xlu1 %851  ;;  %1907 = vperm.xlu0 %9311, %v615_v45   ;;  %v3097_v62 = vmax.f32 %v2825_v47, 0.0 }
 0x197   : > { %v1444_v56 = vmul.f32 %v10046_v16, %v852_v55  ;;  %v1445_v57 = vmul.f32 %v10049_v17, %v852_v55  ;;  %1006 = vperm.xlu1 %9314, %v615_v45   ;;  %3558 = vmatmul.mubr.f32.gmra.mxu0 %v3095_v51  ;;  %v2828_v61 = vadd.f32 %v10067_v29, %v2544_v49  ;;  %v620_v55 = vld [vmem:[%s9867_s26 + $0x220] sm:$0xff] }
 0x198   : > { %3562 = vmatprep.mubr.f32.mxu0 %v3098_v52  ;;  %v2827_v4 = vadd.f32 %v10061_v23, %v2543_v48 }
 0x199   : > { %v2545_v63 = vadd.f32 %v2273_v53, %v1444_v56  ;;  %v2546_v0 = vadd.f32 %v2274_v54, %v1445_v57  ;;  %v1788_v2 = vpop.permute.xlu0 %1787  ;;  %v3100_v3 = vmax.f32 %v2828_v61, 0.0 }
 0x19a   : > { %v2275_v5 = vmul.f32 %v10054_v19, %v1788_v2  ;;  %v2276_v6 = vmul.f32 %v10057_v20, %v1788_v2  ;;  %v857_v7 = vpop.permute.xlu1 %856  ;;  %1911 = vperm.xlu0 %9311, %v616_v60   ;;  %v3099_v58 = vmax.f32 %v2827_v4, 0.0 }
 0x19b   : > { %v1446_v8 = vmul.f32 %v10046_v16, %v857_v7  ;;  %v1447_v11 = vmul.f32 %v10049_v17, %v857_v7  ;;  %1011 = vperm.xlu1 %9314, %v616_v60   ;;  %3563 = vmatmul.mubr.f32.gmra.mxu0 %v3097_v62  ;;  %v2830_v13 = vadd.f32 %v10067_v29, %v2546_v0  ;;  %v621_v7 = vld [vmem:[%s9867_s26 + $0x228] sm:$0xff] }
 0x19c   : > { %3567 = vmatprep.mubr.f32.mxu0 %v3100_v3  ;;  %v2829_v21 = vadd.f32 %v10061_v23, %v2545_v63 }
 0x19d   : > { %v2547_v14 = vadd.f32 %v2275_v5, %v1446_v8  ;;  %v2548_v15 = vadd.f32 %v2276_v6, %v1447_v11  ;;  %v1792_v18 = vpop.permute.xlu0 %1791  ;;  %v3102_v22 = vmax.f32 %v2830_v13, 0.0 }
 0x19e   : > { %v2277_v24 = vmul.f32 %v10054_v19, %v1792_v18  ;;  %v2278_v25 = vmul.f32 %v10057_v20, %v1792_v18  ;;  %v862_v26 = vpop.permute.xlu1 %861  ;;  %1915 = vperm.xlu0 %9311, %v617_v12   ;;  %v3101_v31 = vmax.f32 %v2829_v21, 0.0 }
 0x19f   : > { %v1448_v27 = vmul.f32 %v10046_v16, %v862_v26  ;;  %v1449_v59 = vmul.f32 %v10049_v17, %v862_v26  ;;  %1016 = vperm.xlu1 %9314, %v617_v12   ;;  %3568 = vmatmul.mubr.f32.gmra.mxu0 %v3099_v58  ;;  %v2832_v30 = vadd.f32 %v10067_v29, %v2548_v15  ;;  %v622_v26 = vld [vmem:[%s9867_s26 + $0x230] sm:$0xff] }
 0x1a0   : > { %3572 = vmatprep.mubr.f32.mxu0 %v3102_v22  ;;  %v2831_v36 = vadd.f32 %v10061_v23, %v2547_v14 }
 0x1a1   : > { %v2549_v32 = vadd.f32 %v2277_v24, %v1448_v27  ;;  %v2550_v33 = vadd.f32 %v2278_v25, %v1449_v59  ;;  %v1796_v34 = vpop.permute.xlu0 %1795  ;;  %v3104_v35 = vmax.f32 %v2832_v30, 0.0 }
 0x1a2   : > { %v2279_v37 = vmul.f32 %v10054_v19, %v1796_v34  ;;  %v2280_v38 = vmul.f32 %v10057_v20, %v1796_v34  ;;  %v867_v39 = vpop.permute.xlu1 %866  ;;  %1919 = vperm.xlu0 %9311, %v618_v28   ;;  %v3103_v48 = vmax.f32 %v2831_v36, 0.0 }
 0x1a3   : > { %v1450_v40 = vmul.f32 %v10046_v16, %v867_v39  ;;  %v1451_v41 = vmul.f32 %v10049_v17, %v867_v39  ;;  %1021 = vperm.xlu1 %9314, %v618_v28   ;;  %3573 = vmatmul.mubr.f32.gmra.mxu0 %v3101_v31  ;;  %v2834_v43 = vadd.f32 %v10067_v29, %v2550_v33  ;;  %v623_v39 = vld [vmem:[%s9867_s26 + $0x238] sm:$0xff] }
 0x1a4   : > { %3577 = vmatprep.mubr.f32.mxu0 %v3104_v35  ;;  %v2833_v44 = vadd.f32 %v10061_v23, %v2549_v32 }
 0x1a5   : > { %v2551_v45 = vadd.f32 %v2279_v37, %v1450_v40  ;;  %v2552_v46 = vadd.f32 %v2280_v38, %v1451_v41  ;;  %v1800_v47 = vpop.permute.xlu0 %1799  ;;  %v3106_v49 = vmax.f32 %v2834_v43, 0.0 }
 0x1a6   : > { %v2281_v50 = vmul.f32 %v10054_v19, %v1800_v47  ;;  %v2282_v51 = vmul.f32 %v10057_v20, %v1800_v47  ;;  %v872_v52 = vpop.permute.xlu1 %871  ;;  %1923 = vperm.xlu0 %9311, %v619_v42   ;;  %v3105_v57 = vmax.f32 %v2833_v44, 0.0 }
 0x1a7   : > { %v1452_v53 = vmul.f32 %v10046_v16, %v872_v52  ;;  %v1453_v54 = vmul.f32 %v10049_v17, %v872_v52  ;;  %1026 = vperm.xlu1 %9314, %v619_v42   ;;  %3578 = vmatmul.mubr.f32.gmra.mxu0 %v3103_v48  ;;  %v2836_v56 = vadd.f32 %v10067_v29, %v2552_v46  ;;  %v624_v52 = vld [vmem:[%s9867_s26 + $0x240] sm:$0xff] }
 0x1a8   : > { %3582 = vmatprep.mubr.f32.mxu0 %v3106_v49  ;;  %v2835_v0 = vadd.f32 %v10061_v23, %v2551_v45 }
 0x1a9   : > { %v2553_v60 = vadd.f32 %v2281_v50, %v1452_v53  ;;  %v2554_v61 = vadd.f32 %v2282_v51, %v1453_v54  ;;  %v1804_v62 = vpop.permute.xlu0 %1803  ;;  %v3108_v63 = vmax.f32 %v2836_v56, 0.0  ;;  %v4237_v54 = vld [vmem:[#allocation9 + $0x38] sm:$0xff] }
 0x1aa   : > { %v2283_v2 = vmul.f32 %v10054_v19, %v1804_v62  ;;  %v2284_v3 = vmul.f32 %v10057_v20, %v1804_v62  ;;  %v877_v4 = vpop.permute.xlu1 %876  ;;  %1927 = vperm.xlu0 %9311, %v620_v55   ;;  %v3107_v14 = vmax.f32 %v2835_v0, 0.0  ;;  %4679 = vmatprep.subr.mxu0 %v4237_v54 }
 0x1ab   : > { %v1454_v5 = vmul.f32 %v10046_v16, %v877_v4  ;;  %v1455_v6 = vmul.f32 %v10049_v17, %v877_v4  ;;  %1031 = vperm.xlu1 %9314, %v620_v55   ;;  %3583 = vmatmul.mubr.f32.gmra.mxu0 %v3105_v57  ;;  %v2838_v8 = vadd.f32 %v10067_v29, %v2554_v61  ;;  %v4236_v55 = vld [vmem:[#allocation9 + $0x30] sm:$0xff] }
 0x1ac   : > { %3587 = vmatprep.mubr.f32.mxu0 %v3108_v63  ;;  %v2837_v11 = vadd.f32 %v10061_v23, %v2553_v60  ;;  %4680 = vmatpush1.msra.mxu0 %v4236_v55 }
 0x1ad   : > { %v2555_v12 = vadd.f32 %v2283_v2, %v1454_v5  ;;  %v2556_v13 = vadd.f32 %v2284_v3, %v1455_v6  ;;  %v1808_v21 = vpop.permute.xlu0 %1807  ;;  %v3110_v15 = vmax.f32 %v2838_v8, 0.0  ;;  %9165 = vmatprep.subr.mxu1 %v4237_v54  ;;  %v625_v6 = vld [vmem:[%s9867_s26 + $0x248] sm:$0xff] }
 0x1ae   : > { %v2285_v18 = vmul.f32 %v10054_v19, %v1808_v21  ;;  %v2286_v58 = vmul.f32 %v10057_v20, %v1808_v21  ;;  %v882_v22 = vpop.permute.xlu1 %881  ;;  %1931 = vperm.xlu0 %9311, %v621_v7   ;;  %v3109_v59 = vmax.f32 %v2837_v11, 0.0  ;;  %9173 = vmatpush1.msra.mxu1 %v4236_v55 }
 0x1af   : > { %v1456_v24 = vmul.f32 %v10046_v16, %v882_v22  ;;  %v1457_v25 = vmul.f32 %v10049_v17, %v882_v22  ;;  %1036 = vperm.xlu1 %9314, %v621_v7   ;;  %3588 = vmatmul.mubr.f32.gmra.mxu0 %v3107_v14  ;;  %v2840_v27 = vadd.f32 %v10067_v29, %v2556_v13 }
 0x1b0   : > { %3592 = vmatprep.mubr.f32.mxu0 %v3110_v15  ;;  %v2839_v33 = vadd.f32 %v10061_v23, %v2555_v12 }
 0x1b1   : > { %v2557_v28 = vadd.f32 %v2285_v18, %v1456_v24  ;;  %v2558_v30 = vadd.f32 %v2286_v58, %v1457_v25  ;;  %v1812_v31 = vpop.permute.xlu0 %1811  ;;  %v3112_v32 = vmax.f32 %v2840_v27, 0.0  ;;  %v626_v25 = vld [vmem:[%s9867_s26 + $0x250] sm:$0xff] }
 0x1b2   : > { %v2287_v34 = vmul.f32 %v10054_v19, %v1812_v31  ;;  %v2288_v35 = vmul.f32 %v10057_v20, %v1812_v31  ;;  %v887_v36 = vpop.permute.xlu1 %886  ;;  %1935 = vperm.xlu0 %9311, %v622_v26   ;;  %v3111_v45 = vmax.f32 %v2839_v33, 0.0 }
 0x1b3   : > { %v1458_v37 = vmul.f32 %v10046_v16, %v887_v36  ;;  %v1459_v38 = vmul.f32 %v10049_v17, %v887_v36  ;;  %1041 = vperm.xlu1 %9314, %v622_v26   ;;  %3593 = vmatmul.mubr.f32.gmra.mxu0 %v3109_v59  ;;  %v2842_v40 = vadd.f32 %v10067_v29, %v2558_v30 }
 0x1b4   : > { %3597 = vmatprep.mubr.f32.mxu0 %v3112_v32  ;;  %v2841_v41 = vadd.f32 %v10061_v23, %v2557_v28 }
 0x1b5   : > { %v2559_v42 = vadd.f32 %v2287_v34, %v1458_v37  ;;  %v2560_v43 = vadd.f32 %v2288_v35, %v1459_v38  ;;  %v1816_v44 = vpop.permute.xlu0 %1815  ;;  %v3114_v46 = vmax.f32 %v2842_v40, 0.0  ;;  %v627_v38 = vld [vmem:[%s9867_s26 + $0x258] sm:$0xff] }
 0x1b6   : > { %v2289_v47 = vmul.f32 %v10054_v19, %v1816_v44  ;;  %v2290_v48 = vmul.f32 %v10057_v20, %v1816_v44  ;;  %v892_v49 = vpop.permute.xlu1 %891  ;;  %1939 = vperm.xlu0 %9311, %v623_v39   ;;  %v3113_v56 = vmax.f32 %v2841_v41, 0.0 }
 0x1b7   : > { %v1460_v50 = vmul.f32 %v10046_v16, %v892_v49  ;;  %v1461_v51 = vmul.f32 %v10049_v17, %v892_v49  ;;  %1046 = vperm.xlu1 %9314, %v623_v39   ;;  %3598 = vmatmul.mubr.f32.gmra.mxu0 %v3111_v45  ;;  %v2844_v53 = vadd.f32 %v10067_v29, %v2560_v43 }
 0x1b8   : > { %3602 = vmatprep.mubr.f32.mxu0 %v3114_v46  ;;  %v2843_v63 = vadd.f32 %v10061_v23, %v2559_v42 }
 0x1b9   : > { %v2561_v57 = vadd.f32 %v2289_v47, %v1460_v50  ;;  %v2562_v60 = vadd.f32 %v2290_v48, %v1461_v51  ;;  %v1820_v61 = vpop.permute.xlu0 %1819  ;;  %v3116_v62 = vmax.f32 %v2844_v53, 0.0  ;;  %v628_v51 = vld [vmem:[%s9867_s26 + $0x260] sm:$0xff] }
 0x1ba   : > { %v2291_v0 = vmul.f32 %v10054_v19, %v1820_v61  ;;  %v2292_v2 = vmul.f32 %v10057_v20, %v1820_v61  ;;  %v897_v3 = vpop.permute.xlu1 %896  ;;  %1943 = vperm.xlu0 %9311, %v624_v52   ;;  %v3115_v21 = vmax.f32 %v2843_v63, 0.0 }
 0x1bb   : > { %v1462_v4 = vmul.f32 %v10046_v16, %v897_v3  ;;  %v1463_v5 = vmul.f32 %v10049_v17, %v897_v3  ;;  %1051 = vperm.xlu1 %9314, %v624_v52   ;;  %3603 = vmatmul.mubr.f32.gmra.mxu0 %v3113_v56  ;;  %v2846_v7 = vadd.f32 %v10067_v29, %v2562_v60  ;;  %v629_v3 = vld [vmem:[%s9867_s26 + $0x268] sm:$0xff] }
 0x1bc   : > { %3607 = vmatprep.mubr.f32.mxu0 %v3116_v62  ;;  %v2845_v8 = vadd.f32 %v10061_v23, %v2561_v57 }
 0x1bd   : > { %v2563_v11 = vadd.f32 %v2291_v0, %v1462_v4  ;;  %v2564_v12 = vadd.f32 %v2292_v2, %v1463_v5  ;;  %v1824_v13 = vpop.permute.xlu0 %1823  ;;  %v3118_v14 = vmax.f32 %v2846_v7, 0.0 }
 0x1be   : > { %v2293_v15 = vmul.f32 %v10054_v19, %v1824_v13  ;;  %v2294_v18 = vmul.f32 %v10057_v20, %v1824_v13  ;;  %v902_v58 = vpop.permute.xlu1 %901  ;;  %1947 = vperm.xlu0 %9311, %v625_v6   ;;  %v3117_v27 = vmax.f32 %v2845_v8, 0.0 }
 0x1bf   : > { %v1464_v22 = vmul.f32 %v10046_v16, %v902_v58  ;;  %v1465_v24 = vmul.f32 %v10049_v17, %v902_v58  ;;  %1056 = vperm.xlu1 %9314, %v625_v6   ;;  %3608 = vmatmul.mubr.f32.gmra.mxu0 %v3115_v21  ;;  %v2848_v26 = vadd.f32 %v10067_v29, %v2564_v12  ;;  %v630_v58 = vld [vmem:[%s9867_s26 + $0x270] sm:$0xff] }
 0x1c0   : > { %3612 = vmatprep.mubr.f32.mxu0 %v3118_v14  ;;  %v2847_v32 = vadd.f32 %v10061_v23, %v2563_v11 }
 0x1c1   : > { %v2565_v59 = vadd.f32 %v2293_v15, %v1464_v22  ;;  %v2566_v28 = vadd.f32 %v2294_v18, %v1465_v24  ;;  %v1828_v30 = vpop.permute.xlu0 %1827  ;;  %v3120_v31 = vmax.f32 %v2848_v26, 0.0 }
 0x1c2   : > { %v2295_v33 = vmul.f32 %v10054_v19, %v1828_v30  ;;  %v2296_v34 = vmul.f32 %v10057_v20, %v1828_v30  ;;  %v907_v35 = vpop.permute.xlu1 %906  ;;  %1951 = vperm.xlu0 %9311, %v626_v25   ;;  %v3119_v44 = vmax.f32 %v2847_v32, 0.0 }
 0x1c3   : > { %v1466_v36 = vmul.f32 %v10046_v16, %v907_v35  ;;  %v1467_v37 = vmul.f32 %v10049_v17, %v907_v35  ;;  %1061 = vperm.xlu1 %9314, %v626_v25   ;;  %3613 = vmatmul.mubr.f32.gmra.mxu0 %v3117_v27  ;;  %v2850_v39 = vadd.f32 %v10067_v29, %v2566_v28 }
 0x1c4   : > { %3617 = vmatprep.mubr.f32.mxu0 %v3120_v31  ;;  %v2849_v40 = vadd.f32 %v10061_v23, %v2565_v59 }
 0x1c5   : > { %v2567_v41 = vadd.f32 %v2295_v33, %v1466_v36  ;;  %v2568_v42 = vadd.f32 %v2296_v34, %v1467_v37  ;;  %v1832_v43 = vpop.permute.xlu0 %1831  ;;  %v3122_v45 = vmax.f32 %v2850_v39, 0.0  ;;  %v4235_v33 = vld [vmem:[#allocation9 + $0x28] sm:$0xff] }
 0x1c6   : > { %v2297_v46 = vmul.f32 %v10054_v19, %v1832_v43  ;;  %v2298_v47 = vmul.f32 %v10057_v20, %v1832_v43  ;;  %v912_v48 = vpop.permute.xlu1 %911  ;;  %1955 = vperm.xlu0 %9311, %v627_v38   ;;  %v3121_v53 = vmax.f32 %v2849_v40, 0.0  ;;  %v631_v36 = vld [vmem:[%s9867_s26 + $0x278] sm:$0xff]  ;;  %9166 = vmatprep.subr.mxu1 %v4235_v33  ;;  %v4233_v40 = vld [vmem:[#allocation9 + $0x18] sm:$0xff] }
 0x1c7   : > { %v1468_v49 = vmul.f32 %v10046_v16, %v912_v48  ;;  %v1469_v50 = vmul.f32 %v10049_v17, %v912_v48  ;;  %1066 = vperm.xlu1 %9314, %v627_v38   ;;  %3618 = vmatmul.mubr.f32.gmra.mxu0 %v3119_v44  ;;  %v2852_v52 = vadd.f32 %v10067_v29, %v2568_v42  ;;  %v4234_v38 = vld [vmem:[#allocation9 + $0x20] sm:$0xff] }
 0x1c8   : > { %3622 = vmatprep.mubr.f32.mxu0 %v3122_v45  ;;  %v2851_v60 = vadd.f32 %v10061_v23, %v2567_v41  ;;  %9174 = vmatpush1.msra.mxu1 %v4234_v38 }
 0x1c9   : > { %v2569_v54 = vadd.f32 %v2297_v46, %v1468_v49  ;;  %v2570_v55 = vadd.f32 %v2298_v47, %v1469_v50  ;;  %v1836_v56 = vpop.permute.xlu0 %1835  ;;  %v3124_v57 = vmax.f32 %v2852_v52, 0.0  ;;  %v4232_v46 = vld [vmem:[#allocation9 + $0x10] sm:$0xff]  ;;  %4681 = vmatprep.subr.mxu0 %v4235_v33  ;;  %9167 = vmatprep.subr.mxu1 %v4233_v40  ;;  %v4231_v50 = vld [vmem:[#allocation9 + $0x8] sm:$0xff] }
 0x1ca   : > { %v2299_v61 = vmul.f32 %v10054_v19, %v1836_v56  ;;  %v2300_v62 = vmul.f32 %v10057_v20, %v1836_v56  ;;  %v917_v63 = vpop.permute.xlu1 %916  ;;  %1959 = vperm.xlu0 %9311, %v628_v51   ;;  %v3123_v11 = vmax.f32 %v2851_v60, 0.0  ;;  %9175 = vmatpush1.msra.mxu1 %v4232_v46 }
 0x1cb   : > { %v1470_v0 = vmul.f32 %v10046_v16, %v917_v63  ;;  %v1471_v2 = vmul.f32 %v10049_v17, %v917_v63  ;;  %1071 = vperm.xlu1 %9314, %v628_v51   ;;  %3623 = vmatmul.mubr.f32.gmra.mxu0 %v3121_v53  ;;  %v2854_v4 = vadd.f32 %v10067_v29, %v2570_v55  ;;  %v632_v53 = vld [vmem:[%s9867_s26 + $0x280] sm:$0xff]  ;;  %v4230_v55 = vld [vmem:[#allocation9] sm:$0xff] }
 0x1cc   : > { %3627 = vmatprep.mubr.f32.mxu0 %v3124_v57  ;;  %v2853_v5 = vadd.f32 %v10061_v23, %v2569_v54  ;;  %9168 = vmatprep.subr.mxu1 %v4231_v50 }
 0x1cd   : > { %v2571_v6 = vadd.f32 %v2299_v61, %v1470_v0  ;;  %v2572_v7 = vadd.f32 %v2300_v62, %v1471_v2  ;;  %v1840_v8 = vpop.permute.xlu0 %1839  ;;  %v3126_v12 = vmax.f32 %v2854_v4, 0.0  ;;  %4682 = vmatpush1.msra.mxu0 %v4234_v38  ;;  %9176 = vmatpush1.msra.mxu1 %v4230_v55 }
 0x1ce   : > { %v2301_v13 = vmul.f32 %v10054_v19, %v1840_v8  ;;  %v2302_v21 = vmul.f32 %v10057_v20, %v1840_v8  ;;  %v922_v14 = vpop.permute.xlu1 %921  ;;  %1963 = vperm.xlu0 %9311, %v629_v3   ;;  %v3125_v24 = vmax.f32 %v2853_v5, 0.0  ;;  %6130 = vmatprep.subr.mxu1 %v13295_v1 }
 0x1cf   : > { %v1472_v15 = vmul.f32 %v10046_v16, %v922_v14  ;;  %v1473_v18 = vmul.f32 %v10049_v17, %v922_v14  ;;  %1076 = vperm.xlu1 %9314, %v629_v3   ;;  %3628 = vmatmul.mubr.f32.gmra.mxu0 %v3123_v11  ;;  %v2856_v22 = vadd.f32 %v10067_v29, %v2572_v7 }
 0x1d0   : > { %3632 = vmatprep.mubr.f32.mxu0 %v3126_v12  ;;  %v2855_v28 = vadd.f32 %v10061_v23, %v2571_v6  ;;  %v633_v6 = vld [vmem:[%s9867_s26 + $0x288] sm:$0xff]  ;;  %4683 = vmatprep.subr.mxu0 %v4233_v40 }
 0x1d1   : > { %v2573_v25 = vadd.f32 %v2301_v13, %v1472_v15  ;;  %v2574_v26 = vadd.f32 %v2302_v21, %v1473_v18  ;;  %v1844_v27 = vpop.permute.xlu0 %1843  ;;  %v3128_v59 = vmax.f32 %v2856_v22, 0.0  ;;  %4684 = vmatpush1.msra.mxu0 %v4232_v46 }
 0x1d2   : > { %v2303_v30 = vmul.f32 %v10054_v19, %v1844_v27  ;;  %v2304_v31 = vmul.f32 %v10057_v20, %v1844_v27  ;;  %v927_v32 = vpop.permute.xlu1 %926  ;;  %1967 = vperm.xlu0 %9311, %v630_v58   ;;  %v3127_v44 = vmax.f32 %v2855_v28, 0.0  ;;  %4685 = vmatprep.subr.mxu0 %v4231_v50 }
 0x1d3   : > { %v1474_v34 = vmul.f32 %v10046_v16, %v927_v32  ;;  %v1475_v35 = vmul.f32 %v10049_v17, %v927_v32  ;;  %1081 = vperm.xlu1 %9314, %v630_v58   ;;  %3633 = vmatmul.mubr.f32.gmra.mxu0 %v3125_v24  ;;  %v2858_v37 = vadd.f32 %v10067_v29, %v2574_v26 }
 0x1d4   : > { %3637 = vmatprep.mubr.f32.mxu0 %v3128_v59  ;;  %v2857_v39 = vadd.f32 %v10061_v23, %v2573_v25  ;;  %v634_v25 = vld [vmem:[%s9867_s26 + $0x290] sm:$0xff]  ;;  %4686 = vmatpush1.msra.mxu0 %v4230_v55 }
 0x1d5   : > { %v2575_v41 = vadd.f32 %v2303_v30, %v1474_v34  ;;  %v2576_v42 = vadd.f32 %v2304_v31, %v1475_v35  ;;  %v1848_v43 = vpop.permute.xlu0 %1847  ;;  %v3130_v45 = vmax.f32 %v2858_v37, 0.0 }
 0x1d6   : > { %v2305_v47 = vmul.f32 %v10054_v19, %v1848_v43  ;;  %v2306_v48 = vmul.f32 %v10057_v20, %v1848_v43  ;;  %v932_v49 = vpop.permute.xlu1 %931  ;;  %1971 = vperm.xlu0 %9311, %v631_v36   ;;  %v3129_v56 = vmax.f32 %v2857_v39, 0.0  ;;  %v635_v39 = vld [vmem:[%s9867_s26 + $0x298] sm:$0xff] }
 0x1d7   : > { %v1476_v51 = vmul.f32 %v10046_v16, %v932_v49  ;;  %v1477_v52 = vmul.f32 %v10049_v17, %v932_v49  ;;  %1086 = vperm.xlu1 %9314, %v631_v36   ;;  %3638 = vmatmul.mubr.f32.gmra.mxu0 %v3127_v44  ;;  %v2860_v54 = vadd.f32 %v10067_v29, %v2576_v42 }
 0x1d8   : > { %3642 = vmatprep.mubr.f32.mxu0 %v3130_v45  ;;  %v2859_v63 = vadd.f32 %v10061_v23, %v2575_v41 }
 0x1d9   : > { %v2577_v57 = vadd.f32 %v2305_v47, %v1476_v51  ;;  %v2578_v60 = vadd.f32 %v2306_v48, %v1477_v52  ;;  %v1852_v61 = vpop.permute.xlu0 %1851  ;;  %v3132_v62 = vmax.f32 %v2860_v54, 0.0  ;;  %v636_v54 = vld [vmem:[%s9867_s26 + $0x2a0] sm:$0xff] }
 0x1da   : > { %v2307_v0 = vmul.f32 %v10054_v19, %v1852_v61  ;;  %v2308_v2 = vmul.f32 %v10057_v20, %v1852_v61  ;;  %v937_v3 = vpop.permute.xlu1 %936  ;;  %1975 = vperm.xlu0 %9311, %v632_v53   ;;  %v3131_v21 = vmax.f32 %v2859_v63, 0.0 }
 0x1db   : > { %v1478_v4 = vmul.f32 %v10046_v16, %v937_v3  ;;  %v1479_v5 = vmul.f32 %v10049_v17, %v937_v3  ;;  %1091 = vperm.xlu1 %9314, %v632_v53   ;;  %3643 = vmatmul.mubr.f32.gmra.mxu0 %v3129_v56  ;;  %v2862_v7 = vadd.f32 %v10067_v29, %v2578_v60 }
 0x1dc   : > { %3647 = vmatprep.mubr.f32.mxu0 %v3132_v62  ;;  %v2861_v8 = vadd.f32 %v10061_v23, %v2577_v57 }
 0x1dd   : > { %v2579_v11 = vadd.f32 %v2307_v0, %v1478_v4  ;;  %v2580_v12 = vadd.f32 %v2308_v2, %v1479_v5  ;;  %v1856_v13 = vpop.permute.xlu0 %1855  ;;  %v3134_v14 = vmax.f32 %v2862_v7, 0.0 }
 0x1de   : > { %v2309_v15 = vmul.f32 %v10054_v19, %v1856_v13  ;;  %v2310_v18 = vmul.f32 %v10057_v20, %v1856_v13  ;;  %v942_v58 = vpop.permute.xlu1 %941  ;;  %1979 = vperm.xlu0 %9311, %v633_v6   ;;  %v3133_v27 = vmax.f32 %v2861_v8, 0.0  ;;  %v637_v8 = vld [vmem:[%s9867_s26 + $0x2a8] sm:$0xff] }
 0x1df   : > { %v1480_v22 = vmul.f32 %v10046_v16, %v942_v58  ;;  %v1481_v24 = vmul.f32 %v10049_v17, %v942_v58  ;;  %1096 = vperm.xlu1 %9314, %v633_v6   ;;  %3648 = vmatmul.mubr.f32.gmra.mxu0 %v3131_v21  ;;  %v2864_v26 = vadd.f32 %v10067_v29, %v2580_v12 }
 0x1e0   : > { %3652 = vmatprep.mubr.f32.mxu0 %v3134_v14  ;;  %v2863_v32 = vadd.f32 %v10061_v23, %v2579_v11 }
 0x1e1   : > { %v2581_v59 = vadd.f32 %v2309_v15, %v1480_v22  ;;  %v2582_v28 = vadd.f32 %v2310_v18, %v1481_v24  ;;  %v1860_v30 = vpop.permute.xlu0 %1859  ;;  %v3136_v31 = vmax.f32 %v2864_v26, 0.0 }
 0x1e2   : > { %v2311_v33 = vmul.f32 %v10054_v19, %v1860_v30  ;;  %v2312_v34 = vmul.f32 %v10057_v20, %v1860_v30  ;;  %v947_v35 = vpop.permute.xlu1 %946  ;;  %1983 = vperm.xlu0 %9311, %v634_v25   ;;  %v3135_v46 = vmax.f32 %v2863_v32, 0.0 }
 0x1e3   : > { %v1482_v36 = vmul.f32 %v10046_v16, %v947_v35  ;;  %v1483_v37 = vmul.f32 %v10049_v17, %v947_v35  ;;  %1101 = vperm.xlu1 %9314, %v634_v25   ;;  %v10428_v38 = vpop.f32.mrf.mxu0  ;;  %3653 = vmatmul.mubr.f32.gmra.mxu0 %v3133_v27  ;;  %v2866_v40 = vadd.f32 %v10067_v29, %v2582_v28  ;;  %v638_v28 = vld [vmem:[%s9867_s26 + $0x2b0] sm:$0xff] }
 0x1e4   : > { %3657 = vmatprep.mubr.f32.mxu0 %v3136_v31  ;;  %v2865_v41 = vadd.f32 %v10061_v23, %v2581_v59 }
 0x1e5   : > { %v2583_v42 = vadd.f32 %v2311_v33, %v1482_v36  ;;  %v2584_v43 = vadd.f32 %v2312_v34, %v1483_v37  ;;  %v3416_v44 = vpop.f32.mrf.mxu0  ;;  %v1864_v45 = vpop.permute.xlu0 %1863  ;;  %v3138_v47 = vmax.f32 %v2866_v40, 0.0 }
 0x1e6   : > { %v2313_v48 = vmul.f32 %v10054_v19, %v1864_v45  ;;  %v2314_v49 = vmul.f32 %v10057_v20, %v1864_v45  ;;  %v952_v50 = vpop.permute.xlu1 %951  ;;  %1987 = vperm.xlu0 %9311, %v635_v39   ;;  %v3137_v56 = vmax.f32 %v2865_v41, 0.0  ;;  %v639_v45 = vld [vmem:[%s9867_s26 + $0x2b8] sm:$0xff] }
 0x1e7   : > { %v1484_v51 = vmul.f32 %v10046_v16, %v952_v50  ;;  %v1485_v52 = vmul.f32 %v10049_v17, %v952_v50  ;;  %1106 = vperm.xlu1 %9314, %v635_v39   ;;  %v10437_v53 = vpop.f32.mrf.mxu0  ;;  %3658 = vmatmul.mubr.f32.gmra.mxu0 %v3135_v46  ;;  %v2868_v55 = vadd.f32 %v10067_v29, %v2584_v43 }
 0x1e8   : > { %3662 = vmatprep.mubr.f32.mxu0 %v3138_v47  ;;  %v2867_v0 = vadd.f32 %v10061_v23, %v2583_v42 }
 0x1e9   : > { %v2585_v57 = vadd.f32 %v2313_v48, %v1484_v51  ;;  %v2586_v60 = vadd.f32 %v2314_v49, %v1485_v52  ;;  %v3421_v61 = vpop.f32.mrf.mxu0  ;;  %v1868_v62 = vpop.permute.xlu0 %1867  ;;  %v3140_v63 = vmax.f32 %v2868_v55, 0.0 }
 0x1ea   : > { %v2315_v2 = vmul.f32 %v10054_v19, %v1868_v62  ;;  %v2316_v3 = vmul.f32 %v10057_v20, %v1868_v62  ;;  %v957_v4 = vpop.permute.xlu1 %956  ;;  %1991 = vperm.xlu0 %9311, %v636_v54   ;;  %v3139_v18 = vmax.f32 %v2867_v0, 0.0 }
 0x1eb   : > { %v1486_v5 = vmul.f32 %v10046_v16, %v957_v4  ;;  %v1487_v6 = vmul.f32 %v10049_v17, %v957_v4  ;;  %1111 = vperm.xlu1 %9314, %v636_v54   ;;  %v10446_v7 = vpop.f32.mrf.mxu0  ;;  %3663 = vmatmul.mubr.f32.gmra.mxu0 %v3137_v56  ;;  %v2870_v11 = vadd.f32 %v10067_v29, %v2586_v60 }
 0x1ec   : > { %3667 = vmatprep.mubr.f32.mxu0 %v3140_v63  ;;  %v2869_v12 = vadd.f32 %v10061_v23, %v2585_v57  ;;  %v640_v63 = vld [vmem:[%s9867_s26 + $0x2c0] sm:$0xff] }
 0x1ed   : > { %v2587_v13 = vadd.f32 %v2315_v2, %v1486_v5  ;;  %v2588_v21 = vadd.f32 %v2316_v3, %v1487_v6  ;;  %v3426_v14 = vpop.f32.mrf.mxu0  ;;  %v1872_v15 = vpop.permute.xlu0 %1871  ;;  %v3142_v58 = vmax.f32 %v2870_v11, 0.0 }
 0x1ee   : > { %v2317_v22 = vmul.f32 %v10054_v19, %v1872_v15  ;;  %v2318_v24 = vmul.f32 %v10057_v20, %v1872_v15  ;;  %v962_v25 = vpop.permute.xlu1 %961  ;;  %1995 = vperm.xlu0 %9311, %v637_v8   ;;  %v3141_v31 = vmax.f32 %v2869_v12, 0.0 }
 0x1ef   : > { %v1488_v26 = vmul.f32 %v10046_v16, %v962_v25  ;;  %v1489_v27 = vmul.f32 %v10049_v17, %v962_v25  ;;  %1116 = vperm.xlu1 %9314, %v637_v8   ;;  %v10455_v59 = vpop.f32.mrf.mxu0  ;;  %3668 = vmatmul.mubr.f32.gmra.mxu0 %v3139_v18  ;;  %v2872_v30 = vadd.f32 %v10067_v29, %v2588_v21 }
 0x1f0   : > { %3672 = vmatprep.mubr.f32.mxu0 %v3142_v58  ;;  %v2871_v37 = vadd.f32 %v10061_v23, %v2587_v13  ;;  %v641_v58 = vld [vmem:[%s9867_s26 + $0x2c8] sm:$0xff] }
 0x1f1   : > { %v2589_v32 = vadd.f32 %v2317_v22, %v1488_v26  ;;  %v2590_v33 = vadd.f32 %v2318_v24, %v1489_v27  ;;  %v3431_v34 = vpop.f32.mrf.mxu0  ;;  %v1876_v35 = vpop.permute.xlu0 %1875  ;;  %v3144_v36 = vmax.f32 %v2872_v30, 0.0 }
 0x1f2   : > { %v2319_v39 = vmul.f32 %v10054_v19, %v1876_v35  ;;  %v2320_v40 = vmul.f32 %v10057_v20, %v1876_v35  ;;  %v967_v41 = vpop.permute.xlu1 %966  ;;  %1999 = vperm.xlu0 %9311, %v638_v28   ;;  %v3143_v52 = vmax.f32 %v2871_v37, 0.0 }
 0x1f3   : > { %v1490_v42 = vmul.f32 %v10046_v16, %v967_v41  ;;  %v1491_v43 = vmul.f32 %v10049_v17, %v967_v41  ;;  %1121 = vperm.xlu1 %9314, %v638_v28   ;;  %v10464_v44 = vpop.f32.mrf.mxu0  ;;  %3673 = vmatmul.mubr.f32.gmra.mxu0 %v3141_v31  ;;  %v2874_v46 = vadd.f32 %v10067_v29, %v2590_v33 }
 0x1f4   : > { %3677 = vmatprep.mubr.f32.mxu0 %v3144_v36  ;;  %v2873_v47 = vadd.f32 %v10061_v23, %v2589_v32 }
 0x1f5   : > { %v2591_v48 = vadd.f32 %v2319_v39, %v1490_v42  ;;  %v2592_v49 = vadd.f32 %v2320_v40, %v1491_v43  ;;  %v3436_v50 = vpop.f32.mrf.mxu0  ;;  %v1880_v51 = vpop.permute.xlu0 %1879  ;;  %v3146_v54 = vmax.f32 %v2874_v46, 0.0  ;;  %v642_v39 = vld [vmem:[%s9867_s26 + $0x2d0] sm:$0xff] }
 0x1f6   : > { %v2321_v55 = vmul.f32 %v10054_v19, %v1880_v51  ;;  %v2322_v56 = vmul.f32 %v10057_v20, %v1880_v51  ;;  %v972_v57 = vpop.permute.xlu1 %971  ;;  %2003 = vperm.xlu0 %9311, %v639_v45   ;;  %v3145_v2 = vmax.f32 %v2873_v47, 0.0 }
 0x1f7   : > { %v1492_v60 = vmul.f32 %v10046_v16, %v972_v57  ;;  %v1493_v61 = vmul.f32 %v10049_v17, %v972_v57  ;;  %1126 = vperm.xlu1 %9314, %v639_v45   ;;  %v10473_v62 = vpop.f32.mrf.mxu0  ;;  %3678 = vmatmul.mubr.f32.gmra.mxu0 %v3143_v52  ;;  %v2876_v0 = vadd.f32 %v10067_v29, %v2592_v49 }
 0x1f8   : > { %3682 = vmatprep.mubr.f32.mxu0 %v3146_v54  ;;  %v2875_v11 = vadd.f32 %v10061_v23, %v2591_v48 }
 0x1f9   : > { %v2593_v3 = vadd.f32 %v2321_v55, %v1492_v60  ;;  %v2594_v4 = vadd.f32 %v2322_v56, %v1493_v61  ;;  %v3441_v5 = vpop.f32.mrf.mxu0  ;;  %v1884_v6 = vpop.permute.xlu0 %1883  ;;  %v3148_v8 = vmax.f32 %v2876_v0, 0.0  ;;  %v643_v56 = vld [vmem:[%s9867_s26 + $0x2d8] sm:$0xff] }
 0x1fa   : > { %v2323_v12 = vmul.f32 %v10054_v19, %v1884_v6  ;;  %v2324_v13 = vmul.f32 %v10057_v20, %v1884_v6  ;;  %v977_v21 = vpop.permute.xlu1 %976  ;;  %2007 = vperm.xlu0 %9311, %v640_v63   ;;  %v3147_v30 = vmax.f32 %v2875_v11, 0.0 }
 0x1fb   : > { %v1494_v14 = vmul.f32 %v10046_v16, %v977_v21  ;;  %v1495_v15 = vmul.f32 %v10049_v17, %v977_v21  ;;  %1131 = vperm.xlu1 %9314, %v640_v63   ;;  %v10482_v18 = vpop.f32.mrf.mxu0  ;;  %3683 = vmatmul.mubr.f32.gmra.mxu0 %v3145_v2  ;;  %v2878_v22 = vadd.f32 %v10067_v29, %v2594_v4  ;;  %v644_v21 = vld [vmem:[%s9867_s26 + $0x2e0] sm:$0xff] }
 0x1fc   : > { %3687 = vmatprep.mubr.f32.mxu0 %v3148_v8  ;;  %v2877_v24 = vadd.f32 %v10061_v23, %v2593_v3 }
 0x1fd   : > { %v2595_v25 = vadd.f32 %v2323_v12, %v1494_v14  ;;  %v2596_v26 = vadd.f32 %v2324_v13, %v1495_v15  ;;  %v3446_v27 = vpop.f32.mrf.mxu0  ;;  %v1888_v28 = vpop.permute.xlu0 %1887  ;;  %v3150_v34 = vmax.f32 %v2878_v22, 0.0 }
 0x1fe   : > { %v2325_v31 = vmul.f32 %v10054_v19, %v1888_v28  ;;  %v2326_v32 = vmul.f32 %v10057_v20, %v1888_v28  ;;  %v982_v33 = vpop.permute.xlu1 %981  ;;  %2011 = vperm.xlu0 %9311, %v641_v58   ;;  %v3149_v47 = vmax.f32 %v2877_v24, 0.0 }
 0x1ff   : > { %v1496_v35 = vmul.f32 %v10046_v16, %v982_v33  ;;  %v1497_v36 = vmul.f32 %v10049_v17, %v982_v33  ;;  %1136 = vperm.xlu1 %9314, %v641_v58   ;;  %v10491_v37 = vpop.f32.mrf.mxu0  ;;  %3688 = vmatmul.mubr.f32.gmra.mxu0 %v3147_v30  ;;  %v2880_v40 = vadd.f32 %v10067_v29, %v2596_v26 }
 0x200   : > { %3692 = vmatprep.mubr.f32.mxu0 %v3150_v34  ;;  %v2879_v41 = vadd.f32 %v10061_v23, %v2595_v25 }
 0x201   : > { %v2597_v42 = vadd.f32 %v2325_v31, %v1496_v35  ;;  %v2598_v43 = vadd.f32 %v2326_v32, %v1497_v36  ;;  %v3451_v45 = vpop.f32.mrf.mxu0  ;;  %v1892_v46 = vpop.permute.xlu0 %1891  ;;  %v3152_v51 = vmax.f32 %v2880_v40, 0.0  ;;  %v645_v35 = vld [vmem:[%s9867_s26 + $0x2e8] sm:$0xff] }
 0x202   : > { %v2327_v48 = vmul.f32 %v10054_v19, %v1892_v46  ;;  %v2328_v49 = vmul.f32 %v10057_v20, %v1892_v46  ;;  %v987_v50 = vpop.permute.xlu1 %986  ;;  %2015 = vperm.xlu0 %9311, %v642_v39   ;;  %v3151_v3 = vmax.f32 %v2879_v41, 0.0 }
 0x203   : > { %v1498_v52 = vmul.f32 %v10046_v16, %v987_v50  ;;  %v1499_v54 = vmul.f32 %v10049_v17, %v987_v50  ;;  %1141 = vperm.xlu1 %9314, %v642_v39   ;;  %v10500_v55 = vpop.f32.mrf.mxu0  ;;  %3693 = vmatmul.mubr.f32.gmra.mxu0 %v3149_v47  ;;  %v2882_v57 = vadd.f32 %v10067_v29, %v2598_v43 }
 0x204   : > { %3697 = vmatprep.mubr.f32.mxu0 %v3152_v51  ;;  %v2881_v60 = vadd.f32 %v10061_v23, %v2597_v42 }
 0x205   : > { %v2599_v61 = vadd.f32 %v2327_v48, %v1498_v52  ;;  %v2600_v63 = vadd.f32 %v2328_v49, %v1499_v54  ;;  %v3456_v0 = vpop.f32.mrf.mxu0  ;;  %v1896_v2 = vpop.permute.xlu0 %1895  ;;  %v3154_v8 = vmax.f32 %v2882_v57, 0.0  ;;  %v646_v54 = vld [vmem:[%s9867_s26 + $0x2f0] sm:$0xff] }
 0x206   : > { %v2329_v4 = vmul.f32 %v10054_v19, %v1896_v2  ;;  %v2330_v5 = vmul.f32 %v10057_v20, %v1896_v2  ;;  %v992_v6 = vpop.permute.xlu1 %991  ;;  %2019 = vperm.xlu0 %9311, %v643_v56   ;;  %v3153_v26 = vmax.f32 %v2881_v60, 0.0 }
 0x207   : > { %v1500_v11 = vmul.f32 %v10046_v16, %v992_v6  ;;  %v1501_v12 = vmul.f32 %v10049_v17, %v992_v6  ;;  %1146 = vperm.xlu1 %9314, %v643_v56   ;;  %v10509_v13 = vpop.f32.mrf.mxu0  ;;  %3698 = vmatmul.mubr.f32.gmra.mxu0 %v3151_v3  ;;  %v2884_v14 = vadd.f32 %v10067_v29, %v2600_v63 }
 0x208   : > { %3702 = vmatprep.mubr.f32.mxu0 %v3154_v8  ;;  %v2883_v15 = vadd.f32 %v10061_v23, %v2599_v61 }
 0x209   : > { %v2601_v58 = vadd.f32 %v2329_v4, %v1500_v11  ;;  %v2602_v22 = vadd.f32 %v2330_v5, %v1501_v12  ;;  %v3461_v24 = vpop.f32.mrf.mxu0  ;;  %v1900_v25 = vpop.permute.xlu0 %1899  ;;  %v3156_v31 = vmax.f32 %v2884_v14, 0.0 }
 0x20a   : > { %v2331_v27 = vmul.f32 %v10054_v19, %v1900_v25  ;;  %v2332_v28 = vmul.f32 %v10057_v20, %v1900_v25  ;;  %v997_v30 = vpop.permute.xlu1 %996  ;;  %2023 = vperm.xlu0 %9311, %v644_v21   ;;  %v3155_v45 = vmax.f32 %v2883_v15, 0.0 }
 0x20b   : > { %v1502_v32 = vmul.f32 %v10046_v16, %v997_v30  ;;  %v1503_v33 = vmul.f32 %v10049_v17, %v997_v30  ;;  %1151 = vperm.xlu1 %9314, %v644_v21   ;;  %v10518_v34 = vpop.f32.mrf.mxu0  ;;  %3703 = vmatmul.mubr.f32.gmra.mxu0 %v3153_v26  ;;  %v2886_v36 = vadd.f32 %v10067_v29, %v2602_v22  ;;  %v647_v21 = vld [vmem:[%s9867_s26 + $0x2f8] sm:$0xff] }
 0x20c   : > { %3707 = vmatprep.mubr.f32.mxu0 %v3156_v31  ;;  %v2885_v39 = vadd.f32 %v10061_v23, %v2601_v58 }
 0x20d   : > { %v2603_v40 = vadd.f32 %v2331_v27, %v1502_v32  ;;  %v2604_v41 = vadd.f32 %v2332_v28, %v1503_v33  ;;  %v3466_v42 = vpop.f32.mrf.mxu0  ;;  %v1904_v43 = vpop.permute.xlu0 %1903  ;;  %v3158_v49 = vmax.f32 %v2886_v36, 0.0  ;;  %v648_v36 = vld [vmem:[%s9867_s26 + $0x300] sm:$0xff] }
 0x20e   : > { %v2333_v46 = vmul.f32 %v10054_v19, %v1904_v43  ;;  %v2334_v47 = vmul.f32 %v10057_v20, %v1904_v43  ;;  %v1002_v48 = vpop.permute.xlu1 %1001  ;;  %2027 = vperm.xlu0 %9311, %v645_v35   ;;  %v3157_v2 = vmax.f32 %v2885_v39, 0.0 }
 0x20f   : > { %v1504_v50 = vmul.f32 %v10046_v16, %v1002_v48  ;;  %v1505_v51 = vmul.f32 %v10049_v17, %v1002_v48  ;;  %1156 = vperm.xlu1 %9314, %v645_v35   ;;  %v10527_v52 = vpop.f32.mrf.mxu0  ;;  %3708 = vmatmul.mubr.f32.gmra.mxu0 %v3155_v45  ;;  %v2888_v56 = vadd.f32 %v10067_v29, %v2604_v41 }
 0x210   : > { %3712 = vmatprep.mubr.f32.mxu0 %v3158_v49  ;;  %v2887_v57 = vadd.f32 %v10061_v23, %v2603_v40 }
 0x211   : > { %v2605_v60 = vadd.f32 %v2333_v46, %v1504_v50  ;;  %v2606_v61 = vadd.f32 %v2334_v47, %v1505_v51  ;;  %v3471_v63 = vpop.f32.mrf.mxu0  ;;  %v1908_v0 = vpop.permute.xlu0 %1907  ;;  %v3160_v6 = vmax.f32 %v2888_v56, 0.0 }
 0x212   : > { %v2335_v3 = vmul.f32 %v10054_v19, %v1908_v0  ;;  %v2336_v4 = vmul.f32 %v10057_v20, %v1908_v0  ;;  %v1007_v5 = vpop.permute.xlu1 %1006  ;;  %2031 = vperm.xlu0 %9311, %v646_v54   ;;  %v3159_v26 = vmax.f32 %v2887_v57, 0.0  ;;  %v649_v57 = vld [vmem:[%s9867_s26 + $0x308] sm:$0xff] }
 0x213   : > { %v1506_v8 = vmul.f32 %v10046_v16, %v1007_v5  ;;  %v1507_v11 = vmul.f32 %v10049_v17, %v1007_v5  ;;  %1161 = vperm.xlu1 %9314, %v646_v54   ;;  %v10536_v12 = vpop.f32.mrf.mxu0  ;;  %3713 = vmatmul.mubr.f32.gmra.mxu0 %v3157_v2  ;;  %v2890_v14 = vadd.f32 %v10067_v29, %v2606_v61 }
 0x214   : > { %3717 = vmatprep.mubr.f32.mxu0 %v3160_v6  ;;  %v2889_v15 = vadd.f32 %v10061_v23, %v2605_v60 }
 0x215   : > { %v2607_v58 = vadd.f32 %v2335_v3, %v1506_v8  ;;  %v2608_v22 = vadd.f32 %v2336_v4, %v1507_v11  ;;  %v3476_v24 = vpop.f32.mrf.mxu0  ;;  %v1912_v25 = vpop.permute.xlu0 %1911  ;;  %v3162_v31 = vmax.f32 %v2890_v14, 0.0 }
 0x216   : > { %v2337_v27 = vmul.f32 %v10054_v19, %v1912_v25  ;;  %v2338_v28 = vmul.f32 %v10057_v20, %v1912_v25  ;;  %v1012_v30 = vpop.permute.xlu1 %1011  ;;  %2035 = vperm.xlu0 %9311, %v647_v21   ;;  %v3161_v46 = vmax.f32 %v2889_v15, 0.0 }
 0x217   : > { %v1508_v32 = vmul.f32 %v10046_v16, %v1012_v30  ;;  %v1509_v33 = vmul.f32 %v10049_v17, %v1012_v30  ;;  %1166 = vperm.xlu1 %9314, %v647_v21   ;;  %v10545_v35 = vpop.f32.mrf.mxu0  ;;  %3718 = vmatmul.mubr.f32.gmra.mxu0 %v3159_v26  ;;  %v2892_v39 = vadd.f32 %v10067_v29, %v2608_v22 }
 0x218   : > { %3722 = vmatprep.mubr.f32.mxu0 %v3162_v31  ;;  %v2891_v40 = vadd.f32 %v10061_v23, %v2607_v58  ;;  %v650_v58 = vld [vmem:[%s9867_s26 + $0x310] sm:$0xff] }
 0x219   : > { %v2609_v41 = vadd.f32 %v2337_v27, %v1508_v32  ;;  %v2610_v42 = vadd.f32 %v2338_v28, %v1509_v33  ;;  %v3481_v43 = vpop.f32.mrf.mxu0  ;;  %v1916_v45 = vpop.permute.xlu0 %1915  ;;  %v3164_v50 = vmax.f32 %v2892_v39, 0.0 }
 0x21a   : > { %v2339_v47 = vmul.f32 %v10054_v19, %v1916_v45  ;;  %v2340_v48 = vmul.f32 %v10057_v20, %v1916_v45  ;;  %v1017_v49 = vpop.permute.xlu1 %1016  ;;  %2039 = vperm.xlu0 %9311, %v648_v36   ;;  %v3163_v4 = vmax.f32 %v2891_v40, 0.0 }
 0x21b   : > { %v1510_v51 = vmul.f32 %v10046_v16, %v1017_v49  ;;  %v1511_v54 = vmul.f32 %v10049_v17, %v1017_v49  ;;  %1171 = vperm.xlu1 %9314, %v648_v36   ;;  %v10554_v56 = vpop.f32.mrf.mxu0  ;;  %3723 = vmatmul.mubr.f32.gmra.mxu0 %v3161_v46  ;;  %v2894_v60 = vadd.f32 %v10067_v29, %v2610_v42  ;;  %v651_v42 = vld [vmem:[%s9867_s26 + $0x318] sm:$0xff] }
 0x21c   : > { %3727 = vmatprep.mubr.f32.mxu0 %v3164_v50  ;;  %v2893_v61 = vadd.f32 %v10061_v23, %v2609_v41 }
 0x21d   : > { %v2611_v63 = vadd.f32 %v2339_v47, %v1510_v51  ;;  %v2612_v0 = vadd.f32 %v2340_v48, %v1511_v54  ;;  %v3486_v2 = vpop.f32.mrf.mxu0  ;;  %v1920_v3 = vpop.permute.xlu0 %1919  ;;  %v3166_v11 = vmax.f32 %v2894_v60, 0.0 }
 0x21e   : > { %v2341_v5 = vmul.f32 %v10054_v19, %v1920_v3  ;;  %v2342_v6 = vmul.f32 %v10057_v20, %v1920_v3  ;;  %v1022_v8 = vpop.permute.xlu1 %1021  ;;  %2043 = vperm.xlu0 %9311, %v649_v57   ;;  %v3165_v30 = vmax.f32 %v2893_v61, 0.0  ;;  %v652_v2 = vld [vmem:[%s9867_s26 + $0x320] sm:$0xff] }
 0x21f   : > { %v1512_v21 = vmul.f32 %v10046_v16, %v1022_v8  ;;  %v1513_v14 = vmul.f32 %v10049_v17, %v1022_v8  ;;  %1176 = vperm.xlu1 %9314, %v649_v57   ;;  %v10563_v15 = vpop.f32.mrf.mxu0  ;;  %3728 = vmatmul.mubr.f32.gmra.mxu0 %v3163_v4  ;;  %v2896_v22 = vadd.f32 %v10067_v29, %v2612_v0 }
 0x220   : > { %3732 = vmatprep.mubr.f32.mxu0 %v3166_v11  ;;  %v2895_v24 = vadd.f32 %v10061_v23, %v2611_v63 }
 0x221   : > { %v2613_v25 = vadd.f32 %v2341_v5, %v1512_v21  ;;  %v2614_v26 = vadd.f32 %v2342_v6, %v1513_v14  ;;  %v3491_v27 = vpop.f32.mrf.mxu0  ;;  %v1924_v28 = vpop.permute.xlu0 %1923  ;;  %v3168_v36 = vmax.f32 %v2896_v22, 0.0 }
 0x222   : > { %v2343_v31 = vmul.f32 %v10054_v19, %v1924_v28  ;;  %v2344_v32 = vmul.f32 %v10057_v20, %v1924_v28  ;;  %v1027_v33 = vpop.permute.xlu1 %1026  ;;  %2047 = vperm.xlu0 %9311, %v650_v58   ;;  %v3167_v50 = vmax.f32 %v2895_v24, 0.0  ;;  %v653_v28 = vld [vmem:[%s9867_s26 + $0x328] sm:$0xff] }
 0x223   : > { %v1514_v39 = vmul.f32 %v10046_v16, %v1027_v33  ;;  %v1515_v40 = vmul.f32 %v10049_v17, %v1027_v33  ;;  %1181 = vperm.xlu1 %9314, %v650_v58   ;;  %v10572_v41 = vpop.f32.mrf.mxu0  ;;  %3733 = vmatmul.mubr.f32.gmra.mxu0 %v3165_v30  ;;  %v2898_v43 = vadd.f32 %v10067_v29, %v2614_v26 }
 0x224   : > { %3737 = vmatprep.mubr.f32.mxu0 %v3168_v36  ;;  %v2897_v45 = vadd.f32 %v10061_v23, %v2613_v25 }
 0x225   : > { %v2615_v46 = vadd.f32 %v2343_v31, %v1514_v39  ;;  %v2616_v47 = vadd.f32 %v2344_v32, %v1515_v40  ;;  %v3496_v48 = vpop.f32.mrf.mxu0  ;;  %v1928_v49 = vpop.permute.xlu0 %1927  ;;  %v3170_v60 = vmax.f32 %v2898_v43, 0.0 }
 0x226   : > { %v2345_v51 = vmul.f32 %v10054_v19, %v1928_v49  ;;  %v2346_v54 = vmul.f32 %v10057_v20, %v1928_v49  ;;  %v1032_v57 = vpop.permute.xlu1 %1031  ;;  %2051 = vperm.xlu0 %9311, %v651_v42   ;;  %v3169_v21 = vmax.f32 %v2897_v45, 0.0 }
 0x227   : > { %v1516_v61 = vmul.f32 %v10046_v16, %v1032_v57  ;;  %v1517_v63 = vmul.f32 %v10049_v17, %v1032_v57  ;;  %1186 = vperm.xlu1 %9314, %v651_v42   ;;  %v10581_v0 = vpop.f32.mrf.mxu0  ;;  %3738 = vmatmul.mubr.f32.gmra.mxu0 %v3167_v50  ;;  %v2900_v3 = vadd.f32 %v10067_v29, %v2616_v47  ;;  %v654_v50 = vld [vmem:[%s9867_s26 + $0x330] sm:$0xff] }
 0x228   : > { %3742 = vmatprep.mubr.f32.mxu0 %v3170_v60  ;;  %v2899_v4 = vadd.f32 %v10061_v23, %v2615_v46 }
 0x229   : > { %v2617_v5 = vadd.f32 %v2345_v51, %v1516_v61  ;;  %v2618_v6 = vadd.f32 %v2346_v54, %v1517_v63  ;;  %v3501_v8 = vpop.f32.mrf.mxu0  ;;  %v1932_v11 = vpop.permute.xlu0 %1931  ;;  %v3172_v24 = vmax.f32 %v2900_v3, 0.0 }
 0x22a   : > { %v2347_v14 = vmul.f32 %v10054_v19, %v1932_v11  ;;  %v2348_v58 = vmul.f32 %v10057_v20, %v1932_v11  ;;  %v1037_v22 = vpop.permute.xlu1 %1036  ;;  %2055 = vperm.xlu0 %9311, %v652_v2   ;;  %v3171_v40 = vmax.f32 %v2899_v4, 0.0 }
 0x22b   : > { %v1518_v25 = vmul.f32 %v10046_v16, %v1037_v22  ;;  %v1519_v26 = vmul.f32 %v10049_v17, %v1037_v22  ;;  %1191 = vperm.xlu1 %9314, %v652_v2   ;;  %v10590_v27 = vpop.f32.mrf.mxu0  ;;  %3743 = vmatmul.mubr.f32.gmra.mxu0 %v3169_v21  ;;  %v2902_v30 = vadd.f32 %v10067_v29, %v2618_v6 }
 0x22c   : > { %3747 = vmatprep.mubr.f32.mxu0 %v3172_v24  ;;  %v2901_v31 = vadd.f32 %v10061_v23, %v2617_v5 }
 0x22d   : > { %v2619_v32 = vadd.f32 %v2347_v14, %v1518_v25  ;;  %v2620_v33 = vadd.f32 %v2348_v58, %v1519_v26  ;;  %v3506_v36 = vpop.f32.mrf.mxu0  ;;  %v1936_v39 = vpop.permute.xlu0 %1935  ;;  %v3174_v46 = vmax.f32 %v2902_v30, 0.0  ;;  %v655_v14 = vld [vmem:[%s9867_s26 + $0x338] sm:$0xff] }
 0x22e   : > { %v2349_v42 = vmul.f32 %v10054_v19, %v1936_v39  ;;  %v2350_v43 = vmul.f32 %v10057_v20, %v1936_v39  ;;  %v1042_v45 = vpop.permute.xlu1 %1041  ;;  %2059 = vperm.xlu0 %9311, %v653_v28   ;;  %v3173_v2 = vmax.f32 %v2901_v31, 0.0 }
 0x22f   : > { %v1520_v47 = vmul.f32 %v10046_v16, %v1042_v45  ;;  %v1521_v48 = vmul.f32 %v10049_v17, %v1042_v45  ;;  %1196 = vperm.xlu1 %9314, %v653_v28   ;;  %v10599_v49 = vpop.f32.mrf.mxu0  ;;  %3748 = vmatmul.mubr.f32.gmra.mxu0 %v3171_v40  ;;  %v2904_v51 = vadd.f32 %v10067_v29, %v2620_v33 }
 0x230   : > { %3752 = vmatprep.mubr.f32.mxu0 %v3174_v46  ;;  %v2903_v54 = vadd.f32 %v10061_v23, %v2619_v32 }
 0x231   : > { %v2621_v57 = vadd.f32 %v2349_v42, %v1520_v47  ;;  %v2622_v60 = vadd.f32 %v2350_v43, %v1521_v48  ;;  %v3511_v61 = vpop.f32.mrf.mxu0  ;;  %v1940_v63 = vpop.permute.xlu0 %1939  ;;  %v3176_v6 = vmax.f32 %v2904_v51, 0.0  ;;  %v656_v43 = vld [vmem:[%s9867_s26 + $0x340] sm:$0xff] }
 0x232   : > { %v2351_v3 = vmul.f32 %v10054_v19, %v1940_v63  ;;  %v2352_v4 = vmul.f32 %v10057_v20, %v1940_v63  ;;  %v1047_v5 = vpop.permute.xlu1 %1046  ;;  %2063 = vperm.xlu0 %9311, %v654_v50   ;;  %v3175_v30 = vmax.f32 %v2903_v54, 0.0 }
 0x233   : > { %v1522_v8 = vmul.f32 %v10046_v16, %v1047_v5  ;;  %v1523_v11 = vmul.f32 %v10049_v17, %v1047_v5  ;;  %1201 = vperm.xlu1 %9314, %v654_v50   ;;  %v10608_v21 = vpop.f32.mrf.mxu0  ;;  %3753 = vmatmul.mubr.f32.gmra.mxu0 %v3173_v2  ;;  %v2906_v58 = vadd.f32 %v10067_v29, %v2622_v60  ;;  %v657_v5 = vld [vmem:[%s9867_s26 + $0x348] sm:$0xff] }
 0x234   : > { %3757 = vmatprep.mubr.f32.mxu0 %v3176_v6  ;;  %v2905_v22 = vadd.f32 %v10061_v23, %v2621_v57 }
 0x235   : > { %v2623_v24 = vadd.f32 %v2351_v3, %v1522_v8  ;;  %v2624_v25 = vadd.f32 %v2352_v4, %v1523_v11  ;;  %v3516_v26 = vpop.f32.mrf.mxu0  ;;  %v1944_v28 = vpop.permute.xlu0 %1943  ;;  %v3178_v36 = vmax.f32 %v2906_v58, 0.0 }
 0x236   : > { %v2353_v31 = vmul.f32 %v10054_v19, %v1944_v28  ;;  %v2354_v32 = vmul.f32 %v10057_v20, %v1944_v28  ;;  %v1052_v33 = vpop.permute.xlu1 %1051  ;;  %2067 = vperm.xlu0 %9311, %v655_v14   ;;  %v3177_v54 = vmax.f32 %v2905_v22, 0.0 }
 0x237   : > { %v1524_v39 = vmul.f32 %v10046_v16, %v1052_v33  ;;  %v1525_v40 = vmul.f32 %v10049_v17, %v1052_v33  ;;  %1206 = vperm.xlu1 %9314, %v655_v14   ;;  %v10617_v42 = vpop.f32.mrf.mxu0  ;;  %3758 = vmatmul.mubr.f32.gmra.mxu0 %v3175_v30  ;;  %v2908_v45 = vadd.f32 %v10067_v29, %v2624_v25 }
 0x238   : > { %3762 = vmatprep.mubr.f32.mxu0 %v3178_v36  ;;  %v2907_v46 = vadd.f32 %v10061_v23, %v2623_v24  ;;  %v658_v36 = vld [vmem:[%s9867_s26 + $0x350] sm:$0xff] }
 0x239   : > { %v2625_v47 = vadd.f32 %v2353_v31, %v1524_v39  ;;  %v2626_v48 = vadd.f32 %v2354_v32, %v1525_v40  ;;  %v3521_v50 = vpop.f32.mrf.mxu0  ;;  %v1948_v51 = vpop.permute.xlu0 %1947  ;;  %v3180_v63 = vmax.f32 %v2908_v45, 0.0 }
 0x23a   : > { %v2355_v57 = vmul.f32 %v10054_v19, %v1948_v51  ;;  %v2356_v60 = vmul.f32 %v10057_v20, %v1948_v51  ;;  %v1057_v61 = vpop.permute.xlu1 %1056  ;;  %2071 = vperm.xlu0 %9311, %v656_v43   ;;  %v3179_v24 = vmax.f32 %v2907_v46, 0.0 }
 0x23b   : > { %v1526_v2 = vmul.f32 %v10046_v16, %v1057_v61  ;;  %v1527_v3 = vmul.f32 %v10049_v17, %v1057_v61  ;;  %1211 = vperm.xlu1 %9314, %v656_v43   ;;  %v10626_v4 = vpop.f32.mrf.mxu0  ;;  %3763 = vmatmul.mubr.f32.gmra.mxu0 %v3177_v54  ;;  %v2910_v6 = vadd.f32 %v10067_v29, %v2626_v48 }
 0x23c   : > { %3767 = vmatprep.mubr.f32.mxu0 %v3180_v63  ;;  %v2909_v8 = vadd.f32 %v10061_v23, %v2625_v47 }
 0x23d   : > { %v2627_v11 = vadd.f32 %v2355_v57, %v1526_v2  ;;  %v2628_v14 = vadd.f32 %v2356_v60, %v1527_v3  ;;  %v3526_v58 = vpop.f32.mrf.mxu0  ;;  %v1952_v22 = vpop.permute.xlu0 %1951  ;;  %v3182_v30 = vmax.f32 %v2910_v6, 0.0  ;;  %v659_v2 = vld [vmem:[%s9867_s26 + $0x358] sm:$0xff] }
 0x23e   : > { %v2357_v25 = vmul.f32 %v10054_v19, %v1952_v22  ;;  %v2358_v26 = vmul.f32 %v10057_v20, %v1952_v22  ;;  %v1062_v28 = vpop.permute.xlu1 %1061  ;;  %2075 = vperm.xlu0 %9311, %v657_v5   ;;  %v3181_v48 = vmax.f32 %v2909_v8, 0.0 }
 0x23f   : > { %v1528_v31 = vmul.f32 %v10046_v16, %v1062_v28  ;;  %v1529_v32 = vmul.f32 %v10049_v17, %v1062_v28  ;;  %1216 = vperm.xlu1 %9314, %v657_v5   ;;  %v10635_v33 = vpop.f32.mrf.mxu0  ;;  %3768 = vmatmul.mubr.f32.gmra.mxu0 %v3179_v24  ;;  %v2912_v39 = vadd.f32 %v10067_v29, %v2628_v14 }
 0x240   : > { %3772 = vmatprep.mubr.f32.mxu0 %v3182_v30  ;;  %v2911_v40 = vadd.f32 %v10061_v23, %v2627_v11 }
 0x241   : > { %v2629_v43 = vadd.f32 %v2357_v25, %v1528_v31  ;;  %v2630_v45 = vadd.f32 %v2358_v26, %v1529_v32  ;;  %v3531_v46 = vpop.f32.mrf.mxu0  ;;  %v1956_v47 = vpop.permute.xlu0 %1955  ;;  %v3184_v57 = vmax.f32 %v2912_v39, 0.0  ;;  %v660_v32 = vld [vmem:[%s9867_s26 + $0x360] sm:$0xff] }
 0x242   : > { %v2359_v50 = vmul.f32 %v10054_v19, %v1956_v47  ;;  %v2360_v51 = vmul.f32 %v10057_v20, %v1956_v47  ;;  %v1067_v54 = vpop.permute.xlu1 %1066  ;;  %2079 = vperm.xlu0 %9311, %v658_v36   ;;  %v3183_v58 = vmax.f32 %v2911_v40, 0.0 }
 0x243   : > { %v1530_v60 = vmul.f32 %v10046_v16, %v1067_v54  ;;  %v1531_v61 = vmul.f32 %v10049_v17, %v1067_v54  ;;  %1221 = vperm.xlu1 %9314, %v658_v36   ;;  %v10644_v63 = vpop.f32.mrf.mxu0  ;;  %3773 = vmatmul.mubr.f32.gmra.mxu0 %v3181_v48  ;;  %v2914_v3 = vadd.f32 %v10067_v29, %v2630_v45 }
 0x244   : > { %3777 = vmatprep.mubr.f32.mxu0 %v3184_v57  ;;  %v2913_v5 = vadd.f32 %v10061_v23, %v2629_v43 }
 0x245   : > { %v2631_v6 = vadd.f32 %v2359_v50, %v1530_v60  ;;  %v2632_v8 = vadd.f32 %v2360_v51, %v1531_v61  ;;  %v3536_v11 = vpop.f32.mrf.mxu0  ;;  %v1960_v14 = vpop.permute.xlu0 %1959  ;;  %v3186_v26 = vmax.f32 %v2914_v3, 0.0 }
 0x246   : > { %v2361_v22 = vmul.f32 %v10054_v19, %v1960_v14  ;;  %v2362_v24 = vmul.f32 %v10057_v20, %v1960_v14  ;;  %v1072_v25 = vpop.permute.xlu1 %1071  ;;  %2083 = vperm.xlu0 %9311, %v659_v2   ;;  %v3185_v47 = vmax.f32 %v2913_v5, 0.0 }
 0x247   : > { %v1532_v28 = vmul.f32 %v10046_v16, %v1072_v25  ;;  %v1533_v30 = vmul.f32 %v10049_v17, %v1072_v25  ;;  %1226 = vperm.xlu1 %9314, %v659_v2   ;;  %v10653_v31 = vpop.f32.mrf.mxu0  ;;  %3778 = vmatmul.mubr.f32.gmra.mxu0 %v3183_v58  ;;  %v2916_v36 = vadd.f32 %v10067_v29, %v2632_v8  ;;  %v661_v2 = vld [vmem:[%s9867_s26 + $0x368] sm:$0xff] }
 0x248   : > { %3782 = vmatprep.mubr.f32.mxu0 %v3186_v26  ;;  %v2915_v39 = vadd.f32 %v10061_v23, %v2631_v6 }
 0x249   : > { %v2633_v40 = vadd.f32 %v2361_v22, %v1532_v28  ;;  %v2634_v43 = vadd.f32 %v2362_v24, %v1533_v30  ;;  %v3541_v45 = vpop.f32.mrf.mxu0  ;;  %v1964_v46 = vpop.permute.xlu0 %1963  ;;  %v3188_v54 = vmax.f32 %v2916_v36, 0.0  ;;  %v662_v36 = vld [vmem:[%s9867_s26 + $0x370] sm:$0xff] }
 0x24a   : > { %v2363_v48 = vmul.f32 %v10054_v19, %v1964_v46  ;;  %v2364_v50 = vmul.f32 %v10057_v20, %v1964_v46  ;;  %v1077_v51 = vpop.permute.xlu1 %1076  ;;  %2087 = vperm.xlu0 %9311, %v660_v32   ;;  %v3187_v58 = vmax.f32 %v2915_v39, 0.0 }
 0x24b   : > { %v1534_v57 = vmul.f32 %v10046_v16, %v1077_v51  ;;  %v1535_v60 = vmul.f32 %v10049_v17, %v1077_v51  ;;  %1231 = vperm.xlu1 %9314, %v660_v32   ;;  %v10662_v61 = vpop.f32.mrf.mxu0  ;;  %3783 = vmatmul.mubr.f32.gmra.mxu0 %v3185_v47  ;;  %v2918_v3 = vadd.f32 %v10067_v29, %v2634_v43 }
 0x24c   : > { %3787 = vmatprep.mubr.f32.mxu0 %v3188_v54  ;;  %v2917_v5 = vadd.f32 %v10061_v23, %v2633_v40 }
 0x24d   : > { %v2635_v6 = vadd.f32 %v2363_v48, %v1534_v57  ;;  %v2636_v8 = vadd.f32 %v2364_v50, %v1535_v60  ;;  %v3546_v11 = vpop.f32.mrf.mxu0  ;;  %v1968_v14 = vpop.permute.xlu0 %1967  ;;  %v3190_v26 = vmax.f32 %v2918_v3, 0.0  ;;  %v10678_v60 = vld [vmem:[#allocation7] ss:$0 sm:$0xff] }
 0x24e   : > { %v2365_v22 = vmul.f32 %v10054_v19, %v1968_v14  ;;  %v2366_v24 = vmul.f32 %v10057_v20, %v1968_v14  ;;  %v1082_v25 = vpop.permute.xlu1 %1081  ;;  %2091 = vperm.xlu0 %9311, %v661_v2   ;;  %v3189_v48 = vmax.f32 %v2917_v5, 0.0 }
 0x24f   : > { %v1536_v28 = vmul.f32 %v10046_v16, %v1082_v25  ;;  %v1537_v30 = vmul.f32 %v10049_v17, %v1082_v25  ;;  %1236 = vperm.xlu1 %9314, %v661_v2   ;;  %v10671_v32 = vpop.f32.mrf.mxu0  ;;  %3788 = vmatmul.mubr.f32.gmra.mxu0 %v3187_v58  ;;  %v2920_v40 = vadd.f32 %v10067_v29, %v2636_v8  ;;  %v663_v8 = vld [vmem:[%s9867_s26 + $0x378] sm:$0xff] }
 0x250   : > { %3792 = vmatprep.mubr.f32.mxu0 %v3190_v26  ;;  %v2919_v39 = vadd.f32 %v10061_v23, %v2635_v6 }
 0x251   : > { %v2637_v43 = vadd.f32 %v2365_v22, %v1536_v28  ;;  %v2638_v45 = vadd.f32 %v2366_v24, %v1537_v30  ;;  %v3551_v46 = vpop.f32.mrf.mxu0  ;;  %v1972_v47 = vpop.permute.xlu0 %1971  ;;  %v3192_v57 = vmax.f32 %v2920_v40, 0.0 }
 0x252   : > { %v2367_v50 = vmul.f32 %v10054_v19, %v1972_v47  ;;  %v2368_v51 = vmul.f32 %v10057_v20, %v1972_v47  ;;  %v1087_v54 = vpop.permute.xlu1 %1086  ;;  %2095 = vperm.xlu0 %9311, %v662_v36   ;;  %v3191_v26 = vmax.f32 %v2919_v39, 0.0  ;;  %v664_v39 = vld [vmem:[%s9867_s26 + $0x380] sm:$0xff] }
 0x253   : > { %v1538_v2 = vmul.f32 %v10046_v16, %v1087_v54  ;;  %v1539_v3 = vmul.f32 %v10049_v17, %v1087_v54  ;;  %1241 = vperm.xlu1 %9314, %v662_v36   ;;  %v3554_v6 = vpop.f32.mrf.mxu0  ;;  %3793 = vmatmul.mubr.f32.gmra.mxu0 %v3189_v48  ;;  %v2922_v5 = vadd.f32 %v10067_v29, %v2638_v45  ;;  %v6106_v45 = vld [vmem:[%s13284_s7 + $0x78] sm:$0xff] }
 0x254   : > { %v3555_v11 = vadd.f32 %v10678_v60, %v3554_v6  ;;  %3797 = vmatprep.mubr.f32.mxu0 %v3192_v57  ;;  %v2921_v14 = vadd.f32 %v10061_v23, %v2637_v43 }
 0x255   : > { %v2639_v58 = vadd.f32 %v2367_v50, %v1538_v2  ;;  %v2640_v22 = vadd.f32 %v2368_v51, %v1539_v3  ;;  %v3556_v24 = vpop.f32.mrf.mxu0  ;;  %v1976_v25 = vpop.permute.xlu0 %1975  ;;  %v3194_v46 = vmax.f32 %v2922_v5, 0.0 }
 0x256   : > { %v4121_v28 = vmax.f32 %v3555_v11, 0.0  ;;  %v2369_v30 = vmul.f32 %v10054_v19, %v1976_v25  ;;  %v2370_v36 = vmul.f32 %v10057_v20, %v1976_v25  ;;  %v1092_v40 = vpop.permute.xlu1 %1091  ;;  %2099 = vperm.xlu0 %9311, %v663_v8   ;;  %v3193_v11 = vmax.f32 %v2921_v14, 0.0 }
 0x257   : > { %v1540_v43 = vmul.f32 %v10046_v16, %v1092_v40  ;;  %v1541_v47 = vmul.f32 %v10049_v17, %v1092_v40  ;;  %1246 = vperm.xlu1 %9314, %v663_v8   ;;  %v3559_v48 = vpop.f32.mrf.mxu0  ;;  %3798 = vmatmul.mubr.f32.gmra.mxu0 %v3191_v26  ;;  %v2924_v51 = vadd.f32 %v10067_v29, %v2640_v22 }
 0x258   : > { %v3560_v50 = vadd.f32 %v10678_v60, %v3559_v48  ;;  %3802 = vmatprep.mubr.f32.mxu0 %v3194_v46  ;;  %8547 = vmatmul.mubr.msk.f32.vlgmr.msra.gmra.mxu1 %vm4246_vm0, %v4121_v28  ;;  %v2923_v54 = vadd.f32 %v10061_v23, %v2639_v58  ;;  %v6105_v58 = vld [vmem:[%s13284_s7 + $0x70] sm:$0xff] }
 0x259   : > { %v2641_v57 = vadd.f32 %v2369_v30, %v1540_v43  ;;  %v2642_v2 = vadd.f32 %v2370_v36, %v1541_v47  ;;  %v3561_v3 = vpop.f32.mrf.mxu0  ;;  %v1980_v6 = vpop.permute.xlu0 %1979  ;;  %4893 = vmatprep.mubr.f32.mxu1 %v13295_v1  ;;  %6131 = vmatpush1.msra.mxu1 %v6106_v45  ;;  %v3196_v26 = vmax.f32 %v2924_v51, 0.0  ;;  %v665_v30 = vld [vmem:[%s9867_s26 + $0x388] sm:$0xff] }
 0x25a   : > { %v4122_v8 = vmax.f32 %v3560_v50, 0.0  ;;  %v2371_v5 = vmul.f32 %v10054_v19, %v1980_v6  ;;  %v2372_v24 = vmul.f32 %v10057_v20, %v1980_v6  ;;  %v1097_v25 = vpop.permute.xlu1 %1096  ;;  %2103 = vperm.xlu0 %9311, %v664_v39   ;;  %6132 = vmatprep.subr.mxu1 %v13295_v1  ;;  %v3195_v50 = vmax.f32 %v2923_v54, 0.0 }
 0x25b   : > { %v1542_v14 = vmul.f32 %v10046_v16, %v1097_v25  ;;  %v1543_v22 = vmul.f32 %v10049_v17, %v1097_v25  ;;  %1251 = vperm.xlu1 %9314, %v664_v39   ;;  %v3564_v28 = vpop.f32.mrf.mxu0  ;;  %3803 = vmatmul.mubr.f32.gmra.mxu0 %v3193_v11  ;;  %v2926_v40 = vadd.f32 %v10067_v29, %v2642_v2 }
 0x25c   : > { %v3565_v36 = vadd.f32 %v10678_v60, %v3564_v28  ;;  %3807 = vmatprep.mubr.f32.mxu0 %v3196_v26  ;;  %8548 = vmatmul.mubr.msk.f32.gmra.mxu1 %vm4246_vm0, %v4122_v8  ;;  %v2925_v46 = vadd.f32 %v10061_v23, %v2641_v57  ;;  %v6104_v57 = vld [vmem:[%s13284_s7 + $0x68] sm:$0xff] }
 0x25d   : > { %v2643_v45 = vadd.f32 %v2371_v5, %v1542_v14  ;;  %v2644_v43 = vadd.f32 %v2372_v24, %v1543_v22  ;;  %v3566_v47 = vpop.f32.mrf.mxu0  ;;  %v1984_v48 = vpop.permute.xlu0 %1983  ;;  %4899 = vmatprep.mubr.f32.mxu1 %v13295_v1  ;;  %6133 = vmatpush1.msra.mxu1 %v6105_v58  ;;  %v3198_v11 = vmax.f32 %v2926_v40, 0.0  ;;  %v666_v5 = vld [vmem:[%s9867_s26 + $0x390] sm:$0xff] }
 0x25e   : > { %v4123_v39 = vmax.f32 %v3565_v36, 0.0  ;;  %v2373_v51 = vmul.f32 %v10054_v19, %v1984_v48  ;;  %v2374_v3 = vmul.f32 %v10057_v20, %v1984_v48  ;;  %v1102_v6 = vpop.permute.xlu1 %1101  ;;  %2107 = vperm.xlu0 %9311, %v665_v30   ;;  %6134 = vmatprep.subr.mxu1 %v13295_v1  ;;  %v3197_v36 = vmax.f32 %v2925_v46, 0.0 }
 0x25f   : > { %v1544_v54 = vmul.f32 %v10046_v16, %v1102_v6  ;;  %v1545_v2 = vmul.f32 %v10049_v17, %v1102_v6  ;;  %1256 = vperm.xlu1 %9314, %v665_v30   ;;  %v3569_v8 = vpop.f32.mrf.mxu0  ;;  %3808 = vmatmul.mubr.f32.gmra.mxu0 %v3195_v50  ;;  %v2928_v25 = vadd.f32 %v10067_v29, %v2644_v43 }
 0x260   : > { %v3570_v24 = vadd.f32 %v10678_v60, %v3569_v8  ;;  %3812 = vmatprep.mubr.f32.mxu0 %v3198_v11  ;;  %8549 = vmatmul.mubr.msk.f32.gmra.mxu1 %vm4246_vm0, %v4123_v39  ;;  %v2927_v26 = vadd.f32 %v10061_v23, %v2643_v45  ;;  %v6103_v45 = vld [vmem:[%s13284_s7 + $0x60] sm:$0xff] }
 0x261   : > { %v2645_v58 = vadd.f32 %v2373_v51, %v1544_v54  ;;  %v2646_v14 = vadd.f32 %v2374_v3, %v1545_v2  ;;  %v3571_v22 = vpop.f32.mrf.mxu0  ;;  %v1988_v28 = vpop.permute.xlu0 %1987  ;;  %4905 = vmatprep.mubr.f32.mxu1 %v13295_v1  ;;  %6135 = vmatpush1.msra.mxu1 %v6104_v57  ;;  %v3200_v50 = vmax.f32 %v2928_v25, 0.0  ;;  %v667_v51 = vld [vmem:[%s9867_s26 + $0x398] sm:$0xff] }
 0x262   : > { %v4124_v30 = vmax.f32 %v3570_v24, 0.0  ;;  %v2375_v40 = vmul.f32 %v10054_v19, %v1988_v28  ;;  %v2376_v47 = vmul.f32 %v10057_v20, %v1988_v28  ;;  %v1107_v48 = vpop.permute.xlu1 %1106  ;;  %2111 = vperm.xlu0 %9311, %v666_v5   ;;  %6136 = vmatprep.subr.mxu1 %v13295_v1  ;;  %v3199_v24 = vmax.f32 %v2927_v26, 0.0 }
 0x263   : > { %v1546_v46 = vmul.f32 %v10046_v16, %v1107_v48  ;;  %v1547_v43 = vmul.f32 %v10049_v17, %v1107_v48  ;;  %1261 = vperm.xlu1 %9314, %v666_v5   ;;  %v3574_v39 = vpop.f32.mrf.mxu0  ;;  %3813 = vmatmul.mubr.f32.gmra.mxu0 %v3197_v36  ;;  %v2930_v6 = vadd.f32 %v10067_v29, %v2646_v14 }
 0x264   : > { %v3575_v3 = vadd.f32 %v10678_v60, %v3574_v39  ;;  %3817 = vmatprep.mubr.f32.mxu0 %v3200_v50  ;;  %8550 = vmatmul.mubr.msk.f32.gmra.mxu1 %vm4246_vm0, %v4124_v30  ;;  %v2929_v11 = vadd.f32 %v10061_v23, %v2645_v58  ;;  %v6102_v58 = vld [vmem:[%s13284_s7 + $0x58] sm:$0xff] }
 0x265   : > { %v2647_v57 = vadd.f32 %v2375_v40, %v1546_v46  ;;  %v2648_v54 = vadd.f32 %v2376_v47, %v1547_v43  ;;  %v3576_v2 = vpop.f32.mrf.mxu0  ;;  %v1992_v8 = vpop.permute.xlu0 %1991  ;;  %4911 = vmatprep.mubr.f32.mxu1 %v13295_v1  ;;  %6137 = vmatpush1.msra.mxu1 %v6103_v45  ;;  %v3202_v36 = vmax.f32 %v2930_v6, 0.0  ;;  %v668_v40 = vld [vmem:[%s9867_s26 + $0x3a0] sm:$0xff] }
 0x266   : > { %v4125_v5 = vmax.f32 %v3575_v3, 0.0  ;;  %v2377_v25 = vmul.f32 %v10054_v19, %v1992_v8  ;;  %v2378_v22 = vmul.f32 %v10057_v20, %v1992_v8  ;;  %v1112_v28 = vpop.permute.xlu1 %1111  ;;  %2115 = vperm.xlu0 %9311, %v667_v51   ;;  %6138 = vmatprep.subr.mxu1 %v13295_v1  ;;  %v3201_v3 = vmax.f32 %v2929_v11, 0.0 }
 0x267   : > { %v1548_v26 = vmul.f32 %v10046_v16, %v1112_v28  ;;  %v1549_v14 = vmul.f32 %v10049_v17, %v1112_v28  ;;  %1266 = vperm.xlu1 %9314, %v667_v51   ;;  %v3579_v30 = vpop.f32.mrf.mxu0  ;;  %3818 = vmatmul.mubr.f32.gmra.mxu0 %v3199_v24  ;;  %v2932_v48 = vadd.f32 %v10067_v29, %v2648_v54 }
 0x268   : > { %v3580_v47 = vadd.f32 %v10678_v60, %v3579_v30  ;;  %3822 = vmatprep.mubr.f32.mxu0 %v3202_v36  ;;  %8551 = vmatmul.mubr.msk.f32.gmra.mxu1 %vm4246_vm0, %v4125_v5  ;;  %v2931_v50 = vadd.f32 %v10061_v23, %v2647_v57  ;;  %v6101_v57 = vld [vmem:[%s13284_s7 + $0x50] sm:$0xff] }
 0x269   : > { %v2649_v45 = vadd.f32 %v2377_v25, %v1548_v26  ;;  %v2650_v46 = vadd.f32 %v2378_v22, %v1549_v14  ;;  %v3581_v43 = vpop.f32.mrf.mxu0  ;;  %v1996_v39 = vpop.permute.xlu0 %1995  ;;  %4917 = vmatprep.mubr.f32.mxu1 %v13295_v1  ;;  %6139 = vmatpush1.msra.mxu1 %v6102_v58  ;;  %v3204_v24 = vmax.f32 %v2932_v48, 0.0  ;;  %v669_v25 = vld [vmem:[%s9867_s26 + $0x3a8] sm:$0xff] }
 0x26a   : > { %v4126_v51 = vmax.f32 %v3580_v47, 0.0  ;;  %v2379_v6 = vmul.f32 %v10054_v19, %v1996_v39  ;;  %v2380_v2 = vmul.f32 %v10057_v20, %v1996_v39  ;;  %v1117_v8 = vpop.permute.xlu1 %1116  ;;  %2119 = vperm.xlu0 %9311, %v668_v40   ;;  %6140 = vmatprep.subr.mxu1 %v13295_v1  ;;  %v3203_v47 = vmax.f32 %v2931_v50, 0.0 }
 0x26b   : > { %v1550_v11 = vmul.f32 %v10046_v16, %v1117_v8  ;;  %v1551_v54 = vmul.f32 %v10049_v17, %v1117_v8  ;;  %1271 = vperm.xlu1 %9314, %v668_v40   ;;  %v3584_v5 = vpop.f32.mrf.mxu0  ;;  %3823 = vmatmul.mubr.f32.gmra.mxu0 %v3201_v3  ;;  %v2934_v28 = vadd.f32 %v10067_v29, %v2650_v46 }
 0x26c   : > { %v3585_v22 = vadd.f32 %v10678_v60, %v3584_v5  ;;  %3827 = vmatprep.mubr.f32.mxu0 %v3204_v24  ;;  %8552 = vmatmul.mubr.msk.f32.gmra.mxu1 %vm4246_vm0, %v4126_v51  ;;  %v2933_v36 = vadd.f32 %v10061_v23, %v2649_v45  ;;  %v6100_v45 = vld [vmem:[%s13284_s7 + $0x48] sm:$0xff] }
 0x26d   : > { %v2651_v58 = vadd.f32 %v2379_v6, %v1550_v11  ;;  %v2652_v26 = vadd.f32 %v2380_v2, %v1551_v54  ;;  %v3586_v14 = vpop.f32.mrf.mxu0  ;;  %v2000_v30 = vpop.permute.xlu0 %1999  ;;  %4923 = vmatprep.mubr.f32.mxu1 %v13295_v1  ;;  %6141 = vmatpush1.msra.mxu1 %v6101_v57  ;;  %v3206_v3 = vmax.f32 %v2934_v28, 0.0  ;;  %v670_v6 = vld [vmem:[%s9867_s26 + $0x3b0] sm:$0xff] }
 0x26e   : > { %v4127_v40 = vmax.f32 %v3585_v22, 0.0  ;;  %v2381_v48 = vmul.f32 %v10054_v19, %v2000_v30  ;;  %v2382_v43 = vmul.f32 %v10057_v20, %v2000_v30  ;;  %v1122_v39 = vpop.permute.xlu1 %1121  ;;  %2123 = vperm.xlu0 %9311, %v669_v25   ;;  %6142 = vmatprep.subr.mxu1 %v13295_v1  ;;  %v3205_v22 = vmax.f32 %v2933_v36, 0.0 }
 0x26f   : > { %v1552_v50 = vmul.f32 %v10046_v16, %v1122_v39  ;;  %v1553_v46 = vmul.f32 %v10049_v17, %v1122_v39  ;;  %1276 = vperm.xlu1 %9314, %v669_v25   ;;  %v3589_v51 = vpop.f32.mrf.mxu0  ;;  %3828 = vmatmul.mubr.f32.gmra.mxu0 %v3203_v47  ;;  %v2936_v8 = vadd.f32 %v10067_v29, %v2652_v26 }
 0x270   : > { %v3590_v2 = vadd.f32 %v10678_v60, %v3589_v51  ;;  %3832 = vmatprep.mubr.f32.mxu0 %v3206_v3  ;;  %8553 = vmatmul.mubr.msk.f32.gmra.mxu1 %vm4246_vm0, %v4127_v40  ;;  %v2935_v24 = vadd.f32 %v10061_v23, %v2651_v58  ;;  %v6099_v58 = vld [vmem:[%s13284_s7 + $0x40] sm:$0xff] }
 0x271   : > { %v2653_v57 = vadd.f32 %v2381_v48, %v1552_v50  ;;  %v2654_v11 = vadd.f32 %v2382_v43, %v1553_v46  ;;  %v3591_v54 = vpop.f32.mrf.mxu0  ;;  %v2004_v5 = vpop.permute.xlu0 %2003  ;;  %4929 = vmatprep.mubr.f32.mxu1 %v13295_v1  ;;  %6143 = vmatpush1.msra.mxu1 %v6100_v45  ;;  %v3208_v47 = vmax.f32 %v2936_v8, 0.0  ;;  %v671_v48 = vld [vmem:[%s9867_s26 + $0x3b8] sm:$0xff] }
 0x272   : > { %v4128_v25 = vmax.f32 %v3590_v2, 0.0  ;;  %v2383_v28 = vmul.f32 %v10054_v19, %v2004_v5  ;;  %v2384_v14 = vmul.f32 %v10057_v20, %v2004_v5  ;;  %v1127_v30 = vpop.permute.xlu1 %1126  ;;  %2127 = vperm.xlu0 %9311, %v670_v6   ;;  %6144 = vmatprep.subr.mxu1 %v13295_v1  ;;  %v3207_v2 = vmax.f32 %v2935_v24, 0.0 }
 0x273   : > { %v1554_v36 = vmul.f32 %v10046_v16, %v1127_v30  ;;  %v1555_v26 = vmul.f32 %v10049_v17, %v1127_v30  ;;  %1281 = vperm.xlu1 %9314, %v670_v6   ;;  %v3594_v40 = vpop.f32.mrf.mxu0  ;;  %3833 = vmatmul.mubr.f32.gmra.mxu0 %v3205_v22  ;;  %v2938_v39 = vadd.f32 %v10067_v29, %v2654_v11 }
 0x274   : > { %v3595_v43 = vadd.f32 %v10678_v60, %v3594_v40  ;;  %3837 = vmatprep.mubr.f32.mxu0 %v3208_v47  ;;  %8554 = vmatmul.mubr.msk.f32.gmra.mxu1 %vm4246_vm0, %v4128_v25  ;;  %v2937_v3 = vadd.f32 %v10061_v23, %v2653_v57  ;;  %v6098_v57 = vld [vmem:[%s13284_s7 + $0x38] sm:$0xff] }
 0x275   : > { %v2655_v45 = vadd.f32 %v2383_v28, %v1554_v36  ;;  %v2656_v50 = vadd.f32 %v2384_v14, %v1555_v26  ;;  %v3596_v46 = vpop.f32.mrf.mxu0  ;;  %v2008_v51 = vpop.permute.xlu0 %2007  ;;  %4935 = vmatprep.mubr.f32.mxu1 %v13295_v1  ;;  %6145 = vmatpush1.msra.mxu1 %v6099_v58  ;;  %v3210_v22 = vmax.f32 %v2938_v39, 0.0  ;;  %v672_v28 = vld [vmem:[%s9867_s26 + $0x3c0] sm:$0xff] }
 0x276   : > { %v4129_v6 = vmax.f32 %v3595_v43, 0.0  ;;  %v2385_v8 = vmul.f32 %v10054_v19, %v2008_v51  ;;  %v2386_v54 = vmul.f32 %v10057_v20, %v2008_v51  ;;  %v1132_v5 = vpop.permute.xlu1 %1131  ;;  %2131 = vperm.xlu0 %9311, %v671_v48   ;;  %6146 = vmatprep.subr.mxu1 %v13295_v1  ;;  %v3209_v43 = vmax.f32 %v2937_v3, 0.0 }
 0x277   : > { %v1556_v24 = vmul.f32 %v10046_v16, %v1132_v5  ;;  %v1557_v11 = vmul.f32 %v10049_v17, %v1132_v5  ;;  %1286 = vperm.xlu1 %9314, %v671_v48   ;;  %v3599_v25 = vpop.f32.mrf.mxu0  ;;  %3838 = vmatmul.mubr.f32.gmra.mxu0 %v3207_v2  ;;  %v2940_v30 = vadd.f32 %v10067_v29, %v2656_v50 }
 0x278   : > { %v3600_v14 = vadd.f32 %v10678_v60, %v3599_v25  ;;  %3842 = vmatprep.mubr.f32.mxu0 %v3210_v22  ;;  %8555 = vmatmul.mubr.msk.f32.gmra.mxu1 %vm4246_vm0, %v4129_v6  ;;  %v2939_v47 = vadd.f32 %v10061_v23, %v2655_v45  ;;  %v6097_v45 = vld [vmem:[%s13284_s7 + $0x30] sm:$0xff] }
 0x279   : > { %v2657_v58 = vadd.f32 %v2385_v8, %v1556_v24  ;;  %v2658_v36 = vadd.f32 %v2386_v54, %v1557_v11  ;;  %v3601_v26 = vpop.f32.mrf.mxu0  ;;  %v2012_v40 = vpop.permute.xlu0 %2011  ;;  %4941 = vmatprep.mubr.f32.mxu1 %v13295_v1  ;;  %6147 = vmatpush1.msra.mxu1 %v6098_v57  ;;  %v3212_v2 = vmax.f32 %v2940_v30, 0.0  ;;  %v673_v8 = vld [vmem:[%s9867_s26 + $0x3c8] sm:$0xff] }
 0x27a   : > { %v4130_v48 = vmax.f32 %v3600_v14, 0.0  ;;  %v2387_v39 = vmul.f32 %v10054_v19, %v2012_v40  ;;  %v2388_v46 = vmul.f32 %v10057_v20, %v2012_v40  ;;  %v1137_v51 = vpop.permute.xlu1 %1136  ;;  %2135 = vperm.xlu0 %9311, %v672_v28   ;;  %6148 = vmatprep.subr.mxu1 %v13295_v1  ;;  %v3211_v22 = vmax.f32 %v2939_v47, 0.0  ;;  %v6096_v47 = vld [vmem:[%s13284_s7 + $0x28] sm:$0xff] }
 0x27b   : > { %v1558_v3 = vmul.f32 %v10046_v16, %v1137_v51  ;;  %v1559_v50 = vmul.f32 %v10049_v17, %v1137_v51  ;;  %1291 = vperm.xlu1 %9314, %v672_v28   ;;  %v3604_v6 = vpop.f32.mrf.mxu0  ;;  %3843 = vmatmul.mubr.f32.gmra.mxu0 %v3209_v43  ;;  %v2942_v5 = vadd.f32 %v10067_v29, %v2658_v36 }
 0x27c   : > { %v3605_v54 = vadd.f32 %v10678_v60, %v3604_v6  ;;  %3847 = vmatprep.mubr.f32.mxu0 %v3212_v2  ;;  %8556 = vmatmul.mubr.msk.f32.gmra.mxu1 %vm4246_vm0, %v4130_v48  ;;  %v2941_v57 = vadd.f32 %v10061_v23, %v2657_v58 }
 0x27d   : > { %v2659_v24 = vadd.f32 %v2387_v39, %v1558_v3  ;;  %v2660_v11 = vadd.f32 %v2388_v46, %v1559_v50  ;;  %v3606_v25 = vpop.f32.mrf.mxu0  ;;  %v2016_v14 = vpop.permute.xlu0 %2015  ;;  %4947 = vmatprep.mubr.f32.mxu1 %v13295_v1  ;;  %6149 = vmatpush1.msra.mxu1 %v6097_v45  ;;  %v3214_v43 = vmax.f32 %v2942_v5, 0.0  ;;  %v674_v39 = vld [vmem:[%s9867_s26 + $0x3d0] sm:$0xff] }
 0x27e   : > { %v4131_v28 = vmax.f32 %v3605_v54, 0.0  ;;  %v2389_v30 = vmul.f32 %v10054_v19, %v2016_v14  ;;  %v2390_v26 = vmul.f32 %v10057_v20, %v2016_v14  ;;  %v1142_v40 = vpop.permute.xlu1 %1141  ;;  %2139 = vperm.xlu0 %9311, %v673_v8   ;;  %6150 = vmatprep.subr.mxu1 %v13295_v1  ;;  %v3213_v2 = vmax.f32 %v2941_v57, 0.0  ;;  %v6095_v57 = vld [vmem:[%s13284_s7 + $0x20] sm:$0xff] }
 0x27f   : > { %v1560_v58 = vmul.f32 %v10046_v16, %v1142_v40  ;;  %v1561_v36 = vmul.f32 %v10049_v17, %v1142_v40  ;;  %1296 = vperm.xlu1 %9314, %v673_v8   ;;  %v3609_v48 = vpop.f32.mrf.mxu0  ;;  %3848 = vmatmul.mubr.f32.gmra.mxu0 %v3211_v22  ;;  %v2944_v51 = vadd.f32 %v10067_v29, %v2660_v11 }
 0x280   : > { %v3610_v46 = vadd.f32 %v10678_v60, %v3609_v48  ;;  %3852 = vmatprep.mubr.f32.mxu0 %v3214_v43  ;;  %8557 = vmatmul.mubr.msk.f32.gmra.mxu1 %vm4246_vm0, %v4131_v28  ;;  %v2943_v45 = vadd.f32 %v10061_v23, %v2659_v24 }
 0x281   : > { %v2661_v3 = vadd.f32 %v2389_v30, %v1560_v58  ;;  %v2662_v50 = vadd.f32 %v2390_v26, %v1561_v36  ;;  %v3611_v6 = vpop.f32.mrf.mxu0  ;;  %v2020_v54 = vpop.permute.xlu0 %2019  ;;  %4953 = vmatprep.mubr.f32.mxu1 %v13295_v1  ;;  %6151 = vmatpush1.msra.mxu1 %v6096_v47  ;;  %v3216_v14 = vmax.f32 %v2944_v51, 0.0  ;;  %v675_v30 = vld [vmem:[%s9867_s26 + $0x3d8] sm:$0xff] }
 0x282   : > { %v4132_v8 = vmax.f32 %v3610_v46, 0.0  ;;  %v2391_v5 = vmul.f32 %v10054_v19, %v2020_v54  ;;  %v2392_v22 = vmul.f32 %v10057_v20, %v2020_v54  ;;  %v1147_v25 = vpop.permute.xlu1 %1146  ;;  %2143 = vperm.xlu0 %9311, %v674_v39   ;;  %6152 = vmatprep.subr.mxu1 %v13295_v1  ;;  %v3215_v43 = vmax.f32 %v2943_v45, 0.0  ;;  %v6094_v45 = vld [vmem:[%s13284_s7 + $0x18] sm:$0xff] }
 0x283   : > { %v1562_v24 = vmul.f32 %v10046_v16, %v1147_v25  ;;  %v1563_v11 = vmul.f32 %v10049_v17, %v1147_v25  ;;  %1301 = vperm.xlu1 %9314, %v674_v39   ;;  %v3614_v28 = vpop.f32.mrf.mxu0  ;;  %3853 = vmatmul.mubr.f32.gmra.mxu0 %v3213_v2  ;;  %v2946_v40 = vadd.f32 %v10067_v29, %v2662_v50 }
 0x284   : > { %v3615_v26 = vadd.f32 %v10678_v60, %v3614_v28  ;;  %3857 = vmatprep.mubr.f32.mxu0 %v3216_v14  ;;  %8558 = vmatmul.mubr.msk.f32.gmra.mxu1 %vm4246_vm0, %v4132_v8  ;;  %v2945_v47 = vadd.f32 %v10061_v23, %v2661_v3 }
 0x285   : > { %v2663_v58 = vadd.f32 %v2391_v5, %v1562_v24  ;;  %v2664_v36 = vadd.f32 %v2392_v22, %v1563_v11  ;;  %v3616_v48 = vpop.f32.mrf.mxu0  ;;  %v2024_v46 = vpop.permute.xlu0 %2023  ;;  %4959 = vmatprep.mubr.f32.mxu1 %v13295_v1  ;;  %6153 = vmatpush1.msra.mxu1 %v6095_v57  ;;  %v3218_v54 = vmax.f32 %v2946_v40, 0.0  ;;  %v676_v5 = vld [vmem:[%s9867_s26 + $0x3e0] sm:$0xff] }
 0x286   : > { %v4133_v39 = vmax.f32 %v3615_v26, 0.0  ;;  %v2393_v51 = vmul.f32 %v10054_v19, %v2024_v46  ;;  %v2394_v2 = vmul.f32 %v10057_v20, %v2024_v46  ;;  %v1152_v6 = vpop.permute.xlu1 %1151  ;;  %2147 = vperm.xlu0 %9311, %v675_v30   ;;  %6154 = vmatprep.subr.mxu1 %v13295_v1  ;;  %v3217_v14 = vmax.f32 %v2945_v47, 0.0 }
 0x287   : > { %v1564_v3 = vmul.f32 %v10046_v16, %v1152_v6  ;;  %v1565_v50 = vmul.f32 %v10049_v17, %v1152_v6  ;;  %1306 = vperm.xlu1 %9314, %v675_v30   ;;  %v3619_v8 = vpop.f32.mrf.mxu0  ;;  %3858 = vmatmul.mubr.f32.gmra.mxu0 %v3215_v43  ;;  %v2948_v25 = vadd.f32 %v10067_v29, %v2664_v36 }
 0x288   : > { %v3620_v22 = vadd.f32 %v10678_v60, %v3619_v8  ;;  %3862 = vmatprep.mubr.f32.mxu0 %v3218_v54  ;;  %8559 = vmatmul.mubr.msk.f32.gmra.mxu1 %vm4246_vm0, %v4133_v39  ;;  %v2947_v57 = vadd.f32 %v10061_v23, %v2663_v58  ;;  %v677_v39 = vld [vmem:[%s9867_s26 + $0x3e8] sm:$0xff] }
 0x289   : > { %v2665_v24 = vadd.f32 %v2393_v51, %v1564_v3  ;;  %v2666_v11 = vadd.f32 %v2394_v2, %v1565_v50  ;;  %v3621_v28 = vpop.f32.mrf.mxu0  ;;  %v2028_v26 = vpop.permute.xlu0 %2027  ;;  %4965 = vmatprep.mubr.f32.mxu1 %v13295_v1  ;;  %6155 = vmatpush1.msra.mxu1 %v6094_v45  ;;  %v3220_v46 = vmax.f32 %v2948_v25, 0.0 }
 0x28a   : > { %v4134_v30 = vmax.f32 %v3620_v22, 0.0  ;;  %v2395_v40 = vmul.f32 %v10054_v19, %v2028_v26  ;;  %v2396_v43 = vmul.f32 %v10057_v20, %v2028_v26  ;;  %v1157_v48 = vpop.permute.xlu1 %1156  ;;  %2151 = vperm.xlu0 %9311, %v676_v5   ;;  %6156 = vmatprep.subr.mxu1 %v13295_v1  ;;  %v3219_v6 = vmax.f32 %v2947_v57, 0.0  ;;  %v678_v26 = vld [vmem:[%s9867_s26 + $0x3f0] sm:$0xff] }
 0x28b   : > { %v1566_v47 = vmul.f32 %v10046_v16, %v1157_v48  ;;  %v1567_v58 = vmul.f32 %v10049_v17, %v1157_v48  ;;  %1311 = vperm.xlu1 %9314, %v676_v5   ;;  %v3624_v36 = vpop.f32.mrf.mxu0  ;;  %3863 = vmatmul.mubr.f32.gmra.mxu0 %v3217_v14  ;;  %v2950_v2 = vadd.f32 %v10067_v29, %v2666_v11 }
 0x28c   : > { %v3625_v51 = vadd.f32 %v10678_v60, %v3624_v36  ;;  %3867 = vmatprep.mubr.f32.mxu0 %v3220_v46  ;;  %8560 = vmatmul.mubr.msk.f32.gmra.mxu1 %vm4246_vm0, %v4134_v30  ;;  %v2949_v54 = vadd.f32 %v10061_v23, %v2665_v24 }
 0x28d   : > { %v2667_v45 = vadd.f32 %v2395_v40, %v1566_v47  ;;  %v2668_v3 = vadd.f32 %v2396_v43, %v1567_v58  ;;  %v3626_v50 = vpop.f32.mrf.mxu0  ;;  %v2032_v8 = vpop.permute.xlu0 %2031  ;;  %4971 = vmatprep.mubr.f32.mxu1 %v13295_v1  ;;  %v3222_v28 = vmax.f32 %v2950_v2, 0.0 }
 0x28e   : > { %v4135_v5 = vmax.f32 %v3625_v51, 0.0  ;;  %v2397_v22 = vmul.f32 %v10054_v19, %v2032_v8  ;;  %v2398_v25 = vmul.f32 %v10057_v20, %v2032_v8  ;;  %v1162_v14 = vpop.permute.xlu1 %1161  ;;  %2155 = vperm.xlu0 %9311, %v677_v39   ;;  %v3221_v43 = vmax.f32 %v2949_v54, 0.0 }
 0x28f   : > { %v1568_v11 = vmul.f32 %v10046_v16, %v1162_v14  ;;  %v1569_v57 = vmul.f32 %v10049_v17, %v1162_v14  ;;  %1316 = vperm.xlu1 %9314, %v677_v39   ;;  %v3629_v24 = vpop.f32.mrf.mxu0  ;;  %3868 = vmatmul.mubr.f32.gmra.mxu0 %v3219_v6  ;;  %v2952_v40 = vadd.f32 %v10067_v29, %v2668_v3  ;;  %v6093_v39 = vld [vmem:[%s13284_s7 + $0x10] sm:$0xff] }
 0x290   : > { %v3630_v30 = vadd.f32 %v10678_v60, %v3629_v24  ;;  %3872 = vmatprep.mubr.f32.mxu0 %v3222_v28  ;;  %8561 = vmatmul.mubr.msk.f32.gmra.mxu1 %vm4246_vm0, %v4135_v5  ;;  %v2951_v48 = vadd.f32 %v10061_v23, %v2667_v45  ;;  %v679_v5 = vld [vmem:[%s9867_s26 + $0x3f8] sm:$0xff] }
 0x291   : > { %v2669_v46 = vadd.f32 %v2397_v22, %v1568_v11  ;;  %v2670_v47 = vadd.f32 %v2398_v25, %v1569_v57  ;;  %v3631_v58 = vpop.f32.mrf.mxu0  ;;  %v2036_v36 = vpop.permute.xlu0 %2035  ;;  %4977 = vmatprep.mubr.f32.mxu1 %v13295_v1  ;;  %v3224_v54 = vmax.f32 %v2952_v40, 0.0  ;;  %6157 = vmatpush1.msra.mxu1 %v6093_v39  ;;  %v680_v39 = vld [vmem:[%s9867_s26 + $0x400] sm:$0xff] }
 0x292   : > { %v4136_v51 = vmax.f32 %v3630_v30, 0.0  ;;  %v2399_v2 = vmul.f32 %v10054_v19, %v2036_v36  ;;  %v2400_v6 = vmul.f32 %v10057_v20, %v2036_v36  ;;  %v1167_v3 = vpop.permute.xlu1 %1166  ;;  %2159 = vperm.xlu0 %9311, %v678_v26   ;;  %v3223_v14 = vmax.f32 %v2951_v48, 0.0  ;;  %6158 = vmatprep.subr.mxu1 %v13295_v1 }
 0x293   : > { %v1570_v45 = vmul.f32 %v10046_v16, %v1167_v3  ;;  %v1571_v50 = vmul.f32 %v10049_v17, %v1167_v3  ;;  %1321 = vperm.xlu1 %9314, %v678_v26   ;;  %v3634_v8 = vpop.f32.mrf.mxu0  ;;  %3873 = vmatmul.mubr.f32.gmra.mxu0 %v3221_v43  ;;  %v2954_v25 = vadd.f32 %v10067_v29, %v2670_v47 }
 0x294   : > { %v3635_v22 = vadd.f32 %v10678_v60, %v3634_v8  ;;  %3877 = vmatprep.mubr.f32.mxu0 %v3224_v54  ;;  %8562 = vmatmul.mubr.msk.f32.gmra.mxu1 %vm4246_vm0, %v4136_v51  ;;  %v2953_v28 = vadd.f32 %v10061_v23, %v2669_v46 }
 0x295   : > { %v2671_v11 = vadd.f32 %v2399_v2, %v1570_v45  ;;  %v2672_v57 = vadd.f32 %v2400_v6, %v1571_v50  ;;  %v3636_v24 = vpop.f32.mrf.mxu0  ;;  %v2040_v30 = vpop.permute.xlu0 %2039  ;;  %4983 = vmatprep.mubr.f32.mxu1 %v13295_v1  ;;  %v3226_v47 = vmax.f32 %v2954_v25, 0.0 }
 0x296   : > { %v4137_v26 = vmax.f32 %v3635_v22, 0.0  ;;  %v2401_v40 = vmul.f32 %v10054_v19, %v2040_v30  ;;  %v2402_v43 = vmul.f32 %v10057_v20, %v2040_v30  ;;  %v1172_v58 = vpop.permute.xlu1 %1171  ;;  %2163 = vperm.xlu0 %9311, %v679_v5   ;;  %v3225_v6 = vmax.f32 %v2953_v28, 0.0  ;;  %v681_v30 = vld [vmem:[%s9867_s26 + $0x408] sm:$0xff] }
 0x297   : > { %v1572_v48 = vmul.f32 %v10046_v16, %v1172_v58  ;;  %v1573_v46 = vmul.f32 %v10049_v17, %v1172_v58  ;;  %1326 = vperm.xlu1 %9314, %v679_v5   ;;  %v3639_v36 = vpop.f32.mrf.mxu0  ;;  %3878 = vmatmul.mubr.f32.gmra.mxu0 %v3223_v14  ;;  %v2956_v2 = vadd.f32 %v10067_v29, %v2672_v57 }
 0x298   : > { %v3640_v51 = vadd.f32 %v10678_v60, %v3639_v36  ;;  %3882 = vmatprep.mubr.f32.mxu0 %v3226_v47  ;;  %8563 = vmatmul.mubr.msk.f32.gmra.mxu1 %vm4246_vm0, %v4137_v26  ;;  %v2955_v3 = vadd.f32 %v10061_v23, %v2671_v11 }
 0x299   : > { %v2673_v54 = vadd.f32 %v2401_v40, %v1572_v48  ;;  %v2674_v45 = vadd.f32 %v2402_v43, %v1573_v46  ;;  %v3641_v50 = vpop.f32.mrf.mxu0  ;;  %v2044_v8 = vpop.permute.xlu0 %2043  ;;  %4989 = vmatprep.mubr.f32.mxu1 %v13295_v1  ;;  %v3228_v24 = vmax.f32 %v2956_v2, 0.0 }
 0x29a   : > { %v4138_v5 = vmax.f32 %v3640_v51, 0.0  ;;  %v2403_v22 = vmul.f32 %v10054_v19, %v2044_v8  ;;  %v2404_v25 = vmul.f32 %v10057_v20, %v2044_v8  ;;  %v1177_v14 = vpop.permute.xlu1 %1176  ;;  %2167 = vperm.xlu0 %9311, %v680_v39   ;;  %v3227_v43 = vmax.f32 %v2955_v3, 0.0 }
 0x29b   : > { %v1574_v57 = vmul.f32 %v10046_v16, %v1177_v14  ;;  %v1575_v28 = vmul.f32 %v10049_v17, %v1177_v14  ;;  %1331 = vperm.xlu1 %9314, %v680_v39   ;;  %v3644_v11 = vpop.f32.mrf.mxu0  ;;  %3883 = vmatmul.mubr.f32.gmra.mxu0 %v3225_v6  ;;  %v2958_v40 = vadd.f32 %v10067_v29, %v2674_v45  ;;  %v6092_v39 = vld [vmem:[%s13284_s7 + $0x8] sm:$0xff] }
 0x29c   : > { %v3645_v26 = vadd.f32 %v10678_v60, %v3644_v11  ;;  %3887 = vmatprep.mubr.f32.mxu0 %v3228_v24  ;;  %8564 = vmatmul.mubr.msk.f32.gmra.mxu1 %vm4246_vm0, %v4138_v5  ;;  %v2957_v58 = vadd.f32 %v10061_v23, %v2673_v54  ;;  %v682_v5 = vld [vmem:[%s9867_s26 + $0x410] sm:$0xff] }
 0x29d   : > { %v2675_v47 = vadd.f32 %v2403_v22, %v1574_v57  ;;  %v2676_v48 = vadd.f32 %v2404_v25, %v1575_v28  ;;  %v3646_v46 = vpop.f32.mrf.mxu0  ;;  %v2048_v36 = vpop.permute.xlu0 %2047  ;;  %4995 = vmatprep.mubr.f32.mxu1 %v13295_v1  ;;  %v3230_v3 = vmax.f32 %v2958_v40, 0.0  ;;  %6159 = vmatpush1.msra.mxu1 %v6092_v39  ;;  %v683_v39 = vld [vmem:[%s9867_s26 + $0x418] sm:$0xff] }
 0x29e   : > { %v4139_v51 = vmax.f32 %v3645_v26, 0.0  ;;  %v2405_v2 = vmul.f32 %v10054_v19, %v2048_v36  ;;  %v2406_v6 = vmul.f32 %v10057_v20, %v2048_v36  ;;  %v1182_v45 = vpop.permute.xlu1 %1181  ;;  %2171 = vperm.xlu0 %9311, %v681_v30   ;;  %v3229_v14 = vmax.f32 %v2957_v58, 0.0  ;;  %6160 = vmatprep.subr.mxu1 %v13295_v1 }
 0x29f   : > { %v1576_v54 = vmul.f32 %v10046_v16, %v1182_v45  ;;  %v1577_v50 = vmul.f32 %v10049_v17, %v1182_v45  ;;  %1336 = vperm.xlu1 %9314, %v681_v30   ;;  %v3649_v8 = vpop.f32.mrf.mxu0  ;;  %3888 = vmatmul.mubr.f32.gmra.mxu0 %v3227_v43  ;;  %v2960_v25 = vadd.f32 %v10067_v29, %v2676_v48 }
 0x2a0   : > { %v3650_v22 = vadd.f32 %v10678_v60, %v3649_v8  ;;  %3892 = vmatprep.mubr.f32.mxu0 %v3230_v3  ;;  %8565 = vmatmul.mubr.msk.f32.gmra.mxu1 %vm4246_vm0, %v4139_v51  ;;  %v2959_v24 = vadd.f32 %v10061_v23, %v2675_v47 }
 0x2a1   : > { %v2677_v57 = vadd.f32 %v2405_v2, %v1576_v54  ;;  %v2678_v28 = vadd.f32 %v2406_v6, %v1577_v50  ;;  %v3651_v11 = vpop.f32.mrf.mxu0  ;;  %v2052_v26 = vpop.permute.xlu0 %2051  ;;  %5001 = vmatprep.mubr.f32.mxu1 %v13295_v1  ;;  %v3232_v48 = vmax.f32 %v2960_v25, 0.0 }
 0x2a2   : > { %v4140_v30 = vmax.f32 %v3650_v22, 0.0  ;;  %v2407_v40 = vmul.f32 %v10054_v19, %v2052_v26  ;;  %v2408_v43 = vmul.f32 %v10057_v20, %v2052_v26  ;;  %v1187_v46 = vpop.permute.xlu1 %1186  ;;  %2175 = vperm.xlu0 %9311, %v682_v5   ;;  %v3231_v6 = vmax.f32 %v2959_v24, 0.0  ;;  %v684_v11 = vld [vmem:[%s9867_s26 + $0x420] sm:$0xff]  ;;  %v10951_v26 = vld [vmem:[#allocation7] ss:$0 sm:$0xff] }
 0x2a3   : > { %v1578_v58 = vmul.f32 %v10046_v16, %v1187_v46  ;;  %v1579_v47 = vmul.f32 %v10049_v17, %v1187_v46  ;;  %1341 = vperm.xlu1 %9314, %v682_v5   ;;  %v3654_v36 = vpop.f32.mrf.mxu0  ;;  %3893 = vmatmul.mubr.f32.gmra.mxu0 %v3229_v14  ;;  %v2962_v2 = vadd.f32 %v10067_v29, %v2678_v28 }
 0x2a4   : > { %v3655_v51 = vadd.f32 %v10678_v60, %v3654_v36  ;;  %3897 = vmatprep.mubr.f32.mxu0 %v3232_v48  ;;  %8566 = vmatmul.mubr.msk.f32.gmra.mxu1 %vm4246_vm0, %v4140_v30  ;;  %v2961_v45 = vadd.f32 %v10061_v23, %v2677_v57 }
 0x2a5   : > { %v2679_v3 = vadd.f32 %v2407_v40, %v1578_v58  ;;  %v2680_v54 = vadd.f32 %v2408_v43, %v1579_v47  ;;  %v3656_v50 = vpop.f32.mrf.mxu0  ;;  %v2056_v8 = vpop.permute.xlu0 %2055  ;;  %5007 = vmatprep.mubr.f32.mxu1 %v13295_v1  ;;  %v3234_v14 = vmax.f32 %v2962_v2, 0.0 }
 0x2a6   : > { %v4141_v5 = vmax.f32 %v3655_v51, 0.0  ;;  %v2409_v22 = vmul.f32 %v10054_v19, %v2056_v8  ;;  %v2410_v60 = vmul.f32 %v10057_v20, %v2056_v8  ;;  %v1192_v25 = vpop.permute.xlu1 %1191  ;;  %2179 = vperm.xlu0 %9311, %v683_v39   ;;  %v3233_v43 = vmax.f32 %v2961_v45, 0.0  ;;  %v685_v8 = vld [vmem:[%s9867_s26 + $0x428] sm:$0xff] }
 0x2a7   : > { %v1580_v28 = vmul.f32 %v10046_v16, %v1192_v25  ;;  %v1581_v24 = vmul.f32 %v10049_v17, %v1192_v25  ;;  %1346 = vperm.xlu1 %9314, %v683_v39   ;;  %v3659_v57 = vpop.f32.mrf.mxu0  ;;  %3898 = vmatmul.mubr.f32.gmra.mxu0 %v3231_v6  ;;  %v2964_v40 = vadd.f32 %v10067_v29, %v2680_v54 }
 0x2a8   : > { %v3660_v30 = vadd.f32 %v10951_v26, %v3659_v57  ;;  %3902 = vmatprep.mubr.f32.mxu0 %v3234_v14  ;;  %8567 = vmatmul.mubr.msk.f32.gmra.mxu1 %vm4246_vm0, %v4141_v5  ;;  %v2963_v46 = vadd.f32 %v10061_v23, %v2679_v3 }
 0x2a9   : > { %v2681_v48 = vadd.f32 %v2409_v22, %v1580_v28  ;;  %v2682_v58 = vadd.f32 %v2410_v60, %v1581_v24  ;;  %v3661_v47 = vpop.f32.mrf.mxu0  ;;  %v2060_v36 = vpop.permute.xlu0 %2059  ;;  %5013 = vmatprep.mubr.f32.mxu1 %v13295_v1  ;;  %v3236_v50 = vmax.f32 %v2964_v40, 0.0 }
 0x2aa   : > { %v4142_v39 = vmax.f32 %v3660_v30, 0.0  ;;  %v2411_v51 = vmul.f32 %v10054_v19, %v2060_v36  ;;  %v2412_v2 = vmul.f32 %v10057_v20, %v2060_v36  ;;  %v1197_v6 = vpop.permute.xlu1 %1196  ;;  %2183 = vperm.xlu0 %9311, %v684_v11   ;;  %v3235_v60 = vmax.f32 %v2963_v46, 0.0 }
 0x2ab   : > { %v1582_v54 = vmul.f32 %v10046_v16, %v1197_v6  ;;  %v1583_v45 = vmul.f32 %v10049_v17, %v1197_v6  ;;  %1351 = vperm.xlu1 %9314, %v684_v11   ;;  %v3664_v3 = vpop.f32.mrf.mxu0  ;;  %3903 = vmatmul.mubr.f32.gmra.mxu0 %v3233_v43  ;;  %v2966_v22 = vadd.f32 %v10067_v29, %v2682_v58  ;;  %v6091_v11 = vld [vmem:[%s13284_s7] sm:$0xff] }
 0x2ac   : > { %v3665_v5 = vadd.f32 %v10951_v26, %v3664_v3  ;;  %3907 = vmatprep.mubr.f32.mxu0 %v3236_v50  ;;  %8568 = vmatmul.mubr.msk.f32.gmra.mxu1 %vm4246_vm0, %v4142_v39  ;;  %v2965_v25 = vadd.f32 %v10061_v23, %v2681_v48  ;;  %v686_v39 = vld [vmem:[%s9867_s26 + $0x430] sm:$0xff] }
 0x2ad   : > { %v2683_v14 = vadd.f32 %v2411_v51, %v1582_v54  ;;  %v2684_v28 = vadd.f32 %v2412_v2, %v1583_v45  ;;  %v3666_v24 = vpop.f32.mrf.mxu0  ;;  %v2064_v57 = vpop.permute.xlu0 %2063  ;;  %5019 = vmatprep.mubr.f32.mxu1 %v13295_v1  ;;  %v3238_v46 = vmax.f32 %v2966_v22, 0.0  ;;  %6161 = vmatpush1.msra.mxu1 %v6091_v11  ;;  %v687_v11 = vld [vmem:[%s9867_s26 + $0x438] sm:$0xff] }
 0x2ae   : > { %v4143_v30 = vmax.f32 %v3665_v5, 0.0  ;;  %v2413_v40 = vmul.f32 %v10054_v19, %v2064_v57  ;;  %v2414_v43 = vmul.f32 %v10057_v20, %v2064_v57  ;;  %v1202_v58 = vpop.permute.xlu1 %1201  ;;  %2187 = vperm.xlu0 %9311, %v685_v8   ;;  %v3237_v6 = vmax.f32 %v2965_v25, 0.0  ;;  %6162 = vmatprep.subr.mxu1 %v13295_v1 }
 0x2af   : > { %v1584_v48 = vmul.f32 %v10046_v16, %v1202_v58  ;;  %v1585_v47 = vmul.f32 %v10049_v17, %v1202_v58  ;;  %1356 = vperm.xlu1 %9314, %v685_v8   ;;  %v3669_v36 = vpop.f32.mrf.mxu0  ;;  %3908 = vmatmul.mubr.f32.gmra.mxu0 %v3235_v60  ;;  %v2968_v2 = vadd.f32 %v10067_v29, %v2684_v28 }
 0x2b0   : > { %v3670_v51 = vadd.f32 %v10951_v26, %v3669_v36  ;;  %3912 = vmatprep.mubr.f32.mxu0 %v3238_v46  ;;  %8569 = vmatmul.mubr.msk.f32.gmra.mxu1 %vm4246_vm0, %v4143_v30  ;;  %v2967_v50 = vadd.f32 %v10061_v23, %v2683_v14 }
 0x2b1   : > { %v2685_v54 = vadd.f32 %v2413_v40, %v1584_v48  ;;  %v2686_v45 = vadd.f32 %v2414_v43, %v1585_v47  ;;  %v3671_v3 = vpop.f32.mrf.mxu0  ;;  %v2068_v5 = vpop.permute.xlu0 %2067  ;;  %5025 = vmatprep.mubr.f32.mxu1 %v13295_v1  ;;  %v3240_v28 = vmax.f32 %v2968_v2, 0.0 }
 0x2b2   : > { %v4144_v8 = vmax.f32 %v3670_v51, 0.0  ;;  %v2415_v22 = vmul.f32 %v10054_v19, %v2068_v5  ;;  %v2416_v60 = vmul.f32 %v10057_v20, %v2068_v5  ;;  %v1207_v24 = vpop.permute.xlu1 %1206  ;;  %2191 = vperm.xlu0 %9311, %v686_v39   ;;  %v3239_v43 = vmax.f32 %v2967_v50, 0.0 }
 0x2b3   : > { %v1586_v25 = vmul.f32 %v10046_v16, %v1207_v24  ;;  %v1587_v14 = vmul.f32 %v10049_v17, %v1207_v24  ;;  %1361 = vperm.xlu1 %9314, %v686_v39   ;;  %v3674_v57 = vpop.f32.mrf.mxu0  ;;  %3913 = vmatmul.mubr.f32.gmra.mxu0 %v3237_v6  ;;  %v2970_v40 = vadd.f32 %v10067_v29, %v2686_v45 }
 0x2b4   : > { %v3675_v30 = vadd.f32 %v10951_v26, %v3674_v57  ;;  %3917 = vmatprep.mubr.f32.mxu0 %v3240_v28  ;;  %8570 = vmatmul.mubr.msk.f32.gmra.mxu1 %vm4246_vm0, %v4144_v8  ;;  %v2969_v58 = vadd.f32 %v10061_v23, %v2685_v54  ;;  %v6122_v57 = vld [vmem:[%s13284_s7 + $0xf8] sm:$0xff] }
 0x2b5   : > { %v2687_v46 = vadd.f32 %v2415_v22, %v1586_v25  ;;  %v2688_v48 = vadd.f32 %v2416_v60, %v1587_v14  ;;  %v3676_v47 = vpop.f32.mrf.mxu0  ;;  %v2072_v36 = vpop.permute.xlu0 %2071  ;;  %5031 = vmatprep.mubr.f32.mxu1 %v13295_v1  ;;  %v3242_v3 = vmax.f32 %v2970_v40, 0.0  ;;  %6163 = vmatpush2.msra.mxu1 %v6122_v57 }
 0x2b6   : > { %v4145_v39 = vmax.f32 %v3675_v30, 0.0  ;;  %v2417_v51 = vmul.f32 %v10054_v19, %v2072_v36  ;;  %v2418_v2 = vmul.f32 %v10057_v20, %v2072_v36  ;;  %v1212_v6 = vpop.permute.xlu1 %1211  ;;  %2195 = vperm.xlu0 %9311, %v687_v11   ;;  %v3241_v60 = vmax.f32 %v2969_v58, 0.0  ;;  %6164 = vmatprep.subr.mxu1 %v13295_v1 }
 0x2b7   : > { %v1588_v5 = vmul.f32 %v10046_v16, %v1212_v6  ;;  %v1589_v50 = vmul.f32 %v10049_v17, %v1212_v6  ;;  %1366 = vperm.xlu1 %9314, %v687_v11   ;;  %v3679_v54 = vpop.f32.mrf.mxu0  ;;  %3918 = vmatmul.mubr.f32.gmra.mxu0 %v3239_v43  ;;  %v2971_v45 = vadd.f32 %v10061_v23, %v2687_v46 }
 0x2b8   : > { %v3680_v8 = vadd.f32 %v10951_v26, %v3679_v54  ;;  %3922 = vmatprep.mubr.f32.mxu0 %v3242_v3  ;;  %8571 = vmatmul.mubr.msk.f32.gmra.mxu1 %vm4246_vm0, %v4145_v39  ;;  %v2972_v22 = vadd.f32 %v10067_v29, %v2688_v48 }
 0x2b9   : > { %v2689_v24 = vadd.f32 %v2417_v51, %v1588_v5  ;;  %v2690_v28 = vadd.f32 %v2418_v2, %v1589_v50  ;;  %v3681_v25 = vpop.f32.mrf.mxu0  ;;  %v2076_v14 = vpop.permute.xlu0 %2075  ;;  %5037 = vmatprep.mubr.f32.mxu1 %v13295_v1  ;;  %v3243_v39 = vmax.f32 %v2971_v45, 0.0 }
 0x2ba   : > { %v4146_v11 = vmax.f32 %v3680_v8, 0.0  ;;  %v2419_v30 = vmul.f32 %v10054_v19, %v2076_v14  ;;  %v2420_v40 = vmul.f32 %v10057_v20, %v2076_v14  ;;  %v1217_v43 = vpop.permute.xlu1 %1216  ;;  %v3244_v46 = vmax.f32 %v2972_v22, 0.0 }
 0x2bb   : > { %v1590_v58 = vmul.f32 %v10046_v16, %v1217_v43  ;;  %v1591_v48 = vmul.f32 %v10049_v17, %v1217_v43  ;;  %v3684_v47 = vpop.f32.mrf.mxu0  ;;  %3923 = vmatmul.mubr.f32.gmra.mxu0 %v3241_v60  ;;  %v2974_v36 = vadd.f32 %v10067_v29, %v2690_v28  ;;  %v2973_v2 = vadd.f32 %v10061_v23, %v2689_v24 }
 0x2bc   : > { %v3685_v51 = vadd.f32 %v10951_v26, %v3684_v47  ;;  %3927 = vmatprep.mubr.f32.mxu0 %v3244_v46  ;;  %8572 = vmatmul.mubr.msk.f32.gmra.mxu1 %vm4246_vm0, %v4146_v11 }
 0x2bd   : > { %v2691_v6 = vadd.f32 %v2419_v30, %v1590_v58  ;;  %v2692_v3 = vadd.f32 %v2420_v40, %v1591_v48  ;;  %v3686_v5 = vpop.f32.mrf.mxu0  ;;  %v2080_v50 = vpop.permute.xlu0 %2079  ;;  %5043 = vmatprep.mubr.f32.mxu1 %v13295_v1  ;;  %v3246_v54 = vmax.f32 %v2974_v36, 0.0  ;;  %v3245_v30 = vmax.f32 %v2973_v2, 0.0 }
 0x2be   : > { %v4147_v8 = vmax.f32 %v3685_v51, 0.0  ;;  %v2421_v22 = vmul.f32 %v10054_v19, %v2080_v50  ;;  %v2422_v45 = vmul.f32 %v10057_v20, %v2080_v50  ;;  %v1222_v60 = vpop.permute.xlu1 %1221  ;;  %v6121_v50 = vld [vmem:[%s13284_s7 + $0xf0] sm:$0xff] }
 0x2bf   : > { %v1592_v28 = vmul.f32 %v10046_v16, %v1222_v60  ;;  %v1593_v25 = vmul.f32 %v10049_v17, %v1222_v60  ;;  %v3689_v24 = vpop.f32.mrf.mxu0  ;;  %3928 = vmatmul.mubr.f32.gmra.mxu0 %v3243_v39  ;;  %v2976_v14 = vadd.f32 %v10067_v29, %v2692_v3  ;;  %v2975_v57 = vadd.f32 %v10061_v23, %v2691_v6 }
 0x2c0   : > { %v3690_v11 = vadd.f32 %v10951_v26, %v3689_v24  ;;  %3932 = vmatprep.mubr.f32.mxu0 %v3246_v54  ;;  %8573 = vmatmul.mubr.msk.f32.gmra.mxu1 %vm4246_vm0, %v4147_v8 }
 0x2c1   : > { %v2693_v40 = vadd.f32 %v2421_v22, %v1592_v28  ;;  %v2694_v43 = vadd.f32 %v2422_v45, %v1593_v25  ;;  %v3691_v46 = vpop.f32.mrf.mxu0  ;;  %v2084_v58 = vpop.permute.xlu0 %2083  ;;  %5049 = vmatprep.mubr.f32.mxu1 %v13295_v1  ;;  %v3248_v48 = vmax.f32 %v2976_v14, 0.0  ;;  %v3247_v54 = vmax.f32 %v2975_v57, 0.0  ;;  %6165 = vmatpush2.msra.mxu1 %v6121_v50 }
 0x2c2   : > { %v4148_v47 = vmax.f32 %v3690_v11, 0.0  ;;  %v2423_v36 = vmul.f32 %v10054_v19, %v2084_v58  ;;  %v2424_v39 = vmul.f32 %v10057_v20, %v2084_v58  ;;  %v1227_v51 = vpop.permute.xlu1 %1226  ;;  %6166 = vmatprep.subr.mxu1 %v13295_v1 }
 0x2c3   : > { %v1594_v6 = vmul.f32 %v10046_v16, %v1227_v51  ;;  %v1595_v3 = vmul.f32 %v10049_v17, %v1227_v51  ;;  %v3694_v5 = vpop.f32.mrf.mxu0  ;;  %3933 = vmatmul.mubr.f32.gmra.mxu0 %v3245_v30  ;;  %v2978_v2 = vadd.f32 %v10067_v29, %v2694_v43  ;;  %v2977_v22 = vadd.f32 %v10061_v23, %v2693_v40 }
 0x2c4   : > { %v3695_v8 = vadd.f32 %v10951_v26, %v3694_v5  ;;  %3937 = vmatprep.mubr.f32.mxu0 %v3248_v48  ;;  %8574 = vmatmul.mubr.msk.f32.gmra.mxu1 %vm4246_vm0, %v4148_v47 }
 0x2c5   : > { %v2695_v45 = vadd.f32 %v2423_v36, %v1594_v6  ;;  %v2696_v60 = vadd.f32 %v2424_v39, %v1595_v3  ;;  %v3696_v28 = vpop.f32.mrf.mxu0  ;;  %v2088_v25 = vpop.permute.xlu0 %2087  ;;  %5055 = vmatprep.mubr.f32.mxu1 %v13295_v1  ;;  %v3250_v24 = vmax.f32 %v2978_v2, 0.0  ;;  %v3249_v36 = vmax.f32 %v2977_v22, 0.0 }
 0x2c6   : > { %v4149_v14 = vmax.f32 %v3695_v8, 0.0  ;;  %v2425_v11 = vmul.f32 %v10054_v19, %v2088_v25  ;;  %v2426_v57 = vmul.f32 %v10057_v20, %v2088_v25  ;;  %v1232_v30 = vpop.permute.xlu1 %1231 }
 0x2c7   : > { %v1596_v43 = vmul.f32 %v10046_v16, %v1232_v30  ;;  %v1597_v40 = vmul.f32 %v10049_v17, %v1232_v30  ;;  %v3699_v46 = vpop.f32.mrf.mxu0  ;;  %3938 = vmatmul.mubr.f32.gmra.mxu0 %v3247_v54  ;;  %v2980_v58 = vadd.f32 %v10067_v29, %v2696_v60  ;;  %v2979_v48 = vadd.f32 %v10061_v23, %v2695_v45 }
 0x2c8   : > { %v3700_v47 = vadd.f32 %v10951_v26, %v3699_v46  ;;  %3942 = vmatprep.mubr.f32.mxu0 %v3250_v24  ;;  %8575 = vmatmul.mubr.msk.f32.gmra.mxu1 %vm4246_vm0, %v4149_v14 }
 0x2c9   : > { %v2697_v39 = vadd.f32 %v2425_v11, %v1596_v43  ;;  %v2698_v51 = vadd.f32 %v2426_v57, %v1597_v40  ;;  %v3701_v6 = vpop.f32.mrf.mxu0  ;;  %v2092_v3 = vpop.permute.xlu0 %2091  ;;  %5061 = vmatprep.mubr.f32.mxu1 %v13295_v1  ;;  %v3252_v5 = vmax.f32 %v2980_v58, 0.0  ;;  %v3251_v25 = vmax.f32 %v2979_v48, 0.0 }
 0x2ca   : > { %v4150_v2 = vmax.f32 %v3700_v47, 0.0  ;;  %v2427_v50 = vmul.f32 %v10054_v19, %v2092_v3  ;;  %v2428_v54 = vmul.f32 %v10057_v20, %v2092_v3  ;;  %v1237_v8 = vpop.permute.xlu1 %1236 }
 0x2cb   : > { %v1598_v45 = vmul.f32 %v10046_v16, %v1237_v8  ;;  %v1599_v60 = vmul.f32 %v10049_v17, %v1237_v8  ;;  %v3704_v28 = vpop.f32.mrf.mxu0  ;;  %3943 = vmatmul.mubr.f32.gmra.mxu0 %v3249_v36  ;;  %v2982_v22 = vadd.f32 %v10067_v29, %v2698_v51  ;;  %v2981_v14 = vadd.f32 %v10061_v23, %v2697_v39 }
 0x2cc   : > { %v3705_v24 = vadd.f32 %v10951_v26, %v3704_v28  ;;  %3947 = vmatprep.mubr.f32.mxu0 %v3252_v5  ;;  %8576 = vmatmul.mubr.msk.f32.gmra.mxu1 %vm4246_vm0, %v4150_v2  ;;  %v6120_v28 = vld [vmem:[%s13284_s7 + $0xe8] sm:$0xff] }
 0x2cd   : > { %v2699_v11 = vadd.f32 %v2427_v50, %v1598_v45  ;;  %v2700_v57 = vadd.f32 %v2428_v54, %v1599_v60  ;;  %v3706_v30 = vpop.f32.mrf.mxu0  ;;  %v2096_v43 = vpop.permute.xlu0 %2095  ;;  %5067 = vmatprep.mubr.f32.mxu1 %v13295_v1  ;;  %v3254_v40 = vmax.f32 %v2982_v22, 0.0  ;;  %v3253_v2 = vmax.f32 %v2981_v14, 0.0  ;;  %6167 = vmatpush2.msra.mxu1 %v6120_v28 }
 0x2ce   : > { %v4151_v46 = vmax.f32 %v3705_v24, 0.0  ;;  %v2429_v58 = vmul.f32 %v10054_v19, %v2096_v43  ;;  %v2430_v47 = vmul.f32 %v10057_v20, %v2096_v43  ;;  %v1242_v48 = vpop.permute.xlu1 %1241  ;;  %6168 = vmatprep.subr.mxu1 %v13295_v1 }
 0x2cf   : > { %v1600_v36 = vmul.f32 %v10046_v16, %v1242_v48  ;;  %v1601_v51 = vmul.f32 %v10049_v17, %v1242_v48  ;;  %v3709_v6 = vpop.f32.mrf.mxu0  ;;  %3948 = vmatmul.mubr.f32.gmra.mxu0 %v3251_v25  ;;  %v2984_v39 = vadd.f32 %v10067_v29, %v2700_v57  ;;  %v2983_v3 = vadd.f32 %v10061_v23, %v2699_v11 }
 0x2d0   : > { %v3710_v5 = vadd.f32 %v10951_v26, %v3709_v6  ;;  %3952 = vmatprep.mubr.f32.mxu0 %v3254_v40  ;;  %8577 = vmatmul.mubr.msk.f32.gmra.mxu1 %vm4246_vm0, %v4151_v46 }
 0x2d1   : > { %v2701_v50 = vadd.f32 %v2429_v58, %v1600_v36  ;;  %v2702_v54 = vadd.f32 %v2430_v47, %v1601_v51  ;;  %v3711_v8 = vpop.f32.mrf.mxu0  ;;  %v2100_v45 = vpop.permute.xlu0 %2099  ;;  %5073 = vmatprep.mubr.f32.mxu1 %v13295_v1  ;;  %v3256_v60 = vmax.f32 %v2984_v39, 0.0  ;;  %v3255_v40 = vmax.f32 %v2983_v3, 0.0 }
 0x2d2   : > { %v4152_v22 = vmax.f32 %v3710_v5, 0.0  ;;  %v2431_v25 = vmul.f32 %v10054_v19, %v2100_v45  ;;  %v2432_v24 = vmul.f32 %v10057_v20, %v2100_v45  ;;  %v1247_v11 = vpop.permute.xlu1 %1246 }
 0x2d3   : > { %v1602_v14 = vmul.f32 %v10046_v16, %v1247_v11  ;;  %v1603_v57 = vmul.f32 %v10049_v17, %v1247_v11  ;;  %v3714_v30 = vpop.f32.mrf.mxu0  ;;  %3953 = vmatmul.mubr.f32.gmra.mxu0 %v3253_v2  ;;  %v2986_v43 = vadd.f32 %v10067_v29, %v2702_v54  ;;  %v2985_v58 = vadd.f32 %v10061_v23, %v2701_v50 }
 0x2d4   : > { %v3715_v46 = vadd.f32 %v10951_v26, %v3714_v30  ;;  %3957 = vmatprep.mubr.f32.mxu0 %v3256_v60  ;;  %8578 = vmatmul.mubr.msk.f32.gmra.mxu1 %vm4246_vm0, %v4152_v22 }
 0x2d5   : > { %v2703_v47 = vadd.f32 %v2431_v25, %v1602_v14  ;;  %v2704_v48 = vadd.f32 %v2432_v24, %v1603_v57  ;;  %v3716_v36 = vpop.f32.mrf.mxu0  ;;  %v2104_v51 = vpop.permute.xlu0 %2103  ;;  %5079 = vmatprep.mubr.f32.mxu1 %v13295_v1  ;;  %v3258_v6 = vmax.f32 %v2986_v43, 0.0  ;;  %v3257_v22 = vmax.f32 %v2985_v58, 0.0 }
 0x2d6   : > { %v4153_v39 = vmax.f32 %v3715_v46, 0.0  ;;  %v2433_v5 = vmul.f32 %v10054_v19, %v2104_v51  ;;  %v2434_v3 = vmul.f32 %v10057_v20, %v2104_v51  ;;  %v1252_v2 = vpop.permute.xlu1 %1251 }
 0x2d7   : > { %v1604_v54 = vmul.f32 %v10046_v16, %v1252_v2  ;;  %v1605_v8 = vmul.f32 %v10049_v17, %v1252_v2  ;;  %v3719_v50 = vpop.f32.mrf.mxu0  ;;  %3958 = vmatmul.mubr.f32.gmra.mxu0 %v3255_v40  ;;  %v2988_v45 = vadd.f32 %v10067_v29, %v2704_v48  ;;  %v2987_v60 = vadd.f32 %v10061_v23, %v2703_v47 }
 0x2d8   : > { %v3720_v28 = vadd.f32 %v10951_v26, %v3719_v50  ;;  %3962 = vmatprep.mubr.f32.mxu0 %v3258_v6  ;;  %8579 = vmatmul.mubr.msk.f32.gmra.mxu1 %vm4246_vm0, %v4153_v39 }
 0x2d9   : > { %v2705_v25 = vadd.f32 %v2433_v5, %v1604_v54  ;;  %v2706_v24 = vadd.f32 %v2434_v3, %v1605_v8  ;;  %v3721_v11 = vpop.f32.mrf.mxu0  ;;  %v2108_v14 = vpop.permute.xlu0 %2107  ;;  %5085 = vmatprep.mubr.f32.mxu1 %v13295_v1  ;;  %v3260_v57 = vmax.f32 %v2988_v45, 0.0  ;;  %v3259_v51 = vmax.f32 %v2987_v60, 0.0 }
 0x2da   : > { %v4154_v30 = vmax.f32 %v3720_v28, 0.0  ;;  %v2435_v43 = vmul.f32 %v10054_v19, %v2108_v14  ;;  %v2436_v40 = vmul.f32 %v10057_v20, %v2108_v14  ;;  %v1257_v46 = vpop.permute.xlu1 %1256  ;;  %v6119_v14 = vld [vmem:[%s13284_s7 + $0xe0] sm:$0xff] }
 0x2db   : > { %v1606_v47 = vmul.f32 %v10046_v16, %v1257_v46  ;;  %v1607_v48 = vmul.f32 %v10049_v17, %v1257_v46  ;;  %v3724_v36 = vpop.f32.mrf.mxu0  ;;  %3963 = vmatmul.mubr.f32.gmra.mxu0 %v3257_v22  ;;  %v2990_v58 = vadd.f32 %v10067_v29, %v2706_v24  ;;  %v2989_v39 = vadd.f32 %v10061_v23, %v2705_v25 }
 0x2dc   : > { %v3725_v6 = vadd.f32 %v10951_v26, %v3724_v36  ;;  %3967 = vmatprep.mubr.f32.mxu0 %v3260_v57  ;;  %8580 = vmatmul.mubr.msk.f32.gmra.mxu1 %vm4246_vm0, %v4154_v30 }
 0x2dd   : > { %v2707_v5 = vadd.f32 %v2435_v43, %v1606_v47  ;;  %v2708_v3 = vadd.f32 %v2436_v40, %v1607_v48  ;;  %v3726_v2 = vpop.f32.mrf.mxu0  ;;  %v2112_v54 = vpop.permute.xlu0 %2111  ;;  %5091 = vmatprep.mubr.f32.mxu1 %v13295_v1  ;;  %v3262_v8 = vmax.f32 %v2990_v58, 0.0  ;;  %v3261_v43 = vmax.f32 %v2989_v39, 0.0  ;;  %6169 = vmatpush2.msra.mxu1 %v6119_v14 }
 0x2de   : > { %v4155_v50 = vmax.f32 %v3725_v6, 0.0  ;;  %v2437_v45 = vmul.f32 %v10054_v19, %v2112_v54  ;;  %v2438_v28 = vmul.f32 %v10057_v20, %v2112_v54  ;;  %v1262_v60 = vpop.permute.xlu1 %1261  ;;  %6170 = vmatprep.subr.mxu1 %v13295_v1 }
 0x2df   : > { %v1608_v22 = vmul.f32 %v10046_v16, %v1262_v60  ;;  %v1609_v24 = vmul.f32 %v10049_v17, %v1262_v60  ;;  %v3729_v11 = vpop.f32.mrf.mxu0  ;;  %3968 = vmatmul.mubr.f32.gmra.mxu0 %v3259_v51  ;;  %v2992_v25 = vadd.f32 %v10067_v29, %v2708_v3  ;;  %v2991_v57 = vadd.f32 %v10061_v23, %v2707_v5 }
 0x2e0   : > { %v3730_v30 = vadd.f32 %v10951_v26, %v3729_v11  ;;  %3972 = vmatprep.mubr.f32.mxu0 %v3262_v8  ;;  %8581 = vmatmul.mubr.msk.f32.gmra.mxu1 %vm4246_vm0, %v4155_v50 }
 0x2e1   : > { %v2709_v40 = vadd.f32 %v2437_v45, %v1608_v22  ;;  %v2710_v46 = vadd.f32 %v2438_v28, %v1609_v24  ;;  %v3731_v47 = vpop.f32.mrf.mxu0  ;;  %v2116_v48 = vpop.permute.xlu0 %2115  ;;  %5097 = vmatprep.mubr.f32.mxu1 %v13295_v1  ;;  %v3264_v36 = vmax.f32 %v2992_v25, 0.0  ;;  %v3263_v8 = vmax.f32 %v2991_v57, 0.0 }
 0x2e2   : > { %v4156_v58 = vmax.f32 %v3730_v30, 0.0  ;;  %v2439_v51 = vmul.f32 %v10054_v19, %v2116_v48  ;;  %v2440_v6 = vmul.f32 %v10057_v20, %v2116_v48  ;;  %v1267_v5 = vpop.permute.xlu1 %1266 }
 0x2e3   : > { %v1610_v3 = vmul.f32 %v10046_v16, %v1267_v5  ;;  %v1611_v39 = vmul.f32 %v10049_v17, %v1267_v5  ;;  %v3734_v2 = vpop.f32.mrf.mxu0  ;;  %3973 = vmatmul.mubr.f32.gmra.mxu0 %v3261_v43  ;;  %v2994_v54 = vadd.f32 %v10067_v29, %v2710_v46  ;;  %v2993_v45 = vadd.f32 %v10061_v23, %v2709_v40 }
 0x2e4   : > { %v3735_v50 = vadd.f32 %v10951_v26, %v3734_v2  ;;  %3977 = vmatprep.mubr.f32.mxu0 %v3264_v36  ;;  %8582 = vmatmul.mubr.msk.f32.gmra.mxu1 %vm4246_vm0, %v4156_v58 }
 0x2e5   : > { %v2711_v28 = vadd.f32 %v2439_v51, %v1610_v3  ;;  %v2712_v60 = vadd.f32 %v2440_v6, %v1611_v39  ;;  %v3736_v22 = vpop.f32.mrf.mxu0  ;;  %v2120_v24 = vpop.permute.xlu0 %2119  ;;  %5103 = vmatprep.mubr.f32.mxu1 %v13295_v1  ;;  %v3266_v11 = vmax.f32 %v2994_v54, 0.0  ;;  %v3265_v58 = vmax.f32 %v2993_v45, 0.0 }
 0x2e6   : > { %v4157_v25 = vmax.f32 %v3735_v50, 0.0  ;;  %v2441_v14 = vmul.f32 %v10054_v19, %v2120_v24  ;;  %v2442_v30 = vmul.f32 %v10057_v20, %v2120_v24  ;;  %v1272_v57 = vpop.permute.xlu1 %1271  ;;  %v6118_v24 = vld [vmem:[%s13284_s7 + $0xd8] sm:$0xff] }
 0x2e7   : > { %v1612_v43 = vmul.f32 %v10046_v16, %v1272_v57  ;;  %v1613_v46 = vmul.f32 %v10049_v17, %v1272_v57  ;;  %v3739_v47 = vpop.f32.mrf.mxu0  ;;  %3978 = vmatmul.mubr.f32.gmra.mxu0 %v3263_v8  ;;  %v2996_v40 = vadd.f32 %v10067_v29, %v2712_v60  ;;  %v2995_v48 = vadd.f32 %v10061_v23, %v2711_v28 }
 0x2e8   : > { %v3740_v36 = vadd.f32 %v10951_v26, %v3739_v47  ;;  %3982 = vmatprep.mubr.f32.mxu0 %v3266_v11  ;;  %8583 = vmatmul.mubr.msk.f32.gmra.mxu1 %vm4246_vm0, %v4157_v25 }
 0x2e9   : > { %v2713_v51 = vadd.f32 %v2441_v14, %v1612_v43  ;;  %v2714_v6 = vadd.f32 %v2442_v30, %v1613_v46  ;;  %v3741_v5 = vpop.f32.mrf.mxu0  ;;  %v2124_v3 = vpop.permute.xlu0 %2123  ;;  %5109 = vmatprep.mubr.f32.mxu1 %v13295_v1  ;;  %v3268_v39 = vmax.f32 %v2996_v40, 0.0  ;;  %v3267_v11 = vmax.f32 %v2995_v48, 0.0  ;;  %6171 = vmatpush2.msra.mxu1 %v6118_v24 }
 0x2ea   : > { %v4158_v2 = vmax.f32 %v3740_v36, 0.0  ;;  %v2443_v54 = vmul.f32 %v10054_v19, %v2124_v3  ;;  %v2444_v8 = vmul.f32 %v10057_v20, %v2124_v3  ;;  %v1277_v50 = vpop.permute.xlu1 %1276  ;;  %6172 = vmatprep.subr.mxu1 %v13295_v1 }
 0x2eb   : > { %v1614_v28 = vmul.f32 %v10046_v16, %v1277_v50  ;;  %v1615_v60 = vmul.f32 %v10049_v17, %v1277_v50  ;;  %v3744_v22 = vpop.f32.mrf.mxu0  ;;  %3983 = vmatmul.mubr.f32.gmra.mxu0 %v3265_v58  ;;  %v2998_v45 = vadd.f32 %v10067_v29, %v2714_v6  ;;  %v2997_v14 = vadd.f32 %v10061_v23, %v2713_v51 }
 0x2ec   : > { %v3745_v25 = vadd.f32 %v10951_v26, %v3744_v22  ;;  %3987 = vmatprep.mubr.f32.mxu0 %v3268_v39  ;;  %8584 = vmatmul.mubr.msk.f32.gmra.mxu1 %vm4246_vm0, %v4158_v2 }
 0x2ed   : > { %v2715_v30 = vadd.f32 %v2443_v54, %v1614_v28  ;;  %v2716_v57 = vadd.f32 %v2444_v8, %v1615_v60  ;;  %v3746_v43 = vpop.f32.mrf.mxu0  ;;  %v2128_v46 = vpop.permute.xlu0 %2127  ;;  %5115 = vmatprep.mubr.f32.mxu1 %v13295_v1  ;;  %v3270_v47 = vmax.f32 %v2998_v45, 0.0  ;;  %v3269_v54 = vmax.f32 %v2997_v14, 0.0 }
 0x2ee   : > { %v4159_v40 = vmax.f32 %v3745_v25, 0.0  ;;  %v2445_v36 = vmul.f32 %v10054_v19, %v2128_v46  ;;  %v2446_v48 = vmul.f32 %v10057_v20, %v2128_v46  ;;  %v1282_v58 = vpop.permute.xlu1 %1281 }
 0x2ef   : > { %v1616_v6 = vmul.f32 %v10046_v16, %v1282_v58  ;;  %v1617_v51 = vmul.f32 %v10049_v17, %v1282_v58  ;;  %v3749_v5 = vpop.f32.mrf.mxu0  ;;  %3988 = vmatmul.mubr.f32.gmra.mxu0 %v3267_v11  ;;  %v3000_v3 = vadd.f32 %v10067_v29, %v2716_v57  ;;  %v2999_v39 = vadd.f32 %v10061_v23, %v2715_v30 }
 0x2f0   : > { %v3750_v2 = vadd.f32 %v10951_v26, %v3749_v5  ;;  %3992 = vmatprep.mubr.f32.mxu0 %v3270_v47  ;;  %8585 = vmatmul.mubr.msk.f32.gmra.mxu1 %vm4246_vm0, %v4159_v40 }
 0x2f1   : > { %v2717_v8 = vadd.f32 %v2445_v36, %v1616_v6  ;;  %v2718_v50 = vadd.f32 %v2446_v48, %v1617_v51  ;;  %v3751_v28 = vpop.f32.mrf.mxu0  ;;  %v2132_v60 = vpop.permute.xlu0 %2131  ;;  %5121 = vmatprep.mubr.f32.mxu1 %v13295_v1  ;;  %v3272_v22 = vmax.f32 %v3000_v3, 0.0  ;;  %v3271_v46 = vmax.f32 %v2999_v39, 0.0 }
 0x2f2   : > { %v4160_v45 = vmax.f32 %v3750_v2, 0.0  ;;  %v2447_v24 = vmul.f32 %v10054_v19, %v2132_v60  ;;  %v2448_v11 = vmul.f32 %v10057_v20, %v2132_v60  ;;  %v1287_v25 = vpop.permute.xlu1 %1286 }
 0x2f3   : > { %v1618_v30 = vmul.f32 %v10046_v16, %v1287_v25  ;;  %v1619_v57 = vmul.f32 %v10049_v17, %v1287_v25  ;;  %v3754_v43 = vpop.f32.mrf.mxu0  ;;  %3993 = vmatmul.mubr.f32.gmra.mxu0 %v3269_v54  ;;  %v3002_v14 = vadd.f32 %v10067_v29, %v2718_v50  ;;  %v3001_v40 = vadd.f32 %v10061_v23, %v2717_v8 }
 0x2f4   : > { %v3755_v47 = vadd.f32 %v10951_v26, %v3754_v43  ;;  %3997 = vmatprep.mubr.f32.mxu0 %v3272_v22  ;;  %8586 = vmatmul.mubr.msk.f32.gmra.mxu1 %vm4246_vm0, %v4160_v45 }
 0x2f5   : > { %v2719_v36 = vadd.f32 %v2447_v24, %v1618_v30  ;;  %v2720_v48 = vadd.f32 %v2448_v11, %v1619_v57  ;;  %v3756_v58 = vpop.f32.mrf.mxu0  ;;  %v2136_v6 = vpop.permute.xlu0 %2135  ;;  %5127 = vmatprep.mubr.f32.mxu1 %v13295_v1  ;;  %v3274_v51 = vmax.f32 %v3002_v14, 0.0  ;;  %v3273_v45 = vmax.f32 %v3001_v40, 0.0 }
 0x2f6   : > { %v4161_v5 = vmax.f32 %v3755_v47, 0.0  ;;  %v2449_v3 = vmul.f32 %v10054_v19, %v2136_v6  ;;  %v2450_v2 = vmul.f32 %v10057_v20, %v2136_v6  ;;  %v1292_v39 = vpop.permute.xlu1 %1291 }
 0x2f7   : > { %v1620_v54 = vmul.f32 %v10046_v16, %v1292_v39  ;;  %v1621_v50 = vmul.f32 %v10049_v17, %v1292_v39  ;;  %v3759_v28 = vpop.f32.mrf.mxu0  ;;  %3998 = vmatmul.mubr.f32.gmra.mxu0 %v3271_v46  ;;  %v3004_v8 = vadd.f32 %v10067_v29, %v2720_v48  ;;  %v3003_v60 = vadd.f32 %v10061_v23, %v2719_v36  ;;  %v6117_v36 = vld [vmem:[%s13284_s7 + $0xd0] sm:$0xff] }
 0x2f8   : > { %v3760_v22 = vadd.f32 %v10951_v26, %v3759_v28  ;;  %4002 = vmatprep.mubr.f32.mxu0 %v3274_v51  ;;  %8587 = vmatmul.mubr.msk.f32.gmra.mxu1 %vm4246_vm0, %v4161_v5 }
 0x2f9   : > { %v2721_v24 = vadd.f32 %v2449_v3, %v1620_v54  ;;  %v2722_v11 = vadd.f32 %v2450_v2, %v1621_v50  ;;  %v3761_v25 = vpop.f32.mrf.mxu0  ;;  %v2140_v30 = vpop.permute.xlu0 %2139  ;;  %5133 = vmatprep.mubr.f32.mxu1 %v13295_v1  ;;  %v3276_v57 = vmax.f32 %v3004_v8, 0.0  ;;  %v3275_v51 = vmax.f32 %v3003_v60, 0.0  ;;  %6173 = vmatpush2.msra.mxu1 %v6117_v36 }
 0x2fa   : > { %v4162_v43 = vmax.f32 %v3760_v22, 0.0  ;;  %v2451_v14 = vmul.f32 %v10054_v19, %v2140_v30  ;;  %v2452_v46 = vmul.f32 %v10057_v20, %v2140_v30  ;;  %v1297_v47 = vpop.permute.xlu1 %1296  ;;  %6174 = vmatprep.subr.mxu1 %v13295_v1 }
 0x2fb   : > { %v1622_v48 = vmul.f32 %v10046_v16, %v1297_v47  ;;  %v1623_v40 = vmul.f32 %v10049_v17, %v1297_v47  ;;  %v3764_v58 = vpop.f32.mrf.mxu0  ;;  %4003 = vmatmul.mubr.f32.gmra.mxu0 %v3273_v45  ;;  %v3006_v6 = vadd.f32 %v10067_v29, %v2722_v11  ;;  %v3005_v3 = vadd.f32 %v10061_v23, %v2721_v24 }
 0x2fc   : > { %v3765_v5 = vadd.f32 %v10951_v26, %v3764_v58  ;;  %4007 = vmatprep.mubr.f32.mxu0 %v3276_v57  ;;  %8588 = vmatmul.mubr.msk.f32.gmra.mxu1 %vm4246_vm0, %v4162_v43 }
 0x2fd   : > { %v2723_v2 = vadd.f32 %v2451_v14, %v1622_v48  ;;  %v2724_v39 = vadd.f32 %v2452_v46, %v1623_v40  ;;  %v3766_v54 = vpop.f32.mrf.mxu0  ;;  %v2144_v50 = vpop.permute.xlu0 %2143  ;;  %5139 = vmatprep.mubr.f32.mxu1 %v13295_v1  ;;  %v3278_v28 = vmax.f32 %v3006_v6, 0.0  ;;  %v3277_v14 = vmax.f32 %v3005_v3, 0.0 }
 0x2fe   : > { %v4163_v8 = vmax.f32 %v3765_v5, 0.0  ;;  %v2453_v22 = vmul.f32 %v10054_v19, %v2144_v50  ;;  %v2454_v60 = vmul.f32 %v10057_v20, %v2144_v50  ;;  %v1302_v45 = vpop.permute.xlu1 %1301 }
 0x2ff   : > { %v1624_v11 = vmul.f32 %v10046_v16, %v1302_v45  ;;  %v1625_v24 = vmul.f32 %v10049_v17, %v1302_v45  ;;  %v3769_v25 = vpop.f32.mrf.mxu0  ;;  %4008 = vmatmul.mubr.f32.gmra.mxu0 %v3275_v51  ;;  %v3008_v30 = vadd.f32 %v10067_v29, %v2724_v39  ;;  %v3007_v57 = vadd.f32 %v10061_v23, %v2723_v2 }
 0x300   : > { %v3770_v43 = vadd.f32 %v10951_v26, %v3769_v25  ;;  %4012 = vmatprep.mubr.f32.mxu0 %v3278_v28  ;;  %8589 = vmatmul.mubr.msk.f32.gmra.mxu1 %vm4246_vm0, %v4163_v8 }
 0x301   : > { %v2725_v46 = vadd.f32 %v2453_v22, %v1624_v11  ;;  %v2726_v47 = vadd.f32 %v2454_v60, %v1625_v24  ;;  %v3771_v36 = vpop.f32.mrf.mxu0  ;;  %v2148_v48 = vpop.permute.xlu0 %2147  ;;  %5145 = vmatprep.mubr.f32.mxu1 %v13295_v1  ;;  %v3280_v40 = vmax.f32 %v3008_v30, 0.0  ;;  %v3279_v50 = vmax.f32 %v3007_v57, 0.0 }
 0x302   : > { %v4164_v58 = vmax.f32 %v3770_v43, 0.0  ;;  %v2455_v6 = vmul.f32 %v10054_v19, %v2148_v48  ;;  %v2456_v51 = vmul.f32 %v10057_v20, %v2148_v48  ;;  %v1307_v5 = vpop.permute.xlu1 %1306  ;;  %v6116_v36 = vld [vmem:[%s13284_s7 + $0xc8] sm:$0xff] }
 0x303   : > { %v1626_v2 = vmul.f32 %v10046_v16, %v1307_v5  ;;  %v1627_v39 = vmul.f32 %v10049_v17, %v1307_v5  ;;  %v3774_v54 = vpop.f32.mrf.mxu0  ;;  %4013 = vmatmul.mubr.f32.gmra.mxu0 %v3277_v14  ;;  %v3010_v3 = vadd.f32 %v10067_v29, %v2726_v47  ;;  %v3009_v8 = vadd.f32 %v10061_v23, %v2725_v46 }
 0x304   : > { %v3775_v28 = vadd.f32 %v10951_v26, %v3774_v54  ;;  %4017 = vmatprep.mubr.f32.mxu0 %v3280_v40  ;;  %8590 = vmatmul.mubr.msk.f32.gmra.mxu1 %vm4246_vm0, %v4164_v58  ;;  %v11205_v40 = vld [vmem:[#allocation7] ss:$0 sm:$0xff] }
 0x305   : > { %v2727_v22 = vadd.f32 %v2455_v6, %v1626_v2  ;;  %v2728_v60 = vadd.f32 %v2456_v51, %v1627_v39  ;;  %v3776_v45 = vpop.f32.mrf.mxu0  ;;  %v2152_v11 = vpop.permute.xlu0 %2151  ;;  %5151 = vmatprep.mubr.f32.mxu1 %v13295_v1  ;;  %v3282_v24 = vmax.f32 %v3010_v3, 0.0  ;;  %v3281_v6 = vmax.f32 %v3009_v8, 0.0  ;;  %6175 = vmatpush2.msra.mxu1 %v6116_v36 }
 0x306   : > { %v4165_v25 = vmax.f32 %v3775_v28, 0.0  ;;  %v2457_v30 = vmul.f32 %v10054_v19, %v2152_v11  ;;  %v2458_v43 = vmul.f32 %v10057_v20, %v2152_v11  ;;  %v1312_v57 = vpop.permute.xlu1 %1311  ;;  %6176 = vmatprep.subr.mxu1 %v13295_v1 }
 0x307   : > { %v1628_v26 = vmul.f32 %v10046_v16, %v1312_v57  ;;  %v1629_v14 = vmul.f32 %v10049_v17, %v1312_v57  ;;  %v3779_v47 = vpop.f32.mrf.mxu0  ;;  %4018 = vmatmul.mubr.f32.gmra.mxu0 %v3279_v50  ;;  %v3012_v46 = vadd.f32 %v10067_v29, %v2728_v60  ;;  %v3011_v48 = vadd.f32 %v10061_v23, %v2727_v22 }
 0x308   : > { %v3780_v58 = vadd.f32 %v11205_v40, %v3779_v47  ;;  %4022 = vmatprep.mubr.f32.mxu0 %v3282_v24  ;;  %8591 = vmatmul.mubr.msk.f32.gmra.mxu1 %vm4246_vm0, %v4165_v25 }
 0x309   : > { %v2729_v51 = vadd.f32 %v2457_v30, %v1628_v26  ;;  %v2730_v5 = vadd.f32 %v2458_v43, %v1629_v14  ;;  %v3781_v2 = vpop.f32.mrf.mxu0  ;;  %v2156_v39 = vpop.permute.xlu0 %2155  ;;  %5157 = vmatprep.mubr.f32.mxu1 %v13295_v1  ;;  %v3284_v54 = vmax.f32 %v3012_v46, 0.0  ;;  %v3283_v24 = vmax.f32 %v3011_v48, 0.0 }
 0x30a   : > { %v4166_v3 = vmax.f32 %v3780_v58, 0.0  ;;  %v2459_v50 = vmul.f32 %v10054_v19, %v2156_v39  ;;  %v2460_v28 = vmul.f32 %v10057_v20, %v2156_v39  ;;  %v1317_v22 = vpop.permute.xlu1 %1316 }
 0x30b   : > { %v1630_v60 = vmul.f32 %v10046_v16, %v1317_v22  ;;  %v1631_v8 = vmul.f32 %v10049_v17, %v1317_v22  ;;  %v3784_v45 = vpop.f32.mrf.mxu0  ;;  %4023 = vmatmul.mubr.f32.gmra.mxu0 %v3281_v6  ;;  %v3014_v11 = vadd.f32 %v10067_v29, %v2730_v5  ;;  %v3013_v30 = vadd.f32 %v10061_v23, %v2729_v51 }
 0x30c   : > { %v3785_v25 = vadd.f32 %v11205_v40, %v3784_v45  ;;  %4027 = vmatprep.mubr.f32.mxu0 %v3284_v54  ;;  %8592 = vmatmul.mubr.msk.f32.gmra.mxu1 %vm4246_vm0, %v4166_v3 }
 0x30d   : > { %v2731_v43 = vadd.f32 %v2459_v50, %v1630_v60  ;;  %v2732_v57 = vadd.f32 %v2460_v28, %v1631_v8  ;;  %v3786_v26 = vpop.f32.mrf.mxu0  ;;  %v2160_v14 = vpop.permute.xlu0 %2159  ;;  %5163 = vmatprep.mubr.f32.mxu1 %v13295_v1  ;;  %v3286_v47 = vmax.f32 %v3014_v11, 0.0  ;;  %v3285_v3 = vmax.f32 %v3013_v30, 0.0 }
 0x30e   : > { %v4167_v46 = vmax.f32 %v3785_v25, 0.0  ;;  %v2461_v36 = vmul.f32 %v10054_v19, %v2160_v14  ;;  %v2462_v58 = vmul.f32 %v10057_v20, %v2160_v14  ;;  %v1322_v48 = vpop.permute.xlu1 %1321 }
 0x30f   : > { %v1632_v6 = vmul.f32 %v10046_v16, %v1322_v48  ;;  %v1633_v5 = vmul.f32 %v10049_v17, %v1322_v48  ;;  %v3789_v2 = vpop.f32.mrf.mxu0  ;;  %4028 = vmatmul.mubr.f32.gmra.mxu0 %v3283_v24  ;;  %v3016_v51 = vadd.f32 %v10067_v29, %v2732_v57  ;;  %v3015_v39 = vadd.f32 %v10061_v23, %v2731_v43 }
 0x310   : > { %v3790_v54 = vadd.f32 %v11205_v40, %v3789_v2  ;;  %4032 = vmatprep.mubr.f32.mxu0 %v3286_v47  ;;  %8593 = vmatmul.mubr.msk.f32.gmra.mxu1 %vm4246_vm0, %v4167_v46  ;;  %v6115_v2 = vld [vmem:[%s13284_s7 + $0xc0] sm:$0xff] }
 0x311   : > { %v2733_v50 = vadd.f32 %v2461_v36, %v1632_v6  ;;  %v2734_v28 = vadd.f32 %v2462_v58, %v1633_v5  ;;  %v3791_v22 = vpop.f32.mrf.mxu0  ;;  %v2164_v60 = vpop.permute.xlu0 %2163  ;;  %5169 = vmatprep.mubr.f32.mxu1 %v13295_v1  ;;  %v3288_v8 = vmax.f32 %v3016_v51, 0.0  ;;  %v3287_v14 = vmax.f32 %v3015_v39, 0.0  ;;  %6177 = vmatpush2.msra.mxu1 %v6115_v2 }
 0x312   : > { %v4168_v45 = vmax.f32 %v3790_v54, 0.0  ;;  %v2463_v11 = vmul.f32 %v10054_v19, %v2164_v60  ;;  %v2464_v24 = vmul.f32 %v10057_v20, %v2164_v60  ;;  %v1327_v25 = vpop.permute.xlu1 %1326  ;;  %6178 = vmatprep.subr.mxu1 %v13295_v1 }
 0x313   : > { %v1634_v43 = vmul.f32 %v10046_v16, %v1327_v25  ;;  %v1635_v57 = vmul.f32 %v10049_v17, %v1327_v25  ;;  %v3794_v26 = vpop.f32.mrf.mxu0  ;;  %4033 = vmatmul.mubr.f32.gmra.mxu0 %v3285_v3  ;;  %v3018_v30 = vadd.f32 %v10067_v29, %v2734_v28  ;;  %v3017_v46 = vadd.f32 %v10061_v23, %v2733_v50 }
 0x314   : > { %v3795_v47 = vadd.f32 %v11205_v40, %v3794_v26  ;;  %4037 = vmatprep.mubr.f32.mxu0 %v3288_v8  ;;  %8594 = vmatmul.mubr.msk.f32.gmra.mxu1 %vm4246_vm0, %v4168_v45 }
 0x315   : > { %v2735_v36 = vadd.f32 %v2463_v11, %v1634_v43  ;;  %v2736_v58 = vadd.f32 %v2464_v24, %v1635_v57  ;;  %v3796_v48 = vpop.f32.mrf.mxu0  ;;  %v2168_v6 = vpop.permute.xlu0 %2167  ;;  %5175 = vmatprep.mubr.f32.mxu1 %v13295_v1  ;;  %v3290_v5 = vmax.f32 %v3018_v30, 0.0  ;;  %v3289_v11 = vmax.f32 %v3017_v46, 0.0 }
 0x316   : > { %v4169_v51 = vmax.f32 %v3795_v47, 0.0  ;;  %v2465_v39 = vmul.f32 %v10054_v19, %v2168_v6  ;;  %v2466_v54 = vmul.f32 %v10057_v20, %v2168_v6  ;;  %v1332_v3 = vpop.permute.xlu1 %1331 }
 0x317   : > { %v1636_v50 = vmul.f32 %v10046_v16, %v1332_v3  ;;  %v1637_v28 = vmul.f32 %v10049_v17, %v1332_v3  ;;  %v3799_v22 = vpop.f32.mrf.mxu0  ;;  %4038 = vmatmul.mubr.f32.gmra.mxu0 %v3287_v14  ;;  %v3020_v60 = vadd.f32 %v10067_v29, %v2736_v58  ;;  %v3019_v24 = vadd.f32 %v10061_v23, %v2735_v36 }
 0x318   : > { %v3800_v8 = vadd.f32 %v11205_v40, %v3799_v22  ;;  %4042 = vmatprep.mubr.f32.mxu0 %v3290_v5  ;;  %v11247_v45 = vpop.f32.mrf.mxu1  ;;  %8595 = vmatmul.mubr.msk.f32.gmra.mxu1 %vm4246_vm0, %v4169_v51 }
 0x319   : > { %v2737_v25 = vadd.f32 %v2465_v39, %v1636_v50  ;;  %v2738_v43 = vadd.f32 %v2466_v54, %v1637_v28  ;;  %v3801_v57 = vpop.f32.mrf.mxu0  ;;  %v2172_v26 = vpop.permute.xlu0 %2171  ;;  %5181 = vmatprep.mubr.f32.mxu1 %v13295_v1  ;;  %v3292_v6 = vmax.f32 %v3020_v60, 0.0  ;;  %v3291_v54 = vmax.f32 %v3019_v24, 0.0 }
 0x31a   : > { %v4170_v30 = vmax.f32 %v3800_v8, 0.0  ;;  %v2467_v14 = vmul.f32 %v10054_v19, %v2172_v26  ;;  %v2468_v47 = vmul.f32 %v10057_v20, %v2172_v26  ;;  %v1337_v58 = vpop.permute.xlu1 %1336  ;;  %v11255_v48 = vpop.f32.mrf.mxu1 }
 0x31b   : > { %v1638_v46 = vmul.f32 %v10046_v16, %v1337_v58  ;;  %v1639_v36 = vmul.f32 %v10049_v17, %v1337_v58  ;;  %v3804_v5 = vpop.f32.mrf.mxu0  ;;  %4043 = vmatmul.mubr.f32.gmra.mxu0 %v3289_v11  ;;  %v3022_v39 = vadd.f32 %v10067_v29, %v2738_v43  ;;  %v3021_v3 = vadd.f32 %v10061_v23, %v2737_v25 }
 0x31c   : > { %v3805_v2 = vadd.f32 %v11205_v40, %v3804_v5  ;;  %4047 = vmatprep.mubr.f32.mxu0 %v3292_v6  ;;  %v11260_v51 = vpop.f32.mrf.mxu1  ;;  %8596 = vmatmul.mubr.msk.f32.gmra.mxu1 %vm4246_vm0, %v4170_v30 }
 0x31d   : > { %v2739_v50 = vadd.f32 %v2467_v14, %v1638_v46  ;;  %v2740_v28 = vadd.f32 %v2468_v47, %v1639_v36  ;;  %v3806_v22 = vpop.f32.mrf.mxu0  ;;  %v2176_v60 = vpop.permute.xlu0 %2175  ;;  %5187 = vmatprep.mubr.f32.mxu1 %v13295_v1  ;;  %v3294_v14 = vmax.f32 %v3022_v39, 0.0  ;;  %v3293_v46 = vmax.f32 %v3021_v3, 0.0  ;;  %v6114_v3 = vld [vmem:[%s13284_s7 + $0xb8] sm:$0xff] }
 0x31e   : > { %v4171_v8 = vmax.f32 %v3805_v2, 0.0  ;;  %v2469_v11 = vmul.f32 %v10054_v19, %v2176_v60  ;;  %v2470_v57 = vmul.f32 %v10057_v20, %v2176_v60  ;;  %v1342_v26 = vpop.permute.xlu1 %1341  ;;  %v11268_v58 = vpop.f32.mrf.mxu1  ;;  %6179 = vmatpush2.msra.mxu1 %v6114_v3 }
 0x31f   : > { %v1640_v30 = vmul.f32 %v10046_v16, %v1342_v26  ;;  %v1641_v24 = vmul.f32 %v10049_v17, %v1342_v26  ;;  %v3809_v43 = vpop.f32.mrf.mxu0  ;;  %4048 = vmatmul.mubr.f32.gmra.mxu0 %v3291_v54  ;;  %v3024_v6 = vadd.f32 %v10067_v29, %v2740_v28  ;;  %v3023_v36 = vadd.f32 %v10061_v23, %v2739_v50 }
 0x320   : > { %v3810_v25 = vadd.f32 %v11205_v40, %v3809_v43  ;;  %v11273_v47 = vpop.f32.mrf.mxu1  ;;  %8597 = vmatmul.mubr.msk.f32.gmra.mxu1 %vm4246_vm0, %v4171_v8  ;;  %4052 = vmatprep.mubr.f32.mxu0 %v3294_v14 }
 0x321   : > { %13322 = vst [vmem:[#allocation20_spill] sm:$0xff] %v11273_v47  ;;  %v2741_v5 = vadd.f32 %v2469_v11, %v1640_v30  ;;  %v2742_v2 = vadd.f32 %v2470_v57, %v1641_v24  ;;  %v3811_v22 = vpop.f32.mrf.mxu0  ;;  %v2180_v60 = vpop.permute.xlu0 %2179  ;;  %5193 = vmatprep.mubr.f32.mxu1 %v13295_v1  ;;  %v3296_v57 = vmax.f32 %v3024_v6, 0.0  ;;  %6180 = vmatprep.subr.mxu1 %v13295_v1 }
 0x322   : > { %v4172_v26 = vmax.f32 %v3810_v25, 0.0  ;;  %v2471_v54 = vmul.f32 %v10054_v19, %v2180_v60  ;;  %v2472_v39 = vmul.f32 %v10057_v20, %v2180_v60  ;;  %v1347_v43 = vpop.permute.xlu1 %1346  ;;  %v11281_v47 = vpop.f32.mrf.mxu1  ;;  %v3295_v25 = vmax.f32 %v3023_v36, 0.0 }
 0x323   : > { %13323 = vst [vmem:[#allocation21_spill] sm:$0xff] %v11281_v47  ;;  %v1642_v50 = vmul.f32 %v10046_v16, %v1347_v43  ;;  %v1643_v28 = vmul.f32 %v10049_v17, %v1347_v43  ;;  %v3814_v8 = vpop.f32.mrf.mxu0  ;;  %4053 = vmatmul.mubr.f32.gmra.mxu0 %v3293_v46  ;;  %v3026_v24 = vadd.f32 %v10067_v29, %v2742_v2 }
 0x324   : > { %v3815_v11 = vadd.f32 %v11205_v40, %v3814_v8  ;;  %v11289_v30 = vpop.f32.mrf.mxu1  ;;  %8598 = vmatmul.mubr.msk.f32.gmra.mxu1 %vm4246_vm0, %v4172_v26  ;;  %v3025_v14 = vadd.f32 %v10061_v23, %v2741_v5  ;;  %4057 = vmatprep.mubr.f32.mxu0 %v3296_v57 }
 0x325   : > { %13324 = vst [vmem:[#allocation22_spill] sm:$0xff] %v11289_v30  ;;  %v2743_v22 = vadd.f32 %v2471_v54, %v1642_v50  ;;  %v2744_v60 = vadd.f32 %v2472_v39, %v1643_v28  ;;  %v3816_v43 = vpop.f32.mrf.mxu0  ;;  %v2184_v47 = vpop.permute.xlu0 %2183  ;;  %5199 = vmatprep.mubr.f32.mxu1 %v13295_v1  ;;  %v3298_v39 = vmax.f32 %v3026_v24, 0.0 }
 0x326   : > { %v4173_v46 = vmax.f32 %v3815_v11, 0.0  ;;  %v2473_v6 = vmul.f32 %v10054_v19, %v2184_v47  ;;  %v2474_v3 = vmul.f32 %v10057_v20, %v2184_v47  ;;  %v1352_v26 = vpop.permute.xlu1 %1351  ;;  %v11298_v8 = vpop.f32.mrf.mxu1  ;;  %v3297_v11 = vmax.f32 %v3025_v14, 0.0 }
 0x327   : > { %13325 = vst [vmem:[#allocation23_spill] sm:$0xff] %v11298_v8  ;;  %v1644_v2 = vmul.f32 %v10046_v16, %v1352_v26  ;;  %v1645_v36 = vmul.f32 %v10049_v17, %v1352_v26  ;;  %v3819_v5 = vpop.f32.mrf.mxu0  ;;  %4058 = vmatmul.mubr.f32.gmra.mxu0 %v3295_v25  ;;  %v3028_v28 = vadd.f32 %v10067_v29, %v2744_v60  ;;  %v13327_v8 = vmov 0.0  }
 0x328   : > { %v3820_v54 = vadd.f32 %v11205_v40, %v3819_v5  ;;  %v11303_v50 = vpop.f32.mrf.mxu1  ;;  %8599 = vmatmul.mubr.msk.f32.gmra.mxu1 %vm4246_vm0, %v4173_v46  ;;  %v3027_v47 = vadd.f32 %v10061_v23, %v2743_v22  ;;  %4062 = vmatprep.mubr.f32.mxu0 %v3298_v39 }
 0x329   : > { %13326 = vst [vmem:[#allocation24_spill] sm:$0xff] %v11303_v50  ;;  %v2745_v57 = vadd.f32 %v2473_v6, %v1644_v2  ;;  %v2746_v43 = vadd.f32 %v2474_v3, %v1645_v36  ;;  %v3821_v1 = vpop.f32.mrf.mxu0  ;;  %v2188_v30 = vpop.permute.xlu0 %2187  ;;  %5205 = vmatprep.mubr.f32.mxu1 %v13327_v8  ;;  %v3300_v46 = vmax.f32 %v3028_v28, 0.0 }
 0x32a   : > { %v4174_v26 = vmax.f32 %v3820_v54, 0.0  ;;  %v2475_v25 = vmul.f32 %v10054_v19, %v2188_v30  ;;  %v2476_v24 = vmul.f32 %v10057_v20, %v2188_v30  ;;  %v1357_v5 = vpop.permute.xlu1 %1356  ;;  %v11311_v50 = vpop.f32.mrf.mxu1  ;;  %v3299_v2 = vmax.f32 %v3027_v47, 0.0 }
 0x32b   : > { %13328 = vst [vmem:[#allocation25_spill] sm:$0xff] %v11311_v50  ;;  %v1646_v60 = vmul.f32 %v10046_v16, %v1357_v5  ;;  %v1647_v14 = vmul.f32 %v10049_v17, %v1357_v5  ;;  %v3824_v22 = vpop.f32.mrf.mxu0  ;;  %4063 = vmatmul.mubr.f32.gmra.mxu0 %v3297_v11  ;;  %v3030_v3 = vadd.f32 %v10067_v29, %v2746_v43 }
 0x32c   : > { %v3825_v1 = vadd.f32 %v11205_v40, %v3824_v22  ;;  %v11316_v6 = vpop.f32.mrf.mxu1  ;;  %8600 = vmatmul.mubr.msk.f32.gmra.mxu1 %vm4246_vm0, %v4174_v26  ;;  %v3029_v30 = vadd.f32 %v10061_v23, %v2745_v57  ;;  %4067 = vmatprep.mubr.f32.mxu0 %v3300_v46  ;;  %v6113_v26 = vld [vmem:[%s13284_s7 + $0xb0] sm:$0xff] }
 0x32d   : > { %13329 = vst [vmem:[#allocation26_spill] sm:$0xff] %v11316_v6  ;;  %v2747_v36 = vadd.f32 %v2475_v25, %v1646_v60  ;;  %v2748_v54 = vadd.f32 %v2476_v24, %v1647_v14  ;;  %v3826_v39 = vpop.f32.mrf.mxu0  ;;  %v2192_v50 = vpop.permute.xlu0 %2191  ;;  %5211 = vmatprep.mubr.f32.mxu1 %v13327_v8  ;;  %v3302_v24 = vmax.f32 %v3030_v3, 0.0  ;;  %6181 = vmatpush2.msra.mxu1 %v6113_v26 }
 0x32e   : > { %v4175_v5 = vmax.f32 %v3825_v1, 0.0  ;;  %v2477_v11 = vmul.f32 %v10054_v19, %v2192_v50  ;;  %v2478_v28 = vmul.f32 %v10057_v20, %v2192_v50  ;;  %v1362_v22 = vpop.permute.xlu1 %1361  ;;  %v11324_v6 = vpop.f32.mrf.mxu1  ;;  %v3301_v14 = vmax.f32 %v3029_v30, 0.0  ;;  %6182 = vmatprep.subr.mxu1 %v13327_v8 }
 0x32f   : > { %13330 = vst [vmem:[#allocation27_spill] sm:$0xff] %v11324_v6  ;;  %v1648_v43 = vmul.f32 %v10046_v16, %v1362_v22  ;;  %v1649_v47 = vmul.f32 %v10049_v17, %v1362_v22  ;;  %v3829_v57 = vpop.f32.mrf.mxu0  ;;  %4068 = vmatmul.mubr.f32.gmra.mxu0 %v3299_v2  ;;  %v3032_v50 = vadd.f32 %v10067_v29, %v2748_v54 }
 0x330   : > { %v3830_v25 = vadd.f32 %v11205_v40, %v3829_v57  ;;  %v11332_v60 = vpop.f32.mrf.mxu1  ;;  %8601 = vmatmul.mubr.msk.f32.gmra.mxu1 %vm4246_vm0, %v4175_v5  ;;  %v3031_v1 = vadd.f32 %v10061_v23, %v2747_v36  ;;  %4072 = vmatprep.mubr.f32.mxu0 %v3302_v24 }
 0x331   : > { %13331 = vst [vmem:[#allocation28_spill] sm:$0xff] %v11332_v60  ;;  %v2749_v46 = vadd.f32 %v2477_v11, %v1648_v43  ;;  %v2750_v39 = vadd.f32 %v2478_v28, %v1649_v47  ;;  %v3831_v22 = vpop.f32.mrf.mxu0  ;;  %v2196_v2 = vpop.permute.xlu0 %2195  ;;  %5217 = vmatprep.mubr.f32.mxu1 %v13327_v8  ;;  %v3304_v28 = vmax.f32 %v3032_v50, 0.0 }
 0x332   : > { %v4176_v6 = vmax.f32 %v3830_v25, 0.0  ;;  %v2479_v3 = vmul.f32 %v10054_v19, %v2196_v2  ;;  %v2480_v57 = vmul.f32 %v10057_v20, %v2196_v2  ;;  %v1367_v60 = vpop.permute.xlu1 %1366  ;;  %v11340_v5 = vpop.f32.mrf.mxu1  ;;  %v3303_v20 = vmax.f32 %v3031_v1, 0.0 }
 0x333   : > { %v1650_v30 = vmul.f32 %v10046_v16, %v1367_v60  ;;  %v1651_v36 = vmul.f32 %v10049_v17, %v1367_v60  ;;  %v3834_v54 = vpop.f32.mrf.mxu0  ;;  %4073 = vmatmul.mubr.f32.gmra.mxu0 %v3301_v14  ;;  %v3034_v19 = vadd.f32 %v10067_v29, %v2750_v39  ;;  %v3033_v47 = vadd.f32 %v10061_v23, %v2749_v46 }
 0x334   : > { %v3835_v11 = vadd.f32 %v11205_v40, %v3834_v54  ;;  %v11346_v43 = vpop.f32.mrf.mxu1  ;;  %8602 = vmatmul.mubr.msk.f32.gmra.mxu1 %vm4246_vm0, %v4176_v6  ;;  %4077 = vmatprep.mubr.f32.mxu0 %v3304_v28  ;;  %v3415_v54 = vadd.f32 %v11205_v40, %v10428_v38  ;;  %v6112_v28 = vld [vmem:[%s13284_s7 + $0xa8] sm:$0xff] }
 0x335   : > { %v2751_v26 = vadd.f32 %v2479_v3, %v1650_v30  ;;  %v2752_v25 = vadd.f32 %v2480_v57, %v1651_v36  ;;  %v3836_v24 = vpop.f32.mrf.mxu0  ;;  %5223 = vmatprep.mubr.f32.mxu1 %v13327_v8  ;;  %v3306_v60 = vmax.f32 %v3034_v19, 0.0  ;;  %v3305_v46 = vmax.f32 %v3033_v47, 0.0  ;;  %6183 = vmatpush2.msra.mxu1 %v6112_v28 }
 0x336   : > { %v4177_v16 = vmax.f32 %v3835_v11, 0.0  ;;  %v11352_v17 = vpop.f32.mrf.mxu1  ;;  %6184 = vmatprep.subr.mxu1 %v13327_v8  ;;  %v4093_v38 = vmax.f32 %v3415_v54, 0.0  ;;  %v3420_v24 = vadd.f32 %v11205_v40, %v10437_v53  ;;  %v3425_v53 = vadd.f32 %v11205_v40, %v10446_v7 }
 0x337   : > { %v3839_v50 = vpop.f32.mrf.mxu0  ;;  %4078 = vmatmul.mubr.f32.gmra.mxu0 %v3303_v20  ;;  %v3036_v14 = vadd.f32 %v10067_v29, %v2752_v25  ;;  %v3035_v39 = vadd.f32 %v10061_v23, %v2751_v26  ;;  %v3430_v7 = vadd.f32 %v11205_v40, %v10455_v59 }
 0x338   : > { %v3840_v6 = vadd.f32 %v11205_v40, %v3839_v50  ;;  %4082 = vmatprep.mubr.f32.mxu0 %v3306_v60  ;;  %v11356_v1 = vpop.f32.mrf.mxu1  ;;  %8603 = vmatmul.mubr.msk.f32.gmra.mxu1 %vm4246_vm0, %v4177_v16 }
 0x339   : > { %v3841_v22 = vpop.f32.mrf.mxu0  ;;  %5229 = vmatprep.mubr.f32.mxu1 %v13327_v8  ;;  %v3308_v2 = vmax.f32 %v3036_v14, 0.0  ;;  %v3307_v23 = vmax.f32 %v3035_v39, 0.0  ;;  %v4094_v39 = vmax.f32 %v3420_v24, 0.0  ;;  %v4096_v59 = vmax.f32 %v3430_v7, 0.0 }
 0x33a   : > { %v4178_v3 = vmax.f32 %v3840_v6, 0.0  ;;  %v11361_v57 = vpop.f32.mrf.mxu1 }
 0x33b   : > { %v3844_v30 = vpop.f32.mrf.mxu0  ;;  %4083 = vmatmul.mubr.f32.gmra.mxu0 %v3305_v46 }
 0x33c   : > { %v3845_v29 = vadd.f32 %v11205_v40, %v3844_v30  ;;  %4087 = vmatprep.mubr.f32.mxu0 %v3308_v2  ;;  %v11364_v36 = vpop.f32.mrf.mxu1  ;;  %8604 = vmatmul.mubr.msk.f32.gmra.mxu1 %vm4246_vm0, %v4178_v3 }
 0x33d   : > { %v3846_v11 = vpop.f32.mrf.mxu0  ;;  %5235 = vmatprep.mubr.f32.mxu1 %v13327_v8 }
 0x33e   : > { %v4179_v19 = vmax.f32 %v3845_v29, 0.0  ;;  %v11373_v20 = vpop.f32.mrf.mxu1 }
 0x33f   : > { %v3849_v47 = vpop.f32.mrf.mxu0  ;;  %4088 = vmatmul.mubr.f32.gmra.mxu0 %v3307_v23  ;;  %v4095_v23 = vmax.f32 %v3425_v53, 0.0 }
 0x340   : > { %v3850_v26 = vadd.f32 %v11205_v40, %v3849_v47  ;;  %v11377_v25 = vpop.f32.mrf.mxu1  ;;  %8605 = vmatmul.mubr.msk.f32.gmra.mxu1 %vm4246_vm0, %v4179_v19  ;;  %4719 = vmatprep.mubr.f32.mxu0 %v13327_v8 }
 0x341   : > { %v3851_v16 = vpop.f32.mrf.mxu0  ;;  %5241 = vmatprep.mubr.f32.mxu1 %v13327_v8 }
 0x342   : > { %v4180_v60 = vmax.f32 %v3850_v26, 0.0  ;;  %v11384_v50 = vpop.f32.mrf.mxu1  ;;  %v6111_v26 = vld [vmem:[%s13284_s7 + $0xa0] sm:$0xff]  ;;  %v3435_v16 = vadd.f32 %v11205_v40, %v10464_v44 }
 0x343   : > { %v3854_v14 = vpop.f32.mrf.mxu0  ;;  %8519 = vmatmul.mubr.msk.f32.vlgmr.msra.gmra.mxu0 %vm4246_vm0, %v4093_v38  ;;  %6185 = vmatpush2.msra.mxu1 %v6111_v26 }
 0x344   : > { %v3855_v6 = vadd.f32 %v11205_v40, %v3854_v14  ;;  %v11388_v46 = vpop.f32.mrf.mxu1  ;;  %8606 = vmatmul.mubr.msk.f32.gmra.mxu1 %vm4246_vm0, %v4180_v60  ;;  %4725 = vmatprep.mubr.f32.mxu0 %v13327_v8  ;;  %v4097_v44 = vmax.f32 %v3435_v16, 0.0 }
 0x345   : > { %v3856_v22 = vpop.f32.mrf.mxu0  ;;  %5247 = vmatprep.mubr.f32.mxu1 %v13327_v8  ;;  %6186 = vmatprep.subr.mxu1 %v13327_v8 }
 0x346   : > { %v4181_v2 = vmax.f32 %v3855_v6, 0.0  ;;  %v11395_v3 = vpop.f32.mrf.mxu1 }
 0x347   : > { %v3859_v30 = vpop.f32.mrf.mxu0  ;;  %8520 = vmatmul.mubr.msk.f32.gmra.mxu0 %vm4246_vm0, %v4094_v39 }
 0x348   : > { %v3860_v29 = vadd.f32 %v11205_v40, %v3859_v30  ;;  %v11399_v54 = vpop.f32.mrf.mxu1  ;;  %8607 = vmatmul.mubr.msk.f32.gmra.mxu1 %vm4246_vm0, %v4181_v2  ;;  %4731 = vmatprep.mubr.f32.mxu0 %v13327_v8  ;;  %v3440_v2 = vadd.f32 %v11205_v40, %v10473_v62  ;;  %v3445_v62 = vadd.f32 %v11205_v40, %v10482_v18 }
 0x349   : > { %v3861_v11 = vpop.f32.mrf.mxu0  ;;  %5253 = vmatprep.mubr.f32.mxu1 %v13327_v8 }
 0x34a   : > { %v4182_v28 = vmax.f32 %v3860_v29, 0.0  ;;  %v11406_v19 = vpop.f32.mrf.mxu1  ;;  %v4099_v18 = vmax.f32 %v3445_v62, 0.0 }
 0x34b   : > { %v3864_v47 = vpop.f32.mrf.mxu0  ;;  %8521 = vmatmul.mubr.msk.f32.gmra.mxu0 %vm4246_vm0, %v4095_v23 }
 0x34c   : > { %v3865_v38 = vadd.f32 %v11205_v40, %v3864_v47  ;;  %v11413_v24 = vpop.f32.mrf.mxu1  ;;  %8608 = vmatmul.mubr.msk.f32.gmra.mxu1 %vm4246_vm0, %v4182_v28  ;;  %4737 = vmatprep.mubr.f32.mxu0 %v13327_v8  ;;  %v4098_v47 = vmax.f32 %v3440_v2, 0.0 }
 0x34d   : > { %v3866_v60 = vpop.f32.mrf.mxu0  ;;  %5259 = vmatprep.mubr.f32.mxu1 %v13327_v8 }
 0x34e   : > { %v4183_v14 = vmax.f32 %v3865_v38, 0.0  ;;  %v11420_v6 = vpop.f32.mrf.mxu1  ;;  %v6110_v60 = vld [vmem:[%s13284_s7 + $0x98] sm:$0xff] }
 0x34f   : > { %v3869_v39 = vpop.f32.mrf.mxu0  ;;  %8522 = vmatmul.mubr.msk.f32.gmra.mxu0 %vm4246_vm0, %v4096_v59  ;;  %6187 = vmatpush2.msra.mxu1 %v6110_v60 }
 0x350   : > { %v3870_v53 = vadd.f32 %v11205_v40, %v3869_v39  ;;  %v11425_v22 = vpop.f32.mrf.mxu1  ;;  %8609 = vmatmul.mubr.msk.f32.gmra.mxu1 %vm4246_vm0, %v4183_v14  ;;  %4743 = vmatprep.mubr.f32.mxu0 %v13327_v8 }
 0x351   : > { %v3871_v30 = vpop.f32.mrf.mxu0  ;;  %5265 = vmatprep.mubr.f32.mxu1 %v13327_v8  ;;  %6188 = vmatprep.subr.mxu1 %v13327_v8 }
 0x352   : > { %v4184_v29 = vmax.f32 %v3870_v53, 0.0  ;;  %v11432_v23 = vpop.f32.mrf.mxu1  ;;  %v3450_v53 = vadd.f32 %v11205_v40, %v10491_v37 }
 0x353   : > { %v3874_v7 = vpop.f32.mrf.mxu0  ;;  %8523 = vmatmul.mubr.msk.f32.gmra.mxu0 %vm4246_vm0, %v4097_v44 }
 0x354   : > { %v3875_v11 = vadd.f32 %v11205_v40, %v3874_v7  ;;  %v11436_v28 = vpop.f32.mrf.mxu1  ;;  %8610 = vmatmul.mubr.msk.f32.gmra.mxu1 %vm4246_vm0, %v4184_v29  ;;  %4749 = vmatprep.mubr.f32.mxu0 %v13327_v8  ;;  %v4100_v37 = vmax.f32 %v3450_v53, 0.0 }
 0x355   : > { %v3876_v26 = vpop.f32.mrf.mxu0  ;;  %5271 = vmatprep.mubr.f32.mxu1 %v13327_v8 }
 0x356   : > { %v4185_v38 = vmax.f32 %v3875_v11, 0.0  ;;  %v11443_v59 = vpop.f32.mrf.mxu1 }
 0x357   : > { %v3879_v16 = vpop.f32.mrf.mxu0  ;;  %8524 = vmatmul.mubr.msk.f32.gmra.mxu0 %vm4246_vm0, %v4098_v47  ;;  %v3455_v47 = vadd.f32 %v11205_v40, %v10500_v55  ;;  %v3460_v55 = vadd.f32 %v11205_v40, %v10509_v13  ;;  %v3465_v13 = vadd.f32 %v11205_v40, %v10518_v34 }
 0x358   : > { %v3880_v14 = vadd.f32 %v11205_v40, %v3879_v16  ;;  %v11450_v39 = vpop.f32.mrf.mxu1  ;;  %8611 = vmatmul.mubr.msk.f32.gmra.mxu1 %vm4246_vm0, %v4185_v38  ;;  %4755 = vmatprep.mubr.f32.mxu0 %v13327_v8 }
 0x359   : > { %v3881_v44 = vpop.f32.mrf.mxu0  ;;  %5277 = vmatprep.mubr.f32.mxu1 %v13327_v8  ;;  %v4103_v34 = vmax.f32 %v3465_v13, 0.0  ;;  %v3475_v13 = vadd.f32 %v11205_v40, %v10536_v12  ;;  %v3480_v12 = vadd.f32 %v11205_v40, %v10545_v35 }
 0x35a   : > { %v4186_v2 = vmax.f32 %v3880_v14, 0.0  ;;  %v11457_v30 = vpop.f32.mrf.mxu1 }
 0x35b   : > { %v3884_v29 = vpop.f32.mrf.mxu0  ;;  %8525 = vmatmul.mubr.msk.f32.gmra.mxu0 %vm4246_vm0, %v4099_v18  ;;  %v4101_v18 = vmax.f32 %v3455_v47, 0.0  ;;  %v4102_v47 = vmax.f32 %v3460_v55, 0.0  ;;  %v4106_v35 = vmax.f32 %v3480_v12, 0.0  ;;  %v3490_v12 = vadd.f32 %v11205_v40, %v10563_v15 }
 0x35c   : > { %v3885_v7 = vadd.f32 %v11205_v40, %v3884_v29  ;;  %v11462_v11 = vpop.f32.mrf.mxu1  ;;  %8612 = vmatmul.mubr.msk.f32.gmra.mxu1 %vm4246_vm0, %v4186_v2  ;;  %4761 = vmatprep.mubr.f32.mxu0 %v13327_v8  ;;  %v3495_v15 = vadd.f32 %v11205_v40, %v10572_v41  ;;  %v3500_v41 = vadd.f32 %v11205_v40, %v10581_v0 }
 0x35d   : > { %v3886_v62 = vpop.f32.mrf.mxu0  ;;  %5283 = vmatprep.mubr.f32.mxu1 %v13327_v8 }
 0x35e   : > { %v4187_v26 = vmax.f32 %v3885_v7, 0.0  ;;  %v11469_v38 = vpop.f32.mrf.mxu1  ;;  %v4110_v0 = vmax.f32 %v3500_v41, 0.0 }
 0x35f   : > { %v3889_v16 = vpop.f32.mrf.mxu0  ;;  %8526 = vmatmul.mubr.msk.f32.gmra.mxu0 %vm4246_vm0, %v4100_v37 }
 0x360   : > { %v3890_v60 = vadd.f32 %v11205_v40, %v3889_v16  ;;  %v11473_v14 = vpop.f32.mrf.mxu1  ;;  %8613 = vmatmul.mubr.msk.f32.gmra.mxu1 %vm4246_vm0, %v4187_v26  ;;  %4767 = vmatprep.mubr.f32.mxu0 %v13327_v8 }
 0x361   : > { %v3891_v53 = vpop.f32.mrf.mxu0  ;;  %5289 = vmatprep.mubr.f32.mxu1 %v13327_v8 }
 0x362   : > { %v4188_v44 = vmax.f32 %v3890_v60, 0.0  ;;  %v11480_v2 = vpop.f32.mrf.mxu1  ;;  %v6109_v60 = vld [vmem:[%s13284_s7 + $0x90] sm:$0xff] }
 0x363   : > { %v3894_v29 = vpop.f32.mrf.mxu0  ;;  %8527 = vmatmul.mubr.msk.f32.gmra.mxu0 %vm4246_vm0, %v4101_v18  ;;  %6189 = vmatpush2.msra.mxu1 %v6109_v60 }
 0x364   : > { %v3895_v7 = vadd.f32 %v11205_v40, %v3894_v29  ;;  %v11484_v37 = vpop.f32.mrf.mxu1  ;;  %8614 = vmatmul.mubr.msk.f32.gmra.mxu1 %vm4246_vm0, %v4188_v44  ;;  %4773 = vmatprep.mubr.f32.mxu0 %v13327_v8  ;;  %v3470_v44 = vadd.f32 %v11205_v40, %v10527_v52 }
 0x365   : > { %v3896_v62 = vpop.f32.mrf.mxu0  ;;  %5295 = vmatprep.mubr.f32.mxu1 %v13327_v8  ;;  %6190 = vmatprep.subr.mxu1 %v13327_v8 }
 0x366   : > { %v4189_v26 = vmax.f32 %v3895_v7, 0.0  ;;  %v11491_v16 = vpop.f32.mrf.mxu1  ;;  %v4104_v52 = vmax.f32 %v3470_v44, 0.0  ;;  %v4105_v44 = vmax.f32 %v3475_v13, 0.0  ;;  %v3485_v13 = vadd.f32 %v11205_v40, %v10554_v56 }
 0x367   : > { %v3899_v18 = vpop.f32.mrf.mxu0  ;;  %8528 = vmatmul.mubr.msk.f32.gmra.mxu0 %vm4246_vm0, %v4102_v47 }
 0x368   : > { %v3900_v53 = vadd.f32 %v11205_v40, %v3899_v18  ;;  %v11498_v55 = vpop.f32.mrf.mxu1  ;;  %8615 = vmatmul.mubr.msk.f32.gmra.mxu1 %vm4246_vm0, %v4189_v26  ;;  %4779 = vmatprep.mubr.f32.mxu0 %v13327_v8  ;;  %v4107_v56 = vmax.f32 %v3485_v13, 0.0  ;;  %v4108_v13 = vmax.f32 %v3490_v12, 0.0  ;;  %v4109_v12 = vmax.f32 %v3495_v15, 0.0 }
 0x369   : > { %13332 = vst [vmem:[#allocation29_spill] sm:$0xff] %v11498_v55  ;;  %v3901_v29 = vpop.f32.mrf.mxu0  ;;  %5301 = vmatprep.mubr.f32.mxu1 %v13327_v8 }
 0x36a   : > { %v4190_v7 = vmax.f32 %v3900_v53, 0.0  ;;  %v11506_v47 = vpop.f32.mrf.mxu1 }
 0x36b   : > { %v3904_v62 = vpop.f32.mrf.mxu0  ;;  %8529 = vmatmul.mubr.msk.f32.gmra.mxu0 %vm4246_vm0, %v4103_v34 }
 0x36c   : > { %v3905_v60 = vadd.f32 %v11205_v40, %v3904_v62  ;;  %v11510_v26 = vpop.f32.mrf.mxu1  ;;  %8616 = vmatmul.mubr.msk.f32.gmra.mxu1 %vm4246_vm0, %v4190_v7  ;;  %4785 = vmatprep.mubr.f32.mxu0 %v13327_v8 }
 0x36d   : > { %13333 = vst [vmem:[#allocation30_spill] sm:$0xff] %v11510_v26  ;;  %v3906_v18 = vpop.f32.mrf.mxu0  ;;  %5307 = vmatprep.mubr.f32.mxu1 %v13327_v8 }
 0x36e   : > { %v4191_v53 = vmax.f32 %v3905_v60, 0.0  ;;  %v11517_v29 = vpop.f32.mrf.mxu1 }
 0x36f   : > { %v3909_v55 = vpop.f32.mrf.mxu0  ;;  %8530 = vmatmul.mubr.msk.f32.gmra.mxu0 %vm4246_vm0, %v4104_v52 }
 0x370   : > { %v3910_v34 = vadd.f32 %v11205_v40, %v3909_v55  ;;  %v11521_v62 = vpop.f32.mrf.mxu1  ;;  %8617 = vmatmul.mubr.msk.f32.gmra.mxu1 %vm4246_vm0, %v4191_v53  ;;  %4791 = vmatprep.mubr.f32.mxu0 %v13327_v8  ;;  %v6108_v55 = vld [vmem:[%s13284_s7 + $0x88] sm:$0xff] }
 0x371   : > { %v3911_v7 = vpop.f32.mrf.mxu0  ;;  %5313 = vmatprep.mubr.f32.mxu1 %v13327_v8  ;;  %6191 = vmatpush2.msra.mxu1 %v6108_v55 }
 0x372   : > { %v4192_v60 = vmax.f32 %v3910_v34, 0.0  ;;  %v11528_v18 = vpop.f32.mrf.mxu1  ;;  %6192 = vmatprep.subr.mxu1 %v13327_v8 }
 0x373   : > { %v3914_v26 = vpop.f32.mrf.mxu0  ;;  %8531 = vmatmul.mubr.msk.f32.gmra.mxu0 %vm4246_vm0, %v4105_v44 }
 0x374   : > { %v3915_v52 = vadd.f32 %v11205_v40, %v3914_v26  ;;  %v11535_v53 = vpop.f32.mrf.mxu1  ;;  %8618 = vmatmul.mubr.msk.f32.gmra.mxu1 %vm4246_vm0, %v4192_v60  ;;  %4797 = vmatprep.mubr.f32.mxu0 %v13327_v8 }
 0x375   : > { %13334 = vst [vmem:[#allocation31_spill] sm:$0xff] %v11535_v53  ;;  %v3916_v34 = vpop.f32.mrf.mxu0  ;;  %5319 = vmatprep.mubr.f32.mxu1 %v13327_v8 }
 0x376   : > { %v4193_v44 = vmax.f32 %v3915_v52, 0.0  ;;  %v11542_v7 = vpop.f32.mrf.mxu1 }
 0x377   : > { %13335 = vst [vmem:[#allocation32_spill] sm:$0xff] %v11542_v7  ;;  %v3919_v26 = vpop.f32.mrf.mxu0  ;;  %8532 = vmatmul.mubr.msk.f32.gmra.mxu0 %vm4246_vm0, %v4106_v35 }
 0x378   : > { %v3920_v60 = vadd.f32 %v11205_v40, %v3919_v26  ;;  %v11547_v53 = vpop.f32.mrf.mxu1  ;;  %8619 = vmatmul.mubr.msk.f32.gmra.mxu1 %vm4246_vm0, %v4193_v44  ;;  %4803 = vmatprep.mubr.f32.mxu0 %v13327_v8 }
 0x379   : > { %13336 = vst [vmem:[#allocation33_spill] sm:$0xff] %v11547_v53  ;;  %v3921_v55 = vpop.f32.mrf.mxu0  ;;  %5325 = vmatprep.mubr.f32.mxu1 %v13327_v8 }
 0x37a   : > { %v4194_v52 = vmax.f32 %v3920_v60, 0.0  ;;  %v11554_v34 = vpop.f32.mrf.mxu1 }
 0x37b   : > { %v3924_v7 = vpop.f32.mrf.mxu0  ;;  %8533 = vmatmul.mubr.msk.f32.gmra.mxu0 %vm4246_vm0, %v4107_v56 }
 0x37c   : > { %v3925_v35 = vadd.f32 %v11205_v40, %v3924_v7  ;;  %v11558_v26 = vpop.f32.mrf.mxu1  ;;  %8620 = vmatmul.mubr.msk.f32.gmra.mxu1 %vm4246_vm0, %v4194_v52  ;;  %4809 = vmatprep.mubr.f32.mxu0 %v13327_v8 }
 0x37d   : > { %v3926_v44 = vpop.f32.mrf.mxu0  ;;  %5331 = vmatprep.mubr.f32.mxu1 %v13327_v8 }
 0x37e   : > { %v4195_v60 = vmax.f32 %v3925_v35, 0.0  ;;  %v11565_v55 = vpop.f32.mrf.mxu1  ;;  %v6107_v35 = vld [vmem:[%s13284_s7 + $0x80] sm:$0xff] }
 0x37f   : > { %v3929_v53 = vpop.f32.mrf.mxu0  ;;  %8534 = vmatmul.mubr.msk.f32.gmra.mxu0 %vm4246_vm0, %v4108_v13  ;;  %6193 = vmatpush2.msra.mxu1 %v6107_v35 }
 0x380   : > { %v3930_v7 = vadd.f32 %v11205_v40, %v3929_v53  ;;  %v11569_v56 = vpop.f32.mrf.mxu1  ;;  %8621 = vmatmul.mubr.msk.f32.gmra.mxu1 %vm4246_vm0, %v4195_v60  ;;  %4815 = vmatprep.mubr.f32.mxu0 %v13327_v8 }
 0x381   : > { %13337 = vst [vmem:[#allocation34_spill] sm:$0xff] %v11569_v56  ;;  %v3931_v52 = vpop.f32.mrf.mxu0  ;;  %5337 = vmatprep.mubr.f32.mxu1 %v13327_v8 }
 0x382   : > { %v4196_v13 = vmax.f32 %v3930_v7, 0.0  ;;  %v11579_v44 = vpop.f32.mrf.mxu1  ;;  %v3505_v52 = vadd.f32 %v11205_v40, %v10590_v27 }
 0x383   : > { %13338 = vst [vmem:[#allocation35_spill] sm:$0xff] %v11579_v44  ;;  %v3934_v53 = vpop.f32.mrf.mxu0  ;;  %8535 = vmatmul.mubr.msk.f32.gmra.mxu0 %vm4246_vm0, %v4109_v12  ;;  %v11593_v12 = vld [vmem:[#allocation7] ss:$0 sm:$0xff] }
 0x384   : > { %v3935_v60 = vadd.f32 %v11205_v40, %v3934_v53  ;;  %v11583_v15 = vpop.f32.mrf.mxu1  ;;  %8622 = vmatmul.mubr.msk.f32.gmra.mxu1 %vm4246_vm0, %v4196_v13  ;;  %4821 = vmatprep.mubr.f32.mxu0 %v13327_v8  ;;  %v4111_v27 = vmax.f32 %v3505_v52, 0.0  ;;  %v3510_v40 = vadd.f32 %v11593_v12, %v10599_v49  ;;  %v3515_v49 = vadd.f32 %v11593_v12, %v10608_v21 }
 0x385   : > { %v3936_v56 = vpop.f32.mrf.mxu0  ;;  %5343 = vmatprep.mubr.f32.mxu1 %v13327_v8  ;;  %v3520_v21 = vadd.f32 %v11593_v12, %v10617_v42  ;;  %v3525_v42 = vadd.f32 %v11593_v12, %v10626_v4  ;;  %v3530_v4 = vadd.f32 %v11593_v12, %v10635_v33  ;;  %v3535_v33 = vadd.f32 %v11593_v12, %v10644_v63 }
 0x386   : > { %v4197_v7 = vmax.f32 %v3935_v60, 0.0  ;;  %v11590_v35 = vpop.f32.mrf.mxu1  ;;  %v4112_v52 = vmax.f32 %v3510_v40, 0.0  ;;  %v4113_v40 = vmax.f32 %v3515_v49, 0.0  ;;  %v3540_v63 = vadd.f32 %v11593_v12, %v10653_v31 }
 0x387   : > { %v3939_v44 = vpop.f32.mrf.mxu0  ;;  %8536 = vmatmul.mubr.msk.f32.gmra.mxu0 %vm4246_vm0, %v4110_v0  ;;  %v4114_v49 = vmax.f32 %v3520_v21, 0.0  ;;  %v4115_v21 = vmax.f32 %v3525_v42, 0.0  ;;  %v4116_v42 = vmax.f32 %v3530_v4, 0.0  ;;  %v4117_v4 = vmax.f32 %v3535_v33, 0.0 }
 0x388   : > { %v3940_v53 = vadd.f32 %v11593_v12, %v3939_v44  ;;  %v11596_v13 = vpop.f32.mrf.mxu1  ;;  %8623 = vmatmul.mubr.msk.f32.gmra.mxu1 %vm4246_vm0, %v4197_v7  ;;  %4827 = vmatprep.mubr.f32.mxu0 %v13327_v8  ;;  %v4118_v33 = vmax.f32 %v3540_v63, 0.0  ;;  %v3545_v31 = vadd.f32 %v11593_v12, %v10662_v61  ;;  %v3550_v61 = vadd.f32 %v11593_v12, %v10671_v32 }
 0x389   : > { %13339 = vst [vmem:[#allocation36_spill] sm:$0xff] %v11596_v13  ;;  %v3941_v56 = vpop.f32.mrf.mxu0  ;;  %5349 = vmatprep.mubr.f32.mxu1 %v13327_v8 }
 0x38a   : > { %v4198_v41 = vmax.f32 %v3940_v53, 0.0  ;;  %v11603_v60 = vpop.f32.mrf.mxu1  ;;  %v4119_v63 = vmax.f32 %v3545_v31, 0.0  ;;  %v4120_v31 = vmax.f32 %v3550_v61, 0.0 }
 0x38b   : > { %13340 = vst [vmem:[#allocation37_spill] sm:$0xff] %v11603_v60  ;;  %v3944_v0 = vpop.f32.mrf.mxu0  ;;  %8537 = vmatmul.mubr.msk.f32.gmra.mxu0 %vm4246_vm0, %v4111_v27 }
 0x38c   : > { %v3945_v44 = vadd.f32 %v11593_v12, %v3944_v0  ;;  %v11607_v13 = vpop.f32.mrf.mxu1  ;;  %8624 = vmatmul.mubr.msk.f32.gmra.mxu1 %vm4246_vm0, %v4198_v41  ;;  %4833 = vmatprep.mubr.f32.mxu0 %v13327_v8 }
 0x38d   : > { %13341 = vst [vmem:[#allocation38_spill] sm:$0xff] %v11607_v13  ;;  %v3946_v7 = vpop.f32.mrf.mxu0  ;;  %5355 = vmatprep.mubr.f32.mxu1 %v13327_v8 }
 0x38e   : > { %v4199_v53 = vmax.f32 %v3945_v44, 0.0  ;;  %v11614_v56 = vpop.f32.mrf.mxu1 }
 0x38f   : > { %v3949_v60 = vpop.f32.mrf.mxu0  ;;  %8538 = vmatmul.mubr.msk.f32.gmra.mxu0 %vm4246_vm0, %v4112_v52 }
 0x390   : > { %v3950_v27 = vadd.f32 %v11593_v12, %v3949_v60  ;;  %v11618_v0 = vpop.f32.mrf.mxu1  ;;  %8625 = vmatmul.mubr.msk.f32.gmra.mxu1 %vm4246_vm0, %v4199_v53  ;;  %4839 = vmatprep.mubr.f32.mxu0 %v13327_v8 }
 0x391   : > { %13342 = vst [vmem:[#allocation39_spill] sm:$0xff] %v11618_v0  ;;  %v3951_v41 = vpop.f32.mrf.mxu0  ;;  %5361 = vmatprep.mubr.f32.mxu1 %v13327_v8 }
 0x392   : > { %v4200_v44 = vmax.f32 %v3950_v27, 0.0  ;;  %v11625_v7 = vpop.f32.mrf.mxu1 }
 0x393   : > { %v3954_v13 = vpop.f32.mrf.mxu0  ;;  %8539 = vmatmul.mubr.msk.f32.gmra.mxu0 %vm4246_vm0, %v4113_v40 }
 0x394   : > { %v3955_v60 = vadd.f32 %v11593_v12, %v3954_v13  ;;  %v11629_v52 = vpop.f32.mrf.mxu1  ;;  %8626 = vmatmul.mubr.msk.f32.gmra.mxu1 %vm4246_vm0, %v4200_v44  ;;  %4845 = vmatprep.mubr.f32.mxu0 %v13327_v8 }
 0x395   : > { %13343 = vst [vmem:[#allocation40_spill] sm:$0xff] %v11629_v52  ;;  %v3956_v53 = vpop.f32.mrf.mxu0  ;;  %5367 = vmatprep.mubr.f32.mxu1 %v13327_v8 }
 0x396   : > { %v4201_v27 = vmax.f32 %v3955_v60, 0.0  ;;  %v11636_v41 = vpop.f32.mrf.mxu1 }
 0x397   : > { %v3959_v0 = vpop.f32.mrf.mxu0  ;;  %8540 = vmatmul.mubr.msk.f32.gmra.mxu0 %vm4246_vm0, %v4114_v49 }
 0x398   : > { %v3960_v13 = vadd.f32 %v11593_v12, %v3959_v0  ;;  %v11640_v40 = vpop.f32.mrf.mxu1  ;;  %8627 = vmatmul.mubr.msk.f32.gmra.mxu1 %vm4246_vm0, %v4201_v27  ;;  %4851 = vmatprep.mubr.f32.mxu0 %v13327_v8 }
 0x399   : > { %13344 = vst [vmem:[#allocation41_spill] sm:$0xff] %v11640_v40  ;;  %v3961_v44 = vpop.f32.mrf.mxu0  ;;  %5373 = vmatprep.mubr.f32.mxu1 %v13327_v8 }
 0x39a   : > { %v4202_v60 = vmax.f32 %v3960_v13, 0.0  ;;  %v11647_v53 = vpop.f32.mrf.mxu1 }
 0x39b   : > { %v3964_v52 = vpop.f32.mrf.mxu0  ;;  %8541 = vmatmul.mubr.msk.f32.gmra.mxu0 %vm4246_vm0, %v4115_v21 }
 0x39c   : > { %v3965_v0 = vadd.f32 %v11593_v12, %v3964_v52  ;;  %v11651_v49 = vpop.f32.mrf.mxu1  ;;  %8628 = vmatmul.mubr.msk.f32.gmra.mxu1 %vm4246_vm0, %v4202_v60  ;;  %4857 = vmatprep.mubr.f32.mxu0 %v13327_v8 }
 0x39d   : > { %13345 = vst [vmem:[#allocation42_spill] sm:$0xff] %v11651_v49  ;;  %v3966_v27 = vpop.f32.mrf.mxu0  ;;  %5379 = vmatprep.mubr.f32.mxu1 %v13327_v8 }
 0x39e   : > { %v4203_v13 = vmax.f32 %v3965_v0, 0.0  ;;  %v11658_v44 = vpop.f32.mrf.mxu1 }
 0x39f   : > { %v3969_v40 = vpop.f32.mrf.mxu0  ;;  %8542 = vmatmul.mubr.msk.f32.gmra.mxu0 %vm4246_vm0, %v4116_v42 }
 0x3a0   : > { %v3970_v52 = vadd.f32 %v11593_v12, %v3969_v40  ;;  %v11662_v21 = vpop.f32.mrf.mxu1  ;;  %8629 = vmatmul.mubr.msk.f32.gmra.mxu1 %vm4246_vm0, %v4203_v13  ;;  %4863 = vmatprep.mubr.f32.mxu0 %v13327_v8 }
 0x3a1   : > { %13346 = vst [vmem:[#allocation43_spill] sm:$0xff] %v11662_v21  ;;  %v3971_v60 = vpop.f32.mrf.mxu0  ;;  %5385 = vmatprep.mubr.f32.mxu1 %v13327_v8 }
 0x3a2   : > { %v4204_v0 = vmax.f32 %v3970_v52, 0.0  ;;  %v11669_v27 = vpop.f32.mrf.mxu1 }
 0x3a3   : > { %v3974_v49 = vpop.f32.mrf.mxu0  ;;  %8543 = vmatmul.mubr.msk.f32.gmra.mxu0 %vm4246_vm0, %v4117_v4 }
 0x3a4   : > { %v3975_v40 = vadd.f32 %v11593_v12, %v3974_v49  ;;  %v11673_v42 = vpop.f32.mrf.mxu1  ;;  %8630 = vmatmul.mubr.msk.f32.gmra.mxu1 %vm4246_vm0, %v4204_v0  ;;  %4869 = vmatprep.mubr.f32.mxu0 %v13327_v8 }
 0x3a5   : > { %13347 = vst [vmem:[#allocation44_spill] sm:$0xff] %v11673_v42  ;;  %v3976_v13 = vpop.f32.mrf.mxu0  ;;  %5391 = vmatprep.mubr.f32.mxu1 %v13327_v8 }
 0x3a6   : > { %v4205_v52 = vmax.f32 %v3975_v40, 0.0  ;;  %v11680_v60 = vpop.f32.mrf.mxu1 }
 0x3a7   : > { %13348 = vst [vmem:[#allocation45_spill] sm:$0xff] %v11680_v60  ;;  %v3979_v21 = vpop.f32.mrf.mxu0  ;;  %8544 = vmatmul.mubr.msk.f32.gmra.mxu0 %vm4246_vm0, %v4118_v33 }
 0x3a8   : > { %v3980_v49 = vadd.f32 %v11593_v12, %v3979_v21  ;;  %v11684_v4 = vpop.f32.mrf.mxu1  ;;  %8631 = vmatmul.mubr.msk.f32.gmra.mxu1 %vm4246_vm0, %v4205_v52  ;;  %4875 = vmatprep.mubr.f32.mxu0 %v13327_v8 }
 0x3a9   : > { %13349 = vst [vmem:[#allocation46_spill] sm:$0xff] %v11684_v4  ;;  %v3981_v0 = vpop.f32.mrf.mxu0  ;;  %5397 = vmatprep.mubr.f32.mxu1 %v13327_v8 }
 0x3aa   : > { %v4206_v40 = vmax.f32 %v3980_v49, 0.0  ;;  %v11691_v13 = vpop.f32.mrf.mxu1 }
 0x3ab   : > { %13350 = vst [vmem:[#allocation47_spill] sm:$0xff] %v11691_v13  ;;  %v3984_v42 = vpop.f32.mrf.mxu0  ;;  %8545 = vmatmul.mubr.msk.f32.gmra.mxu0 %vm4246_vm0, %v4119_v63 }
 0x3ac   : > { %v3985_v21 = vadd.f32 %v11593_v12, %v3984_v42  ;;  %v11695_v33 = vpop.f32.mrf.mxu1  ;;  %8632 = vmatmul.mubr.msk.f32.gmra.mxu1 %vm4246_vm0, %v4206_v40  ;;  %4881 = vmatprep.mubr.f32.mxu0 %v13327_v8 }
 0x3ad   : > { %13351 = vst [vmem:[#allocation48_spill] sm:$0xff] %v11695_v33  ;;  %v3986_v52 = vpop.f32.mrf.mxu0  ;;  %5403 = vmatprep.mubr.f32.mxu1 %v13327_v8 }
 0x3ae   : > { %v4207_v32 = vmax.f32 %v3985_v21, 0.0  ;;  %v11700_v0 = vpop.f32.mrf.mxu1 }
 0x3af   : > { %13352 = vst [vmem:[#allocation49_spill] sm:$0xff] %v11700_v0  ;;  %v3989_v49 = vpop.f32.mrf.mxu0  ;;  %8546 = vmatmul.mubr.msk.f32.gmra.mxu0 %vm4246_vm0, %v4120_v31 }
 0x3b0   : > { %v3990_v63 = vadd.f32 %v11593_v12, %v3989_v49  ;;  %v11704_v4 = vpop.f32.mrf.mxu1  ;;  %8633 = vmatmul.mubr.msk.f32.gmra.mxu1 %vm4246_vm0, %v4207_v32 }
 0x3b1   : > { %13353 = vst [vmem:[#allocation50_spill] sm:$0xff] %v11704_v4  ;;  %v3991_v42 = vpop.f32.mrf.mxu0  ;;  %5409 = vmatprep.mubr.f32.mxu1 %v13327_v8 }
 0x3b2   : > { %v4208_v40 = vmax.f32 %v3990_v63, 0.0  ;;  %v11708_v61 = vpop.f32.mrf.mxu1 }
 0x3b3   : > { %13354 = vst [vmem:[#allocation51_spill] sm:$0xff] %v11708_v61  ;;  %v3994_v52 = vpop.f32.mrf.mxu0 }
 0x3b4   : > { %v3995_v21 = vadd.f32 %v11593_v12, %v3994_v52  ;;  %v11711_v33 = vpop.f32.mrf.mxu1  ;;  %8634 = vmatmul.mubr.msk.f32.gmra.mxu1 %vm4246_vm0, %v4208_v40 }
 0x3b5   : > { %13355 = vst [vmem:[#allocation52_spill] sm:$0xff] %v11711_v33  ;;  %v3996_v31 = vpop.f32.mrf.mxu0  ;;  %5415 = vmatprep.mubr.f32.mxu1 %v13327_v8 }
 0x3b6   : > { %v4209_v49 = vmax.f32 %v3995_v21, 0.0  ;;  %v11715_v4 = vpop.f32.mrf.mxu1 }
 0x3b7   : > { %13356 = vst [vmem:[#allocation53_spill] sm:$0xff] %v11715_v4  ;;  %v3999_v32 = vpop.f32.mrf.mxu0 }
 0x3b8   : > { %v4000_v42 = vadd.f32 %v11593_v12, %v3999_v32  ;;  %v11718_v0 = vpop.f32.mrf.mxu1  ;;  %8635 = vmatmul.mubr.msk.f32.gmra.mxu1 %vm4246_vm0, %v4209_v49 }
 0x3b9   : > { %13357 = vst [vmem:[#allocation54_spill] sm:$0xff] %v11718_v0  ;;  %v4001_v63 = vpop.f32.mrf.mxu0  ;;  %5421 = vmatprep.mubr.f32.mxu1 %v13327_v8 }
 0x3ba   : > { %v4210_v52 = vmax.f32 %v4000_v42, 0.0  ;;  %v11722_v33 = vpop.f32.mrf.mxu1 }
 0x3bb   : > { %13358 = vst [vmem:[#allocation55_spill] sm:$0xff] %v11722_v33  ;;  %v4004_v40 = vpop.f32.mrf.mxu0 }
 0x3bc   : > { %v4005_v31 = vadd.f32 %v11593_v12, %v4004_v40  ;;  %v11725_v61 = vpop.f32.mrf.mxu1  ;;  %8636 = vmatmul.mubr.msk.f32.gmra.mxu1 %vm4246_vm0, %v4210_v52 }
 0x3bd   : > { %13359 = vst [vmem:[#allocation56_spill] sm:$0xff] %v11725_v61  ;;  %v4006_v21 = vpop.f32.mrf.mxu0  ;;  %5427 = vmatprep.mubr.f32.mxu1 %v13327_v8 }
 0x3be   : > { %v4211_v32 = vmax.f32 %v4005_v31, 0.0  ;;  %v11729_v0 = vpop.f32.mrf.mxu1 }
 0x3bf   : > { %13360 = vst [vmem:[#allocation57_spill] sm:$0xff] %v11729_v0  ;;  %v4009_v49 = vpop.f32.mrf.mxu0 }
 0x3c0   : > { %v4010_v63 = vadd.f32 %v11593_v12, %v4009_v49  ;;  %v11732_v4 = vpop.f32.mrf.mxu1  ;;  %8637 = vmatmul.mubr.msk.f32.gmra.mxu1 %vm4246_vm0, %v4211_v32 }
 0x3c1   : > { %13361 = vst [vmem:[#allocation58_spill] sm:$0xff] %v11732_v4  ;;  %v4011_v42 = vpop.f32.mrf.mxu0  ;;  %5433 = vmatprep.mubr.f32.mxu1 %v13327_v8 }
 0x3c2   : > { %v4212_v40 = vmax.f32 %v4010_v63, 0.0  ;;  %v11736_v61 = vpop.f32.mrf.mxu1 }
 0x3c3   : > { %13362 = vst [vmem:[#allocation59_spill] sm:$0xff] %v11736_v61  ;;  %v4014_v52 = vpop.f32.mrf.mxu0 }
 0x3c4   : > { %v4015_v21 = vadd.f32 %v11593_v12, %v4014_v52  ;;  %v11739_v33 = vpop.f32.mrf.mxu1  ;;  %8638 = vmatmul.mubr.msk.f32.gmra.mxu1 %vm4246_vm0, %v4212_v40 }
 0x3c5   : > { %13363 = vst [vmem:[#allocation60_spill] sm:$0xff] %v11739_v33  ;;  %v4016_v31 = vpop.f32.mrf.mxu0  ;;  %5439 = vmatprep.mubr.f32.mxu1 %v13327_v8 }
 0x3c6   : > { %v4213_v49 = vmax.f32 %v4015_v21, 0.0  ;;  %v11743_v4 = vpop.f32.mrf.mxu1 }
 0x3c7   : > { %13364 = vst [vmem:[#allocation61_spill] sm:$0xff] %v11743_v4  ;;  %v4019_v32 = vpop.f32.mrf.mxu0 }
 0x3c8   : > { %v4020_v42 = vadd.f32 %v11593_v12, %v4019_v32  ;;  %v11746_v0 = vpop.f32.mrf.mxu1  ;;  %8639 = vmatmul.mubr.msk.f32.gmra.mxu1 %vm4246_vm0, %v4213_v49 }
 0x3c9   : > { %13365 = vst [vmem:[#allocation62_spill] sm:$0xff] %v11746_v0  ;;  %v4021_v63 = vpop.f32.mrf.mxu0  ;;  %5445 = vmatprep.mubr.f32.mxu1 %v13327_v8 }
 0x3ca   : > { %v4214_v52 = vmax.f32 %v4020_v42, 0.0  ;;  %v11750_v33 = vpop.f32.mrf.mxu1 }
 0x3cb   : > { %13366 = vst [vmem:[#allocation63_spill] sm:$0xff] %v11750_v33  ;;  %v4024_v40 = vpop.f32.mrf.mxu0 }
 0x3cc   : > { %v4025_v31 = vadd.f32 %v11593_v12, %v4024_v40  ;;  %v11753_v61 = vpop.f32.mrf.mxu1  ;;  %8640 = vmatmul.mubr.msk.f32.gmra.mxu1 %vm4246_vm0, %v4214_v52 }
 0x3cd   : > { %13367 = vst [vmem:[#allocation64_spill] sm:$0xff] %v11753_v61  ;;  %v4026_v21 = vpop.f32.mrf.mxu0  ;;  %5451 = vmatprep.mubr.f32.mxu1 %v13327_v8 }
 0x3ce   : > { %v4215_v32 = vmax.f32 %v4025_v31, 0.0  ;;  %v11757_v0 = vpop.f32.mrf.mxu1 }
 0x3cf   : > { %13368 = vst [vmem:[#allocation65_spill] sm:$0xff] %v11757_v0  ;;  %v4029_v49 = vpop.f32.mrf.mxu0 }
 0x3d0   : > { %v4030_v63 = vadd.f32 %v11593_v12, %v4029_v49  ;;  %v11760_v4 = vpop.f32.mrf.mxu1  ;;  %8641 = vmatmul.mubr.msk.f32.gmra.mxu1 %vm4246_vm0, %v4215_v32 }
 0x3d1   : > { %13369 = vst [vmem:[#allocation66_spill] sm:$0xff] %v11760_v4  ;;  %v4031_v42 = vpop.f32.mrf.mxu0  ;;  %5457 = vmatprep.mubr.f32.mxu1 %v13327_v8 }
 0x3d2   : > { %v4216_v40 = vmax.f32 %v4030_v63, 0.0  ;;  %v11764_v61 = vpop.f32.mrf.mxu1 }
 0x3d3   : > { %13370 = vst [vmem:[#allocation67_spill] sm:$0xff] %v11764_v61  ;;  %v4034_v52 = vpop.f32.mrf.mxu0 }
 0x3d4   : > { %v4035_v21 = vadd.f32 %v11593_v12, %v4034_v52  ;;  %v11767_v33 = vpop.f32.mrf.mxu1  ;;  %8642 = vmatmul.mubr.msk.f32.gmra.mxu1 %vm4246_vm0, %v4216_v40 }
 0x3d5   : > { %13371 = vst [vmem:[#allocation68_spill] sm:$0xff] %v11767_v33  ;;  %v4036_v31 = vpop.f32.mrf.mxu0  ;;  %5463 = vmatprep.mubr.f32.mxu1 %v13327_v8 }
 0x3d6   : > { %v4217_v49 = vmax.f32 %v4035_v21, 0.0  ;;  %v11771_v4 = vpop.f32.mrf.mxu1 }
 0x3d7   : > { %13372 = vst [vmem:[#allocation69_spill] sm:$0xff] %v11771_v4  ;;  %v4039_v32 = vpop.f32.mrf.mxu0 }
 0x3d8   : > { %v4040_v42 = vadd.f32 %v11593_v12, %v4039_v32  ;;  %v11774_v0 = vpop.f32.mrf.mxu1  ;;  %8643 = vmatmul.mubr.msk.f32.gmra.mxu1 %vm4246_vm0, %v4217_v49 }
 0x3d9   : > { %13373 = vst [vmem:[#allocation70_spill] sm:$0xff] %v11774_v0  ;;  %v4041_v63 = vpop.f32.mrf.mxu0  ;;  %5469 = vmatprep.mubr.f32.mxu1 %v13327_v8 }
 0x3da   : > { %v4218_v52 = vmax.f32 %v4040_v42, 0.0  ;;  %v11778_v33 = vpop.f32.mrf.mxu1 }
 0x3db   : > { %13374 = vst [vmem:[#allocation71_spill] sm:$0xff] %v11778_v33  ;;  %v4044_v40 = vpop.f32.mrf.mxu0 }
 0x3dc   : > { %v4045_v31 = vadd.f32 %v11593_v12, %v4044_v40  ;;  %v11781_v61 = vpop.f32.mrf.mxu1  ;;  %8644 = vmatmul.mubr.msk.f32.gmra.mxu1 %vm4246_vm0, %v4218_v52 }
 0x3dd   : > { %13375 = vst [vmem:[#allocation72_spill] sm:$0xff] %v11781_v61  ;;  %v4046_v21 = vpop.f32.mrf.mxu0  ;;  %5475 = vmatprep.mubr.f32.mxu1 %v13327_v8 }
 0x3de   : > { %v4219_v32 = vmax.f32 %v4045_v31, 0.0  ;;  %v11785_v0 = vpop.f32.mrf.mxu1 }
 0x3df   : > { %13376 = vst [vmem:[#allocation73_spill] sm:$0xff] %v11785_v0  ;;  %v4049_v49 = vpop.f32.mrf.mxu0 }
 0x3e0   : > { %v4050_v63 = vadd.f32 %v11593_v12, %v4049_v49  ;;  %v11788_v4 = vpop.f32.mrf.mxu1  ;;  %8645 = vmatmul.mubr.msk.f32.gmra.mxu1 %vm4246_vm0, %v4219_v32 }
 0x3e1   : > { %13377 = vst [vmem:[#allocation74_spill] sm:$0xff] %v11788_v4  ;;  %v4051_v42 = vpop.f32.mrf.mxu0  ;;  %5481 = vmatprep.mubr.f32.mxu1 %v13327_v8 }
 0x3e2   : > { %v4220_v40 = vmax.f32 %v4050_v63, 0.0  ;;  %v11792_v61 = vpop.f32.mrf.mxu1 }
 0x3e3   : > { %13378 = vst [vmem:[#allocation75_spill] sm:$0xff] %v11792_v61  ;;  %v4054_v52 = vpop.f32.mrf.mxu0 }
 0x3e4   : > { %v4055_v21 = vadd.f32 %v11593_v12, %v4054_v52  ;;  %v11795_v33 = vpop.f32.mrf.mxu1  ;;  %8646 = vmatmul.mubr.msk.f32.gmra.mxu1 %vm4246_vm0, %v4220_v40 }
 0x3e5   : > { %13379 = vst [vmem:[#allocation76_spill] sm:$0xff] %v11795_v33  ;;  %v4056_v31 = vpop.f32.mrf.mxu0  ;;  %5487 = vmatprep.mubr.f32.mxu1 %v13327_v8 }
 0x3e6   : > { %v4221_v49 = vmax.f32 %v4055_v21, 0.0  ;;  %v11799_v4 = vpop.f32.mrf.mxu1 }
 0x3e7   : > { %13380 = vst [vmem:[#allocation77_spill] sm:$0xff] %v11799_v4  ;;  %v4059_v32 = vpop.f32.mrf.mxu0 }
 0x3e8   : > { %v4060_v42 = vadd.f32 %v11593_v12, %v4059_v32  ;;  %v11802_v0 = vpop.f32.mrf.mxu1  ;;  %8647 = vmatmul.mubr.msk.f32.gmra.mxu1 %vm4246_vm0, %v4221_v49 }
 0x3e9   : > { %13381 = vst [vmem:[#allocation78_spill] sm:$0xff] %v11802_v0  ;;  %v4061_v63 = vpop.f32.mrf.mxu0  ;;  %5493 = vmatprep.mubr.f32.mxu1 %v13327_v8 }
 0x3ea   : > { %v4222_v52 = vmax.f32 %v4060_v42, 0.0  ;;  %v11806_v33 = vpop.f32.mrf.mxu1 }
 0x3eb   : > { %13382 = vst [vmem:[#allocation79_spill] sm:$0xff] %v11806_v33  ;;  %v4064_v40 = vpop.f32.mrf.mxu0 }
 0x3ec   : > { %v4065_v31 = vadd.f32 %v11593_v12, %v4064_v40  ;;  %v11809_v61 = vpop.f32.mrf.mxu1  ;;  %8648 = vmatmul.mubr.msk.f32.gmra.mxu1 %vm4246_vm0, %v4222_v52 }
 0x3ed   : > { %13383 = vst [vmem:[#allocation80_spill] sm:$0xff] %v11809_v61  ;;  %v4066_v21 = vpop.f32.mrf.mxu0  ;;  %5499 = vmatprep.mubr.f32.mxu1 %v13327_v8 }
 0x3ee   : > { %v4223_v32 = vmax.f32 %v4065_v31, 0.0  ;;  %v11813_v0 = vpop.f32.mrf.mxu1 }
 0x3ef   : > { %13384 = vst [vmem:[#allocation81_spill] sm:$0xff] %v11813_v0  ;;  %v4069_v49 = vpop.f32.mrf.mxu0 }
 0x3f0   : > { %v4070_v63 = vadd.f32 %v11593_v12, %v4069_v49  ;;  %v11816_v4 = vpop.f32.mrf.mxu1  ;;  %8649 = vmatmul.mubr.msk.f32.gmra.mxu1 %vm4246_vm0, %v4223_v32 }
 0x3f1   : > { %13385 = vst [vmem:[#allocation82_spill] sm:$0xff] %v11816_v4  ;;  %v4071_v42 = vpop.f32.mrf.mxu0  ;;  %5505 = vmatprep.mubr.f32.mxu1 %v13327_v8 }
 0x3f2   : > { %v4224_v40 = vmax.f32 %v4070_v63, 0.0  ;;  %v11820_v61 = vpop.f32.mrf.mxu1 }
 0x3f3   : > { %13386 = vst [vmem:[#allocation83_spill] sm:$0xff] %v11820_v61  ;;  %v4074_v52 = vpop.f32.mrf.mxu0 }
 0x3f4   : > { %v4075_v21 = vadd.f32 %v11593_v12, %v4074_v52  ;;  %v11823_v33 = vpop.f32.mrf.mxu1  ;;  %8650 = vmatmul.mubr.msk.f32.gmra.mxu1 %vm4246_vm0, %v4224_v40 }
 0x3f5   : > { %13387 = vst [vmem:[#allocation84_spill] sm:$0xff] %v11823_v33  ;;  %v4076_v31 = vpop.f32.mrf.mxu0  ;;  %5511 = vmatprep.mubr.f32.mxu1 %v13327_v8 }
 0x3f6   : > { %v4225_v49 = vmax.f32 %v4075_v21, 0.0  ;;  %v11827_v4 = vpop.f32.mrf.mxu1 }
 0x3f7   : > { %13388 = vst [vmem:[#allocation85_spill] sm:$0xff] %v11827_v4  ;;  %v4079_v32 = vpop.f32.mrf.mxu0 }
 0x3f8   : > { %v4080_v42 = vadd.f32 %v11593_v12, %v4079_v32  ;;  %v11830_v63 = vpop.f32.mrf.mxu1  ;;  %8651 = vmatmul.mubr.msk.f32.gmra.mxu1 %vm4246_vm0, %v4225_v49 }
 0x3f9   : > { %13389 = vst [vmem:[#allocation86_spill] sm:$0xff] %v11830_v63  ;;  %v4081_v61 = vpop.f32.mrf.mxu0  ;;  %5517 = vmatprep.mubr.f32.mxu1 %v13327_v8 }
 0x3fa   : > { %v4226_v52 = vmax.f32 %v4080_v42, 0.0  ;;  %v11834_v33 = vpop.f32.mrf.mxu1  ;;  %v4229_v61 = vld [vmem:[%s463_s29] sm:$0x3]  ;;  %s8517_s29 = sshll.u32 %s548_s11, 3 }
 0x3fb   : > { %13390 = vst [vmem:[#allocation87_spill] sm:$0xff] %v11834_v33  ;;  %v4084_v40 = vpop.f32.mrf.mxu0  ;;  %s12536_s27 = scalar_lea.vmem %s13560_s6, %s8517_s29 }
 0x3fc   : > { %v4085_v31 = vadd.f32 %v11593_v12, %v4084_v40  ;;  %v11837_v21 = vpop.f32.mrf.mxu1  ;;  %8652 = vmatmul.mubr.msk.f32.gmra.mxu1 %vm4246_vm0, %v4226_v52 }
 0x3fd   : > { %13391 = vst [vmem:[#allocation88_spill] sm:$0xff] %v11837_v21  ;;  %v4086_v4 = vpop.f32.mrf.mxu0  ;;  %5523 = vmatprep.mubr.f32.mxu1 %v13327_v8 }
 0x3fe   : > { %v4227_v32 = vmax.f32 %v4085_v31, 0.0  ;;  %v11841_v63 = vpop.f32.mrf.mxu1  ;;  %v11853_v4 = vrot.slane %v4229_v61, %v10040_v9 }
 0x3ff   : > { %13392 = vst [vmem:[#allocation89_spill] sm:$0xff] %v11841_v63  ;;  %v4089_v49 = vpop.f32.mrf.mxu0  ;;  %v11856_v63 = vrot.slane %v4229_v61, %v10042_v10 }
 0x400   : > { %v4090_v42 = vadd.f32 %v11593_v12, %v4089_v49  ;;  %v11846_v0 = vpop.f32.mrf.mxu1  ;;  %8653 = vmatmul.mubr.msk.f32.gmra.mxu1 %vm4246_vm0, %v4227_v32 }
 0x401   : > { %13393 = vst [vmem:[#allocation90_spill] sm:$0xff] %v11846_v0  ;;  %v4091_v40 = vpop.f32.mrf.mxu0  ;;  %5529 = vmatprep.mubr.f32.mxu1 %v13327_v8 }
 0x402   : > { %v4228_v21 = vmax.f32 %v4090_v42, 0.0  ;;  %v11850_v52 = vpop.f32.mrf.mxu1 }
 0x403   : > { %13394 = vst [vmem:[#allocation91_spill] sm:$0xff] %v11850_v52  ;;  %v4721_v31 = vpop.f32.mrf.mxu0 }
 0x404   : > { %v11858_v33 = vpop.f32.mrf.mxu1  ;;  %8654 = vmatmul.mubr.msk.f32.gmra.mxu1 %vm4246_vm0, %v4228_v21  ;;  %v5547_v12 = vadd.f32 %v11853_v4, %v4721_v31 }
 0x405   : > { %13395 = vst [vmem:[#allocation92_spill] sm:$0xff] %v11858_v33  ;;  %v4723_v32 = vpop.f32.mrf.mxu0 }
 0x406   : > { %v5548_v49 = vadd.f32 %v11856_v63, %v4723_v32  ;;  %v11863_v8 = vpop.f32.mrf.mxu1  ;;  %v5819_v9 = vmax.f32 %v5547_v12, 0.0 }
 0x407   : > { %13396 = vst [vmem:[#allocation93_spill] sm:$0xff] %v11863_v8  ;;  %v4727_v42 = vpop.f32.mrf.mxu0 }
 0x408   : > { %v5820_v40 = vmax.f32 %v5548_v49, 0.0  ;;  %v11865_v0 = vpop.f32.mrf.mxu1  ;;  %v5549_v52 = vadd.f32 %v11853_v4, %v4727_v42 }
 0x409   : > { %13397 = vst [vmem:[#allocation94_spill] sm:$0xff] %v11865_v0  ;;  %v4729_v10 = vpop.f32.mrf.mxu0 }
 0x40a   : > { %v5550_v61 = vadd.f32 %v11856_v63, %v4729_v10  ;;  %v11869_v33 = vpop.f32.mrf.mxu1  ;;  %6194 = vmatprep.mubr.f32.mxu1 %v5820_v40  ;;  %v5821_v32 = vmax.f32 %v5549_v52, 0.0 }
 0x40b   : > { %13398 = vst [vmem:[#allocation95_spill] sm:$0xff] %v11869_v33  ;;  %v4733_v21 = vpop.f32.mrf.mxu0  ;;  %6195 = vmatmul.mubr.f32.vlgmr.msra.gmra.mxu1 %v5819_v9 }
 0x40c   : > { %v5822_v31 = vmax.f32 %v5550_v61, 0.0  ;;  %v11871_v13 = vpop.f32.mrf.mxu1  ;;  %v5551_v8 = vadd.f32 %v11853_v4, %v4733_v21 }
 0x40d   : > { %13399 = vst [vmem:[#allocation96_spill] sm:$0xff] %v11871_v13  ;;  %v4735_v49 = vpop.f32.mrf.mxu0 }
 0x40e   : > { %v5552_v0 = vadd.f32 %v11856_v63, %v4735_v49  ;;  %v11875_v12 = vpop.f32.mrf.mxu1  ;;  %6199 = vmatprep.mubr.f32.mxu1 %v5822_v31  ;;  %v5823_v40 = vmax.f32 %v5551_v8, 0.0 }
 0x40f   : > { %13400 = vst [vmem:[#allocation97_spill] sm:$0xff] %v11875_v12  ;;  %v4739_v42 = vpop.f32.mrf.mxu0  ;;  %6200 = vmatmul.mubr.f32.gmra.mxu1 %v5821_v32 }
 0x410   : > { %v5824_v10 = vmax.f32 %v5552_v0, 0.0  ;;  %v11877_v60 = vpop.f32.mrf.mxu1  ;;  %v5553_v9 = vadd.f32 %v11853_v4, %v4739_v42 }
 0x411   : > { %13401 = vst [vmem:[#allocation98_spill] sm:$0xff] %v11877_v60  ;;  %v4741_v61 = vpop.f32.mrf.mxu0 }
 0x412   : > { %v5554_v13 = vadd.f32 %v11856_v63, %v4741_v61  ;;  %v11881_v52 = vpop.f32.mrf.mxu1  ;;  %6204 = vmatprep.mubr.f32.mxu1 %v5824_v10  ;;  %v5825_v31 = vmax.f32 %v5553_v9, 0.0 }
 0x413   : > { %13402 = vst [vmem:[#allocation99_spill] sm:$0xff] %v11881_v52  ;;  %v4745_v21 = vpop.f32.mrf.mxu0  ;;  %6205 = vmatmul.mubr.f32.gmra.mxu1 %v5823_v40 }
 0x414   : > { %v5826_v49 = vmax.f32 %v5554_v13, 0.0  ;;  %v11883_v33 = vpop.f32.mrf.mxu1  ;;  %v5555_v32 = vadd.f32 %v11853_v4, %v4745_v21 }
 0x415   : > { %13403 = vst [vmem:[#allocation100_spill] sm:$0xff] %v11883_v33  ;;  %v4747_v0 = vpop.f32.mrf.mxu0 }
 0x416   : > { %v5556_v60 = vadd.f32 %v11856_v63, %v4747_v0  ;;  %v11887_v8 = vpop.f32.mrf.mxu1  ;;  %6209 = vmatprep.mubr.f32.mxu1 %v5826_v49  ;;  %v5827_v10 = vmax.f32 %v5555_v32, 0.0 }
 0x417   : > { %13404 = vst [vmem:[#allocation101_spill] sm:$0xff] %v11887_v8  ;;  %v4751_v42 = vpop.f32.mrf.mxu0  ;;  %6210 = vmatmul.mubr.f32.gmra.mxu1 %v5825_v31 }
 0x418   : > { %v5828_v61 = vmax.f32 %v5556_v60, 0.0  ;;  %v11889_v12 = vpop.f32.mrf.mxu1  ;;  %v5557_v40 = vadd.f32 %v11853_v4, %v4751_v42 }
 0x419   : > { %13405 = vst [vmem:[#allocation102_spill] sm:$0xff] %v11889_v12  ;;  %v4753_v13 = vpop.f32.mrf.mxu0 }
 0x41a   : > { %v5558_v33 = vadd.f32 %v11856_v63, %v4753_v13  ;;  %v11893_v9 = vpop.f32.mrf.mxu1  ;;  %6214 = vmatprep.mubr.f32.mxu1 %v5828_v61  ;;  %v5829_v49 = vmax.f32 %v5557_v40, 0.0 }
 0x41b   : > { %13406 = vst [vmem:[#allocation103_spill] sm:$0xff] %v11893_v9  ;;  %v4757_v21 = vpop.f32.mrf.mxu0  ;;  %6215 = vmatmul.mubr.f32.gmra.mxu1 %v5827_v10 }
 0x41c   : > { %v5830_v0 = vmax.f32 %v5558_v33, 0.0  ;;  %v11895_v52 = vpop.f32.mrf.mxu1  ;;  %v5559_v31 = vadd.f32 %v11853_v4, %v4757_v21 }
 0x41d   : > { %13407 = vst [vmem:[#allocation104_spill] sm:$0xff] %v11895_v52  ;;  %v4759_v60 = vpop.f32.mrf.mxu0 }
 0x41e   : > { %v5560_v12 = vadd.f32 %v11856_v63, %v4759_v60  ;;  %v11899_v32 = vpop.f32.mrf.mxu1  ;;  %6219 = vmatprep.mubr.f32.mxu1 %v5830_v0  ;;  %v5831_v61 = vmax.f32 %v5559_v31, 0.0 }
 0x41f   : > { %13408 = vst [vmem:[#allocation105_spill] sm:$0xff] %v11899_v32  ;;  %v4763_v42 = vpop.f32.mrf.mxu0  ;;  %6220 = vmatmul.mubr.f32.gmra.mxu1 %v5829_v49 }
 0x420   : > { %v5832_v13 = vmax.f32 %v5560_v12, 0.0  ;;  %v11901_v8 = vpop.f32.mrf.mxu1  ;;  %v5561_v10 = vadd.f32 %v11853_v4, %v4763_v42 }
 0x421   : > { %13409 = vst [vmem:[#allocation106_spill] sm:$0xff] %v11901_v8  ;;  %v4765_v33 = vpop.f32.mrf.mxu0 }
 0x422   : > { %v5562_v52 = vadd.f32 %v11856_v63, %v4765_v33  ;;  %v11905_v40 = vpop.f32.mrf.mxu1  ;;  %6224 = vmatprep.mubr.f32.mxu1 %v5832_v13  ;;  %v5833_v0 = vmax.f32 %v5561_v10, 0.0 }
 0x423   : > { %13410 = vst [vmem:[#allocation107_spill] sm:$0xff] %v11905_v40  ;;  %v4769_v21 = vpop.f32.mrf.mxu0  ;;  %6225 = vmatmul.mubr.f32.gmra.mxu1 %v5831_v61 }
 0x424   : > { %v5834_v60 = vmax.f32 %v5562_v52, 0.0  ;;  %v11907_v9 = vpop.f32.mrf.mxu1  ;;  %v5563_v49 = vadd.f32 %v11853_v4, %v4769_v21 }
 0x425   : > { %13411 = vst [vmem:[#allocation108_spill] sm:$0xff] %v11907_v9  ;;  %v4771_v12 = vpop.f32.mrf.mxu0 }
 0x426   : > { %v5564_v8 = vadd.f32 %v11856_v63, %v4771_v12  ;;  %v11911_v31 = vpop.f32.mrf.mxu1  ;;  %6229 = vmatprep.mubr.f32.mxu1 %v5834_v60  ;;  %v5835_v13 = vmax.f32 %v5563_v49, 0.0 }
 0x427   : > { %13412 = vst [vmem:[#allocation109_spill] sm:$0xff] %v11911_v31  ;;  %v4775_v42 = vpop.f32.mrf.mxu0  ;;  %6230 = vmatmul.mubr.f32.gmra.mxu1 %v5833_v0 }
 0x428   : > { %v5836_v33 = vmax.f32 %v5564_v8, 0.0  ;;  %v11913_v32 = vpop.f32.mrf.mxu1  ;;  %v5565_v61 = vadd.f32 %v11853_v4, %v4775_v42 }
 0x429   : > { %13413 = vst [vmem:[#allocation110_spill] sm:$0xff] %v11913_v32  ;;  %v4777_v52 = vpop.f32.mrf.mxu0 }
 0x42a   : > { %v5566_v9 = vadd.f32 %v11856_v63, %v4777_v52  ;;  %v11917_v10 = vpop.f32.mrf.mxu1  ;;  %6234 = vmatprep.mubr.f32.mxu1 %v5836_v33  ;;  %v5837_v60 = vmax.f32 %v5565_v61, 0.0 }
 0x42b   : > { %13414 = vst [vmem:[#allocation111_spill] sm:$0xff] %v11917_v10  ;;  %v4781_v21 = vpop.f32.mrf.mxu0  ;;  %6235 = vmatmul.mubr.f32.gmra.mxu1 %v5835_v13 }
 0x42c   : > { %v5838_v12 = vmax.f32 %v5566_v9, 0.0  ;;  %v11919_v40 = vpop.f32.mrf.mxu1  ;;  %v5567_v0 = vadd.f32 %v11853_v4, %v4781_v21 }
 0x42d   : > { %13415 = vst [vmem:[#allocation112_spill] sm:$0xff] %v11919_v40  ;;  %v4783_v8 = vpop.f32.mrf.mxu0 }
 0x42e   : > { %v5568_v32 = vadd.f32 %v11856_v63, %v4783_v8  ;;  %v11923_v49 = vpop.f32.mrf.mxu1  ;;  %6239 = vmatprep.mubr.f32.mxu1 %v5838_v12  ;;  %v5839_v33 = vmax.f32 %v5567_v0, 0.0 }
 0x42f   : > { %13416 = vst [vmem:[#allocation113_spill] sm:$0xff] %v11923_v49  ;;  %v4787_v42 = vpop.f32.mrf.mxu0  ;;  %6240 = vmatmul.mubr.f32.gmra.mxu1 %v5837_v60 }
 0x430   : > { %v5840_v52 = vmax.f32 %v5568_v32, 0.0  ;;  %v11925_v31 = vpop.f32.mrf.mxu1  ;;  %v5569_v13 = vadd.f32 %v11853_v4, %v4787_v42 }
 0x431   : > { %13417 = vst [vmem:[#allocation114_spill] sm:$0xff] %v11925_v31  ;;  %v4789_v9 = vpop.f32.mrf.mxu0 }
 0x432   : > { %v5570_v40 = vadd.f32 %v11856_v63, %v4789_v9  ;;  %v11929_v61 = vpop.f32.mrf.mxu1  ;;  %6244 = vmatprep.mubr.f32.mxu1 %v5840_v52  ;;  %v5841_v12 = vmax.f32 %v5569_v13, 0.0 }
 0x433   : > { %13418 = vst [vmem:[#allocation115_spill] sm:$0xff] %v11929_v61  ;;  %v4793_v21 = vpop.f32.mrf.mxu0  ;;  %6245 = vmatmul.mubr.f32.gmra.mxu1 %v5839_v33 }
 0x434   : > { %v5842_v8 = vmax.f32 %v5570_v40, 0.0  ;;  %v11931_v10 = vpop.f32.mrf.mxu1  ;;  %v5571_v60 = vadd.f32 %v11853_v4, %v4793_v21 }
 0x435   : > { %13419 = vst [vmem:[#allocation116_spill] sm:$0xff] %v11931_v10  ;;  %v4795_v32 = vpop.f32.mrf.mxu0 }
 0x436   : > { %v5572_v31 = vadd.f32 %v11856_v63, %v4795_v32  ;;  %v11935_v0 = vpop.f32.mrf.mxu1  ;;  %6249 = vmatprep.mubr.f32.mxu1 %v5842_v8  ;;  %v5843_v52 = vmax.f32 %v5571_v60, 0.0 }
 0x437   : > { %13420 = vst [vmem:[#allocation117_spill] sm:$0xff] %v11935_v0  ;;  %v4799_v42 = vpop.f32.mrf.mxu0  ;;  %6250 = vmatmul.mubr.f32.gmra.mxu1 %v5841_v12 }
 0x438   : > { %v5844_v9 = vmax.f32 %v5572_v31, 0.0  ;;  %v11937_v49 = vpop.f32.mrf.mxu1  ;;  %v5573_v33 = vadd.f32 %v11853_v4, %v4799_v42 }
 0x439   : > { %13421 = vst [vmem:[#allocation118_spill] sm:$0xff] %v11937_v49  ;;  %v4801_v40 = vpop.f32.mrf.mxu0 }
 0x43a   : > { %v5574_v10 = vadd.f32 %v11856_v63, %v4801_v40  ;;  %v11941_v13 = vpop.f32.mrf.mxu1  ;;  %6254 = vmatprep.mubr.f32.mxu1 %v5844_v9  ;;  %v5845_v8 = vmax.f32 %v5573_v33, 0.0 }
 0x43b   : > { %13422 = vst [vmem:[#allocation119_spill] sm:$0xff] %v11941_v13  ;;  %v4805_v21 = vpop.f32.mrf.mxu0  ;;  %6255 = vmatmul.mubr.f32.gmra.mxu1 %v5843_v52 }
 0x43c   : > { %v5846_v32 = vmax.f32 %v5574_v10, 0.0  ;;  %v11943_v61 = vpop.f32.mrf.mxu1  ;;  %v5575_v12 = vadd.f32 %v11853_v4, %v4805_v21 }
 0x43d   : > { %13423 = vst [vmem:[#allocation120_spill] sm:$0xff] %v11943_v61  ;;  %v4807_v31 = vpop.f32.mrf.mxu0 }
 0x43e   : > { %v5576_v49 = vadd.f32 %v11856_v63, %v4807_v31  ;;  %v11947_v60 = vpop.f32.mrf.mxu1  ;;  %6259 = vmatprep.mubr.f32.mxu1 %v5846_v32  ;;  %v5847_v9 = vmax.f32 %v5575_v12, 0.0 }
 0x43f   : > { %13424 = vst [vmem:[#allocation121_spill] sm:$0xff] %v11947_v60  ;;  %v4811_v42 = vpop.f32.mrf.mxu0  ;;  %6260 = vmatmul.mubr.f32.gmra.mxu1 %v5845_v8 }
 0x440   : > { %v5848_v40 = vmax.f32 %v5576_v49, 0.0  ;;  %v11949_v0 = vpop.f32.mrf.mxu1  ;;  %v5577_v52 = vadd.f32 %v11853_v4, %v4811_v42  ;;  %v7018_v42 = vld [vmem:[%s13286_s9 + $0x38] sm:$0xff] }
 0x441   : > { %13425 = vst [vmem:[#allocation122_spill] sm:$0xff] %v11949_v0  ;;  %v4813_v10 = vpop.f32.mrf.mxu0  ;;  %8941 = vmatprep.subr.mxu0 %v7018_v42 }
 0x442   : > { %v5578_v61 = vadd.f32 %v11856_v63, %v4813_v10  ;;  %v11953_v33 = vpop.f32.mrf.mxu1  ;;  %6264 = vmatprep.mubr.f32.mxu1 %v5848_v40  ;;  %v5849_v32 = vmax.f32 %v5577_v52, 0.0  ;;  %8942 = vmatpush3.msra.mxu0 %v7018_v42 }
 0x443   : > { %13426 = vst [vmem:[#allocation123_spill] sm:$0xff] %v11953_v33  ;;  %v4817_v21 = vpop.f32.mrf.mxu0  ;;  %6265 = vmatmul.mubr.f32.gmra.mxu1 %v5847_v9  ;;  %v7017_v9 = vld [vmem:[%s13286_s9 + $0x30] sm:$0xff] }
 0x444   : > { %v5850_v31 = vmax.f32 %v5578_v61, 0.0  ;;  %v11955_v13 = vpop.f32.mrf.mxu1  ;;  %v5579_v8 = vadd.f32 %v11853_v4, %v4817_v21  ;;  %8943 = vmatprep.subr.mxu0 %v7017_v9 }
 0x445   : > { %13427 = vst [vmem:[#allocation124_spill] sm:$0xff] %v11955_v13  ;;  %v4819_v49 = vpop.f32.mrf.mxu0  ;;  %8944 = vmatpush3.msra.mxu0 %v7017_v9  ;;  %v7014_v9 = vld [vmem:[%s13286_s9 + $0x18] sm:$0xff] }
 0x446   : > { %v5580_v0 = vadd.f32 %v11856_v63, %v4819_v49  ;;  %v11959_v12 = vpop.f32.mrf.mxu1  ;;  %6269 = vmatprep.mubr.f32.mxu1 %v5850_v31  ;;  %v5851_v52 = vmax.f32 %v5579_v8, 0.0  ;;  %v7016_v31 = vld [vmem:[%s13286_s9 + $0x28] sm:$0xff] }
 0x447   : > { %13428 = vst [vmem:[#allocation125_spill] sm:$0xff] %v11959_v12  ;;  %v4823_v10 = vpop.f32.mrf.mxu0  ;;  %6270 = vmatmul.mubr.f32.gmra.mxu1 %v5849_v32  ;;  %8945 = vmatprep.subr.mxu0 %v7016_v31 }
 0x448   : > { %v5852_v40 = vmax.f32 %v5580_v0, 0.0  ;;  %v11964_v61 = vpop.f32.mrf.mxu1  ;;  %v5581_v21 = vadd.f32 %v11853_v4, %v4823_v10  ;;  %v7015_v0 = vld [vmem:[%s13286_s9 + $0x20] sm:$0xff]  ;;  %8946 = vmatpush3.msra.mxu0 %v7016_v31 }
 0x449   : > { %13429 = vst [vmem:[#allocation126_spill] sm:$0xff] %v11964_v61  ;;  %v4825_v49 = vpop.f32.mrf.mxu0  ;;  %8947 = vmatprep.subr.mxu0 %v7015_v0 }
 0x44a   : > { %v5582_v32 = vadd.f32 %v11856_v63, %v4825_v49  ;;  %v11974_v13 = vpop.f32.mrf.mxu1  ;;  %6274 = vmatprep.mubr.f32.mxu1 %v5852_v40  ;;  %v5853_v61 = vmax.f32 %v5581_v21, 0.0  ;;  %8948 = vmatpush3.msra.mxu0 %v7015_v0 }
 0x44b   : > { %13430 = vst [vmem:[#allocation127_spill] sm:$0xff] %v11974_v13  ;;  %v4829_v42 = vpop.f32.mrf.mxu0  ;;  %6275 = vmatmul.mubr.f32.gmra.mxu1 %v5851_v52  ;;  %v7013_v52 = vld [vmem:[%s13286_s9 + $0x10] sm:$0xff]  ;;  %8949 = vmatprep.subr.mxu0 %v7014_v9 }
 0x44c   : > { %v5854_v8 = vmax.f32 %v5582_v32, 0.0  ;;  %v11979_v10 = vpop.f32.mrf.mxu1  ;;  %v5583_v12 = vadd.f32 %v11853_v4, %v4829_v42  ;;  %8950 = vmatpush3.msra.mxu0 %v7014_v9 }
 0x44d   : > { %13431 = vst [vmem:[#allocation128_spill] sm:$0xff] %v11979_v10  ;;  %v4831_v33 = vpop.f32.mrf.mxu0  ;;  %8951 = vmatprep.subr.mxu0 %v7013_v52 }
 0x44e   : > { %v5584_v49 = vadd.f32 %v11856_v63, %v4831_v33  ;;  %v11983_v40 = vpop.f32.mrf.mxu1  ;;  %6279 = vmatprep.mubr.f32.mxu1 %v5854_v8  ;;  %v5855_v33 = vmax.f32 %v5583_v12, 0.0  ;;  %8952 = vmatpush3.msra.mxu0 %v7013_v52 }
 0x44f   : > { %13432 = vst [vmem:[#allocation129_spill] sm:$0xff] %v11983_v40  ;;  %v4835_v31 = vpop.f32.mrf.mxu0  ;;  %6280 = vmatmul.mubr.f32.gmra.mxu1 %v5853_v61  ;;  %v7012_v61 = vld [vmem:[%s13286_s9 + $0x8] sm:$0xff] }
 0x450   : > { %v5856_v21 = vmax.f32 %v5584_v49, 0.0  ;;  %v11991_v32 = vpop.f32.mrf.mxu1  ;;  %v5585_v42 = vadd.f32 %v11853_v4, %v4835_v31  ;;  %v7011_v49 = vld [vmem:[%s13286_s9] sm:$0xff]  ;;  %8953 = vmatprep.subr.mxu0 %v7012_v61 }
 0x451   : > { %13433 = vst [vmem:[#allocation130_spill] sm:$0xff] %v11991_v32  ;;  %v4837_v8 = vpop.f32.mrf.mxu0  ;;  %8954 = vmatpush3.msra.mxu0 %v7012_v61 }
 0x452   : > { %v5586_v0 = vadd.f32 %v11856_v63, %v4837_v8  ;;  %v11995_v10 = vpop.f32.mrf.mxu1  ;;  %6284 = vmatprep.mubr.f32.mxu1 %v5856_v21  ;;  %v5857_v8 = vmax.f32 %v5585_v42, 0.0  ;;  %8955 = vmatprep.subr.mxu0 %v7011_v49 }
 0x453   : > { %13434 = vst [vmem:[#allocation131_spill] sm:$0xff] %v11995_v10  ;;  %v4841_v9 = vpop.f32.mrf.mxu0  ;;  %6285 = vmatmul.mubr.f32.gmra.mxu1 %v5855_v33  ;;  %8956 = vmatpush3.msra.mxu0 %v7011_v49 }
 0x454   : > { %v5858_v12 = vmax.f32 %v5586_v0, 0.0  ;;  %v12003_v31 = vpop.f32.mrf.mxu1  ;;  %v5587_v32 = vadd.f32 %v11853_v4, %v4841_v9 }
 0x455   : > { %13435 = vst [vmem:[#allocation132_spill] sm:$0xff] %v12003_v31  ;;  %v4843_v21 = vpop.f32.mrf.mxu0 }
 0x456   : > { %v5588_v52 = vadd.f32 %v11856_v63, %v4843_v21  ;;  %v12007_v10 = vpop.f32.mrf.mxu1  ;;  %6289 = vmatprep.mubr.f32.mxu1 %v5858_v12  ;;  %v5859_v0 = vmax.f32 %v5587_v32, 0.0 }
 0x457   : > { %13436 = vst [vmem:[#allocation133_spill] sm:$0xff] %v12007_v10  ;;  %v4847_v40 = vpop.f32.mrf.mxu0  ;;  %6290 = vmatmul.mubr.f32.gmra.mxu1 %v5857_v8 }
 0x458   : > { %v5860_v13 = vmax.f32 %v5588_v52, 0.0  ;;  %v12009_v33 = vpop.f32.mrf.mxu1  ;;  %v5589_v31 = vadd.f32 %v11853_v4, %v4847_v40 }
 0x459   : > { %13437 = vst [vmem:[#allocation134_spill] sm:$0xff] %v12009_v33  ;;  %v4849_v61 = vpop.f32.mrf.mxu0 }
 0x45a   : > { %v5590_v42 = vadd.f32 %v11856_v63, %v4849_v61  ;;  %v12013_v9 = vpop.f32.mrf.mxu1  ;;  %6294 = vmatprep.mubr.f32.mxu1 %v5860_v13  ;;  %v5861_v49 = vmax.f32 %v5589_v31, 0.0 }
 0x45b   : > { %13438 = vst [vmem:[#allocation135_spill] sm:$0xff] %v12013_v9  ;;  %v4853_v60 = vpop.f32.mrf.mxu0  ;;  %6295 = vmatmul.mubr.f32.gmra.mxu1 %v5859_v0 }
 0x45c   : > { %v5862_v21 = vmax.f32 %v5590_v42, 0.0  ;;  %v12015_v10 = vpop.f32.mrf.mxu1  ;;  %v5591_v12 = vadd.f32 %v11853_v4, %v4853_v60 }
 0x45d   : > { %13439 = vst [vmem:[#allocation136_spill] sm:$0xff] %v12015_v10  ;;  %v4855_v8 = vpop.f32.mrf.mxu0 }
 0x45e   : > { %v5592_v52 = vadd.f32 %v11856_v63, %v4855_v8  ;;  %v12019_v32 = vpop.f32.mrf.mxu1  ;;  %6299 = vmatprep.mubr.f32.mxu1 %v5862_v21  ;;  %v5863_v13 = vmax.f32 %v5591_v12, 0.0 }
 0x45f   : > { %13440 = vst [vmem:[#allocation137_spill] sm:$0xff] %v12019_v32  ;;  %v4859_v40 = vpop.f32.mrf.mxu0  ;;  %6300 = vmatmul.mubr.f32.gmra.mxu1 %v5861_v49 }
 0x460   : > { %v5864_v61 = vmax.f32 %v5592_v52, 0.0  ;;  %v12021_v33 = vpop.f32.mrf.mxu1  ;;  %v5593_v0 = vadd.f32 %v11853_v4, %v4859_v40 }
 0x461   : > { %13441 = vst [vmem:[#allocation138_spill] sm:$0xff] %v12021_v33  ;;  %v4861_v42 = vpop.f32.mrf.mxu0 }
 0x462   : > { %v5594_v10 = vadd.f32 %v11856_v63, %v4861_v42  ;;  %v12025_v31 = vpop.f32.mrf.mxu1  ;;  %6304 = vmatprep.mubr.f32.mxu1 %v5864_v61  ;;  %v5865_v21 = vmax.f32 %v5593_v0, 0.0 }
 0x463   : > { %13442 = vst [vmem:[#allocation139_spill] sm:$0xff] %v12025_v31  ;;  %v4865_v60 = vpop.f32.mrf.mxu0  ;;  %6305 = vmatmul.mubr.f32.gmra.mxu1 %v5863_v13 }
 0x464   : > { %v5866_v8 = vmax.f32 %v5594_v10, 0.0  ;;  %v12027_v9 = vpop.f32.mrf.mxu1  ;;  %v5595_v49 = vadd.f32 %v11853_v4, %v4865_v60 }
 0x465   : > { %13443 = vst [vmem:[#allocation140_spill] sm:$0xff] %v12027_v9  ;;  %v4867_v52 = vpop.f32.mrf.mxu0 }
 0x466   : > { %v5596_v33 = vadd.f32 %v11856_v63, %v4867_v52  ;;  %v12031_v12 = vpop.f32.mrf.mxu1  ;;  %6309 = vmatprep.mubr.f32.mxu1 %v5866_v8  ;;  %v5867_v61 = vmax.f32 %v5595_v49, 0.0 }
 0x467   : > { %13444 = vst [vmem:[#allocation141_spill] sm:$0xff] %v12031_v12  ;;  %v4871_v40 = vpop.f32.mrf.mxu0  ;;  %6310 = vmatmul.mubr.f32.gmra.mxu1 %v5865_v21 }
 0x468   : > { %v5868_v42 = vmax.f32 %v5596_v33, 0.0  ;;  %v12033_v32 = vpop.f32.mrf.mxu1  ;;  %v5597_v13 = vadd.f32 %v11853_v4, %v4871_v40 }
 0x469   : > { %13445 = vst [vmem:[#allocation142_spill] sm:$0xff] %v12033_v32  ;;  %v4873_v10 = vpop.f32.mrf.mxu0 }
 0x46a   : > { %v5598_v9 = vadd.f32 %v11856_v63, %v4873_v10  ;;  %v12037_v0 = vpop.f32.mrf.mxu1  ;;  %6314 = vmatprep.mubr.f32.mxu1 %v5868_v42  ;;  %v5869_v8 = vmax.f32 %v5597_v13, 0.0  ;;  %v5604_v13 = vadd.f32 %v11856_v63, %v11255_v48 }
 0x46b   : > { %v4877_v60 = vpop.f32.mrf.mxu0  ;;  %6315 = vmatmul.mubr.f32.gmra.mxu1 %v5867_v61 }
 0x46c   : > { %v5870_v52 = vmax.f32 %v5598_v9, 0.0  ;;  %v12039_v31 = vpop.f32.mrf.mxu1  ;;  %v5599_v21 = vadd.f32 %v11853_v4, %v4877_v60 }
 0x46d   : > { %13446 = vst [vmem:[#allocation143_spill] sm:$0xff] %v12039_v31  ;;  %v4879_v33 = vpop.f32.mrf.mxu0 }
 0x46e   : > { %v5600_v32 = vadd.f32 %v11856_v63, %v4879_v33  ;;  %v12043_v49 = vpop.f32.mrf.mxu1  ;;  %6319 = vmatprep.mubr.f32.mxu1 %v5870_v52  ;;  %v5871_v42 = vmax.f32 %v5599_v21, 0.0  ;;  %v5876_v21 = vmax.f32 %v5604_v13, 0.0 }
 0x46f   : > { %v4883_v40 = vpop.f32.mrf.mxu0  ;;  %6320 = vmatmul.mubr.f32.gmra.mxu1 %v5869_v8 }
 0x470   : > { %v5872_v10 = vmax.f32 %v5600_v32, 0.0  ;;  %v12045_v12 = vpop.f32.mrf.mxu1  ;;  %v5601_v61 = vadd.f32 %v11853_v4, %v4883_v40  ;;  %v5603_v32 = vadd.f32 %v11853_v4, %v11247_v45  ;;  %v5606_v40 = vadd.f32 %v11856_v63, %v11268_v58 }
 0x471   : > { %13447 = vst [vmem:[#allocation144_spill] sm:$0xff] %v12045_v12  ;;  %v4885_v9 = vpop.f32.mrf.mxu0 }
 0x472   : > { %v5602_v60 = vadd.f32 %v11856_v63, %v4885_v9  ;;  %v12051_v31 = vpop.f32.mrf.mxu1  ;;  %6324 = vmatprep.mubr.f32.mxu1 %v5872_v10  ;;  %v5873_v8 = vmax.f32 %v5601_v61, 0.0  ;;  %v5875_v10 = vmax.f32 %v5603_v32, 0.0  ;;  %v5878_v9 = vmax.f32 %v5606_v40, 0.0 }
 0x473   : > { %6325 = vmatmul.mubr.f32.gmra.mxu1 %v5871_v42  ;;  %v5605_v42 = vadd.f32 %v11853_v4, %v11260_v51 }
 0x474   : > { %v5874_v33 = vmax.f32 %v5602_v60, 0.0  ;;  %v12053_v52 = vpop.f32.mrf.mxu1  ;;  %v13450_v60 = vld [vmem:[#allocation21_spill] sm:$0xff] }
 0x475   : > { %13448 = vst [vmem:[#allocation145_spill] sm:$0xff] %v12053_v52  ;;  %v5608_v45 = vadd.f32 %v11856_v63, %v13450_v60  ;;  %v5877_v58 = vmax.f32 %v5605_v42, 0.0  ;;  %v13457_v60 = vld [vmem:[#allocation22_spill] sm:$0xff] }
 0x476   : > { %v12059_v12 = vpop.f32.mrf.mxu1  ;;  %6329 = vmatprep.mubr.f32.mxu1 %v5874_v33  ;;  %v13453_v33 = vld [vmem:[#allocation20_spill] sm:$0xff] }
 0x477   : > { %6330 = vmatmul.mubr.f32.gmra.mxu1 %v5873_v8  ;;  %v5607_v8 = vadd.f32 %v11853_v4, %v13453_v33 }
 0x478   : > { %v12061_v48 = vpop.f32.mrf.mxu1  ;;  %6334 = vmatprep.mubr.f32.mxu1 %v5876_v21  ;;  %v13454_v21 = vld [vmem:[#allocation23_spill] sm:$0xff] }
 0x479   : > { %13449 = vst [vmem:[#allocation146_spill] sm:$0xff] %v12061_v48  ;;  %v5880_v48 = vmax.f32 %v5608_v45, 0.0  ;;  %v5610_v32 = vadd.f32 %v11856_v63, %v13454_v21  ;;  %v5879_v40 = vmax.f32 %v5607_v8, 0.0  ;;  %v13460_v21 = vld [vmem:[#allocation24_spill] sm:$0xff] }
 0x47a   : > { %v12067_v61 = vpop.f32.mrf.mxu1 }
 0x47b   : > { %13451 = vst [vmem:[#allocation21_spill] sm:$0xff] %v12067_v61  ;;  %6335 = vmatmul.mubr.f32.gmra.mxu1 %v5875_v10  ;;  %v5609_v10 = vadd.f32 %v11853_v4, %v13457_v60 }
 0x47c   : > { %v12069_v13 = vpop.f32.mrf.mxu1  ;;  %6339 = vmatprep.mubr.f32.mxu1 %v5878_v9  ;;  %v13458_v9 = vld [vmem:[#allocation25_spill] sm:$0xff] }
 0x47d   : > { %13452 = vst [vmem:[#allocation147_spill] sm:$0xff] %v12069_v13  ;;  %v5882_v13 = vmax.f32 %v5610_v32, 0.0  ;;  %v5612_v42 = vadd.f32 %v11856_v63, %v13458_v9  ;;  %v5881_v33 = vmax.f32 %v5609_v10, 0.0  ;;  %v13463_v9 = vld [vmem:[#allocation26_spill] sm:$0xff] }
 0x47e   : > { %v12075_v52 = vpop.f32.mrf.mxu1 }
 0x47f   : > { %13455 = vst [vmem:[#allocation20_spill] sm:$0xff] %v12075_v52  ;;  %6340 = vmatmul.mubr.f32.gmra.mxu1 %v5877_v58  ;;  %v5611_v58 = vadd.f32 %v11853_v4, %v13460_v21 }
 0x480   : > { %v12077_v51 = vpop.f32.mrf.mxu1  ;;  %6344 = vmatprep.mubr.f32.mxu1 %v5880_v48  ;;  %v13461_v48 = vld [vmem:[#allocation27_spill] sm:$0xff] }
 0x481   : > { %13456 = vst [vmem:[#allocation23_spill] sm:$0xff] %v12077_v51  ;;  %v5884_v51 = vmax.f32 %v5612_v42, 0.0  ;;  %v5614_v8 = vadd.f32 %v11856_v63, %v13461_v48  ;;  %v5883_v60 = vmax.f32 %v5611_v58, 0.0  ;;  %v13464_v48 = vld [vmem:[#allocation28_spill] sm:$0xff] }
 0x482   : > { %v12083_v61 = vpop.f32.mrf.mxu1 }
 0x483   : > { %6345 = vmatmul.mubr.f32.gmra.mxu1 %v5879_v40  ;;  %v5613_v40 = vadd.f32 %v11853_v4, %v13463_v9 }
 0x484   : > { %v12085_v45 = vpop.f32.mrf.mxu1  ;;  %6349 = vmatprep.mubr.f32.mxu1 %v5882_v13  ;;  %v5616_v13 = vadd.f32 %v11856_v63, %v11340_v5 }
 0x485   : > { %13459 = vst [vmem:[#allocation22_spill] sm:$0xff] %v12085_v45  ;;  %v5886_v45 = vmax.f32 %v5614_v8, 0.0  ;;  %v5885_v21 = vmax.f32 %v5613_v40, 0.0 }
 0x486   : > { %v12091_v52 = vpop.f32.mrf.mxu1 }
 0x487   : > { %6350 = vmatmul.mubr.f32.gmra.mxu1 %v5881_v33  ;;  %v5615_v33 = vadd.f32 %v11853_v4, %v13464_v48 }
 0x488   : > { %v12093_v32 = vpop.f32.mrf.mxu1  ;;  %6354 = vmatprep.mubr.f32.mxu1 %v5884_v51  ;;  %v5618_v51 = vadd.f32 %v11856_v63, %v11352_v17 }
 0x489   : > { %13462 = vst [vmem:[#allocation25_spill] sm:$0xff] %v12093_v32  ;;  %v5888_v32 = vmax.f32 %v5616_v13, 0.0  ;;  %v5887_v5 = vmax.f32 %v5615_v33, 0.0 }
 0x48a   : > { %v12099_v10 = vpop.f32.mrf.mxu1  ;;  %v5890_v9 = vmax.f32 %v5618_v51, 0.0  ;;  %v5621_v51 = vadd.f32 %v11853_v4, %v11364_v36 }
 0x48b   : > { %6355 = vmatmul.mubr.f32.gmra.mxu1 %v5883_v60  ;;  %v5617_v60 = vadd.f32 %v11853_v4, %v11346_v43 }
 0x48c   : > { %v12101_v42 = vpop.f32.mrf.mxu1  ;;  %6359 = vmatprep.mubr.f32.mxu1 %v5886_v45  ;;  %v5620_v45 = vadd.f32 %v11856_v63, %v11361_v57 }
 0x48d   : > { %v5889_v17 = vmax.f32 %v5617_v60, 0.0  ;;  %v5624_v60 = vadd.f32 %v11856_v63, %v11384_v50 }
 0x48e   : > { %v12107_v58 = vpop.f32.mrf.mxu1  ;;  %v5892_v48 = vmax.f32 %v5620_v45, 0.0  ;;  %v5623_v45 = vadd.f32 %v11853_v4, %v11377_v25 }
 0x48f   : > { %6360 = vmatmul.mubr.f32.gmra.mxu1 %v5885_v21  ;;  %v5619_v21 = vadd.f32 %v11853_v4, %v11356_v1 }
 0x490   : > { %v12109_v8 = vpop.f32.mrf.mxu1  ;;  %6364 = vmatprep.mubr.f32.mxu1 %v5888_v32  ;;  %v5622_v32 = vadd.f32 %v11856_v63, %v11373_v20  ;;  %v5893_v20 = vmax.f32 %v5621_v51, 0.0  ;;  %v5895_v50 = vmax.f32 %v5623_v45, 0.0  ;;  %v5628_v51 = vadd.f32 %v11856_v63, %v11406_v19 }
 0x491   : > { %v5891_v57 = vmax.f32 %v5619_v21, 0.0  ;;  %v5626_v21 = vadd.f32 %v11856_v63, %v11395_v3  ;;  %v5630_v45 = vadd.f32 %v11856_v63, %v11420_v6 }
 0x492   : > { %v12115_v40 = vpop.f32.mrf.mxu1 }
 0x493   : > { %6365 = vmatmul.mubr.f32.gmra.mxu1 %v5887_v5  ;;  %v5894_v5 = vmax.f32 %v5622_v32, 0.0  ;;  %v5625_v32 = vadd.f32 %v11853_v4, %v11388_v46 }
 0x494   : > { %v12117_v13 = vpop.f32.mrf.mxu1  ;;  %6369 = vmatprep.mubr.f32.mxu1 %v5890_v9 }
 0x495   : > { %v5897_v3 = vmax.f32 %v5625_v32, 0.0  ;;  %v5632_v32 = vadd.f32 %v11856_v63, %v11432_v23 }
 0x496   : > { %v12123_v33 = vpop.f32.mrf.mxu1 }
 0x497   : > { %6370 = vmatmul.mubr.f32.gmra.mxu1 %v5889_v17  ;;  %v5896_v17 = vmax.f32 %v5624_v60, 0.0  ;;  %v5627_v60 = vadd.f32 %v11853_v4, %v11399_v54 }
 0x498   : > { %v12125_v43 = vpop.f32.mrf.mxu1  ;;  %6374 = vmatprep.mubr.f32.mxu1 %v5892_v48 }
 0x499   : > { %v5899_v19 = vmax.f32 %v5627_v60, 0.0  ;;  %v5634_v60 = vadd.f32 %v11856_v63, %v11443_v59 }
 0x49a   : > { %v12131_v9 = vpop.f32.mrf.mxu1 }
 0x49b   : > { %6375 = vmatmul.mubr.f32.gmra.mxu1 %v5891_v57  ;;  %v5898_v57 = vmax.f32 %v5626_v21, 0.0  ;;  %v5629_v21 = vadd.f32 %v11853_v4, %v11413_v24 }
 0x49c   : > { %v12133_v1 = vpop.f32.mrf.mxu1  ;;  %6379 = vmatprep.mubr.f32.mxu1 %v5894_v5 }
 0x49d   : > { %v5901_v6 = vmax.f32 %v5629_v21, 0.0  ;;  %v5636_v21 = vadd.f32 %v11856_v63, %v11457_v30 }
 0x49e   : > { %v12139_v48 = vpop.f32.mrf.mxu1 }
 0x49f   : > { %6380 = vmatmul.mubr.f32.gmra.mxu1 %v5893_v20  ;;  %v5900_v20 = vmax.f32 %v5628_v51, 0.0  ;;  %v5631_v51 = vadd.f32 %v11853_v4, %v11425_v22 }
 0x4a0   : > { %v12141_v36 = vpop.f32.mrf.mxu1  ;;  %6384 = vmatprep.mubr.f32.mxu1 %v5896_v17 }
 0x4a1   : > { %v5903_v23 = vmax.f32 %v5631_v51, 0.0  ;;  %v5638_v51 = vadd.f32 %v11856_v63, %v11469_v38 }
 0x4a2   : > { %v12147_v5 = vpop.f32.mrf.mxu1 }
 0x4a3   : > { %6385 = vmatmul.mubr.f32.gmra.mxu1 %v5895_v50  ;;  %v5902_v50 = vmax.f32 %v5630_v45, 0.0  ;;  %v5633_v45 = vadd.f32 %v11853_v4, %v11436_v28 }
 0x4a4   : > { %v12149_v25 = vpop.f32.mrf.mxu1  ;;  %6389 = vmatprep.mubr.f32.mxu1 %v5898_v57 }
 0x4a5   : > { %v5905_v59 = vmax.f32 %v5633_v45, 0.0  ;;  %v5640_v45 = vadd.f32 %v11856_v63, %v11480_v2 }
 0x4a6   : > { %v12155_v17 = vpop.f32.mrf.mxu1 }
 0x4a7   : > { %6390 = vmatmul.mubr.f32.gmra.mxu1 %v5897_v3  ;;  %v5904_v3 = vmax.f32 %v5632_v32, 0.0  ;;  %v5635_v32 = vadd.f32 %v11853_v4, %v11450_v39 }
 0x4a8   : > { %v12157_v46 = vpop.f32.mrf.mxu1  ;;  %6394 = vmatprep.mubr.f32.mxu1 %v5900_v20 }
 0x4a9   : > { %v5907_v30 = vmax.f32 %v5635_v32, 0.0  ;;  %v5642_v32 = vadd.f32 %v11856_v63, %v11491_v16  ;;  %v13467_v16 = vld [vmem:[#allocation29_spill] sm:$0xff] }
 0x4aa   : > { %v12163_v57 = vpop.f32.mrf.mxu1 }
 0x4ab   : > { %6395 = vmatmul.mubr.f32.gmra.mxu1 %v5899_v19  ;;  %v5906_v19 = vmax.f32 %v5634_v60, 0.0  ;;  %v5637_v60 = vadd.f32 %v11853_v4, %v11462_v11 }
 0x4ac   : > { %v12165_v54 = vpop.f32.mrf.mxu1  ;;  %6399 = vmatprep.mubr.f32.mxu1 %v5902_v50 }
 0x4ad   : > { %v5909_v38 = vmax.f32 %v5637_v60, 0.0  ;;  %v5644_v60 = vadd.f32 %v11856_v63, %v11506_v47 }
 0x4ae   : > { %v12171_v20 = vpop.f32.mrf.mxu1 }
 0x4af   : > { %6400 = vmatmul.mubr.f32.gmra.mxu1 %v5901_v6  ;;  %v5908_v6 = vmax.f32 %v5636_v21, 0.0  ;;  %v5639_v21 = vadd.f32 %v11853_v4, %v11473_v14 }
 0x4b0   : > { %v12173_v24 = vpop.f32.mrf.mxu1  ;;  %6404 = vmatprep.mubr.f32.mxu1 %v5904_v3 }
 0x4b1   : > { %v5911_v2 = vmax.f32 %v5639_v21, 0.0  ;;  %v5646_v21 = vadd.f32 %v11856_v63, %v11517_v29 }
 0x4b2   : > { %v12179_v50 = vpop.f32.mrf.mxu1 }
 0x4b3   : > { %6405 = vmatmul.mubr.f32.gmra.mxu1 %v5903_v23  ;;  %v5910_v23 = vmax.f32 %v5638_v51, 0.0  ;;  %v5641_v51 = vadd.f32 %v11853_v4, %v11484_v37 }
 0x4b4   : > { %v12181_v22 = vpop.f32.mrf.mxu1  ;;  %6409 = vmatprep.mubr.f32.mxu1 %v5906_v19 }
 0x4b5   : > { %v5913_v14 = vmax.f32 %v5641_v51, 0.0  ;;  %v5918_v51 = vmax.f32 %v5646_v21, 0.0 }
 0x4b6   : > { %v12187_v3 = vpop.f32.mrf.mxu1 }
 0x4b7   : > { %6410 = vmatmul.mubr.f32.gmra.mxu1 %v5905_v59  ;;  %v5912_v59 = vmax.f32 %v5640_v45, 0.0  ;;  %v5643_v45 = vadd.f32 %v11853_v4, %v13467_v16 }
 0x4b8   : > { %v12189_v28 = vpop.f32.mrf.mxu1  ;;  %6414 = vmatprep.mubr.f32.mxu1 %v5908_v6 }
 0x4b9   : > { %v5915_v37 = vmax.f32 %v5643_v45, 0.0 }
 0x4ba   : > { %v12195_v19 = vpop.f32.mrf.mxu1 }
 0x4bb   : > { %6415 = vmatmul.mubr.f32.gmra.mxu1 %v5907_v30  ;;  %v5914_v30 = vmax.f32 %v5642_v32, 0.0 }
 0x4bc   : > { %v12197_v39 = vpop.f32.mrf.mxu1  ;;  %6419 = vmatprep.mubr.f32.mxu1 %v5910_v23 }
 0x4be   : > { %v12203_v6 = vpop.f32.mrf.mxu1 }
 0x4bf   : > { %6420 = vmatmul.mubr.f32.gmra.mxu1 %v5909_v38 }
 0x4c0   : > { %v12205_v11 = vpop.f32.mrf.mxu1  ;;  %6424 = vmatprep.mubr.f32.mxu1 %v5912_v59  ;;  %v13469_v59 = vld [vmem:[#allocation30_spill] sm:$0xff] }
 0x4c1   : > { %13465 = vst [vmem:[#allocation24_spill] sm:$0xff] %v12205_v11  ;;  %v5916_v11 = vmax.f32 %v5644_v60, 0.0  ;;  %v5645_v47 = vadd.f32 %v11853_v4, %v13469_v59  ;;  %v13471_v59 = vld [vmem:[#allocation32_spill] sm:$0xff] }
 0x4c2   : > { %v12211_v23 = vpop.f32.mrf.mxu1 }
 0x4c3   : > { %13466 = vst [vmem:[#allocation27_spill] sm:$0xff] %v12211_v23  ;;  %6425 = vmatmul.mubr.f32.gmra.mxu1 %v5911_v2  ;;  %v12223_v2 = vld [vmem:[#allocation10] ss:$0 sm:$0xff]  ;;  %v5917_v29 = vmax.f32 %v5645_v47, 0.0 }
 0x4c4   : > { %6429 = vmatprep.mubr.f32.mxu1 %v5914_v30  ;;  %v12215_v38 = vpop.f32.mrf.mxu1  ;;  %v5648_v30 = vadd.f32 %v11856_v63, %v11528_v18 }
 0x4c5   : > { %13468 = vst [vmem:[#allocation26_spill] sm:$0xff] %v12215_v38  ;;  %v5650_v38 = vadd.f32 %v11856_v63, %v13471_v59 }
 0x4c6   : > { %v12221_v32 = vpop.f32.mrf.mxu1  ;;  %v5920_v45 = vmax.f32 %v5648_v30, 0.0 }
 0x4c7   : > { %6430 = vmatmul.mubr.f32.gmra.mxu1 %v5913_v14  ;;  %13470 = vst [vmem:[#allocation28_spill] sm:$0xff] %v12221_v32 }
 0x4c8   : > { %6434 = vmatprep.mubr.f32.mxu1 %v5916_v11  ;;  %v5647_v11 = vadd.f32 %v11853_v4, %v11521_v62  ;;  %v5652_v62 = vadd.f32 %v11856_v63, %v11554_v34 }
 0x4ca   : > { %v5919_v18 = vmax.f32 %v5647_v11, 0.0 }
 0x4cb   : > { %v6196_v16 = vpop.f32.mrf.mxu1  ;;  %6435 = vmatmul.mubr.f32.gmra.mxu1 %v5915_v37  ;;  %v13472_v37 = vld [vmem:[#allocation31_spill] sm:$0xff] }
 0x4cc   : > { %v6197_v60 = vadd.f32 %v12223_v2, %v6196_v16  ;;  %6439 = vmatprep.mubr.f32.mxu1 %v5918_v51  ;;  %v5649_v47 = vadd.f32 %v11853_v4, %v13472_v37  ;;  %v5922_v16 = vmax.f32 %v5650_v38, 0.0  ;;  %v5654_v38 = vadd.f32 %v11856_v63, %v11565_v55 }
 0x4cd   : > { %v6198_v14 = vpop.f32.mrf.mxu1 }
 0x4ce   : > { %v6875_v32 = vmax.f32 %v6197_v60, 0.0 }
 0x4cf   : > { %v6201_v23 = vpop.f32.mrf.mxu1  ;;  %6440 = vmatmul.mubr.f32.gmra.mxu1 %v5917_v29  ;;  %v13473_v29 = vld [vmem:[#allocation33_spill] sm:$0xff] }
 0x4d0   : > { %v6202_v21 = vadd.f32 %v12223_v2, %v6201_v23  ;;  %6444 = vmatprep.mubr.f32.mxu1 %v5920_v45  ;;  %8957 = vmatprep.mubr.msk.f32.mxu0 %vm4246_vm0, %v6875_v32  ;;  %v5921_v23 = vmax.f32 %v5649_v47, 0.0  ;;  %v5651_v32 = vadd.f32 %v11853_v4, %v13473_v29  ;;  %v5924_v45 = vmax.f32 %v5652_v62, 0.0 }
 0x4d1   : > { %v6203_v51 = vpop.f32.mrf.mxu1 }
 0x4d2   : > { %v6876_v30 = vmax.f32 %v6202_v21, 0.0  ;;  %v5923_v21 = vmax.f32 %v5651_v32, 0.0  ;;  %v5926_v51 = vmax.f32 %v5654_v38, 0.0 }
 0x4d3   : > { %v6206_v14 = vpop.f32.mrf.mxu1  ;;  %6445 = vmatmul.mubr.f32.gmra.mxu1 %v5919_v18  ;;  %v5653_v18 = vadd.f32 %v11853_v4, %v11558_v26  ;;  %v5658_v26 = vadd.f32 %v11856_v63, %v11590_v35 }
 0x4d4   : > { %v6207_v60 = vadd.f32 %v12223_v2, %v6206_v14  ;;  %6449 = vmatprep.mubr.f32.mxu1 %v5922_v16  ;;  %8958 = vmatmul.mubr.msk.f32.vlgmr.msra.gmra.mxu0 %vm4246_vm0, %v6876_v30  ;;  %v13474_v16 = vld [vmem:[#allocation35_spill] sm:$0xff] }
 0x4d5   : > { %v6208_v11 = vpop.f32.mrf.mxu1  ;;  %v5656_v62 = vadd.f32 %v11856_v63, %v13474_v16 }
 0x4d6   : > { %v6877_v59 = vmax.f32 %v6207_v60, 0.0  ;;  %v5925_v60 = vmax.f32 %v5653_v18, 0.0  ;;  %v5930_v18 = vmax.f32 %v5658_v26, 0.0 }
 0x4d7   : > { %v6211_v37 = vpop.f32.mrf.mxu1  ;;  %6450 = vmatmul.mubr.f32.gmra.mxu1 %v5921_v23  ;;  %v13475_v23 = vld [vmem:[#allocation34_spill] sm:$0xff]  ;;  %v5928_v11 = vmax.f32 %v5656_v62, 0.0 }
 0x4d8   : > { %v6212_v34 = vadd.f32 %v12223_v2, %v6211_v37  ;;  %6454 = vmatprep.mubr.f32.mxu1 %v5924_v45  ;;  %8960 = vmatprep.mubr.msk.f32.mxu0 %vm4246_vm0, %v6877_v59  ;;  %v5655_v29 = vadd.f32 %v11853_v4, %v13475_v23 }
 0x4d9   : > { %v6213_v47 = vpop.f32.mrf.mxu1 }
 0x4da   : > { %v6878_v30 = vmax.f32 %v6212_v34, 0.0  ;;  %v5927_v37 = vmax.f32 %v5655_v29, 0.0  ;;  %v5657_v34 = vadd.f32 %v11853_v4, %v11583_v15  ;;  %v13476_v47 = vld [vmem:[#allocation37_spill] sm:$0xff]  ;;  %v5662_v15 = vadd.f32 %v11856_v63, %v11614_v56 }
 0x4db   : > { %v6216_v14 = vpop.f32.mrf.mxu1  ;;  %6455 = vmatmul.mubr.f32.gmra.mxu1 %v5923_v21 }
 0x4dc   : > { %v6217_v55 = vadd.f32 %v12223_v2, %v6216_v14  ;;  %6459 = vmatprep.mubr.f32.mxu1 %v5926_v51  ;;  %8961 = vmatmul.mubr.msk.f32.gmra.mxu0 %vm4246_vm0, %v6878_v30  ;;  %v5660_v51 = vadd.f32 %v11856_v63, %v13476_v47  ;;  %v5929_v30 = vmax.f32 %v5657_v34, 0.0  ;;  %v13477_v14 = vld [vmem:[#allocation36_spill] sm:$0xff]  ;;  %v5664_v34 = vadd.f32 %v11856_v63, %v11625_v7 }
 0x4dd   : > { %v6218_v32 = vpop.f32.mrf.mxu1 }
 0x4de   : > { %v6879_v45 = vmax.f32 %v6217_v55, 0.0  ;;  %v5659_v55 = vadd.f32 %v11853_v4, %v13477_v14  ;;  %v5932_v23 = vmax.f32 %v5660_v51, 0.0  ;;  %v13479_v51 = vld [vmem:[#allocation39_spill] sm:$0xff] }
 0x4df   : > { %v6221_v38 = vpop.f32.mrf.mxu1  ;;  %6460 = vmatmul.mubr.f32.gmra.mxu1 %v5925_v60 }
 0x4e0   : > { %v6222_v59 = vadd.f32 %v12223_v2, %v6221_v38  ;;  %6464 = vmatprep.mubr.f32.mxu1 %v5928_v11  ;;  %8963 = vmatprep.mubr.msk.f32.mxu0 %vm4246_vm0, %v6879_v45  ;;  %v5931_v26 = vmax.f32 %v5659_v55, 0.0  ;;  %v13478_v45 = vld [vmem:[#allocation38_spill] sm:$0xff] }
 0x4e1   : > { %v6223_v21 = vpop.f32.mrf.mxu1  ;;  %v5661_v38 = vadd.f32 %v11853_v4, %v13478_v45 }
 0x4e2   : > { %v6880_v16 = vmax.f32 %v6222_v59, 0.0 }
 0x4e3   : > { %v6226_v62 = vpop.f32.mrf.mxu1  ;;  %6465 = vmatmul.mubr.f32.gmra.mxu1 %v5927_v37  ;;  %v5934_v37 = vmax.f32 %v5662_v15, 0.0  ;;  %v5933_v47 = vmax.f32 %v5661_v38, 0.0 }
 0x4e4   : > { %v6227_v35 = vadd.f32 %v12223_v2, %v6226_v62  ;;  %6469 = vmatprep.mubr.f32.mxu1 %v5930_v18  ;;  %8964 = vmatmul.mubr.msk.f32.gmra.mxu0 %vm4246_vm0, %v6880_v16  ;;  %v5663_v16 = vadd.f32 %v11853_v4, %v13479_v51 }
 0x4e5   : > { %v6228_v60 = vpop.f32.mrf.mxu1 }
 0x4e6   : > { %v6881_v29 = vmax.f32 %v6227_v35, 0.0  ;;  %v5936_v35 = vmax.f32 %v5664_v34, 0.0  ;;  %v5935_v60 = vmax.f32 %v5663_v16, 0.0  ;;  %v13482_v16 = vld [vmem:[#allocation42_spill] sm:$0xff] }
 0x4e7   : > { %v6231_v32 = vpop.f32.mrf.mxu1  ;;  %6470 = vmatmul.mubr.f32.gmra.mxu1 %v5929_v30  ;;  %v5666_v30 = vadd.f32 %v11856_v63, %v11636_v41 }
 0x4e8   : > { %v6232_v11 = vadd.f32 %v12223_v2, %v6231_v32  ;;  %6474 = vmatprep.mubr.f32.mxu1 %v5932_v23  ;;  %8966 = vmatprep.mubr.msk.f32.mxu0 %vm4246_vm0, %v6881_v29  ;;  %v13480_v23 = vld [vmem:[#allocation40_spill] sm:$0xff] }
 0x4e9   : > { %v6233_v59 = vpop.f32.mrf.mxu1  ;;  %v5665_v15 = vadd.f32 %v11853_v4, %v13480_v23  ;;  %v5938_v32 = vmax.f32 %v5666_v30, 0.0  ;;  %v13483_v23 = vld [vmem:[#allocation43_spill] sm:$0xff] }
 0x4ea   : > { %v6882_v21 = vmax.f32 %v6232_v11, 0.0  ;;  %v5668_v11 = vadd.f32 %v11856_v63, %v11647_v53  ;;  %v13481_v59 = vld [vmem:[#allocation41_spill] sm:$0xff] }
 0x4eb   : > { %v6236_v18 = vpop.f32.mrf.mxu1  ;;  %6475 = vmatmul.mubr.f32.gmra.mxu1 %v5931_v26  ;;  %v5937_v38 = vmax.f32 %v5665_v15, 0.0  ;;  %v5671_v15 = vadd.f32 %v11853_v4, %v13483_v23 }
 0x4ec   : > { %v6237_v56 = vadd.f32 %v12223_v2, %v6236_v18  ;;  %6479 = vmatprep.mubr.f32.mxu1 %v5934_v37  ;;  %8967 = vmatmul.mubr.msk.f32.gmra.mxu0 %vm4246_vm0, %v6882_v21  ;;  %v5667_v37 = vadd.f32 %v11853_v4, %v13481_v59  ;;  %v5940_v21 = vmax.f32 %v5668_v11, 0.0  ;;  %v5670_v18 = vadd.f32 %v11856_v63, %v11658_v44  ;;  %v13484_v11 = vld [vmem:[#allocation45_spill] sm:$0xff]  ;;  %v13485_v59 = vld [vmem:[#allocation44_spill] sm:$0xff] }
 0x4ed   : > { %v6238_v62 = vpop.f32.mrf.mxu1 }
 0x4ee   : > { %v6883_v14 = vmax.f32 %v6237_v56, 0.0  ;;  %v5939_v51 = vmax.f32 %v5667_v37, 0.0  ;;  %v5669_v62 = vadd.f32 %v11853_v4, %v13482_v16  ;;  %v5942_v30 = vmax.f32 %v5670_v18, 0.0  ;;  %v13486_v18 = vld [vmem:[#allocation47_spill] sm:$0xff] }
 0x4ef   : > { %v6241_v55 = vpop.f32.mrf.mxu1  ;;  %6480 = vmatmul.mubr.f32.gmra.mxu1 %v5933_v47  ;;  %v5673_v37 = vadd.f32 %v11853_v4, %v13485_v59 }
 0x4f0   : > { %v6242_v7 = vadd.f32 %v12223_v2, %v6241_v55  ;;  %6484 = vmatprep.mubr.f32.mxu1 %v5936_v35  ;;  %8969 = vmatprep.mubr.msk.f32.mxu0 %vm4246_vm0, %v6883_v14  ;;  %v5672_v14 = vadd.f32 %v11856_v63, %v11669_v27 }
 0x4f1   : > { %v6243_v29 = vpop.f32.mrf.mxu1  ;;  %v5945_v16 = vmax.f32 %v5673_v37, 0.0 }
 0x4f2   : > { %v6884_v26 = vmax.f32 %v6242_v7, 0.0 }
 0x4f3   : > { %v6246_v45 = vpop.f32.mrf.mxu1  ;;  %6485 = vmatmul.mubr.f32.gmra.mxu1 %v5935_v60  ;;  %v5941_v60 = vmax.f32 %v5669_v62, 0.0  ;;  %v13487_v62 = vld [vmem:[#allocation46_spill] sm:$0xff] }
 0x4f4   : > { %v6247_v41 = vadd.f32 %v12223_v2, %v6246_v45  ;;  %6489 = vmatprep.mubr.f32.mxu1 %v5938_v32  ;;  %8970 = vmatmul.mubr.msk.f32.gmra.mxu0 %vm4246_vm0, %v6884_v26  ;;  %v5944_v32 = vmax.f32 %v5672_v14, 0.0  ;;  %v5674_v26 = vadd.f32 %v11856_v63, %v13484_v11 }
 0x4f5   : > { %v6248_v34 = vpop.f32.mrf.mxu1 }
 0x4f6   : > { %v6885_v56 = vmax.f32 %v6247_v41, 0.0 }
 0x4f7   : > { %v6251_v47 = vpop.f32.mrf.mxu1  ;;  %6490 = vmatmul.mubr.f32.gmra.mxu1 %v5937_v38  ;;  %v5943_v38 = vmax.f32 %v5671_v15, 0.0 }
 0x4f8   : > { %v6252_v53 = vadd.f32 %v12223_v2, %v6251_v47  ;;  %6494 = vmatprep.mubr.f32.mxu1 %v5940_v21  ;;  %8972 = vmatprep.mubr.msk.f32.mxu0 %vm4246_vm0, %v6885_v56  ;;  %v5946_v21 = vmax.f32 %v5674_v26, 0.0  ;;  %v5676_v56 = vadd.f32 %v11856_v63, %v13486_v18 }
 0x4f9   : > { %v6253_v35 = vpop.f32.mrf.mxu1 }
 0x4fa   : > { %v6886_v55 = vmax.f32 %v6252_v53, 0.0  ;;  %v5675_v35 = vadd.f32 %v11853_v4, %v13487_v62  ;;  %v5948_v14 = vmax.f32 %v5676_v56, 0.0 }
 0x4fb   : > { %v6256_v7 = vpop.f32.mrf.mxu1  ;;  %6495 = vmatmul.mubr.f32.gmra.mxu1 %v5939_v51 }
 0x4fc   : > { %v6257_v44 = vadd.f32 %v12223_v2, %v6256_v7  ;;  %6499 = vmatprep.mubr.f32.mxu1 %v5942_v30  ;;  %8973 = vmatmul.mubr.msk.f32.gmra.mxu0 %vm4246_vm0, %v6886_v55  ;;  %v13488_v55 = vld [vmem:[#allocation49_spill] sm:$0xff]  ;;  %v5947_v15 = vmax.f32 %v5675_v35, 0.0 }
 0x4fd   : > { %v6258_v29 = vpop.f32.mrf.mxu1  ;;  %v5678_v7 = vadd.f32 %v11856_v63, %v13488_v55 }
 0x4fe   : > { %v6887_v45 = vmax.f32 %v6257_v44, 0.0  ;;  %v13489_v29 = vld [vmem:[#allocation48_spill] sm:$0xff] }
 0x4ff   : > { %v6261_v41 = vpop.f32.mrf.mxu1  ;;  %6500 = vmatmul.mubr.f32.gmra.mxu1 %v5941_v60  ;;  %v5950_v26 = vmax.f32 %v5678_v7, 0.0 }
 0x500   : > { %v6262_v27 = vadd.f32 %v12223_v2, %v6261_v41  ;;  %6504 = vmatprep.mubr.f32.mxu1 %v5944_v32  ;;  %8975 = vmatprep.mubr.msk.f32.mxu0 %vm4246_vm0, %v6887_v45  ;;  %v5677_v32 = vadd.f32 %v11853_v4, %v13489_v29  ;;  %v13490_v45 = vld [vmem:[#allocation51_spill] sm:$0xff] }
 0x501   : > { %v6263_v34 = vpop.f32.mrf.mxu1  ;;  %v5680_v41 = vadd.f32 %v11856_v63, %v13490_v45 }
 0x502   : > { %v6888_v47 = vmax.f32 %v6262_v27, 0.0  ;;  %v5949_v37 = vmax.f32 %v5677_v32, 0.0  ;;  %v13491_v34 = vld [vmem:[#allocation50_spill] sm:$0xff] }
 0x503   : > { %v6266_v53 = vpop.f32.mrf.mxu1  ;;  %6505 = vmatmul.mubr.f32.gmra.mxu1 %v5943_v38  ;;  %v5952_v56 = vmax.f32 %v5680_v41, 0.0 }
 0x504   : > { %v6267_v51 = vadd.f32 %v12223_v2, %v6266_v53  ;;  %6509 = vmatprep.mubr.f32.mxu1 %v5946_v21  ;;  %8976 = vmatmul.mubr.msk.f32.gmra.mxu0 %vm4246_vm0, %v6888_v47  ;;  %v5679_v21 = vadd.f32 %v11853_v4, %v13491_v34  ;;  %v13492_v47 = vld [vmem:[#allocation53_spill] sm:$0xff] }
 0x505   : > { %v6268_v30 = vpop.f32.mrf.mxu1  ;;  %v5682_v53 = vadd.f32 %v11856_v63, %v13492_v47 }
 0x506   : > { %v6889_v44 = vmax.f32 %v6267_v51, 0.0  ;;  %v5951_v35 = vmax.f32 %v5679_v21, 0.0  ;;  %v13493_v30 = vld [vmem:[#allocation52_spill] sm:$0xff] }
 0x507   : > { %v6271_v60 = vpop.f32.mrf.mxu1  ;;  %6510 = vmatmul.mubr.f32.gmra.mxu1 %v5945_v16  ;;  %v5954_v7 = vmax.f32 %v5682_v53, 0.0 }
 0x508   : > { %v6272_v23 = vadd.f32 %v12223_v2, %v6271_v60  ;;  %6514 = vmatprep.mubr.f32.mxu1 %v5948_v14  ;;  %8978 = vmatprep.mubr.msk.f32.mxu0 %vm4246_vm0, %v6889_v44  ;;  %v5681_v14 = vadd.f32 %v11853_v4, %v13493_v30  ;;  %v13494_v44 = vld [vmem:[#allocation55_spill] sm:$0xff] }
 0x509   : > { %v6273_v11 = vpop.f32.mrf.mxu1  ;;  %v5684_v60 = vadd.f32 %v11856_v63, %v13494_v44 }
 0x50a   : > { %v6890_v27 = vmax.f32 %v6272_v23, 0.0  ;;  %v5953_v32 = vmax.f32 %v5681_v14, 0.0  ;;  %v13495_v11 = vld [vmem:[#allocation54_spill] sm:$0xff] }
 0x50b   : > { %v6276_v38 = vpop.f32.mrf.mxu1  ;;  %6515 = vmatmul.mubr.f32.gmra.mxu1 %v5947_v15  ;;  %v5956_v41 = vmax.f32 %v5684_v60, 0.0 }
 0x50c   : > { %v6277_v59 = vadd.f32 %v12223_v2, %v6276_v38  ;;  %6519 = vmatprep.mubr.f32.mxu1 %v5950_v26  ;;  %8979 = vmatmul.mubr.msk.f32.gmra.mxu0 %vm4246_vm0, %v6890_v27  ;;  %v5683_v26 = vadd.f32 %v11853_v4, %v13495_v11  ;;  %v13496_v27 = vld [vmem:[#allocation57_spill] sm:$0xff] }
 0x50d   : > { %v6278_v18 = vpop.f32.mrf.mxu1  ;;  %v5686_v38 = vadd.f32 %v11856_v63, %v13496_v27 }
 0x50e   : > { %v6891_v51 = vmax.f32 %v6277_v59, 0.0  ;;  %v5955_v21 = vmax.f32 %v5683_v26, 0.0  ;;  %v13497_v18 = vld [vmem:[#allocation56_spill] sm:$0xff] }
 0x50f   : > { %v6281_v16 = vpop.f32.mrf.mxu1  ;;  %6520 = vmatmul.mubr.f32.gmra.mxu1 %v5949_v37  ;;  %v5958_v53 = vmax.f32 %v5686_v38, 0.0 }
 0x510   : > { %v6282_v62 = vadd.f32 %v12223_v2, %v6281_v16  ;;  %6524 = vmatprep.mubr.f32.mxu1 %v5952_v56  ;;  %8981 = vmatprep.mubr.msk.f32.mxu0 %vm4246_vm0, %v6891_v51  ;;  %v5685_v56 = vadd.f32 %v11853_v4, %v13497_v18  ;;  %v13498_v51 = vld [vmem:[#allocation59_spill] sm:$0xff] }
 0x511   : > { %v6283_v55 = vpop.f32.mrf.mxu1  ;;  %v5688_v16 = vadd.f32 %v11856_v63, %v13498_v51 }
 0x512   : > { %v6892_v23 = vmax.f32 %v6282_v62, 0.0  ;;  %v5957_v14 = vmax.f32 %v5685_v56, 0.0  ;;  %v13499_v55 = vld [vmem:[#allocation58_spill] sm:$0xff] }
 0x513   : > { %v6286_v15 = vpop.f32.mrf.mxu1  ;;  %6525 = vmatmul.mubr.f32.gmra.mxu1 %v5951_v35  ;;  %v5960_v60 = vmax.f32 %v5688_v16, 0.0 }
 0x514   : > { %v6287_v29 = vadd.f32 %v12223_v2, %v6286_v15  ;;  %6529 = vmatprep.mubr.f32.mxu1 %v5954_v7  ;;  %8982 = vmatmul.mubr.msk.f32.gmra.mxu0 %vm4246_vm0, %v6892_v23  ;;  %v5687_v7 = vadd.f32 %v11853_v4, %v13499_v55  ;;  %v13500_v23 = vld [vmem:[#allocation61_spill] sm:$0xff] }
 0x515   : > { %v6288_v45 = vpop.f32.mrf.mxu1  ;;  %v5690_v15 = vadd.f32 %v11856_v63, %v13500_v23 }
 0x516   : > { %v6893_v59 = vmax.f32 %v6287_v29, 0.0  ;;  %v5959_v26 = vmax.f32 %v5687_v7, 0.0  ;;  %v13501_v45 = vld [vmem:[#allocation60_spill] sm:$0xff] }
 0x517   : > { %v6291_v37 = vpop.f32.mrf.mxu1  ;;  %6530 = vmatmul.mubr.f32.gmra.mxu1 %v5953_v32  ;;  %v5962_v38 = vmax.f32 %v5690_v15, 0.0 }
 0x518   : > { %v6292_v34 = vadd.f32 %v12223_v2, %v6291_v37  ;;  %6534 = vmatprep.mubr.f32.mxu1 %v5956_v41  ;;  %8984 = vmatprep.mubr.msk.f32.mxu0 %vm4246_vm0, %v6893_v59  ;;  %v5689_v41 = vadd.f32 %v11853_v4, %v13501_v45  ;;  %v13502_v59 = vld [vmem:[#allocation63_spill] sm:$0xff] }
 0x519   : > { %v6293_v47 = vpop.f32.mrf.mxu1  ;;  %v5692_v37 = vadd.f32 %v11856_v63, %v13502_v59 }
 0x51a   : > { %v6894_v62 = vmax.f32 %v6292_v34, 0.0  ;;  %v5961_v56 = vmax.f32 %v5689_v41, 0.0  ;;  %v13503_v47 = vld [vmem:[#allocation62_spill] sm:$0xff] }
 0x51b   : > { %v6296_v35 = vpop.f32.mrf.mxu1  ;;  %6535 = vmatmul.mubr.f32.gmra.mxu1 %v5955_v21  ;;  %v5964_v16 = vmax.f32 %v5692_v37, 0.0 }
 0x51c   : > { %v6297_v30 = vadd.f32 %v12223_v2, %v6296_v35  ;;  %6539 = vmatprep.mubr.f32.mxu1 %v5958_v53  ;;  %8985 = vmatmul.mubr.msk.f32.gmra.mxu0 %vm4246_vm0, %v6894_v62  ;;  %v5691_v53 = vadd.f32 %v11853_v4, %v13503_v47  ;;  %v13504_v62 = vld [vmem:[#allocation65_spill] sm:$0xff] }
 0x51d   : > { %v6298_v44 = vpop.f32.mrf.mxu1  ;;  %v5694_v35 = vadd.f32 %v11856_v63, %v13504_v62 }
 0x51e   : > { %v6895_v29 = vmax.f32 %v6297_v30, 0.0  ;;  %v5963_v7 = vmax.f32 %v5691_v53, 0.0  ;;  %v13505_v44 = vld [vmem:[#allocation64_spill] sm:$0xff] }
 0x51f   : > { %v6301_v32 = vpop.f32.mrf.mxu1  ;;  %6540 = vmatmul.mubr.f32.gmra.mxu1 %v5957_v14  ;;  %v5966_v15 = vmax.f32 %v5694_v35, 0.0 }
 0x520   : > { %v6302_v11 = vadd.f32 %v12223_v2, %v6301_v32  ;;  %6544 = vmatprep.mubr.f32.mxu1 %v5960_v60  ;;  %8987 = vmatprep.mubr.msk.f32.mxu0 %vm4246_vm0, %v6895_v29  ;;  %v5693_v60 = vadd.f32 %v11853_v4, %v13505_v44  ;;  %v13506_v29 = vld [vmem:[#allocation67_spill] sm:$0xff] }
 0x521   : > { %v6303_v27 = vpop.f32.mrf.mxu1  ;;  %v5696_v32 = vadd.f32 %v11856_v63, %v13506_v29 }
 0x522   : > { %v6896_v34 = vmax.f32 %v6302_v11, 0.0  ;;  %v5965_v41 = vmax.f32 %v5693_v60, 0.0  ;;  %v13507_v27 = vld [vmem:[#allocation66_spill] sm:$0xff] }
 0x523   : > { %v6306_v21 = vpop.f32.mrf.mxu1  ;;  %6545 = vmatmul.mubr.f32.gmra.mxu1 %v5959_v26  ;;  %v5968_v37 = vmax.f32 %v5696_v32, 0.0 }
 0x524   : > { %v6307_v18 = vadd.f32 %v12223_v2, %v6306_v21  ;;  %6549 = vmatprep.mubr.f32.mxu1 %v5962_v38  ;;  %8988 = vmatmul.mubr.msk.f32.gmra.mxu0 %vm4246_vm0, %v6896_v34  ;;  %v5695_v38 = vadd.f32 %v11853_v4, %v13507_v27  ;;  %v13508_v34 = vld [vmem:[#allocation69_spill] sm:$0xff] }
 0x525   : > { %v6308_v51 = vpop.f32.mrf.mxu1  ;;  %v5698_v21 = vadd.f32 %v11856_v63, %v13508_v34 }
 0x526   : > { %v6897_v30 = vmax.f32 %v6307_v18, 0.0  ;;  %v5967_v53 = vmax.f32 %v5695_v38, 0.0  ;;  %v13509_v51 = vld [vmem:[#allocation68_spill] sm:$0xff] }
 0x527   : > { %v6311_v14 = vpop.f32.mrf.mxu1  ;;  %6550 = vmatmul.mubr.f32.gmra.mxu1 %v5961_v56  ;;  %v5970_v35 = vmax.f32 %v5698_v21, 0.0 }
 0x528   : > { %v6312_v55 = vadd.f32 %v12223_v2, %v6311_v14  ;;  %6554 = vmatprep.mubr.f32.mxu1 %v5964_v16  ;;  %8990 = vmatprep.mubr.msk.f32.mxu0 %vm4246_vm0, %v6897_v30  ;;  %v5697_v16 = vadd.f32 %v11853_v4, %v13509_v51  ;;  %v13510_v30 = vld [vmem:[#allocation71_spill] sm:$0xff] }
 0x529   : > { %v6313_v23 = vpop.f32.mrf.mxu1  ;;  %v5700_v14 = vadd.f32 %v11856_v63, %v13510_v30 }
 0x52a   : > { %v6898_v11 = vmax.f32 %v6312_v55, 0.0  ;;  %v5969_v60 = vmax.f32 %v5697_v16, 0.0  ;;  %v13511_v23 = vld [vmem:[#allocation70_spill] sm:$0xff] }
 0x52b   : > { %v6316_v26 = vpop.f32.mrf.mxu1  ;;  %6555 = vmatmul.mubr.f32.gmra.mxu1 %v5963_v7  ;;  %v5972_v32 = vmax.f32 %v5700_v14, 0.0 }
 0x52c   : > { %v6317_v45 = vadd.f32 %v12223_v2, %v6316_v26  ;;  %6559 = vmatprep.mubr.f32.mxu1 %v5966_v15  ;;  %8991 = vmatmul.mubr.msk.f32.gmra.mxu0 %vm4246_vm0, %v6898_v11  ;;  %v5699_v15 = vadd.f32 %v11853_v4, %v13511_v23  ;;  %v13512_v11 = vld [vmem:[#allocation73_spill] sm:$0xff] }
 0x52d   : > { %v6318_v59 = vpop.f32.mrf.mxu1  ;;  %v5702_v26 = vadd.f32 %v11856_v63, %v13512_v11 }
 0x52e   : > { %v6899_v18 = vmax.f32 %v6317_v45, 0.0  ;;  %v5971_v38 = vmax.f32 %v5699_v15, 0.0  ;;  %v13513_v59 = vld [vmem:[#allocation72_spill] sm:$0xff] }
 0x52f   : > { %v6321_v56 = vpop.f32.mrf.mxu1  ;;  %6560 = vmatmul.mubr.f32.gmra.mxu1 %v5965_v41  ;;  %v5974_v21 = vmax.f32 %v5702_v26, 0.0 }
 0x530   : > { %v6322_v47 = vadd.f32 %v12223_v2, %v6321_v56  ;;  %6564 = vmatprep.mubr.f32.mxu1 %v5968_v37  ;;  %8993 = vmatprep.mubr.msk.f32.mxu0 %vm4246_vm0, %v6899_v18  ;;  %v5701_v37 = vadd.f32 %v11853_v4, %v13513_v59  ;;  %v13514_v18 = vld [vmem:[#allocation75_spill] sm:$0xff] }
 0x531   : > { %v6323_v62 = vpop.f32.mrf.mxu1  ;;  %v5704_v56 = vadd.f32 %v11856_v63, %v13514_v18 }
 0x532   : > { %v6900_v55 = vmax.f32 %v6322_v47, 0.0  ;;  %v5973_v16 = vmax.f32 %v5701_v37, 0.0  ;;  %v13515_v62 = vld [vmem:[#allocation74_spill] sm:$0xff] }
 0x533   : > { %v6326_v7 = vpop.f32.mrf.mxu1  ;;  %6565 = vmatmul.mubr.f32.gmra.mxu1 %v5967_v53  ;;  %v5976_v14 = vmax.f32 %v5704_v56, 0.0 }
 0x534   : > { %v6327_v44 = vadd.f32 %v12223_v2, %v6326_v7  ;;  %6569 = vmatprep.mubr.f32.mxu1 %v5970_v35  ;;  %8994 = vmatmul.mubr.msk.f32.gmra.mxu0 %vm4246_vm0, %v6900_v55  ;;  %v5703_v35 = vadd.f32 %v11853_v4, %v13515_v62  ;;  %v13516_v55 = vld [vmem:[#allocation77_spill] sm:$0xff] }
 0x535   : > { %v6328_v29 = vpop.f32.mrf.mxu1  ;;  %v5706_v7 = vadd.f32 %v11856_v63, %v13516_v55 }
 0x536   : > { %v6901_v45 = vmax.f32 %v6327_v44, 0.0  ;;  %v5975_v15 = vmax.f32 %v5703_v35, 0.0  ;;  %v13517_v29 = vld [vmem:[#allocation76_spill] sm:$0xff] }
 0x537   : > { %v6331_v41 = vpop.f32.mrf.mxu1  ;;  %6570 = vmatmul.mubr.f32.gmra.mxu1 %v5969_v60  ;;  %v5978_v26 = vmax.f32 %v5706_v7, 0.0 }
 0x538   : > { %v6332_v27 = vadd.f32 %v12223_v2, %v6331_v41  ;;  %6574 = vmatprep.mubr.f32.mxu1 %v5972_v32  ;;  %8996 = vmatprep.mubr.msk.f32.mxu0 %vm4246_vm0, %v6901_v45  ;;  %v5705_v32 = vadd.f32 %v11853_v4, %v13517_v29  ;;  %v13518_v45 = vld [vmem:[#allocation79_spill] sm:$0xff] }
 0x539   : > { %v6333_v34 = vpop.f32.mrf.mxu1  ;;  %v5708_v41 = vadd.f32 %v11856_v63, %v13518_v45 }
 0x53a   : > { %v6902_v47 = vmax.f32 %v6332_v27, 0.0  ;;  %v5977_v37 = vmax.f32 %v5705_v32, 0.0  ;;  %v13519_v34 = vld [vmem:[#allocation78_spill] sm:$0xff] }
 0x53b   : > { %v6336_v53 = vpop.f32.mrf.mxu1  ;;  %6575 = vmatmul.mubr.f32.gmra.mxu1 %v5971_v38  ;;  %v5980_v56 = vmax.f32 %v5708_v41, 0.0 }
 0x53c   : > { %v6337_v51 = vadd.f32 %v12223_v2, %v6336_v53  ;;  %6579 = vmatprep.mubr.f32.mxu1 %v5974_v21  ;;  %8997 = vmatmul.mubr.msk.f32.gmra.mxu0 %vm4246_vm0, %v6902_v47  ;;  %v5707_v21 = vadd.f32 %v11853_v4, %v13519_v34  ;;  %v13520_v47 = vld [vmem:[#allocation81_spill] sm:$0xff] }
 0x53d   : > { %v6338_v30 = vpop.f32.mrf.mxu1  ;;  %v5710_v53 = vadd.f32 %v11856_v63, %v13520_v47 }
 0x53e   : > { %v6903_v44 = vmax.f32 %v6337_v51, 0.0  ;;  %v5979_v35 = vmax.f32 %v5707_v21, 0.0  ;;  %v13521_v30 = vld [vmem:[#allocation80_spill] sm:$0xff] }
 0x53f   : > { %v6341_v60 = vpop.f32.mrf.mxu1  ;;  %6580 = vmatmul.mubr.f32.gmra.mxu1 %v5973_v16  ;;  %v5982_v7 = vmax.f32 %v5710_v53, 0.0 }
 0x540   : > { %v6342_v23 = vadd.f32 %v12223_v2, %v6341_v60  ;;  %6584 = vmatprep.mubr.f32.mxu1 %v5976_v14  ;;  %8999 = vmatprep.mubr.msk.f32.mxu0 %vm4246_vm0, %v6903_v44  ;;  %v5709_v14 = vadd.f32 %v11853_v4, %v13521_v30  ;;  %v13522_v44 = vld [vmem:[#allocation83_spill] sm:$0xff] }
 0x541   : > { %v6343_v11 = vpop.f32.mrf.mxu1  ;;  %v5712_v60 = vadd.f32 %v11856_v63, %v13522_v44 }
 0x542   : > { %v6904_v27 = vmax.f32 %v6342_v23, 0.0  ;;  %v5981_v32 = vmax.f32 %v5709_v14, 0.0  ;;  %v13523_v11 = vld [vmem:[#allocation82_spill] sm:$0xff] }
 0x543   : > { %v6346_v38 = vpop.f32.mrf.mxu1  ;;  %6585 = vmatmul.mubr.f32.gmra.mxu1 %v5975_v15  ;;  %v5984_v41 = vmax.f32 %v5712_v60, 0.0 }
 0x544   : > { %v6347_v59 = vadd.f32 %v12223_v2, %v6346_v38  ;;  %6589 = vmatprep.mubr.f32.mxu1 %v5978_v26  ;;  %9000 = vmatmul.mubr.msk.f32.gmra.mxu0 %vm4246_vm0, %v6904_v27  ;;  %v5711_v26 = vadd.f32 %v11853_v4, %v13523_v11  ;;  %v13524_v27 = vld [vmem:[#allocation85_spill] sm:$0xff] }
 0x545   : > { %v6348_v18 = vpop.f32.mrf.mxu1  ;;  %v5714_v38 = vadd.f32 %v11856_v63, %v13524_v27 }
 0x546   : > { %v6905_v51 = vmax.f32 %v6347_v59, 0.0  ;;  %v5983_v21 = vmax.f32 %v5711_v26, 0.0  ;;  %v13525_v18 = vld [vmem:[#allocation84_spill] sm:$0xff] }
 0x547   : > { %v6351_v16 = vpop.f32.mrf.mxu1  ;;  %6590 = vmatmul.mubr.f32.gmra.mxu1 %v5977_v37  ;;  %v5986_v53 = vmax.f32 %v5714_v38, 0.0 }
 0x548   : > { %v6352_v62 = vadd.f32 %v12223_v2, %v6351_v16  ;;  %6594 = vmatprep.mubr.f32.mxu1 %v5980_v56  ;;  %9002 = vmatprep.mubr.msk.f32.mxu0 %vm4246_vm0, %v6905_v51  ;;  %v5713_v56 = vadd.f32 %v11853_v4, %v13525_v18  ;;  %v13526_v51 = vld [vmem:[#allocation87_spill] sm:$0xff] }
 0x549   : > { %v6353_v55 = vpop.f32.mrf.mxu1  ;;  %v5716_v16 = vadd.f32 %v11856_v63, %v13526_v51 }
 0x54a   : > { %v6906_v23 = vmax.f32 %v6352_v62, 0.0  ;;  %v5985_v14 = vmax.f32 %v5713_v56, 0.0  ;;  %v13527_v55 = vld [vmem:[#allocation86_spill] sm:$0xff] }
 0x54b   : > { %v6356_v15 = vpop.f32.mrf.mxu1  ;;  %6595 = vmatmul.mubr.f32.gmra.mxu1 %v5979_v35  ;;  %v5988_v60 = vmax.f32 %v5716_v16, 0.0 }
 0x54c   : > { %v6357_v29 = vadd.f32 %v12223_v2, %v6356_v15  ;;  %6599 = vmatprep.mubr.f32.mxu1 %v5982_v7  ;;  %9003 = vmatmul.mubr.msk.f32.gmra.mxu0 %vm4246_vm0, %v6906_v23  ;;  %v5715_v7 = vadd.f32 %v11853_v4, %v13527_v55  ;;  %v13528_v23 = vld [vmem:[#allocation89_spill] sm:$0xff] }
 0x54d   : > { %v6358_v45 = vpop.f32.mrf.mxu1  ;;  %v5718_v15 = vadd.f32 %v11856_v63, %v13528_v23 }
 0x54e   : > { %v6907_v59 = vmax.f32 %v6357_v29, 0.0  ;;  %v5987_v26 = vmax.f32 %v5715_v7, 0.0  ;;  %v13529_v45 = vld [vmem:[#allocation88_spill] sm:$0xff] }
 0x54f   : > { %v6361_v37 = vpop.f32.mrf.mxu1  ;;  %6600 = vmatmul.mubr.f32.gmra.mxu1 %v5981_v32  ;;  %v5990_v38 = vmax.f32 %v5718_v15, 0.0 }
 0x550   : > { %v6362_v34 = vadd.f32 %v12223_v2, %v6361_v37  ;;  %6604 = vmatprep.mubr.f32.mxu1 %v5984_v41  ;;  %9005 = vmatprep.mubr.msk.f32.mxu0 %vm4246_vm0, %v6907_v59  ;;  %v5717_v41 = vadd.f32 %v11853_v4, %v13529_v45  ;;  %v13530_v59 = vld [vmem:[#allocation91_spill] sm:$0xff] }
 0x551   : > { %v6363_v47 = vpop.f32.mrf.mxu1  ;;  %v5720_v37 = vadd.f32 %v11856_v63, %v13530_v59 }
 0x552   : > { %v6908_v62 = vmax.f32 %v6362_v34, 0.0  ;;  %v5989_v56 = vmax.f32 %v5717_v41, 0.0  ;;  %v13531_v47 = vld [vmem:[#allocation90_spill] sm:$0xff] }
 0x553   : > { %v6366_v35 = vpop.f32.mrf.mxu1  ;;  %6605 = vmatmul.mubr.f32.gmra.mxu1 %v5983_v21  ;;  %v5992_v16 = vmax.f32 %v5720_v37, 0.0 }
 0x554   : > { %v6367_v30 = vadd.f32 %v12223_v2, %v6366_v35  ;;  %6609 = vmatprep.mubr.f32.mxu1 %v5986_v53  ;;  %9006 = vmatmul.mubr.msk.f32.gmra.mxu0 %vm4246_vm0, %v6908_v62  ;;  %v5719_v53 = vadd.f32 %v11853_v4, %v13531_v47  ;;  %v13532_v62 = vld [vmem:[#allocation93_spill] sm:$0xff] }
 0x555   : > { %v6368_v44 = vpop.f32.mrf.mxu1  ;;  %v5722_v35 = vadd.f32 %v11856_v63, %v13532_v62 }
 0x556   : > { %v6909_v29 = vmax.f32 %v6367_v30, 0.0  ;;  %v5991_v7 = vmax.f32 %v5719_v53, 0.0  ;;  %v13533_v44 = vld [vmem:[#allocation92_spill] sm:$0xff] }
 0x557   : > { %v6371_v32 = vpop.f32.mrf.mxu1  ;;  %6610 = vmatmul.mubr.f32.gmra.mxu1 %v5985_v14  ;;  %v5994_v15 = vmax.f32 %v5722_v35, 0.0 }
 0x558   : > { %v6372_v11 = vadd.f32 %v12223_v2, %v6371_v32  ;;  %6614 = vmatprep.mubr.f32.mxu1 %v5988_v60  ;;  %9008 = vmatprep.mubr.msk.f32.mxu0 %vm4246_vm0, %v6909_v29  ;;  %v5721_v60 = vadd.f32 %v11853_v4, %v13533_v44  ;;  %v13534_v29 = vld [vmem:[#allocation95_spill] sm:$0xff] }
 0x559   : > { %v6373_v27 = vpop.f32.mrf.mxu1  ;;  %v5724_v32 = vadd.f32 %v11856_v63, %v13534_v29 }
 0x55a   : > { %v6910_v34 = vmax.f32 %v6372_v11, 0.0  ;;  %v5993_v41 = vmax.f32 %v5721_v60, 0.0  ;;  %v13535_v27 = vld [vmem:[#allocation94_spill] sm:$0xff] }
 0x55b   : > { %v6376_v21 = vpop.f32.mrf.mxu1  ;;  %6615 = vmatmul.mubr.f32.gmra.mxu1 %v5987_v26  ;;  %v5996_v37 = vmax.f32 %v5724_v32, 0.0 }
 0x55c   : > { %v6377_v18 = vadd.f32 %v12223_v2, %v6376_v21  ;;  %6619 = vmatprep.mubr.f32.mxu1 %v5990_v38  ;;  %9009 = vmatmul.mubr.msk.f32.gmra.mxu0 %vm4246_vm0, %v6910_v34  ;;  %v5723_v38 = vadd.f32 %v11853_v4, %v13535_v27  ;;  %v13536_v34 = vld [vmem:[#allocation97_spill] sm:$0xff] }
 0x55d   : > { %v6378_v51 = vpop.f32.mrf.mxu1  ;;  %v5726_v21 = vadd.f32 %v11856_v63, %v13536_v34 }
 0x55e   : > { %v6911_v30 = vmax.f32 %v6377_v18, 0.0  ;;  %v5995_v53 = vmax.f32 %v5723_v38, 0.0  ;;  %v13537_v51 = vld [vmem:[#allocation96_spill] sm:$0xff] }
 0x55f   : > { %v6381_v14 = vpop.f32.mrf.mxu1  ;;  %6620 = vmatmul.mubr.f32.gmra.mxu1 %v5989_v56  ;;  %v5998_v35 = vmax.f32 %v5726_v21, 0.0 }
 0x560   : > { %v6382_v55 = vadd.f32 %v12223_v2, %v6381_v14  ;;  %6624 = vmatprep.mubr.f32.mxu1 %v5992_v16  ;;  %9011 = vmatprep.mubr.msk.f32.mxu0 %vm4246_vm0, %v6911_v30  ;;  %v5725_v16 = vadd.f32 %v11853_v4, %v13537_v51  ;;  %v13538_v30 = vld [vmem:[#allocation99_spill] sm:$0xff] }
 0x561   : > { %v6383_v23 = vpop.f32.mrf.mxu1  ;;  %v5728_v14 = vadd.f32 %v11856_v63, %v13538_v30 }
 0x562   : > { %v6912_v11 = vmax.f32 %v6382_v55, 0.0  ;;  %v5997_v60 = vmax.f32 %v5725_v16, 0.0  ;;  %v13539_v23 = vld [vmem:[#allocation98_spill] sm:$0xff] }
 0x563   : > { %v6386_v26 = vpop.f32.mrf.mxu1  ;;  %6625 = vmatmul.mubr.f32.gmra.mxu1 %v5991_v7  ;;  %v6000_v32 = vmax.f32 %v5728_v14, 0.0 }
 0x564   : > { %v6387_v45 = vadd.f32 %v12223_v2, %v6386_v26  ;;  %6629 = vmatprep.mubr.f32.mxu1 %v5994_v15  ;;  %9012 = vmatmul.mubr.msk.f32.gmra.mxu0 %vm4246_vm0, %v6912_v11  ;;  %v5727_v15 = vadd.f32 %v11853_v4, %v13539_v23  ;;  %v13540_v11 = vld [vmem:[#allocation101_spill] sm:$0xff] }
 0x565   : > { %v6388_v59 = vpop.f32.mrf.mxu1  ;;  %v5730_v26 = vadd.f32 %v11856_v63, %v13540_v11 }
 0x566   : > { %v6913_v18 = vmax.f32 %v6387_v45, 0.0  ;;  %v5999_v38 = vmax.f32 %v5727_v15, 0.0  ;;  %v13541_v59 = vld [vmem:[#allocation100_spill] sm:$0xff] }
 0x567   : > { %v6391_v56 = vpop.f32.mrf.mxu1  ;;  %6630 = vmatmul.mubr.f32.gmra.mxu1 %v5993_v41  ;;  %v6002_v21 = vmax.f32 %v5730_v26, 0.0 }
 0x568   : > { %v6392_v47 = vadd.f32 %v12223_v2, %v6391_v56  ;;  %6634 = vmatprep.mubr.f32.mxu1 %v5996_v37  ;;  %9014 = vmatprep.mubr.msk.f32.mxu0 %vm4246_vm0, %v6913_v18  ;;  %v5729_v37 = vadd.f32 %v11853_v4, %v13541_v59  ;;  %v13542_v18 = vld [vmem:[#allocation103_spill] sm:$0xff] }
 0x569   : > { %v6393_v62 = vpop.f32.mrf.mxu1  ;;  %v5732_v56 = vadd.f32 %v11856_v63, %v13542_v18 }
 0x56a   : > { %v6914_v55 = vmax.f32 %v6392_v47, 0.0  ;;  %v6001_v16 = vmax.f32 %v5729_v37, 0.0  ;;  %v13543_v62 = vld [vmem:[#allocation102_spill] sm:$0xff] }
 0x56b   : > { %v6396_v7 = vpop.f32.mrf.mxu1  ;;  %6635 = vmatmul.mubr.f32.gmra.mxu1 %v5995_v53  ;;  %v6004_v14 = vmax.f32 %v5732_v56, 0.0 }
 0x56c   : > { %v6397_v44 = vadd.f32 %v12223_v2, %v6396_v7  ;;  %6639 = vmatprep.mubr.f32.mxu1 %v5998_v35  ;;  %9015 = vmatmul.mubr.msk.f32.gmra.mxu0 %vm4246_vm0, %v6914_v55  ;;  %v5731_v35 = vadd.f32 %v11853_v4, %v13543_v62  ;;  %v13544_v55 = vld [vmem:[#allocation105_spill] sm:$0xff] }
 0x56d   : > { %v6398_v29 = vpop.f32.mrf.mxu1  ;;  %v5734_v7 = vadd.f32 %v11856_v63, %v13544_v55 }
 0x56e   : > { %v6915_v45 = vmax.f32 %v6397_v44, 0.0  ;;  %v6003_v15 = vmax.f32 %v5731_v35, 0.0  ;;  %v13545_v29 = vld [vmem:[#allocation104_spill] sm:$0xff] }
 0x56f   : > { %v6401_v41 = vpop.f32.mrf.mxu1  ;;  %6640 = vmatmul.mubr.f32.gmra.mxu1 %v5997_v60  ;;  %v6006_v26 = vmax.f32 %v5734_v7, 0.0 }
 0x570   : > { %v6402_v27 = vadd.f32 %v12223_v2, %v6401_v41  ;;  %6644 = vmatprep.mubr.f32.mxu1 %v6000_v32  ;;  %9017 = vmatprep.mubr.msk.f32.mxu0 %vm4246_vm0, %v6915_v45  ;;  %v5733_v32 = vadd.f32 %v11853_v4, %v13545_v29  ;;  %v13546_v45 = vld [vmem:[#allocation107_spill] sm:$0xff] }
 0x571   : > { %v6403_v34 = vpop.f32.mrf.mxu1  ;;  %v5736_v41 = vadd.f32 %v11856_v63, %v13546_v45 }
 0x572   : > { %v6916_v47 = vmax.f32 %v6402_v27, 0.0  ;;  %v6005_v37 = vmax.f32 %v5733_v32, 0.0  ;;  %v13548_v34 = vld [vmem:[#allocation106_spill] sm:$0xff] }
 0x573   : > { %v6406_v53 = vpop.f32.mrf.mxu1  ;;  %6645 = vmatmul.mubr.f32.gmra.mxu1 %v5999_v38  ;;  %v6008_v56 = vmax.f32 %v5736_v41, 0.0 }
 0x574   : > { %v6407_v51 = vadd.f32 %v12223_v2, %v6406_v53  ;;  %6649 = vmatprep.mubr.f32.mxu1 %v6002_v21  ;;  %9018 = vmatmul.mubr.msk.f32.gmra.mxu0 %vm4246_vm0, %v6916_v47  ;;  %v5735_v21 = vadd.f32 %v11853_v4, %v13548_v34  ;;  %v13549_v47 = vld [vmem:[#allocation109_spill] sm:$0xff]  ;;  %v12510_v34 = vld [vmem:[#allocation10] ss:$0 sm:$0xff] }
 0x575   : > { %v6408_v30 = vpop.f32.mrf.mxu1  ;;  %v5738_v53 = vadd.f32 %v11856_v63, %v13549_v47 }
 0x576   : > { %v6917_v44 = vmax.f32 %v6407_v51, 0.0  ;;  %v6007_v35 = vmax.f32 %v5735_v21, 0.0  ;;  %v13550_v30 = vld [vmem:[#allocation108_spill] sm:$0xff] }
 0x577   : > { %v6411_v60 = vpop.f32.mrf.mxu1  ;;  %6650 = vmatmul.mubr.f32.gmra.mxu1 %v6001_v16  ;;  %v6010_v7 = vmax.f32 %v5738_v53, 0.0 }
 0x578   : > { %v6412_v23 = vadd.f32 %v12223_v2, %v6411_v60  ;;  %6654 = vmatprep.mubr.f32.mxu1 %v6004_v14  ;;  %9020 = vmatprep.mubr.msk.f32.mxu0 %vm4246_vm0, %v6917_v44  ;;  %v5737_v14 = vadd.f32 %v11853_v4, %v13550_v30  ;;  %v13551_v44 = vld [vmem:[#allocation111_spill] sm:$0xff] }
 0x579   : > { %v6413_v11 = vpop.f32.mrf.mxu1  ;;  %v5740_v60 = vadd.f32 %v11856_v63, %v13551_v44 }
 0x57a   : > { %v6918_v27 = vmax.f32 %v6412_v23, 0.0  ;;  %v6009_v32 = vmax.f32 %v5737_v14, 0.0  ;;  %v13552_v11 = vld [vmem:[#allocation110_spill] sm:$0xff] }
 0x57b   : > { %v6416_v38 = vpop.f32.mrf.mxu1  ;;  %6655 = vmatmul.mubr.f32.gmra.mxu1 %v6003_v15  ;;  %v6012_v41 = vmax.f32 %v5740_v60, 0.0 }
 0x57c   : > { %v6417_v59 = vadd.f32 %v12223_v2, %v6416_v38  ;;  %6659 = vmatprep.mubr.f32.mxu1 %v6006_v26  ;;  %9021 = vmatmul.mubr.msk.f32.gmra.mxu0 %vm4246_vm0, %v6918_v27  ;;  %v5739_v26 = vadd.f32 %v11853_v4, %v13552_v11  ;;  %v13553_v27 = vld [vmem:[#allocation113_spill] sm:$0xff] }
 0x57d   : > { %v6418_v18 = vpop.f32.mrf.mxu1  ;;  %v5742_v38 = vadd.f32 %v11856_v63, %v13553_v27 }
 0x57e   : > { %v6919_v51 = vmax.f32 %v6417_v59, 0.0  ;;  %v6011_v21 = vmax.f32 %v5739_v26, 0.0  ;;  %v13554_v18 = vld [vmem:[#allocation112_spill] sm:$0xff] }
 0x57f   : > { %v6421_v16 = vpop.f32.mrf.mxu1  ;;  %6660 = vmatmul.mubr.f32.gmra.mxu1 %v6005_v37  ;;  %v6014_v53 = vmax.f32 %v5742_v38, 0.0 }
 0x580   : > { %v6422_v62 = vadd.f32 %v12223_v2, %v6421_v16  ;;  %6664 = vmatprep.mubr.f32.mxu1 %v6008_v56  ;;  %9023 = vmatprep.mubr.msk.f32.mxu0 %vm4246_vm0, %v6919_v51  ;;  %v5741_v56 = vadd.f32 %v11853_v4, %v13554_v18  ;;  %v13555_v51 = vld [vmem:[#allocation115_spill] sm:$0xff] }
 0x581   : > { %v6423_v55 = vpop.f32.mrf.mxu1  ;;  %v5744_v16 = vadd.f32 %v11856_v63, %v13555_v51  ;;  %v13561_v51 = vld [vmem:[#allocation118_spill] sm:$0xff] }
 0x582   : > { %v6920_v23 = vmax.f32 %v6422_v62, 0.0  ;;  %v6013_v14 = vmax.f32 %v5741_v56, 0.0  ;;  %v13556_v55 = vld [vmem:[#allocation114_spill] sm:$0xff] }
 0x583   : > { %v6426_v15 = vpop.f32.mrf.mxu1  ;;  %6665 = vmatmul.mubr.f32.gmra.mxu1 %v6007_v35  ;;  %v6016_v60 = vmax.f32 %v5744_v16, 0.0  ;;  %v5747_v16 = vadd.f32 %v11853_v4, %v13561_v51 }
 0x584   : > { %v6427_v29 = vadd.f32 %v12223_v2, %v6426_v15  ;;  %6669 = vmatprep.mubr.f32.mxu1 %v6010_v7  ;;  %9024 = vmatmul.mubr.msk.f32.gmra.mxu0 %vm4246_vm0, %v6920_v23  ;;  %v5743_v7 = vadd.f32 %v11853_v4, %v13556_v55  ;;  %v13557_v23 = vld [vmem:[#allocation117_spill] sm:$0xff] }
 0x585   : > { %v6428_v45 = vpop.f32.mrf.mxu1  ;;  %v5746_v15 = vadd.f32 %v11856_v63, %v13557_v23 }
 0x586   : > { %v6921_v59 = vmax.f32 %v6427_v29, 0.0  ;;  %v6015_v26 = vmax.f32 %v5743_v7, 0.0  ;;  %v13558_v45 = vld [vmem:[#allocation116_spill] sm:$0xff] }
 0x587   : > { %v6431_v37 = vpop.f32.mrf.mxu1  ;;  %6670 = vmatmul.mubr.f32.gmra.mxu1 %v6009_v32  ;;  %v6018_v38 = vmax.f32 %v5746_v15, 0.0 }
 0x588   : > { %v6432_v2 = vadd.f32 %v12510_v34, %v6431_v37  ;;  %6674 = vmatprep.mubr.f32.mxu1 %v6012_v41  ;;  %9026 = vmatprep.mubr.msk.f32.mxu0 %vm4246_vm0, %v6921_v59  ;;  %v5745_v41 = vadd.f32 %v11853_v4, %v13558_v45  ;;  %v13559_v59 = vld [vmem:[#allocation119_spill] sm:$0xff] }
 0x589   : > { %v6433_v47 = vpop.f32.mrf.mxu1  ;;  %v5748_v37 = vadd.f32 %v11856_v63, %v13559_v59 }
 0x58a   : > { %v6922_v62 = vmax.f32 %v6432_v2, 0.0 }
 0x58b   : > { %v6436_v35 = vpop.f32.mrf.mxu1  ;;  %6675 = vmatmul.mubr.f32.gmra.mxu1 %v6011_v21  ;;  %v12531_v21 = vld [vmem:[#allocation12] ss:$0 sm:$0xff] }
 0x58c   : > { %v6437_v30 = vadd.f32 %v12510_v34, %v6436_v35  ;;  %6679 = vmatprep.mubr.f32.mxu1 %v6014_v53  ;;  %9027 = vmatmul.mubr.msk.f32.gmra.mxu0 %vm4246_vm0, %v6922_v62  ;;  %v6017_v53 = vmax.f32 %v5745_v41, 0.0  ;;  %v13564_v41 = vld [vmem:[#allocation123_spill] sm:$0xff] }
 0x58d   : > { %v6438_v44 = vpop.f32.mrf.mxu1 }
 0x58e   : > { %v6923_v29 = vmax.f32 %v6437_v30, 0.0  ;;  %v6020_v30 = vmax.f32 %v5748_v37, 0.0 }
 0x58f   : > { %v6441_v32 = vpop.f32.mrf.mxu1  ;;  %6680 = vmatmul.mubr.f32.gmra.mxu1 %v6013_v14  ;;  %v13562_v14 = vld [vmem:[#allocation121_spill] sm:$0xff] }
 0x590   : > { %v6442_v11 = vadd.f32 %v12510_v34, %v6441_v32  ;;  %6684 = vmatprep.mubr.f32.mxu1 %v6016_v60  ;;  %9029 = vmatprep.mubr.msk.f32.mxu0 %vm4246_vm0, %v6923_v29  ;;  %v5750_v55 = vadd.f32 %v11856_v63, %v13562_v14  ;;  %v6019_v29 = vmax.f32 %v5747_v16, 0.0  ;;  %v13563_v32 = vld [vmem:[#allocation120_spill] sm:$0xff] }
 0x591   : > { %v6443_v27 = vpop.f32.mrf.mxu1 }
 0x592   : > { %v6924_v2 = vmax.f32 %v6442_v11, 0.0  ;;  %v5749_v11 = vadd.f32 %v11853_v4, %v13563_v32  ;;  %v6022_v45 = vmax.f32 %v5750_v55, 0.0  ;;  %v5752_v27 = vadd.f32 %v11856_v63, %v13564_v41 }
 0x593   : > { %v6446_v18 = vpop.f32.mrf.mxu1  ;;  %6685 = vmatmul.mubr.f32.gmra.mxu1 %v6015_v26 }
 0x594   : > { %v6447_v56 = vadd.f32 %v12510_v34, %v6446_v18  ;;  %6689 = vmatprep.mubr.f32.mxu1 %v6018_v38  ;;  %v8959_v47 = vpop.f32.mrf.mxu0  ;;  %9030 = vmatmul.mubr.msk.f32.gmra.mxu0 %vm4246_vm0, %v6924_v2  ;;  %v6021_v18 = vmax.f32 %v5749_v11, 0.0  ;;  %v6024_v16 = vmax.f32 %v5752_v27, 0.0  ;;  %v13568_v11 = vld [vmem:[#allocation127_spill] sm:$0xff] }
 0x595   : > { %v7506_v62 = vadd.f32 %v8959_v47, %v12531_v21  ;;  %v6448_v35 = vpop.f32.mrf.mxu1 }
 0x596   : > { %v6925_v7 = vmax.f32 %v6447_v56, 0.0  ;;  %v7500_v44 = vpop.f32.mrf.mxu0  ;;  %v13565_v56 = vld [vmem:[#allocation122_spill] sm:$0xff] }
 0x597   : > { %8181 = vst.msk [vmem:[%s12536_s27 + $0x8] sm:$0xff] %vm8179_vm1, %v7506_v62  ;;  %v7501_v60 = vadd.f32 %v12531_v21, %v7500_v44  ;;  %v6451_v23 = vpop.f32.mrf.mxu1  ;;  %6690 = vmatmul.mubr.f32.gmra.mxu1 %v6017_v53  ;;  %v5751_v47 = vadd.f32 %v11853_v4, %v13565_v56  ;;  %v13566_v62 = vld [vmem:[#allocation125_spill] sm:$0xff] }
 0x598   : > { %v6452_v15 = vadd.f32 %v12510_v34, %v6451_v23  ;;  %6694 = vmatprep.mubr.f32.mxu1 %v6020_v30  ;;  %9032 = vmatprep.mubr.msk.f32.mxu0 %vm4246_vm0, %v6925_v7  ;;  %v5754_v35 = vadd.f32 %v11856_v63, %v13566_v62  ;;  %v13567_v23 = vld [vmem:[#allocation124_spill] sm:$0xff] }
 0x599   : > { %8180 = vst.msk [vmem:[%s12536_s27] sm:$0xff] %vm8179_vm1, %v7501_v60  ;;  %v6453_v26 = vpop.f32.mrf.mxu1  ;;  %v6023_v60 = vmax.f32 %v5751_v47, 0.0 }
 0x59a   : > { %v6926_v38 = vmax.f32 %v6452_v15, 0.0  ;;  %v5753_v15 = vadd.f32 %v11853_v4, %v13567_v23  ;;  %v6026_v32 = vmax.f32 %v5754_v35, 0.0  ;;  %v5756_v26 = vadd.f32 %v11856_v63, %v13568_v11 }
 0x59b   : > { %v6456_v59 = vpop.f32.mrf.mxu1  ;;  %6695 = vmatmul.mubr.f32.gmra.mxu1 %v6019_v29 }
 0x59c   : > { %v6457_v37 = vadd.f32 %v12510_v34, %v6456_v59  ;;  %6699 = vmatprep.mubr.f32.mxu1 %v6022_v45  ;;  %v8962_v2 = vpop.f32.mrf.mxu0  ;;  %9033 = vmatmul.mubr.msk.f32.gmra.mxu0 %vm4246_vm0, %v6926_v38  ;;  %v6025_v59 = vmax.f32 %v5753_v15, 0.0  ;;  %v6028_v47 = vmax.f32 %v5756_v26, 0.0  ;;  %v13572_v15 = vld [vmem:[#allocation131_spill] sm:$0xff] }
 0x59d   : > { %v7516_v53 = vadd.f32 %v8962_v2, %v12531_v21  ;;  %v6458_v51 = vpop.f32.mrf.mxu1 }
 0x59e   : > { %v6927_v30 = vmax.f32 %v6457_v37, 0.0  ;;  %v7510_v14 = vpop.f32.mrf.mxu0  ;;  %v13569_v37 = vld [vmem:[#allocation126_spill] sm:$0xff] }
 0x59f   : > { %8183 = vst.msk [vmem:[%s12536_s27 + $0x18] sm:$0xff] %vm8179_vm1, %v7516_v53  ;;  %v7511_v55 = vadd.f32 %v12531_v21, %v7510_v14  ;;  %v6461_v7 = vpop.f32.mrf.mxu1  ;;  %6700 = vmatmul.mubr.f32.gmra.mxu1 %v6021_v18  ;;  %v5755_v2 = vadd.f32 %v11853_v4, %v13569_v37  ;;  %v13570_v53 = vld [vmem:[#allocation129_spill] sm:$0xff] }
 0x5a0   : > { %v6462_v44 = vadd.f32 %v12510_v34, %v6461_v7  ;;  %6704 = vmatprep.mubr.f32.mxu1 %v6024_v16  ;;  %9035 = vmatprep.mubr.msk.f32.mxu0 %vm4246_vm0, %v6927_v30  ;;  %v5758_v51 = vadd.f32 %v11856_v63, %v13570_v53  ;;  %v13571_v7 = vld [vmem:[#allocation128_spill] sm:$0xff] }
 0x5a1   : > { %8182 = vst.msk [vmem:[%s12536_s27 + $0x10] sm:$0xff] %vm8179_vm1, %v7511_v55  ;;  %v6463_v29 = vpop.f32.mrf.mxu1  ;;  %v6027_v55 = vmax.f32 %v5755_v2, 0.0 }
 0x5a2   : > { %v6928_v45 = vmax.f32 %v6462_v44, 0.0  ;;  %v5757_v44 = vadd.f32 %v11853_v4, %v13571_v7  ;;  %v6030_v23 = vmax.f32 %v5758_v51, 0.0  ;;  %v5760_v29 = vadd.f32 %v11856_v63, %v13572_v15 }
 0x5a3   : > { %v6466_v41 = vpop.f32.mrf.mxu1  ;;  %6705 = vmatmul.mubr.f32.gmra.mxu1 %v6023_v60 }
 0x5a4   : > { %v6467_v27 = vadd.f32 %v12510_v34, %v6466_v41  ;;  %6709 = vmatprep.mubr.f32.mxu1 %v6026_v32  ;;  %v8965_v38 = vpop.f32.mrf.mxu0  ;;  %9036 = vmatmul.mubr.msk.f32.gmra.mxu0 %vm4246_vm0, %v6928_v45  ;;  %v6029_v41 = vmax.f32 %v5757_v44, 0.0  ;;  %v6032_v2 = vmax.f32 %v5760_v29, 0.0  ;;  %v13576_v44 = vld [vmem:[#allocation135_spill] sm:$0xff] }
 0x5a5   : > { %v7526_v18 = vadd.f32 %v8965_v38, %v12531_v21  ;;  %v6468_v56 = vpop.f32.mrf.mxu1 }
 0x5a6   : > { %v6929_v16 = vmax.f32 %v6467_v27, 0.0  ;;  %v7520_v62 = vpop.f32.mrf.mxu0  ;;  %v13573_v27 = vld [vmem:[#allocation130_spill] sm:$0xff] }
 0x5a7   : > { %8185 = vst.msk [vmem:[%s12536_s27 + $0x28] sm:$0xff] %vm8179_vm1, %v7526_v18  ;;  %v7521_v35 = vadd.f32 %v12531_v21, %v7520_v62  ;;  %v6471_v30 = vpop.f32.mrf.mxu1  ;;  %6710 = vmatmul.mubr.f32.gmra.mxu1 %v6025_v59  ;;  %v5759_v38 = vadd.f32 %v11853_v4, %v13573_v27  ;;  %v13574_v18 = vld [vmem:[#allocation133_spill] sm:$0xff] }
 0x5a8   : > { %v6472_v14 = vadd.f32 %v12510_v34, %v6471_v30  ;;  %6714 = vmatprep.mubr.f32.mxu1 %v6028_v47  ;;  %9038 = vmatprep.mubr.msk.f32.mxu0 %vm4246_vm0, %v6929_v16  ;;  %v5762_v56 = vadd.f32 %v11856_v63, %v13574_v18  ;;  %v13575_v30 = vld [vmem:[#allocation132_spill] sm:$0xff] }
 0x5a9   : > { %8184 = vst.msk [vmem:[%s12536_s27 + $0x20] sm:$0xff] %vm8179_vm1, %v7521_v35  ;;  %v6473_v60 = vpop.f32.mrf.mxu1  ;;  %v6031_v35 = vmax.f32 %v5759_v38, 0.0 }
 0x5aa   : > { %v6930_v32 = vmax.f32 %v6472_v14, 0.0  ;;  %v5761_v14 = vadd.f32 %v11853_v4, %v13575_v30  ;;  %v6034_v7 = vmax.f32 %v5762_v56, 0.0  ;;  %v5764_v60 = vadd.f32 %v11856_v63, %v13576_v44 }
 0x5ab   : > { %v6476_v11 = vpop.f32.mrf.mxu1  ;;  %6715 = vmatmul.mubr.f32.gmra.mxu1 %v6027_v55 }
 0x5ac   : > { %v6477_v26 = vadd.f32 %v12510_v34, %v6476_v11  ;;  %6719 = vmatprep.mubr.f32.mxu1 %v6030_v23  ;;  %v8968_v45 = vpop.f32.mrf.mxu0  ;;  %9039 = vmatmul.mubr.msk.f32.gmra.mxu0 %vm4246_vm0, %v6930_v32  ;;  %v6033_v11 = vmax.f32 %v5761_v14, 0.0  ;;  %v6036_v38 = vmax.f32 %v5764_v60, 0.0  ;;  %v13580_v14 = vld [vmem:[#allocation139_spill] sm:$0xff] }
 0x5ad   : > { %v7536_v59 = vadd.f32 %v8968_v45, %v12531_v21  ;;  %v6478_v37 = vpop.f32.mrf.mxu1 }
 0x5ae   : > { %v6931_v47 = vmax.f32 %v6477_v26, 0.0  ;;  %v7530_v53 = vpop.f32.mrf.mxu0  ;;  %v13577_v26 = vld [vmem:[#allocation134_spill] sm:$0xff] }
 0x5af   : > { %8187 = vst.msk [vmem:[%s12536_s27 + $0x38] sm:$0xff] %vm8179_vm1, %v7536_v59  ;;  %v7531_v51 = vadd.f32 %v12531_v21, %v7530_v53  ;;  %v6481_v16 = vpop.f32.mrf.mxu1  ;;  %6720 = vmatmul.mubr.f32.gmra.mxu1 %v6029_v41  ;;  %v5763_v45 = vadd.f32 %v11853_v4, %v13577_v26  ;;  %v13578_v59 = vld [vmem:[#allocation137_spill] sm:$0xff] }
 0x5b0   : > { %v6482_v62 = vadd.f32 %v12510_v34, %v6481_v16  ;;  %6724 = vmatprep.mubr.f32.mxu1 %v6032_v2  ;;  %9041 = vmatprep.mubr.msk.f32.mxu0 %vm4246_vm0, %v6931_v47  ;;  %v5766_v37 = vadd.f32 %v11856_v63, %v13578_v59  ;;  %v13579_v16 = vld [vmem:[#allocation136_spill] sm:$0xff] }
 0x5b1   : > { %8186 = vst.msk [vmem:[%s12536_s27 + $0x30] sm:$0xff] %vm8179_vm1, %v7531_v51  ;;  %v6483_v55 = vpop.f32.mrf.mxu1  ;;  %v6035_v51 = vmax.f32 %v5763_v45, 0.0 }
 0x5b2   : > { %v6932_v23 = vmax.f32 %v6482_v62, 0.0  ;;  %v5765_v62 = vadd.f32 %v11853_v4, %v13579_v16  ;;  %v6038_v30 = vmax.f32 %v5766_v37, 0.0  ;;  %v5768_v55 = vadd.f32 %v11856_v63, %v13580_v14 }
 0x5b3   : > { %v6486_v15 = vpop.f32.mrf.mxu1  ;;  %6725 = vmatmul.mubr.f32.gmra.mxu1 %v6031_v35 }
 0x5b4   : > { %v6487_v29 = vadd.f32 %v12510_v34, %v6486_v15  ;;  %6729 = vmatprep.mubr.f32.mxu1 %v6034_v7  ;;  %v8971_v32 = vpop.f32.mrf.mxu0  ;;  %9042 = vmatmul.mubr.msk.f32.gmra.mxu0 %vm4246_vm0, %v6932_v23  ;;  %v6037_v15 = vmax.f32 %v5765_v62, 0.0  ;;  %v6040_v45 = vmax.f32 %v5768_v55, 0.0  ;;  %v5772_v62 = vadd.f32 %v11856_v63, %v12037_v0 }
 0x5b5   : > { %v7546_v41 = vadd.f32 %v8971_v32, %v12531_v21  ;;  %v6488_v27 = vpop.f32.mrf.mxu1  ;;  %v5774_v0 = vadd.f32 %v11856_v63, %v12043_v49 }
 0x5b6   : > { %v6933_v2 = vmax.f32 %v6487_v29, 0.0  ;;  %v7540_v18 = vpop.f32.mrf.mxu0  ;;  %v13581_v29 = vld [vmem:[#allocation138_spill] sm:$0xff] }
 0x5b7   : > { %8189 = vst.msk [vmem:[%s12536_s27 + $0x48] sm:$0xff] %vm8179_vm1, %v7546_v41  ;;  %v7541_v56 = vadd.f32 %v12531_v21, %v7540_v18  ;;  %v6491_v47 = vpop.f32.mrf.mxu1  ;;  %6730 = vmatmul.mubr.f32.gmra.mxu1 %v6033_v11  ;;  %v5767_v32 = vadd.f32 %v11853_v4, %v13581_v29  ;;  %v13582_v41 = vld [vmem:[#allocation141_spill] sm:$0xff]  ;;  %v6044_v29 = vmax.f32 %v5772_v62, 0.0 }
 0x5b8   : > { %v6492_v53 = vadd.f32 %v12510_v34, %v6491_v47  ;;  %6734 = vmatprep.mubr.f32.mxu1 %v6036_v38  ;;  %9044 = vmatprep.mubr.msk.f32.mxu0 %vm4246_vm0, %v6933_v2  ;;  %v5770_v27 = vadd.f32 %v11856_v63, %v13582_v41  ;;  %v13583_v47 = vld [vmem:[#allocation140_spill] sm:$0xff] }
 0x5b9   : > { %8188 = vst.msk [vmem:[%s12536_s27 + $0x40] sm:$0xff] %vm8179_vm1, %v7541_v56  ;;  %v6493_v35 = vpop.f32.mrf.mxu1  ;;  %v6039_v56 = vmax.f32 %v5767_v32, 0.0 }
 0x5ba   : > { %v6934_v7 = vmax.f32 %v6492_v53, 0.0  ;;  %v5769_v53 = vadd.f32 %v11853_v4, %v13583_v47  ;;  %v6042_v16 = vmax.f32 %v5770_v27, 0.0 }
 0x5bb   : > { %v6496_v44 = vpop.f32.mrf.mxu1  ;;  %6735 = vmatmul.mubr.f32.gmra.mxu1 %v6035_v51 }
 0x5bc   : > { %v6497_v60 = vadd.f32 %v12510_v34, %v6496_v44  ;;  %6739 = vmatprep.mubr.f32.mxu1 %v6038_v30  ;;  %v8974_v23 = vpop.f32.mrf.mxu0  ;;  %9045 = vmatmul.mubr.msk.f32.gmra.mxu0 %vm4246_vm0, %v6934_v7  ;;  %v6041_v7 = vmax.f32 %v5769_v53, 0.0  ;;  %v13584_v44 = vld [vmem:[#allocation142_spill] sm:$0xff] }
 0x5bd   : > { %v7556_v11 = vadd.f32 %v8974_v23, %v12531_v21  ;;  %v6498_v26 = vpop.f32.mrf.mxu1 }
 0x5be   : > { %v6935_v38 = vmax.f32 %v6497_v60, 0.0  ;;  %v7550_v59 = vpop.f32.mrf.mxu0  ;;  %v5771_v60 = vadd.f32 %v11853_v4, %v13584_v44 }
 0x5bf   : > { %8191 = vst.msk [vmem:[%s12536_s27 + $0x58] sm:$0xff] %vm8179_vm1, %v7556_v11  ;;  %v7551_v37 = vadd.f32 %v12531_v21, %v7550_v59  ;;  %v6501_v2 = vpop.f32.mrf.mxu1  ;;  %6740 = vmatmul.mubr.f32.gmra.mxu1 %v6037_v15 }
 0x5c0   : > { %v6502_v18 = vadd.f32 %v12510_v34, %v6501_v2  ;;  %6744 = vmatprep.mubr.f32.mxu1 %v6040_v45  ;;  %9047 = vmatprep.mubr.msk.f32.mxu0 %vm4246_vm0, %v6935_v38  ;;  %v6043_v27 = vmax.f32 %v5771_v60, 0.0  ;;  %v13585_v38 = vld [vmem:[#allocation143_spill] sm:$0xff]  ;;  %v5776_v2 = vadd.f32 %v11856_v63, %v12051_v31  ;;  %v5778_v31 = vadd.f32 %v11856_v63, %v12059_v12 }
 0x5c1   : > { %8190 = vst.msk [vmem:[%s12536_s27 + $0x50] sm:$0xff] %vm8179_vm1, %v7551_v37  ;;  %v6503_v51 = vpop.f32.mrf.mxu1  ;;  %v5773_v59 = vadd.f32 %v11853_v4, %v13585_v38  ;;  %v6046_v37 = vmax.f32 %v5774_v0, 0.0 }
 0x5c2   : > { %v6936_v35 = vmax.f32 %v6502_v18, 0.0 }
 0x5c3   : > { %v6506_v30 = vpop.f32.mrf.mxu1  ;;  %6745 = vmatmul.mubr.f32.gmra.mxu1 %v6039_v56  ;;  %v6045_v51 = vmax.f32 %v5773_v59, 0.0 }
 0x5c4   : > { %v6507_v14 = vadd.f32 %v12510_v34, %v6506_v30  ;;  %6749 = vmatprep.mubr.f32.mxu1 %v6042_v16  ;;  %v8977_v55 = vpop.f32.mrf.mxu0  ;;  %9048 = vmatmul.mubr.msk.f32.gmra.mxu0 %vm4246_vm0, %v6936_v35  ;;  %v13586_v16 = vld [vmem:[#allocation144_spill] sm:$0xff] }
 0x5c5   : > { %v7566_v23 = vadd.f32 %v8977_v55, %v12531_v21  ;;  %v6508_v15 = vpop.f32.mrf.mxu1  ;;  %v5775_v62 = vadd.f32 %v11853_v4, %v13586_v16 }
 0x5c6   : > { %v6937_v32 = vmax.f32 %v6507_v14, 0.0  ;;  %v7560_v11 = vpop.f32.mrf.mxu0  ;;  %v6048_v14 = vmax.f32 %v5776_v2, 0.0 }
 0x5c7   : > { %8193 = vst.msk [vmem:[%s12536_s27 + $0x68] sm:$0xff] %vm8179_vm1, %v7566_v23  ;;  %v7561_v26 = vadd.f32 %v12531_v21, %v7560_v11  ;;  %v6511_v45 = vpop.f32.mrf.mxu1  ;;  %6750 = vmatmul.mubr.f32.gmra.mxu1 %v6041_v7  ;;  %v6047_v15 = vmax.f32 %v5775_v62, 0.0  ;;  %v13588_v11 = vld [vmem:[#allocation21_spill] sm:$0xff] }
 0x5c8   : > { %v6512_v41 = vadd.f32 %v12510_v34, %v6511_v45  ;;  %6754 = vmatprep.mubr.f32.mxu1 %v6044_v29  ;;  %9050 = vmatprep.mubr.msk.f32.mxu0 %vm4246_vm0, %v6937_v32  ;;  %v13587_v29 = vld [vmem:[#allocation145_spill] sm:$0xff]  ;;  %v6050_v32 = vmax.f32 %v5778_v31, 0.0  ;;  %v13591_v31 = vld [vmem:[#allocation147_spill] sm:$0xff] }
 0x5c9   : > { %8192 = vst.msk [vmem:[%s12536_s27 + $0x60] sm:$0xff] %vm8179_vm1, %v7561_v26  ;;  %v6513_v49 = vpop.f32.mrf.mxu1  ;;  %v5777_v0 = vadd.f32 %v11853_v4, %v13587_v29  ;;  %v5780_v26 = vadd.f32 %v11856_v63, %v13588_v11 }
 0x5ca   : > { %v6938_v18 = vmax.f32 %v6512_v41, 0.0  ;;  %v13589_v49 = vld [vmem:[#allocation146_spill] sm:$0xff] }
 0x5cb   : > { %v6516_v56 = vpop.f32.mrf.mxu1  ;;  %6755 = vmatmul.mubr.f32.gmra.mxu1 %v6043_v27  ;;  %v6049_v59 = vmax.f32 %v5777_v0, 0.0 }
 0x5cc   : > { %v6517_v47 = vadd.f32 %v12510_v34, %v6516_v56  ;;  %6759 = vmatprep.mubr.f32.mxu1 %v6046_v37  ;;  %v8980_v53 = vpop.f32.mrf.mxu0  ;;  %9051 = vmatmul.mubr.msk.f32.gmra.mxu0 %vm4246_vm0, %v6938_v18  ;;  %v5779_v37 = vadd.f32 %v11853_v4, %v13589_v49  ;;  %v6052_v56 = vmax.f32 %v5780_v26, 0.0 }
 0x5cd   : > { %v7576_v35 = vadd.f32 %v8980_v53, %v12531_v21  ;;  %v6518_v30 = vpop.f32.mrf.mxu1 }
 0x5ce   : > { %v6939_v55 = vmax.f32 %v6517_v47, 0.0  ;;  %v7570_v7 = vpop.f32.mrf.mxu0  ;;  %v13590_v47 = vld [vmem:[#allocation20_spill] sm:$0xff] }
 0x5cf   : > { %8195 = vst.msk [vmem:[%s12536_s27 + $0x78] sm:$0xff] %vm8179_vm1, %v7576_v35  ;;  %v7571_v44 = vadd.f32 %v12531_v21, %v7570_v7  ;;  %v6521_v60 = vpop.f32.mrf.mxu1  ;;  %6760 = vmatmul.mubr.f32.gmra.mxu1 %v6045_v51  ;;  %v5782_v53 = vadd.f32 %v11856_v63, %v13590_v47 }
 0x5d0   : > { %v6522_v23 = vadd.f32 %v12510_v34, %v6521_v60  ;;  %6764 = vmatprep.mubr.f32.mxu1 %v6048_v14  ;;  %9053 = vmatprep.mubr.msk.f32.mxu0 %vm4246_vm0, %v6939_v55  ;;  %v6051_v14 = vmax.f32 %v5779_v37, 0.0  ;;  %v5781_v55 = vadd.f32 %v11853_v4, %v13591_v31  ;;  %v5784_v60 = vadd.f32 %v11856_v63, %v12083_v61 }
 0x5d1   : > { %8194 = vst.msk [vmem:[%s12536_s27 + $0x70] sm:$0xff] %vm8179_vm1, %v7571_v44  ;;  %v6523_v12 = vpop.f32.mrf.mxu1  ;;  %v6054_v44 = vmax.f32 %v5782_v53, 0.0  ;;  %v5786_v61 = vadd.f32 %v11856_v63, %v12091_v52  ;;  %v5788_v53 = vadd.f32 %v11856_v63, %v12099_v10  ;;  %v5790_v10 = vadd.f32 %v11856_v63, %v12107_v58 }
 0x5d2   : > { %v6940_v45 = vmax.f32 %v6522_v23, 0.0  ;;  %v6053_v12 = vmax.f32 %v5781_v55, 0.0 }
 0x5d3   : > { %v6526_v41 = vpop.f32.mrf.mxu1  ;;  %6765 = vmatmul.mubr.f32.gmra.mxu1 %v6047_v15  ;;  %v6058_v47 = vmax.f32 %v5786_v61, 0.0 }
 0x5d4   : > { %v6527_v27 = vadd.f32 %v12510_v34, %v6526_v41  ;;  %6769 = vmatprep.mubr.f32.mxu1 %v6050_v32  ;;  %v8983_v38 = vpop.f32.mrf.mxu0  ;;  %9054 = vmatmul.mubr.msk.f32.gmra.mxu0 %vm4246_vm0, %v6940_v45  ;;  %v13592_v32 = vld [vmem:[#allocation23_spill] sm:$0xff]  ;;  %v6056_v41 = vmax.f32 %v5784_v60, 0.0 }
 0x5d5   : > { %v7586_v2 = vadd.f32 %v8983_v38, %v12531_v21  ;;  %v6528_v18 = vpop.f32.mrf.mxu1  ;;  %v5783_v11 = vadd.f32 %v11853_v4, %v13592_v32  ;;  %v5789_v32 = vadd.f32 %v11853_v4, %v12101_v42  ;;  %v5791_v42 = vadd.f32 %v11853_v4, %v12109_v8 }
 0x5d6   : > { %v6941_v51 = vmax.f32 %v6527_v27, 0.0  ;;  %v7580_v16 = vpop.f32.mrf.mxu0  ;;  %v13593_v18 = vld [vmem:[#allocation22_spill] sm:$0xff] }
 0x5d7   : > { %8197 = vst.msk [vmem:[%s12536_s27 + $0x88] sm:$0xff] %vm8179_vm1, %v7586_v2  ;;  %v7581_v62 = vadd.f32 %v12531_v21, %v7580_v16  ;;  %v6531_v35 = vpop.f32.mrf.mxu1  ;;  %6770 = vmatmul.mubr.f32.gmra.mxu1 %v6049_v59  ;;  %v6055_v2 = vmax.f32 %v5783_v11, 0.0  ;;  %v6062_v11 = vmax.f32 %v5790_v10, 0.0  ;;  %v6063_v8 = vmax.f32 %v5791_v42, 0.0 }
 0x5d8   : > { %v6532_v30 = vadd.f32 %v12510_v34, %v6531_v35  ;;  %6774 = vmatprep.mubr.f32.mxu1 %v6052_v56  ;;  %9056 = vmatprep.mubr.msk.f32.mxu0 %vm4246_vm0, %v6941_v51  ;;  %v5785_v56 = vadd.f32 %v11853_v4, %v13593_v18 }
 0x5d9   : > { %8196 = vst.msk [vmem:[%s12536_s27 + $0x80] sm:$0xff] %vm8179_vm1, %v7581_v62  ;;  %v6533_v7 = vpop.f32.mrf.mxu1 }
 0x5da   : > { %v6942_v23 = vmax.f32 %v6532_v30, 0.0  ;;  %v6057_v30 = vmax.f32 %v5785_v56, 0.0 }
 0x5db   : > { %v6536_v15 = vpop.f32.mrf.mxu1  ;;  %6775 = vmatmul.mubr.f32.gmra.mxu1 %v6051_v14  ;;  %v13594_v14 = vld [vmem:[#allocation25_spill] sm:$0xff] }
 0x5dc   : > { %v6537_v29 = vadd.f32 %v12510_v34, %v6536_v15  ;;  %6779 = vmatprep.mubr.f32.mxu1 %v6054_v44  ;;  %v8986_v0 = vpop.f32.mrf.mxu0  ;;  %9057 = vmatmul.mubr.msk.f32.gmra.mxu0 %vm4246_vm0, %v6942_v23  ;;  %v5787_v31 = vadd.f32 %v11853_v4, %v13594_v14  ;;  %v6060_v44 = vmax.f32 %v5788_v53, 0.0  ;;  %v5793_v53 = vadd.f32 %v11853_v4, %v12117_v13 }
 0x5dd   : > { %v7596_v26 = vadd.f32 %v8986_v0, %v12531_v21  ;;  %v6538_v45 = vpop.f32.mrf.mxu1  ;;  %v5795_v13 = vadd.f32 %v11853_v4, %v12125_v43 }
 0x5de   : > { %v6943_v27 = vmax.f32 %v6537_v29, 0.0  ;;  %v7590_v38 = vpop.f32.mrf.mxu0 }
 0x5df   : > { %8199 = vst.msk [vmem:[%s12536_s27 + $0x98] sm:$0xff] %vm8179_vm1, %v7596_v26  ;;  %v7591_v59 = vadd.f32 %v12531_v21, %v7590_v38  ;;  %v6541_v49 = vpop.f32.mrf.mxu1  ;;  %6780 = vmatmul.mubr.f32.gmra.mxu1 %v6053_v12  ;;  %v6059_v12 = vmax.f32 %v5787_v31, 0.0  ;;  %v5792_v26 = vadd.f32 %v11856_v63, %v12115_v40  ;;  %v6061_v38 = vmax.f32 %v5789_v32, 0.0 }
 0x5e0   : > { %v6542_v37 = vadd.f32 %v12510_v34, %v6541_v49  ;;  %6784 = vmatprep.mubr.f32.mxu1 %v6056_v41  ;;  %9059 = vmatprep.mubr.msk.f32.mxu0 %vm4246_vm0, %v6943_v27  ;;  %v5794_v40 = vadd.f32 %v11856_v63, %v12123_v33  ;;  %v6065_v31 = vmax.f32 %v5793_v53, 0.0  ;;  %v6067_v43 = vmax.f32 %v5795_v13, 0.0 }
 0x5e1   : > { %8198 = vst.msk [vmem:[%s12536_s27 + $0x90] sm:$0xff] %vm8179_vm1, %v7591_v59  ;;  %v6543_v52 = vpop.f32.mrf.mxu1  ;;  %v5800_v32 = vadd.f32 %v11856_v63, %v12147_v5  ;;  %v5802_v5 = vadd.f32 %v11856_v63, %v12155_v17 }
 0x5e2   : > { %v6944_v51 = vmax.f32 %v6542_v37, 0.0  ;;  %v6064_v37 = vmax.f32 %v5792_v26, 0.0 }
 0x5e3   : > { %v6546_v16 = vpop.f32.mrf.mxu1  ;;  %6785 = vmatmul.mubr.f32.gmra.mxu1 %v6055_v2 }
 0x5e4   : > { %v6547_v62 = vadd.f32 %v12510_v34, %v6546_v16  ;;  %6789 = vmatprep.mubr.f32.mxu1 %v6058_v47  ;;  %v8989_v35 = vpop.f32.mrf.mxu0  ;;  %9060 = vmatmul.mubr.msk.f32.gmra.mxu0 %vm4246_vm0, %v6944_v51  ;;  %v6066_v51 = vmax.f32 %v5794_v40, 0.0  ;;  %v5796_v16 = vadd.f32 %v11856_v63, %v12131_v9  ;;  %v5798_v9 = vadd.f32 %v11856_v63, %v12139_v48 }
 0x5e5   : > { %v7606_v55 = vadd.f32 %v8989_v35, %v12531_v21  ;;  %v6548_v7 = vpop.f32.mrf.mxu1 }
 0x5e6   : > { %v6945_v60 = vmax.f32 %v6547_v62, 0.0  ;;  %v7600_v23 = vpop.f32.mrf.mxu0 }
 0x5e7   : > { %8201 = vst.msk [vmem:[%s12536_s27 + $0xa8] sm:$0xff] %vm8179_vm1, %v7606_v55  ;;  %v7601_v15 = vadd.f32 %v12531_v21, %v7600_v23  ;;  %v6551_v29 = vpop.f32.mrf.mxu1  ;;  %6790 = vmatmul.mubr.f32.gmra.mxu1 %v6057_v30 }
 0x5e8   : > { %v6552_v0 = vadd.f32 %v12510_v34, %v6551_v29  ;;  %6794 = vmatprep.mubr.f32.mxu1 %v6060_v44  ;;  %9062 = vmatprep.mubr.msk.f32.mxu0 %vm4246_vm0, %v6945_v60  ;;  %v6068_v44 = vmax.f32 %v5796_v16, 0.0 }
 0x5e9   : > { %8200 = vst.msk [vmem:[%s12536_s27 + $0xa0] sm:$0xff] %vm8179_vm1, %v7601_v15  ;;  %v6553_v58 = vpop.f32.mrf.mxu1 }
 0x5ea   : > { %v6946_v45 = vmax.f32 %v6552_v0, 0.0  ;;  %v5797_v0 = vadd.f32 %v11853_v4, %v12133_v1  ;;  %v5799_v1 = vadd.f32 %v11853_v4, %v12141_v36 }
 0x5eb   : > { %v6556_v41 = vpop.f32.mrf.mxu1  ;;  %6795 = vmatmul.mubr.f32.gmra.mxu1 %v6059_v12  ;;  %v6070_v12 = vmax.f32 %v5798_v9, 0.0 }
 0x5ec   : > { %v6557_v61 = vadd.f32 %v12510_v34, %v6556_v41  ;;  %6799 = vmatprep.mubr.f32.mxu1 %v6062_v11  ;;  %v8992_v27 = vpop.f32.mrf.mxu0  ;;  %9063 = vmatmul.mubr.msk.f32.gmra.mxu0 %vm4246_vm0, %v6946_v45  ;;  %v6069_v41 = vmax.f32 %v5797_v0, 0.0  ;;  %v6071_v36 = vmax.f32 %v5799_v1, 0.0 }
 0x5ed   : > { %v7616_v59 = vadd.f32 %v8992_v27, %v12531_v21  ;;  %v6558_v49 = vpop.f32.mrf.mxu1 }
 0x5ee   : > { %v6947_v2 = vmax.f32 %v6557_v61, 0.0  ;;  %v7610_v18 = vpop.f32.mrf.mxu0 }
 0x5ef   : > { %8203 = vst.msk [vmem:[%s12536_s27 + $0xb8] sm:$0xff] %vm8179_vm1, %v7616_v59  ;;  %v7611_v56 = vadd.f32 %v12531_v21, %v7610_v18  ;;  %v6561_v52 = vpop.f32.mrf.mxu1  ;;  %6800 = vmatmul.mubr.f32.gmra.mxu1 %v6061_v38  ;;  %v6072_v38 = vmax.f32 %v5800_v32, 0.0  ;;  %v6074_v18 = vmax.f32 %v5802_v5, 0.0 }
 0x5f0   : > { %v6562_v47 = vadd.f32 %v12510_v34, %v6561_v52  ;;  %6804 = vmatprep.mubr.f32.mxu1 %v6064_v37  ;;  %9065 = vmatprep.mubr.msk.f32.mxu0 %vm4246_vm0, %v6947_v2  ;;  %v5801_v2 = vadd.f32 %v11853_v4, %v12149_v25  ;;  %v5803_v25 = vadd.f32 %v11853_v4, %v12157_v46 }
 0x5f1   : > { %8202 = vst.msk [vmem:[%s12536_s27 + $0xb0] sm:$0xff] %vm8179_vm1, %v7611_v56  ;;  %v6563_v33 = vpop.f32.mrf.mxu1  ;;  %v5804_v56 = vadd.f32 %v11856_v63, %v12163_v57  ;;  %v5806_v57 = vadd.f32 %v11856_v63, %v12171_v20 }
 0x5f2   : > { %v6948_v62 = vmax.f32 %v6562_v47, 0.0  ;;  %v6073_v33 = vmax.f32 %v5801_v2, 0.0  ;;  %v6075_v46 = vmax.f32 %v5803_v25, 0.0 }
 0x5f3   : > { %v6566_v35 = vpop.f32.mrf.mxu1  ;;  %6805 = vmatmul.mubr.f32.gmra.mxu1 %v6063_v8 }
 0x5f4   : > { %v6567_v30 = vadd.f32 %v12510_v34, %v6566_v35  ;;  %6809 = vmatprep.mubr.f32.mxu1 %v6066_v51  ;;  %v8995_v14 = vpop.f32.mrf.mxu0  ;;  %9066 = vmatmul.mubr.msk.f32.gmra.mxu0 %vm4246_vm0, %v6948_v62  ;;  %v6076_v62 = vmax.f32 %v5804_v56, 0.0 }
 0x5f5   : > { %v7626_v55 = vadd.f32 %v8995_v14, %v12531_v21  ;;  %v6568_v7 = vpop.f32.mrf.mxu1 }
 0x5f6   : > { %v6949_v10 = vmax.f32 %v6567_v30, 0.0  ;;  %v7620_v60 = vpop.f32.mrf.mxu0  ;;  %v6078_v7 = vmax.f32 %v5806_v57, 0.0 }
 0x5f7   : > { %8205 = vst.msk [vmem:[%s12536_s27 + $0xc8] sm:$0xff] %vm8179_vm1, %v7626_v55  ;;  %v7621_v23 = vadd.f32 %v12531_v21, %v7620_v60  ;;  %v6571_v15 = vpop.f32.mrf.mxu1  ;;  %6810 = vmatmul.mubr.f32.gmra.mxu1 %v6065_v31  ;;  %v5805_v55 = vadd.f32 %v11853_v4, %v12165_v54  ;;  %v5807_v54 = vadd.f32 %v11853_v4, %v12173_v24 }
 0x5f8   : > { %v6572_v29 = vadd.f32 %v12510_v34, %v6571_v15  ;;  %6814 = vmatprep.mubr.f32.mxu1 %v6068_v44  ;;  %9068 = vmatprep.mubr.msk.f32.mxu0 %vm4246_vm0, %v6949_v10  ;;  %v5808_v44 = vadd.f32 %v11856_v63, %v12179_v50  ;;  %v5810_v50 = vadd.f32 %v11856_v63, %v12187_v3 }
 0x5f9   : > { %8204 = vst.msk [vmem:[%s12536_s27 + $0xc0] sm:$0xff] %vm8179_vm1, %v7621_v23  ;;  %v6573_v48 = vpop.f32.mrf.mxu1  ;;  %v6077_v15 = vmax.f32 %v5805_v55, 0.0  ;;  %v6079_v24 = vmax.f32 %v5807_v54, 0.0 }
 0x5fa   : > { %v6950_v58 = vmax.f32 %v6572_v29, 0.0  ;;  %v6080_v0 = vmax.f32 %v5808_v44, 0.0  ;;  %v13598_v44 = vld [vmem:[#allocation26_spill] sm:$0xff] }
 0x5fb   : > { %v6576_v11 = vpop.f32.mrf.mxu1  ;;  %6815 = vmatmul.mubr.f32.gmra.mxu1 %v6067_v43 }
 0x5fc   : > { %v6577_v26 = vadd.f32 %v12510_v34, %v6576_v11  ;;  %6819 = vmatprep.mubr.f32.mxu1 %v6070_v12  ;;  %v8998_v45 = vpop.f32.mrf.mxu0  ;;  %9069 = vmatmul.mubr.msk.f32.gmra.mxu0 %vm4246_vm0, %v6950_v58 }
 0x5fd   : > { %v7636_v61 = vadd.f32 %v8998_v45, %v12531_v21  ;;  %v6578_v27 = vpop.f32.mrf.mxu1  ;;  %v6082_v45 = vmax.f32 %v5810_v50, 0.0 }
 0x5fe   : > { %v6951_v42 = vmax.f32 %v6577_v26, 0.0  ;;  %v7630_v59 = vpop.f32.mrf.mxu0  ;;  %v5809_v26 = vadd.f32 %v11853_v4, %v12181_v22  ;;  %v5811_v22 = vadd.f32 %v11853_v4, %v12189_v28 }
 0x5ff   : > { %8207 = vst.msk [vmem:[%s12536_s27 + $0xd8] sm:$0xff] %vm8179_vm1, %v7636_v61  ;;  %v7631_v49 = vadd.f32 %v12531_v21, %v7630_v59  ;;  %v6581_v37 = vpop.f32.mrf.mxu1  ;;  %6820 = vmatmul.mubr.f32.gmra.mxu1 %v6069_v41  ;;  %v5812_v41 = vadd.f32 %v11856_v63, %v12195_v19  ;;  %v5814_v19 = vadd.f32 %v11856_v63, %v12203_v6 }
 0x600   : > { %v6582_v40 = vadd.f32 %v12510_v34, %v6581_v37  ;;  %6824 = vmatprep.mubr.f32.mxu1 %v6072_v38  ;;  %9071 = vmatprep.mubr.msk.f32.mxu0 %vm4246_vm0, %v6951_v42  ;;  %v6081_v5 = vmax.f32 %v5809_v26, 0.0  ;;  %v6083_v28 = vmax.f32 %v5811_v22, 0.0 }
 0x601   : > { %8206 = vst.msk [vmem:[%s12536_s27 + $0xd0] sm:$0xff] %vm8179_vm1, %v7631_v49  ;;  %v6583_v17 = vpop.f32.mrf.mxu1  ;;  %v6084_v49 = vmax.f32 %v5812_v41, 0.0  ;;  %v6086_v56 = vmax.f32 %v5814_v19, 0.0 }
 0x602   : > { %v6952_v52 = vmax.f32 %v6582_v40, 0.0 }
 0x603   : > { %v6586_v47 = vpop.f32.mrf.mxu1  ;;  %6825 = vmatmul.mubr.f32.gmra.mxu1 %v6071_v36 }
 0x604   : > { %v6587_v8 = vadd.f32 %v12510_v34, %v6586_v47  ;;  %6829 = vmatprep.mubr.f32.mxu1 %v6074_v18  ;;  %v9001_v53 = vpop.f32.mrf.mxu0  ;;  %9072 = vmatmul.mubr.msk.f32.gmra.mxu0 %vm4246_vm0, %v6952_v52  ;;  %v5813_v18 = vadd.f32 %v11853_v4, %v12197_v39  ;;  %v13595_v52 = vld [vmem:[#allocation27_spill] sm:$0xff] }
 0x605   : > { %v7646_v51 = vadd.f32 %v9001_v53, %v12531_v21  ;;  %v6588_v16 = vpop.f32.mrf.mxu1  ;;  %v5816_v47 = vadd.f32 %v11856_v63, %v13595_v52 }
 0x606   : > { %v6953_v35 = vmax.f32 %v6587_v8, 0.0  ;;  %v7640_v30 = vpop.f32.mrf.mxu0  ;;  %v6085_v39 = vmax.f32 %v5813_v18, 0.0 }
 0x607   : > { %8209 = vst.msk [vmem:[%s12536_s27 + $0xe8] sm:$0xff] %vm8179_vm1, %v7646_v51  ;;  %v7641_v14 = vadd.f32 %v12531_v21, %v7640_v30  ;;  %v6591_v31 = vpop.f32.mrf.mxu1  ;;  %6830 = vmatmul.mubr.f32.gmra.mxu1 %v6073_v33  ;;  %v12844_v33 = vld [vmem:[#allocation10] ss:$0 sm:$0xff]  ;;  %v13596_v51 = vld [vmem:[#allocation24_spill] sm:$0xff] }
 0x608   : > { %v6592_v13 = vadd.f32 %v12510_v34, %v6591_v31  ;;  %6834 = vmatprep.mubr.f32.mxu1 %v6076_v62  ;;  %9074 = vmatprep.mubr.msk.f32.mxu0 %vm4246_vm0, %v6953_v35  ;;  %v5815_v16 = vadd.f32 %v11853_v4, %v13596_v51  ;;  %v6088_v35 = vmax.f32 %v5816_v47, 0.0  ;;  %v13597_v30 = vld [vmem:[#allocation28_spill] sm:$0xff] }
 0x609   : > { %8208 = vst.msk [vmem:[%s12536_s27 + $0xe0] sm:$0xff] %vm8179_vm1, %v7641_v14  ;;  %v6593_v20 = vpop.f32.mrf.mxu1  ;;  %v5818_v14 = vadd.f32 %v11856_v63, %v13597_v30 }
 0x60a   : > { %v6954_v9 = vmax.f32 %v6592_v13, 0.0 }
 0x60b   : > { %v6596_v10 = vpop.f32.mrf.mxu1  ;;  %6835 = vmatmul.mubr.f32.gmra.mxu1 %v6075_v46 }
 0x60c   : > { %v6597_v60 = vadd.f32 %v12510_v34, %v6596_v10  ;;  %6839 = vmatprep.mubr.f32.mxu1 %v6078_v7  ;;  %v9004_v23 = vpop.f32.mrf.mxu0  ;;  %9075 = vmatmul.mubr.msk.f32.gmra.mxu0 %vm4246_vm0, %v6954_v9  ;;  %v6087_v7 = vmax.f32 %v5815_v16, 0.0  ;;  %v5817_v9 = vadd.f32 %v11853_v4, %v13598_v44  ;;  %v6090_v10 = vmax.f32 %v5818_v14, 0.0 }
 0x60d   : > { %v7656_v29 = vadd.f32 %v9004_v23, %v12531_v21  ;;  %v6598_v43 = vpop.f32.mrf.mxu1 }
 0x60e   : > { %v6955_v48 = vmax.f32 %v6597_v60, 0.0  ;;  %v7650_v12 = vpop.f32.mrf.mxu0  ;;  %v6089_v54 = vmax.f32 %v5817_v9, 0.0 }
 0x60f   : > { %8211 = vst.msk [vmem:[%s12536_s27 + $0xf8] sm:$0xff] %vm8179_vm1, %v7656_v29  ;;  %v7651_v32 = vadd.f32 %v12531_v21, %v7650_v12  ;;  %v6601_v58 = vpop.f32.mrf.mxu1  ;;  %6840 = vmatmul.mubr.f32.gmra.mxu1 %v6077_v15  ;;  %v12864_v29 = vld [vmem:[#allocation12] ss:$0 sm:$0xff] }
 0x610   : > { %v6602_v11 = vadd.f32 %v12510_v34, %v6601_v58  ;;  %6844 = vmatprep.mubr.f32.mxu1 %v6080_v0  ;;  %9077 = vmatprep.mubr.msk.f32.mxu0 %vm4246_vm0, %v6955_v48 }
 0x611   : > { %8210 = vst.msk [vmem:[%s12536_s27 + $0xf0] sm:$0xff] %vm8179_vm1, %v7651_v32  ;;  %v6603_v3 = vpop.f32.mrf.mxu1 }
 0x612   : > { %v6956_v1 = vmax.f32 %v6602_v11, 0.0 }
 0x613   : > { %v6606_v61 = vpop.f32.mrf.mxu1  ;;  %6845 = vmatmul.mubr.f32.gmra.mxu1 %v6079_v24 }
 0x614   : > { %v6607_v27 = vadd.f32 %v12510_v34, %v6606_v61  ;;  %6849 = vmatprep.mubr.f32.mxu1 %v6082_v45  ;;  %v9007_v38 = vpop.f32.mrf.mxu0  ;;  %9078 = vmatmul.mubr.msk.f32.gmra.mxu0 %vm4246_vm0, %v6956_v1 }
 0x615   : > { %v7666_v42 = vadd.f32 %v9007_v38, %v12531_v21  ;;  %v6608_v59 = vpop.f32.mrf.mxu1 }
 0x616   : > { %v6957_v37 = vmax.f32 %v6607_v27, 0.0  ;;  %v7660_v40 = vpop.f32.mrf.mxu0 }
 0x617   : > { %8213 = vst.msk [vmem:[%s12536_s27 + $0x108] sm:$0xff] %vm8179_vm1, %v7666_v42  ;;  %v7661_v36 = vadd.f32 %v12531_v21, %v7660_v40  ;;  %v6611_v2 = vpop.f32.mrf.mxu1  ;;  %6850 = vmatmul.mubr.f32.gmra.mxu1 %v6081_v5 }
 0x618   : > { %v6612_v17 = vadd.f32 %v12510_v34, %v6611_v2  ;;  %6854 = vmatprep.mubr.f32.mxu1 %v6084_v49  ;;  %9080 = vmatprep.mubr.msk.f32.mxu0 %vm4246_vm0, %v6957_v37 }
 0x619   : > { %8212 = vst.msk [vmem:[%s12536_s27 + $0x100] sm:$0xff] %vm8179_vm1, %v7661_v36  ;;  %v6613_v6 = vpop.f32.mrf.mxu1 }
 0x61a   : > { %v6958_v8 = vmax.f32 %v6612_v17, 0.0 }
 0x61b   : > { %v6616_v53 = vpop.f32.mrf.mxu1  ;;  %6855 = vmatmul.mubr.f32.gmra.mxu1 %v6083_v28 }
 0x61c   : > { %v6617_v34 = vadd.f32 %v12844_v33, %v6616_v53  ;;  %6859 = vmatprep.mubr.f32.mxu1 %v6086_v56  ;;  %v9010_v25 = vpop.f32.mrf.mxu0  ;;  %9081 = vmatmul.mubr.msk.f32.gmra.mxu0 %vm4246_vm0, %v6958_v8 }
 0x61d   : > { %v7676_v62 = vadd.f32 %v9010_v25, %v12531_v21  ;;  %v6618_v57 = vpop.f32.mrf.mxu1 }
 0x61e   : > { %v6959_v31 = vmax.f32 %v6617_v34, 0.0  ;;  %v7670_v13 = vpop.f32.mrf.mxu0 }
 0x61f   : > { %8215 = vst.msk [vmem:[%s12536_s27 + $0x118] sm:$0xff] %vm8179_vm1, %v7676_v62  ;;  %v7671_v46 = vadd.f32 %v12531_v21, %v7670_v13  ;;  %v6621_v55 = vpop.f32.mrf.mxu1  ;;  %6860 = vmatmul.mubr.f32.gmra.mxu1 %v6085_v39 }
 0x620   : > { %v6622_v20 = vadd.f32 %v12844_v33, %v6621_v55  ;;  %6864 = vmatprep.mubr.f32.mxu1 %v6088_v35  ;;  %9083 = vmatprep.mubr.msk.f32.mxu0 %vm4246_vm0, %v6959_v31 }
 0x621   : > { %8214 = vst.msk [vmem:[%s12536_s27 + $0x110] sm:$0xff] %vm8179_vm1, %v7671_v46  ;;  %v6623_v63 = vpop.f32.mrf.mxu1 }
 0x622   : > { %v6960_v60 = vmax.f32 %v6622_v20, 0.0 }
 0x623   : > { %v6626_v23 = vpop.f32.mrf.mxu1  ;;  %6865 = vmatmul.mubr.f32.gmra.mxu1 %v6087_v7 }
 0x624   : > { %v6627_v21 = vadd.f32 %v12844_v33, %v6626_v23  ;;  %6869 = vmatprep.mubr.f32.mxu1 %v6090_v10  ;;  %v9013_v15 = vpop.f32.mrf.mxu0  ;;  %9084 = vmatmul.mubr.msk.f32.gmra.mxu0 %vm4246_vm0, %v6960_v60 }
 0x625   : > { %v7686_v4 = vadd.f32 %v12864_v29, %v9013_v15  ;;  %v6628_v43 = vpop.f32.mrf.mxu1 }
 0x626   : > { %v6961_v0 = vmax.f32 %v6627_v21, 0.0  ;;  %v7680_v50 = vpop.f32.mrf.mxu0 }
 0x627   : > { %8217 = vst.msk [vmem:[%s12536_s27 + $0x128] sm:$0xff] %vm8179_vm1, %v7686_v4  ;;  %v7681_v48 = vadd.f32 %v12864_v29, %v7680_v50  ;;  %v6631_v12 = vpop.f32.mrf.mxu1  ;;  %6870 = vmatmul.mubr.f32.gmra.mxu1 %v6089_v54 }
 0x628   : > { %v6632_v32 = vadd.f32 %v12844_v33, %v6631_v12  ;;  %9086 = vmatprep.mubr.msk.f32.mxu0 %vm4246_vm0, %v6961_v0 }
 0x629   : > { %8216 = vst.msk [vmem:[%s12536_s27 + $0x120] sm:$0xff] %vm8179_vm1, %v7681_v48  ;;  %v6633_v58 = vpop.f32.mrf.mxu1 }
 0x62a   : > { %v6962_v11 = vmax.f32 %v6632_v32, 0.0 }
 0x62b   : > { %v6636_v24 = vpop.f32.mrf.mxu1 }
 0x62c   : > { %v6637_v26 = vadd.f32 %v12844_v33, %v6636_v24  ;;  %v9016_v3 = vpop.f32.mrf.mxu0  ;;  %9087 = vmatmul.mubr.msk.f32.gmra.mxu0 %vm4246_vm0, %v6962_v11 }
 0x62d   : > { %v7696_v45 = vadd.f32 %v12864_v29, %v9016_v3  ;;  %v6638_v41 = vpop.f32.mrf.mxu1 }
 0x62e   : > { %v6963_v1 = vmax.f32 %v6637_v26, 0.0  ;;  %v7690_v61 = vpop.f32.mrf.mxu0 }
 0x62f   : > { %8219 = vst.msk [vmem:[%s12536_s27 + $0x138] sm:$0xff] %vm8179_vm1, %v7696_v45  ;;  %v7691_v27 = vadd.f32 %v12864_v29, %v7690_v61  ;;  %v6641_v38 = vpop.f32.mrf.mxu1 }
 0x630   : > { %v6642_v5 = vadd.f32 %v12844_v33, %v6641_v38  ;;  %9089 = vmatprep.mubr.msk.f32.mxu0 %vm4246_vm0, %v6963_v1 }
 0x631   : > { %8218 = vst.msk [vmem:[%s12536_s27 + $0x130] sm:$0xff] %vm8179_vm1, %v7691_v27  ;;  %v6643_v22 = vpop.f32.mrf.mxu1 }
 0x632   : > { %v6964_v42 = vmax.f32 %v6642_v5, 0.0 }
 0x633   : > { %v6646_v59 = vpop.f32.mrf.mxu1 }
 0x634   : > { %v6647_v49 = vadd.f32 %v12844_v33, %v6646_v59  ;;  %v9019_v19 = vpop.f32.mrf.mxu0  ;;  %9090 = vmatmul.mubr.msk.f32.gmra.mxu0 %vm4246_vm0, %v6964_v42 }
 0x635   : > { %v7706_v37 = vadd.f32 %v12864_v29, %v9019_v19  ;;  %v6648_v40 = vpop.f32.mrf.mxu1 }
 0x636   : > { %v6965_v36 = vmax.f32 %v6647_v49, 0.0  ;;  %v7700_v2 = vpop.f32.mrf.mxu0 }
 0x637   : > { %8221 = vst.msk [vmem:[%s12536_s27 + $0x148] sm:$0xff] %vm8179_vm1, %v7706_v37  ;;  %v7701_v17 = vadd.f32 %v12864_v29, %v7700_v2  ;;  %v6651_v28 = vpop.f32.mrf.mxu1 }
 0x638   : > { %v6652_v18 = vadd.f32 %v12844_v33, %v6651_v28  ;;  %9092 = vmatprep.mubr.msk.f32.mxu0 %vm4246_vm0, %v6965_v36 }
 0x639   : > { %8220 = vst.msk [vmem:[%s12536_s27 + $0x140] sm:$0xff] %vm8179_vm1, %v7701_v17  ;;  %v6653_v6 = vpop.f32.mrf.mxu1 }
 0x63a   : > { %v6966_v56 = vmax.f32 %v6652_v18, 0.0 }
 0x63b   : > { %v6656_v52 = vpop.f32.mrf.mxu1 }
 0x63c   : > { %v6657_v47 = vadd.f32 %v12844_v33, %v6656_v52  ;;  %v9022_v8 = vpop.f32.mrf.mxu0  ;;  %9093 = vmatmul.mubr.msk.f32.gmra.mxu0 %vm4246_vm0, %v6966_v56 }
 0x63d   : > { %v7716_v53 = vadd.f32 %v12864_v29, %v9022_v8  ;;  %v6658_v34 = vpop.f32.mrf.mxu1 }
 0x63e   : > { %v6967_v25 = vmax.f32 %v6657_v47, 0.0  ;;  %v7710_v39 = vpop.f32.mrf.mxu0 }
 0x63f   : > { %8223 = vst.msk [vmem:[%s12536_s27 + $0x158] sm:$0xff] %vm8179_vm1, %v7716_v53  ;;  %v7711_v51 = vadd.f32 %v12864_v29, %v7710_v39  ;;  %v6661_v16 = vpop.f32.mrf.mxu1 }
 0x640   : > { %v6662_v62 = vadd.f32 %v12844_v33, %v6661_v16  ;;  %9095 = vmatprep.mubr.msk.f32.mxu0 %vm4246_vm0, %v6967_v25 }
 0x641   : > { %8222 = vst.msk [vmem:[%s12536_s27 + $0x150] sm:$0xff] %vm8179_vm1, %v7711_v51  ;;  %v6663_v57 = vpop.f32.mrf.mxu1 }
 0x642   : > { %v6968_v35 = vmax.f32 %v6662_v62, 0.0 }
 0x643   : > { %v6666_v30 = vpop.f32.mrf.mxu1 }
 0x644   : > { %v6667_v14 = vadd.f32 %v12844_v33, %v6666_v30  ;;  %v9025_v31 = vpop.f32.mrf.mxu0  ;;  %9096 = vmatmul.mubr.msk.f32.gmra.mxu0 %vm4246_vm0, %v6968_v35 }
 0x645   : > { %v7726_v13 = vadd.f32 %v12864_v29, %v9025_v31  ;;  %v6668_v46 = vpop.f32.mrf.mxu1 }
 0x646   : > { %v6969_v55 = vmax.f32 %v6667_v14, 0.0  ;;  %v7720_v20 = vpop.f32.mrf.mxu0 }
 0x647   : > { %8225 = vst.msk [vmem:[%s12536_s27 + $0x168] sm:$0xff] %vm8179_vm1, %v7726_v13  ;;  %v7721_v7 = vadd.f32 %v12864_v29, %v7720_v20  ;;  %v6671_v44 = vpop.f32.mrf.mxu1 }
 0x648   : > { %v6672_v9 = vadd.f32 %v12844_v33, %v6671_v44  ;;  %9098 = vmatprep.mubr.msk.f32.mxu0 %vm4246_vm0, %v6969_v55 }
 0x649   : > { %8224 = vst.msk [vmem:[%s12536_s27 + $0x160] sm:$0xff] %vm8179_vm1, %v7721_v7  ;;  %v6673_v63 = vpop.f32.mrf.mxu1 }
 0x64a   : > { %v6970_v10 = vmax.f32 %v6672_v9, 0.0 }
 0x64b   : > { %v6676_v60 = vpop.f32.mrf.mxu1 }
 0x64c   : > { %v6677_v23 = vadd.f32 %v12844_v33, %v6676_v60  ;;  %v9028_v21 = vpop.f32.mrf.mxu0  ;;  %9099 = vmatmul.mubr.msk.f32.gmra.mxu0 %vm4246_vm0, %v6970_v10 }
 0x64d   : > { %v7736_v15 = vadd.f32 %v12864_v29, %v9028_v21  ;;  %v6678_v54 = vpop.f32.mrf.mxu1 }
 0x64e   : > { %v6971_v4 = vmax.f32 %v6677_v23, 0.0  ;;  %v7730_v43 = vpop.f32.mrf.mxu0 }
 0x64f   : > { %8227 = vst.msk [vmem:[%s12536_s27 + $0x178] sm:$0xff] %vm8179_vm1, %v7736_v15  ;;  %v7731_v0 = vadd.f32 %v12864_v29, %v7730_v43  ;;  %v6681_v50 = vpop.f32.mrf.mxu1 }
 0x650   : > { %v6682_v48 = vadd.f32 %v12844_v33, %v6681_v50  ;;  %9101 = vmatprep.mubr.msk.f32.mxu0 %vm4246_vm0, %v6971_v4 }
 0x651   : > { %8226 = vst.msk [vmem:[%s12536_s27 + $0x170] sm:$0xff] %vm8179_vm1, %v7731_v0  ;;  %v6683_v12 = vpop.f32.mrf.mxu1 }
 0x652   : > { %v6972_v32 = vmax.f32 %v6682_v48, 0.0 }
 0x653   : > { %v6686_v58 = vpop.f32.mrf.mxu1 }
 0x654   : > { %v6687_v11 = vadd.f32 %v12844_v33, %v6686_v58  ;;  %v9031_v24 = vpop.f32.mrf.mxu0  ;;  %9102 = vmatmul.mubr.msk.f32.gmra.mxu0 %vm4246_vm0, %v6972_v32 }
 0x655   : > { %v7746_v26 = vadd.f32 %v12864_v29, %v9031_v24  ;;  %v6688_v3 = vpop.f32.mrf.mxu1 }
 0x656   : > { %v6973_v45 = vmax.f32 %v6687_v11, 0.0  ;;  %v7740_v41 = vpop.f32.mrf.mxu0 }
 0x657   : > { %8229 = vst.msk [vmem:[%s12536_s27 + $0x188] sm:$0xff] %vm8179_vm1, %v7746_v26  ;;  %v7741_v1 = vadd.f32 %v12864_v29, %v7740_v41  ;;  %v6691_v61 = vpop.f32.mrf.mxu1 }
 0x658   : > { %v6692_v27 = vadd.f32 %v12844_v33, %v6691_v61  ;;  %9104 = vmatprep.mubr.msk.f32.mxu0 %vm4246_vm0, %v6973_v45 }
 0x659   : > { %8228 = vst.msk [vmem:[%s12536_s27 + $0x180] sm:$0xff] %vm8179_vm1, %v7741_v1  ;;  %v6693_v38 = vpop.f32.mrf.mxu1 }
 0x65a   : > { %v6974_v5 = vmax.f32 %v6692_v27, 0.0 }
 0x65b   : > { %v6696_v22 = vpop.f32.mrf.mxu1 }
 0x65c   : > { %v6697_v42 = vadd.f32 %v12844_v33, %v6696_v22  ;;  %v9034_v59 = vpop.f32.mrf.mxu0  ;;  %9105 = vmatmul.mubr.msk.f32.gmra.mxu0 %vm4246_vm0, %v6974_v5 }
 0x65d   : > { %v7756_v49 = vadd.f32 %v12864_v29, %v9034_v59  ;;  %v6698_v19 = vpop.f32.mrf.mxu1 }
 0x65e   : > { %v6975_v37 = vmax.f32 %v6697_v42, 0.0  ;;  %v7750_v40 = vpop.f32.mrf.mxu0 }
 0x65f   : > { %8231 = vst.msk [vmem:[%s12536_s27 + $0x198] sm:$0xff] %vm8179_vm1, %v7756_v49  ;;  %v7751_v36 = vadd.f32 %v12864_v29, %v7750_v40  ;;  %v6701_v2 = vpop.f32.mrf.mxu1 }
 0x660   : > { %v6702_v17 = vadd.f32 %v12844_v33, %v6701_v2  ;;  %9107 = vmatprep.mubr.msk.f32.mxu0 %vm4246_vm0, %v6975_v37 }
 0x661   : > { %8230 = vst.msk [vmem:[%s12536_s27 + $0x190] sm:$0xff] %vm8179_vm1, %v7751_v36  ;;  %v6703_v28 = vpop.f32.mrf.mxu1 }
 0x662   : > { %v6976_v18 = vmax.f32 %v6702_v17, 0.0 }
 0x663   : > { %v6706_v6 = vpop.f32.mrf.mxu1 }
 0x664   : > { %v6707_v56 = vadd.f32 %v12844_v33, %v6706_v6  ;;  %v9037_v52 = vpop.f32.mrf.mxu0  ;;  %9108 = vmatmul.mubr.msk.f32.gmra.mxu0 %vm4246_vm0, %v6976_v18 }
 0x665   : > { %v7766_v47 = vadd.f32 %v12864_v29, %v9037_v52  ;;  %v6708_v8 = vpop.f32.mrf.mxu1 }
 0x666   : > { %v6977_v53 = vmax.f32 %v6707_v56, 0.0  ;;  %v7760_v34 = vpop.f32.mrf.mxu0 }
 0x667   : > { %8233 = vst.msk [vmem:[%s12536_s27 + $0x1a8] sm:$0xff] %vm8179_vm1, %v7766_v47  ;;  %v7761_v25 = vadd.f32 %v12864_v29, %v7760_v34  ;;  %v6711_v39 = vpop.f32.mrf.mxu1 }
 0x668   : > { %v6712_v51 = vadd.f32 %v12844_v33, %v6711_v39  ;;  %9110 = vmatprep.mubr.msk.f32.mxu0 %vm4246_vm0, %v6977_v53 }
 0x669   : > { %8232 = vst.msk [vmem:[%s12536_s27 + $0x1a0] sm:$0xff] %vm8179_vm1, %v7761_v25  ;;  %v6713_v16 = vpop.f32.mrf.mxu1 }
 0x66a   : > { %v6978_v62 = vmax.f32 %v6712_v51, 0.0 }
 0x66b   : > { %v6716_v57 = vpop.f32.mrf.mxu1 }
 0x66c   : > { %v6717_v35 = vadd.f32 %v12844_v33, %v6716_v57  ;;  %v9040_v30 = vpop.f32.mrf.mxu0  ;;  %9111 = vmatmul.mubr.msk.f32.gmra.mxu0 %vm4246_vm0, %v6978_v62 }
 0x66d   : > { %v7776_v14 = vadd.f32 %v12864_v29, %v9040_v30  ;;  %v6718_v31 = vpop.f32.mrf.mxu1 }
 0x66e   : > { %v6979_v13 = vmax.f32 %v6717_v35, 0.0  ;;  %v7770_v46 = vpop.f32.mrf.mxu0 }
 0x66f   : > { %8235 = vst.msk [vmem:[%s12536_s27 + $0x1b8] sm:$0xff] %vm8179_vm1, %v7776_v14  ;;  %v7771_v55 = vadd.f32 %v12864_v29, %v7770_v46  ;;  %v6721_v20 = vpop.f32.mrf.mxu1 }
 0x670   : > { %v6722_v7 = vadd.f32 %v12844_v33, %v6721_v20  ;;  %9113 = vmatprep.mubr.msk.f32.mxu0 %vm4246_vm0, %v6979_v13 }
 0x671   : > { %8234 = vst.msk [vmem:[%s12536_s27 + $0x1b0] sm:$0xff] %vm8179_vm1, %v7771_v55  ;;  %v6723_v44 = vpop.f32.mrf.mxu1 }
 0x672   : > { %v6980_v9 = vmax.f32 %v6722_v7, 0.0 }
 0x673   : > { %v6726_v63 = vpop.f32.mrf.mxu1 }
 0x674   : > { %v6727_v10 = vadd.f32 %v12844_v33, %v6726_v63  ;;  %v9043_v60 = vpop.f32.mrf.mxu0  ;;  %9114 = vmatmul.mubr.msk.f32.gmra.mxu0 %vm4246_vm0, %v6980_v9 }
 0x675   : > { %v7786_v23 = vadd.f32 %v12864_v29, %v9043_v60  ;;  %v6728_v21 = vpop.f32.mrf.mxu1 }
 0x676   : > { %v6981_v15 = vmax.f32 %v6727_v10, 0.0  ;;  %v7780_v54 = vpop.f32.mrf.mxu0 }
 0x677   : > { %8237 = vst.msk [vmem:[%s12536_s27 + $0x1c8] sm:$0xff] %vm8179_vm1, %v7786_v23  ;;  %v7781_v4 = vadd.f32 %v12864_v29, %v7780_v54  ;;  %v6731_v43 = vpop.f32.mrf.mxu1 }
 0x678   : > { %v6732_v0 = vadd.f32 %v12844_v33, %v6731_v43  ;;  %9116 = vmatprep.mubr.msk.f32.mxu0 %vm4246_vm0, %v6981_v15 }
 0x679   : > { %8236 = vst.msk [vmem:[%s12536_s27 + $0x1c0] sm:$0xff] %vm8179_vm1, %v7781_v4  ;;  %v6733_v50 = vpop.f32.mrf.mxu1 }
 0x67a   : > { %v6982_v48 = vmax.f32 %v6732_v0, 0.0 }
 0x67b   : > { %v6736_v12 = vpop.f32.mrf.mxu1 }
 0x67c   : > { %v6737_v32 = vadd.f32 %v12844_v33, %v6736_v12  ;;  %v9046_v58 = vpop.f32.mrf.mxu0  ;;  %9117 = vmatmul.mubr.msk.f32.gmra.mxu0 %vm4246_vm0, %v6982_v48 }
 0x67d   : > { %v7796_v11 = vadd.f32 %v12864_v29, %v9046_v58  ;;  %v6738_v24 = vpop.f32.mrf.mxu1 }
 0x67e   : > { %v6983_v26 = vmax.f32 %v6737_v32, 0.0  ;;  %v7790_v3 = vpop.f32.mrf.mxu0 }
 0x67f   : > { %8239 = vst.msk [vmem:[%s12536_s27 + $0x1d8] sm:$0xff] %vm8179_vm1, %v7796_v11  ;;  %v7791_v45 = vadd.f32 %v12864_v29, %v7790_v3  ;;  %v6741_v41 = vpop.f32.mrf.mxu1 }
 0x680   : > { %v6742_v1 = vadd.f32 %v12844_v33, %v6741_v41  ;;  %9119 = vmatprep.mubr.msk.f32.mxu0 %vm4246_vm0, %v6983_v26 }
 0x681   : > { %8238 = vst.msk [vmem:[%s12536_s27 + $0x1d0] sm:$0xff] %vm8179_vm1, %v7791_v45  ;;  %v6743_v61 = vpop.f32.mrf.mxu1 }
 0x682   : > { %v6984_v27 = vmax.f32 %v6742_v1, 0.0 }
 0x683   : > { %v6746_v38 = vpop.f32.mrf.mxu1 }
 0x684   : > { %v6747_v5 = vadd.f32 %v12844_v33, %v6746_v38  ;;  %v9049_v22 = vpop.f32.mrf.mxu0  ;;  %9120 = vmatmul.mubr.msk.f32.gmra.mxu0 %vm4246_vm0, %v6984_v27 }
 0x685   : > { %v7806_v42 = vadd.f32 %v12864_v29, %v9049_v22  ;;  %v6748_v59 = vpop.f32.mrf.mxu1 }
 0x686   : > { %v6985_v49 = vmax.f32 %v6747_v5, 0.0  ;;  %v7800_v19 = vpop.f32.mrf.mxu0 }
 0x687   : > { %8241 = vst.msk [vmem:[%s12536_s27 + $0x1e8] sm:$0xff] %vm8179_vm1, %v7806_v42  ;;  %v7801_v37 = vadd.f32 %v12864_v29, %v7800_v19  ;;  %v6751_v40 = vpop.f32.mrf.mxu1 }
 0x688   : > { %v6752_v36 = vadd.f32 %v12844_v33, %v6751_v40  ;;  %9122 = vmatprep.mubr.msk.f32.mxu0 %vm4246_vm0, %v6985_v49 }
 0x689   : > { %8240 = vst.msk [vmem:[%s12536_s27 + $0x1e0] sm:$0xff] %vm8179_vm1, %v7801_v37  ;;  %v6753_v2 = vpop.f32.mrf.mxu1 }
 0x68a   : > { %v6986_v17 = vmax.f32 %v6752_v36, 0.0 }
 0x68b   : > { %v6756_v28 = vpop.f32.mrf.mxu1 }
 0x68c   : > { %v6757_v18 = vadd.f32 %v12844_v33, %v6756_v28  ;;  %v9052_v6 = vpop.f32.mrf.mxu0  ;;  %9123 = vmatmul.mubr.msk.f32.gmra.mxu0 %vm4246_vm0, %v6986_v17 }
 0x68d   : > { %v7816_v56 = vadd.f32 %v12864_v29, %v9052_v6  ;;  %v6758_v52 = vpop.f32.mrf.mxu1 }
 0x68e   : > { %v6987_v47 = vmax.f32 %v6757_v18, 0.0  ;;  %v7810_v8 = vpop.f32.mrf.mxu0 }
 0x68f   : > { %8243 = vst.msk [vmem:[%s12536_s27 + $0x1f8] sm:$0xff] %vm8179_vm1, %v7816_v56  ;;  %v7811_v53 = vadd.f32 %v12864_v29, %v7810_v8  ;;  %v6761_v34 = vpop.f32.mrf.mxu1 }
 0x690   : > { %v6762_v25 = vadd.f32 %v12844_v33, %v6761_v34  ;;  %9125 = vmatprep.mubr.msk.f32.mxu0 %vm4246_vm0, %v6987_v47 }
 0x691   : > { %8242 = vst.msk [vmem:[%s12536_s27 + $0x1f0] sm:$0xff] %vm8179_vm1, %v7811_v53  ;;  %v6763_v39 = vpop.f32.mrf.mxu1 }
 0x692   : > { %v6988_v51 = vmax.f32 %v6762_v25, 0.0 }
 0x693   : > { %v6766_v16 = vpop.f32.mrf.mxu1 }
 0x694   : > { %v6767_v62 = vadd.f32 %v12844_v33, %v6766_v16  ;;  %v9055_v57 = vpop.f32.mrf.mxu0  ;;  %9126 = vmatmul.mubr.msk.f32.gmra.mxu0 %vm4246_vm0, %v6988_v51 }
 0x695   : > { %v7826_v35 = vadd.f32 %v12864_v29, %v9055_v57  ;;  %v6768_v30 = vpop.f32.mrf.mxu1 }
 0x696   : > { %v6989_v14 = vmax.f32 %v6767_v62, 0.0  ;;  %v7820_v31 = vpop.f32.mrf.mxu0 }
 0x697   : > { %8245 = vst.msk [vmem:[%s12536_s27 + $0x208] sm:$0xff] %vm8179_vm1, %v7826_v35  ;;  %v7821_v13 = vadd.f32 %v12864_v29, %v7820_v31  ;;  %v6771_v46 = vpop.f32.mrf.mxu1 }
 0x698   : > { %v6772_v55 = vadd.f32 %v12844_v33, %v6771_v46  ;;  %9128 = vmatprep.mubr.msk.f32.mxu0 %vm4246_vm0, %v6989_v14 }
 0x699   : > { %8244 = vst.msk [vmem:[%s12536_s27 + $0x200] sm:$0xff] %vm8179_vm1, %v7821_v13  ;;  %v6773_v20 = vpop.f32.mrf.mxu1 }
 0x69a   : > { %v6990_v7 = vmax.f32 %v6772_v55, 0.0 }
 0x69b   : > { %v6776_v44 = vpop.f32.mrf.mxu1 }
 0x69c   : > { %v6777_v9 = vadd.f32 %v12844_v33, %v6776_v44  ;;  %v9058_v63 = vpop.f32.mrf.mxu0  ;;  %9129 = vmatmul.mubr.msk.f32.gmra.mxu0 %vm4246_vm0, %v6990_v7 }
 0x69d   : > { %v7836_v10 = vadd.f32 %v12864_v29, %v9058_v63  ;;  %v6778_v60 = vpop.f32.mrf.mxu1 }
 0x69e   : > { %v6991_v23 = vmax.f32 %v6777_v9, 0.0  ;;  %v7830_v21 = vpop.f32.mrf.mxu0 }
 0x69f   : > { %8247 = vst.msk [vmem:[%s12536_s27 + $0x218] sm:$0xff] %vm8179_vm1, %v7836_v10  ;;  %v7831_v15 = vadd.f32 %v12864_v29, %v7830_v21  ;;  %v6781_v54 = vpop.f32.mrf.mxu1 }
 0x6a0   : > { %v6782_v4 = vadd.f32 %v12844_v33, %v6781_v54  ;;  %9131 = vmatprep.mubr.msk.f32.mxu0 %vm4246_vm0, %v6991_v23 }
 0x6a1   : > { %8246 = vst.msk [vmem:[%s12536_s27 + $0x210] sm:$0xff] %vm8179_vm1, %v7831_v15  ;;  %v6783_v43 = vpop.f32.mrf.mxu1 }
 0x6a2   : > { %v6992_v0 = vmax.f32 %v6782_v4, 0.0 }
 0x6a3   : > { %v6786_v50 = vpop.f32.mrf.mxu1 }
 0x6a4   : > { %v6787_v48 = vadd.f32 %v12844_v33, %v6786_v50  ;;  %v9061_v12 = vpop.f32.mrf.mxu0  ;;  %9132 = vmatmul.mubr.msk.f32.gmra.mxu0 %vm4246_vm0, %v6992_v0 }
 0x6a5   : > { %v7846_v32 = vadd.f32 %v12864_v29, %v9061_v12  ;;  %v6788_v58 = vpop.f32.mrf.mxu1 }
 0x6a6   : > { %v6993_v11 = vmax.f32 %v6787_v48, 0.0  ;;  %v7840_v24 = vpop.f32.mrf.mxu0 }
 0x6a7   : > { %8249 = vst.msk [vmem:[%s12536_s27 + $0x228] sm:$0xff] %vm8179_vm1, %v7846_v32  ;;  %v7841_v26 = vadd.f32 %v12864_v29, %v7840_v24  ;;  %v6791_v3 = vpop.f32.mrf.mxu1 }
 0x6a8   : > { %v6792_v45 = vadd.f32 %v12844_v33, %v6791_v3  ;;  %9134 = vmatprep.mubr.msk.f32.mxu0 %vm4246_vm0, %v6993_v11 }
 0x6a9   : > { %8248 = vst.msk [vmem:[%s12536_s27 + $0x220] sm:$0xff] %vm8179_vm1, %v7841_v26  ;;  %v6793_v41 = vpop.f32.mrf.mxu1 }
 0x6aa   : > { %v6994_v1 = vmax.f32 %v6792_v45, 0.0 }
 0x6ab   : > { %v6796_v61 = vpop.f32.mrf.mxu1 }
 0x6ac   : > { %v6797_v27 = vadd.f32 %v12844_v33, %v6796_v61  ;;  %v9064_v38 = vpop.f32.mrf.mxu0  ;;  %9135 = vmatmul.mubr.msk.f32.gmra.mxu0 %vm4246_vm0, %v6994_v1 }
 0x6ad   : > { %v7856_v5 = vadd.f32 %v12864_v29, %v9064_v38  ;;  %v6798_v22 = vpop.f32.mrf.mxu1 }
 0x6ae   : > { %v6995_v42 = vmax.f32 %v6797_v27, 0.0  ;;  %v7850_v59 = vpop.f32.mrf.mxu0 }
 0x6af   : > { %8251 = vst.msk [vmem:[%s12536_s27 + $0x238] sm:$0xff] %vm8179_vm1, %v7856_v5  ;;  %v7851_v49 = vadd.f32 %v12864_v29, %v7850_v59  ;;  %v6801_v19 = vpop.f32.mrf.mxu1 }
 0x6b0   : > { %v6802_v37 = vadd.f32 %v12844_v33, %v6801_v19  ;;  %9137 = vmatprep.mubr.msk.f32.mxu0 %vm4246_vm0, %v6995_v42 }
 0x6b1   : > { %8250 = vst.msk [vmem:[%s12536_s27 + $0x230] sm:$0xff] %vm8179_vm1, %v7851_v49  ;;  %v6803_v40 = vpop.f32.mrf.mxu1 }
 0x6b2   : > { %v6996_v36 = vmax.f32 %v6802_v37, 0.0 }
 0x6b3   : > { %v6806_v2 = vpop.f32.mrf.mxu1 }
 0x6b4   : > { %v6807_v17 = vadd.f32 %v12844_v33, %v6806_v2  ;;  %v9067_v28 = vpop.f32.mrf.mxu0  ;;  %9138 = vmatmul.mubr.msk.f32.gmra.mxu0 %vm4246_vm0, %v6996_v36 }
 0x6b5   : > { %v7866_v18 = vadd.f32 %v12864_v29, %v9067_v28  ;;  %v6808_v6 = vpop.f32.mrf.mxu1 }
 0x6b6   : > { %v6997_v56 = vmax.f32 %v6807_v17, 0.0  ;;  %v7860_v52 = vpop.f32.mrf.mxu0 }
 0x6b7   : > { %8253 = vst.msk [vmem:[%s12536_s27 + $0x248] sm:$0xff] %vm8179_vm1, %v7866_v18  ;;  %v7861_v47 = vadd.f32 %v12864_v29, %v7860_v52  ;;  %v6811_v8 = vpop.f32.mrf.mxu1 }
 0x6b8   : > { %v6812_v53 = vadd.f32 %v12844_v33, %v6811_v8  ;;  %9140 = vmatprep.mubr.msk.f32.mxu0 %vm4246_vm0, %v6997_v56 }
 0x6b9   : > { %8252 = vst.msk [vmem:[%s12536_s27 + $0x240] sm:$0xff] %vm8179_vm1, %v7861_v47  ;;  %v6813_v34 = vpop.f32.mrf.mxu1 }
 0x6ba   : > { %v6998_v25 = vmax.f32 %v6812_v53, 0.0 }
 0x6bb   : > { %v6816_v39 = vpop.f32.mrf.mxu1 }
 0x6bc   : > { %v6817_v51 = vadd.f32 %v12844_v33, %v6816_v39  ;;  %v9070_v16 = vpop.f32.mrf.mxu0  ;;  %9141 = vmatmul.mubr.msk.f32.gmra.mxu0 %vm4246_vm0, %v6998_v25 }
 0x6bd   : > { %v7876_v62 = vadd.f32 %v12864_v29, %v9070_v16  ;;  %v6818_v57 = vpop.f32.mrf.mxu1 }
 0x6be   : > { %v6999_v35 = vmax.f32 %v6817_v51, 0.0  ;;  %v7870_v30 = vpop.f32.mrf.mxu0 }
 0x6bf   : > { %8255 = vst.msk [vmem:[%s12536_s27 + $0x258] sm:$0xff] %vm8179_vm1, %v7876_v62  ;;  %v7871_v14 = vadd.f32 %v12864_v29, %v7870_v30  ;;  %v6821_v31 = vpop.f32.mrf.mxu1 }
 0x6c0   : > { %v6822_v13 = vadd.f32 %v12844_v33, %v6821_v31  ;;  %9143 = vmatprep.mubr.msk.f32.mxu0 %vm4246_vm0, %v6999_v35 }
 0x6c1   : > { %8254 = vst.msk [vmem:[%s12536_s27 + $0x250] sm:$0xff] %vm8179_vm1, %v7871_v14  ;;  %v6823_v46 = vpop.f32.mrf.mxu1 }
 0x6c2   : > { %v7000_v55 = vmax.f32 %v6822_v13, 0.0 }
 0x6c3   : > { %v6826_v20 = vpop.f32.mrf.mxu1 }
 0x6c4   : > { %v6827_v7 = vadd.f32 %v12844_v33, %v6826_v20  ;;  %v9073_v44 = vpop.f32.mrf.mxu0  ;;  %9144 = vmatmul.mubr.msk.f32.gmra.mxu0 %vm4246_vm0, %v7000_v55 }
 0x6c5   : > { %v7886_v9 = vadd.f32 %v12864_v29, %v9073_v44  ;;  %v6828_v63 = vpop.f32.mrf.mxu1 }
 0x6c6   : > { %v7001_v10 = vmax.f32 %v6827_v7, 0.0  ;;  %v7880_v60 = vpop.f32.mrf.mxu0 }
 0x6c7   : > { %8257 = vst.msk [vmem:[%s12536_s27 + $0x268] sm:$0xff] %vm8179_vm1, %v7886_v9  ;;  %v7881_v23 = vadd.f32 %v12864_v29, %v7880_v60  ;;  %v6831_v21 = vpop.f32.mrf.mxu1 }
 0x6c8   : > { %v6832_v15 = vadd.f32 %v12844_v33, %v6831_v21  ;;  %9146 = vmatprep.mubr.msk.f32.mxu0 %vm4246_vm0, %v7001_v10 }
 0x6c9   : > { %8256 = vst.msk [vmem:[%s12536_s27 + $0x260] sm:$0xff] %vm8179_vm1, %v7881_v23  ;;  %v6833_v54 = vpop.f32.mrf.mxu1 }
 0x6ca   : > { %v7002_v4 = vmax.f32 %v6832_v15, 0.0 }
 0x6cb   : > { %v6836_v43 = vpop.f32.mrf.mxu1 }
 0x6cc   : > { %v6837_v0 = vadd.f32 %v12844_v33, %v6836_v43  ;;  %v9076_v50 = vpop.f32.mrf.mxu0  ;;  %9147 = vmatmul.mubr.msk.f32.gmra.mxu0 %vm4246_vm0, %v7002_v4 }
 0x6cd   : > { %v7896_v48 = vadd.f32 %v12864_v29, %v9076_v50  ;;  %v6838_v12 = vpop.f32.mrf.mxu1 }
 0x6ce   : > { %v7003_v32 = vmax.f32 %v6837_v0, 0.0  ;;  %v7890_v58 = vpop.f32.mrf.mxu0 }
 0x6cf   : > { %8259 = vst.msk [vmem:[%s12536_s27 + $0x278] sm:$0xff] %vm8179_vm1, %v7896_v48  ;;  %v7891_v11 = vadd.f32 %v12864_v29, %v7890_v58  ;;  %v6841_v24 = vpop.f32.mrf.mxu1 }
 0x6d0   : > { %v6842_v26 = vadd.f32 %v12844_v33, %v6841_v24  ;;  %9149 = vmatprep.mubr.msk.f32.mxu0 %vm4246_vm0, %v7003_v32 }
 0x6d1   : > { %8258 = vst.msk [vmem:[%s12536_s27 + $0x270] sm:$0xff] %vm8179_vm1, %v7891_v11  ;;  %v6843_v3 = vpop.f32.mrf.mxu1 }
 0x6d2   : > { %v7004_v45 = vmax.f32 %v6842_v26, 0.0 }
 0x6d3   : > { %v6846_v41 = vpop.f32.mrf.mxu1 }
 0x6d4   : > { %v6847_v1 = vadd.f32 %v12844_v33, %v6846_v41  ;;  %v9079_v61 = vpop.f32.mrf.mxu0  ;;  %9150 = vmatmul.mubr.msk.f32.gmra.mxu0 %vm4246_vm0, %v7004_v45 }
 0x6d5   : > { %v7906_v27 = vadd.f32 %v12864_v29, %v9079_v61  ;;  %v6848_v38 = vpop.f32.mrf.mxu1 }
 0x6d6   : > { %v7005_v5 = vmax.f32 %v6847_v1, 0.0  ;;  %v7900_v22 = vpop.f32.mrf.mxu0 }
 0x6d7   : > { %8261 = vst.msk [vmem:[%s12536_s27 + $0x288] sm:$0xff] %vm8179_vm1, %v7906_v27  ;;  %v7901_v42 = vadd.f32 %v12864_v29, %v7900_v22  ;;  %v6851_v59 = vpop.f32.mrf.mxu1 }
 0x6d8   : > { %v6852_v49 = vadd.f32 %v12844_v33, %v6851_v59  ;;  %9152 = vmatprep.mubr.msk.f32.mxu0 %vm4246_vm0, %v7005_v5 }
 0x6d9   : > { %8260 = vst.msk [vmem:[%s12536_s27 + $0x280] sm:$0xff] %vm8179_vm1, %v7901_v42  ;;  %v6853_v19 = vpop.f32.mrf.mxu1 }
 0x6da   : > { %v7006_v37 = vmax.f32 %v6852_v49, 0.0 }
 0x6db   : > { %v6856_v40 = vpop.f32.mrf.mxu1 }
 0x6dc   : > { %v6857_v36 = vadd.f32 %v12844_v33, %v6856_v40  ;;  %v9082_v2 = vpop.f32.mrf.mxu0  ;;  %9153 = vmatmul.mubr.msk.f32.gmra.mxu0 %vm4246_vm0, %v7006_v37 }
 0x6dd   : > { %v7916_v17 = vadd.f32 %v12864_v29, %v9082_v2  ;;  %v6858_v28 = vpop.f32.mrf.mxu1 }
 0x6de   : > { %v7007_v18 = vmax.f32 %v6857_v36, 0.0  ;;  %v7910_v6 = vpop.f32.mrf.mxu0 }
 0x6df   : > { %8263 = vst.msk [vmem:[%s12536_s27 + $0x298] sm:$0xff] %vm8179_vm1, %v7916_v17  ;;  %v7911_v56 = vadd.f32 %v12864_v29, %v7910_v6  ;;  %v6861_v52 = vpop.f32.mrf.mxu1 }
 0x6e0   : > { %v6862_v47 = vadd.f32 %v12844_v33, %v6861_v52  ;;  %9155 = vmatprep.mubr.msk.f32.mxu0 %vm4246_vm0, %v7007_v18 }
 0x6e1   : > { %8262 = vst.msk [vmem:[%s12536_s27 + $0x290] sm:$0xff] %vm8179_vm1, %v7911_v56  ;;  %v6863_v8 = vpop.f32.mrf.mxu1 }
 0x6e2   : > { %v7008_v53 = vmax.f32 %v6862_v47, 0.0 }
 0x6e3   : > { %v6866_v34 = vpop.f32.mrf.mxu1 }
 0x6e4   : > { %v6867_v25 = vadd.f32 %v12844_v33, %v6866_v34  ;;  %v9085_v39 = vpop.f32.mrf.mxu0  ;;  %9156 = vmatmul.mubr.msk.f32.gmra.mxu0 %vm4246_vm0, %v7008_v53 }
 0x6e5   : > { %v7926_v51 = vadd.f32 %v12864_v29, %v9085_v39  ;;  %v6868_v16 = vpop.f32.mrf.mxu1 }
 0x6e6   : > { %v7009_v62 = vmax.f32 %v6867_v25, 0.0  ;;  %v7920_v57 = vpop.f32.mrf.mxu0 }
 0x6e7   : > { %8265 = vst.msk [vmem:[%s12536_s27 + $0x2a8] sm:$0xff] %vm8179_vm1, %v7926_v51  ;;  %v7921_v35 = vadd.f32 %v12864_v29, %v7920_v57  ;;  %v6871_v30 = vpop.f32.mrf.mxu1 }
 0x6e8   : > { %v6872_v14 = vadd.f32 %v12844_v33, %v6871_v30  ;;  %9158 = vmatprep.mubr.msk.f32.mxu0 %vm4246_vm0, %v7009_v62 }
 0x6e9   : > { %8264 = vst.msk [vmem:[%s12536_s27 + $0x2a0] sm:$0xff] %vm8179_vm1, %v7921_v35  ;;  %v6873_v31 = vpop.f32.mrf.mxu1 }
 0x6ea   : > { %v7010_v13 = vmax.f32 %v6872_v14, 0.0 }
 0x6ec   : > { %v9088_v46 = vpop.f32.mrf.mxu0  ;;  %9159 = vmatmul.mubr.msk.f32.gmra.mxu0 %vm4246_vm0, %v7010_v13 }
 0x6ed   : > { %v7936_v55 = vadd.f32 %v12864_v29, %v9088_v46 }
 0x6ee   : > { %v7930_v20 = vpop.f32.mrf.mxu0 }
 0x6ef   : > { %8267 = vst.msk [vmem:[%s12536_s27 + $0x2b8] sm:$0xff] %vm8179_vm1, %v7936_v55  ;;  %v7931_v7 = vadd.f32 %v12864_v29, %v7930_v20 }
 0x6f1   : > { %8266 = vst.msk [vmem:[%s12536_s27 + $0x2b0] sm:$0xff] %vm8179_vm1, %v7931_v7 }
 0x6f4   : > { %v9091_v33 = vpop.f32.mrf.mxu0 }
 0x6f5   : > { %v7946_v44 = vadd.f32 %v12864_v29, %v9091_v33 }
 0x6f6   : > { %v7940_v9 = vpop.f32.mrf.mxu0 }
 0x6f7   : > { %8269 = vst.msk [vmem:[%s12536_s27 + $0x2c8] sm:$0xff] %vm8179_vm1, %v7946_v44  ;;  %v7941_v63 = vadd.f32 %v12864_v29, %v7940_v9 }
 0x6f9   : > { %8268 = vst.msk [vmem:[%s12536_s27 + $0x2c0] sm:$0xff] %vm8179_vm1, %v7941_v63 }
 0x6fc   : > { %v9094_v10 = vpop.f32.mrf.mxu0 }
 0x6fd   : > { %v7956_v60 = vadd.f32 %v12864_v29, %v9094_v10 }
 0x6fe   : > { %v7950_v23 = vpop.f32.mrf.mxu0 }
 0x6ff   : > { %8271 = vst.msk [vmem:[%s12536_s27 + $0x2d8] sm:$0xff] %vm8179_vm1, %v7956_v60  ;;  %v7951_v21 = vadd.f32 %v12864_v29, %v7950_v23 }
 0x701   : > { %8270 = vst.msk [vmem:[%s12536_s27 + $0x2d0] sm:$0xff] %vm8179_vm1, %v7951_v21 }
 0x704   : > { %v9097_v15 = vpop.f32.mrf.mxu0 }
 0x705   : > { %v7966_v54 = vadd.f32 %v12864_v29, %v9097_v15 }
 0x706   : > { %v7960_v4 = vpop.f32.mrf.mxu0 }
 0x707   : > { %8273 = vst.msk [vmem:[%s12536_s27 + $0x2e8] sm:$0xff] %vm8179_vm1, %v7966_v54  ;;  %v7961_v43 = vadd.f32 %v12864_v29, %v7960_v4  ;;  %v9321_v4 = vld [vmem:[#allocation12] ss:$0 sm:$0xff] }
 0x709   : > { %8272 = vst.msk [vmem:[%s12536_s27 + $0x2e0] sm:$0xff] %vm8179_vm1, %v7961_v43 }
 0x70c   : > { %v9100_v0 = vpop.f32.mrf.mxu0 }
 0x70d   : > { %v7976_v50 = vadd.f32 %v12864_v29, %v9100_v0 }
 0x70e   : > { %v7970_v48 = vpop.f32.mrf.mxu0 }
 0x70f   : > { %8275 = vst.msk [vmem:[%s12536_s27 + $0x2f8] sm:$0xff] %vm8179_vm1, %v7976_v50  ;;  %v7971_v12 = vadd.f32 %v12864_v29, %v7970_v48 }
 0x711   : > { %8274 = vst.msk [vmem:[%s12536_s27 + $0x2f0] sm:$0xff] %vm8179_vm1, %v7971_v12 }
 0x714   : > { %v9103_v32 = vpop.f32.mrf.mxu0 }
 0x715   : > { %v7986_v58 = vadd.f32 %v12864_v29, %v9103_v32 }
 0x716   : > { %v7980_v11 = vpop.f32.mrf.mxu0 }
 0x717   : > { %8277 = vst.msk [vmem:[%s12536_s27 + $0x308] sm:$0xff] %vm8179_vm1, %v7986_v58  ;;  %v7981_v24 = vadd.f32 %v12864_v29, %v7980_v11 }
 0x719   : > { %8276 = vst.msk [vmem:[%s12536_s27 + $0x300] sm:$0xff] %vm8179_vm1, %v7981_v24 }
 0x71c   : > { %v9106_v26 = vpop.f32.mrf.mxu0 }
 0x71d   : > { %v7996_v3 = vadd.f32 %v12864_v29, %v9106_v26 }
 0x71e   : > { %v7990_v45 = vpop.f32.mrf.mxu0 }
 0x71f   : > { %8279 = vst.msk [vmem:[%s12536_s27 + $0x318] sm:$0xff] %vm8179_vm1, %v7996_v3  ;;  %v7991_v41 = vadd.f32 %v12864_v29, %v7990_v45 }
 0x721   : > { %8278 = vst.msk [vmem:[%s12536_s27 + $0x310] sm:$0xff] %vm8179_vm1, %v7991_v41 }
 0x724   : > { %v9109_v1 = vpop.f32.mrf.mxu0 }
 0x725   : > { %v8006_v61 = vadd.f32 %v12864_v29, %v9109_v1 }
 0x726   : > { %v8000_v27 = vpop.f32.mrf.mxu0 }
 0x727   : > { %8281 = vst.msk [vmem:[%s12536_s27 + $0x328] sm:$0xff] %vm8179_vm1, %v8006_v61  ;;  %v8001_v38 = vadd.f32 %v12864_v29, %v8000_v27 }
 0x729   : > { %8280 = vst.msk [vmem:[%s12536_s27 + $0x320] sm:$0xff] %vm8179_vm1, %v8001_v38 }
 0x72c   : > { %v9112_v5 = vpop.f32.mrf.mxu0 }
 0x72d   : > { %v8016_v22 = vadd.f32 %v12864_v29, %v9112_v5 }
 0x72e   : > { %v8010_v42 = vpop.f32.mrf.mxu0 }
 0x72f   : > { %8283 = vst.msk [vmem:[%s12536_s27 + $0x338] sm:$0xff] %vm8179_vm1, %v8016_v22  ;;  %v8011_v59 = vadd.f32 %v12864_v29, %v8010_v42 }
 0x731   : > { %8282 = vst.msk [vmem:[%s12536_s27 + $0x330] sm:$0xff] %vm8179_vm1, %v8011_v59 }
 0x734   : > { %v9115_v49 = vpop.f32.mrf.mxu0 }
 0x735   : > { %v8026_v19 = vadd.f32 %v12864_v29, %v9115_v49 }
 0x736   : > { %v8020_v37 = vpop.f32.mrf.mxu0 }
 0x737   : > { %8285 = vst.msk [vmem:[%s12536_s27 + $0x348] sm:$0xff] %vm8179_vm1, %v8026_v19  ;;  %v8021_v40 = vadd.f32 %v12864_v29, %v8020_v37 }
 0x739   : > { %8284 = vst.msk [vmem:[%s12536_s27 + $0x340] sm:$0xff] %vm8179_vm1, %v8021_v40 }
 0x73c   : > { %v9118_v36 = vpop.f32.mrf.mxu0 }
 0x73d   : > { %v8036_v2 = vadd.f32 %v12864_v29, %v9118_v36 }
 0x73e   : > { %v8030_v17 = vpop.f32.mrf.mxu0 }
 0x73f   : > { %8287 = vst.msk [vmem:[%s12536_s27 + $0x358] sm:$0xff] %vm8179_vm1, %v8036_v2  ;;  %v8031_v28 = vadd.f32 %v12864_v29, %v8030_v17 }
 0x741   : > { %8286 = vst.msk [vmem:[%s12536_s27 + $0x350] sm:$0xff] %vm8179_vm1, %v8031_v28 }
 0x744   : > { %v9121_v18 = vpop.f32.mrf.mxu0 }
 0x745   : > { %v8046_v6 = vadd.f32 %v12864_v29, %v9121_v18 }
 0x746   : > { %v8040_v56 = vpop.f32.mrf.mxu0 }
 0x747   : > { %8289 = vst.msk [vmem:[%s12536_s27 + $0x368] sm:$0xff] %vm8179_vm1, %v8046_v6  ;;  %v8041_v52 = vadd.f32 %v12864_v29, %v8040_v56 }
 0x749   : > { %8288 = vst.msk [vmem:[%s12536_s27 + $0x360] sm:$0xff] %vm8179_vm1, %v8041_v52 }
 0x74c   : > { %v9124_v47 = vpop.f32.mrf.mxu0 }
 0x74d   : > { %v8056_v8 = vadd.f32 %v12864_v29, %v9124_v47 }
 0x74e   : > { %v8050_v53 = vpop.f32.mrf.mxu0 }
 0x74f   : > { %8291 = vst.msk [vmem:[%s12536_s27 + $0x378] sm:$0xff] %vm8179_vm1, %v8056_v8  ;;  %v8051_v34 = vadd.f32 %v12864_v29, %v8050_v53 }
 0x751   : > { %8290 = vst.msk [vmem:[%s12536_s27 + $0x370] sm:$0xff] %vm8179_vm1, %v8051_v34 }
 0x754   : > { %v9127_v25 = vpop.f32.mrf.mxu0 }
 0x755   : > { %v8066_v39 = vadd.f32 %v12864_v29, %v9127_v25 }
 0x756   : > { %v8060_v51 = vpop.f32.mrf.mxu0 }
 0x757   : > { %8293 = vst.msk [vmem:[%s12536_s27 + $0x388] sm:$0xff] %vm8179_vm1, %v8066_v39  ;;  %v8061_v16 = vadd.f32 %v12864_v29, %v8060_v51 }
 0x759   : > { %8292 = vst.msk [vmem:[%s12536_s27 + $0x380] sm:$0xff] %vm8179_vm1, %v8061_v16 }
 0x75c   : > { %v9130_v62 = vpop.f32.mrf.mxu0 }
 0x75d   : > { %v8076_v57 = vadd.f32 %v12864_v29, %v9130_v62 }
 0x75e   : > { %v8070_v35 = vpop.f32.mrf.mxu0 }
 0x75f   : > { %8295 = vst.msk [vmem:[%s12536_s27 + $0x398] sm:$0xff] %vm8179_vm1, %v8076_v57  ;;  %v8071_v30 = vadd.f32 %v12864_v29, %v8070_v35 }
 0x761   : > { %8294 = vst.msk [vmem:[%s12536_s27 + $0x390] sm:$0xff] %vm8179_vm1, %v8071_v30 }
 0x764   : > { %v9133_v14 = vpop.f32.mrf.mxu0 }
 0x765   : > { %v8086_v31 = vadd.f32 %v12864_v29, %v9133_v14 }
 0x766   : > { %v8080_v13 = vpop.f32.mrf.mxu0 }
 0x767   : > { %8297 = vst.msk [vmem:[%s12536_s27 + $0x3a8] sm:$0xff] %vm8179_vm1, %v8086_v31  ;;  %v8081_v46 = vadd.f32 %v12864_v29, %v8080_v13 }
 0x769   : > { %8296 = vst.msk [vmem:[%s12536_s27 + $0x3a0] sm:$0xff] %vm8179_vm1, %v8081_v46 }
 0x76c   : > { %v9136_v55 = vpop.f32.mrf.mxu0 }
 0x76d   : > { %v8096_v20 = vadd.f32 %v12864_v29, %v9136_v55 }
 0x76e   : > { %v8090_v7 = vpop.f32.mrf.mxu0 }
 0x76f   : > { %8299 = vst.msk [vmem:[%s12536_s27 + $0x3b8] sm:$0xff] %vm8179_vm1, %v8096_v20  ;;  %v8091_v33 = vadd.f32 %v12864_v29, %v8090_v7 }
 0x771   : > { %8298 = vst.msk [vmem:[%s12536_s27 + $0x3b0] sm:$0xff] %vm8179_vm1, %v8091_v33 }
 0x774   : > { %v9139_v44 = vpop.f32.mrf.mxu0 }
 0x775   : > { %v8106_v9 = vadd.f32 %v12864_v29, %v9139_v44 }
 0x776   : > { %v8100_v63 = vpop.f32.mrf.mxu0 }
 0x777   : > { %8301 = vst.msk [vmem:[%s12536_s27 + $0x3c8] sm:$0xff] %vm8179_vm1, %v8106_v9  ;;  %v8101_v10 = vadd.f32 %v12864_v29, %v8100_v63 }
 0x779   : > { %8300 = vst.msk [vmem:[%s12536_s27 + $0x3c0] sm:$0xff] %vm8179_vm1, %v8101_v10 }
 0x77c   : > { %v9142_v60 = vpop.f32.mrf.mxu0 }
 0x77d   : > { %v8116_v23 = vadd.f32 %v12864_v29, %v9142_v60 }
 0x77e   : > { %v8110_v21 = vpop.f32.mrf.mxu0 }
 0x77f   : > { %8303 = vst.msk [vmem:[%s12536_s27 + $0x3d8] sm:$0xff] %vm8179_vm1, %v8116_v23  ;;  %v8111_v15 = vadd.f32 %v12864_v29, %v8110_v21 }
 0x781   : > { %8302 = vst.msk [vmem:[%s12536_s27 + $0x3d0] sm:$0xff] %vm8179_vm1, %v8111_v15 }
 0x784   : > { %v9145_v54 = vpop.f32.mrf.mxu0 }
 0x785   : > { %v8126_v43 = vadd.f32 %v9321_v4, %v9145_v54 }
 0x786   : > { %v8120_v0 = vpop.f32.mrf.mxu0 }
 0x787   : > { %8305 = vst.msk [vmem:[%s12536_s27 + $0x3e8] sm:$0xff] %vm8179_vm1, %v8126_v43  ;;  %v8121_v50 = vadd.f32 %v9321_v4, %v8120_v0 }
 0x789   : > { %8304 = vst.msk [vmem:[%s12536_s27 + $0x3e0] sm:$0xff] %vm8179_vm1, %v8121_v50 }
 0x78c   : > { %v9148_v48 = vpop.f32.mrf.mxu0 }
 0x78d   : > { %v8136_v12 = vadd.f32 %v9321_v4, %v9148_v48 }
 0x78e   : > { %v8130_v32 = vpop.f32.mrf.mxu0 }
 0x78f   : > { %8307 = vst.msk [vmem:[%s12536_s27 + $0x3f8] sm:$0xff] %vm8179_vm1, %v8136_v12  ;;  %v8131_v29 = vadd.f32 %v9321_v4, %v8130_v32 }
 0x791   : > { %8306 = vst.msk [vmem:[%s12536_s27 + $0x3f0] sm:$0xff] %vm8179_vm1, %v8131_v29 }
 0x794   : > { %v9151_v58 = vpop.f32.mrf.mxu0 }
 0x795   : > { %v8146_v11 = vadd.f32 %v9321_v4, %v9151_v58 }
 0x796   : > { %v8140_v24 = vpop.f32.mrf.mxu0 }
 0x797   : > { %8309 = vst.msk [vmem:[%s12536_s27 + $0x408] sm:$0xff] %vm8179_vm1, %v8146_v11  ;;  %v8141_v26 = vadd.f32 %v9321_v4, %v8140_v24 }
 0x799   : > { %8308 = vst.msk [vmem:[%s12536_s27 + $0x400] sm:$0xff] %vm8179_vm1, %v8141_v26 }
 0x79c   : > { %v9154_v3 = vpop.f32.mrf.mxu0 }
 0x79d   : > { %v8156_v45 = vadd.f32 %v9321_v4, %v9154_v3 }
 0x79e   : > { %v8150_v41 = vpop.f32.mrf.mxu0 }
 0x79f   : > { %8311 = vst.msk [vmem:[%s12536_s27 + $0x418] sm:$0xff] %vm8179_vm1, %v8156_v45  ;;  %v8151_v1 = vadd.f32 %v9321_v4, %v8150_v41 }
 0x7a1   : > { %8310 = vst.msk [vmem:[%s12536_s27 + $0x410] sm:$0xff] %vm8179_vm1, %v8151_v1 }
 0x7a4   : > { %v9157_v61 = vpop.f32.mrf.mxu0 }
 0x7a5   : > { %v8166_v27 = vadd.f32 %v9321_v4, %v9157_v61 }
 0x7a6   : > { %v8160_v38 = vpop.f32.mrf.mxu0 }
 0x7a7   : > { %8313 = vst.msk [vmem:[%s12536_s27 + $0x428] sm:$0xff] %vm8179_vm1, %v8166_v27  ;;  %v8161_v5 = vadd.f32 %v9321_v4, %v8160_v38 }
 0x7a9   : > { %8312 = vst.msk [vmem:[%s12536_s27 + $0x420] sm:$0xff] %vm8179_vm1, %v8161_v5 }
 0x7ac   : > { %v9160_v22 = vpop.f32.mrf.mxu0 }
 0x7ad   : > { %v8176_v42 = vadd.f32 %v9321_v4, %v9160_v22 }
 0x7ae   : > { %v8170_v59 = vpop.f32.mrf.mxu0 }
 0x7af   : > { %8315 = vst.msk [vmem:[%s12536_s27 + $0x438] sm:$0xff] %vm8179_vm1, %v8176_v42  ;;  %v8171_v49 = vadd.f32 %v9321_v4, %v8170_v59 }
 0x7b1   : > { %8314 = vst.msk [vmem:[%s12536_s27 + $0x430] sm:$0xff] %vm8179_vm1, %v8171_v49 }
 0x7b2 PF: > { %s29_s24 = sadd.s32 1, %s9590_s24   ;;  %s13599_s12 = sld [smem:[#allocation19_spill]] }
 0x7b3   : > { %p26_p7 = scmp.ge.s32.totalorder %s29_s24, 6   ;;  %s13600_s17 = smov %s9566_s18 }
 0x7b4   : > { %s13601_s18 = smov %s9570_s19  ;;  %s13602_s19 = smov %s9802_s25 }
 0x7b5   : > { %s13603_s20 = smov %s9582_s22  ;;  %s13604_s21 = smov %s9586_s23 }
 0x7b6   : > { %s13605_s22 = smov %s13608_s16  ;;  %28 = sbr.rel (!%p26_p7) target bundleno = 17 (0x11), region = 141 }
 0x7b8   : > { %s13606_s23 = smov %s13599_s12 }
 0x7bb   :  { %8346 = vsyncpa [#allocation3], 1 }
 0x7bc   :  { %8348 = vsyncpa [#allocation3 + $0x1], 1 }
 0x7bd   :  { %8349 = vsyncpa [#allocation5], 1 }
 0x7be   :  { %8351 = vsyncpa [#allocation5 + $0x1], 1 }
 0x7bf   :  { %8352 = vsyncpa [#allocation8], 1 }
 0x7c0   :  { %8353 = vsyncpa [#allocation11], 1 }

</bundles_post_ra>
